<compile_context>
chip_gen: v6e
topology: v6e:2x2x1
jax: 0.10.0
libtpu: 0.0.40
codegen_flags: <defaults>
</compile_context>

<pallas_src>
import jax
import jax.numpy as jnp
import numpy as np
from jax.experimental import pallas as pl
from jax.experimental.pallas import tpu as pltpu

# Hyperparameters the PyTorch module references as globals.
CHUNK_CHANNELS = 4
STEPPER_HIDDEN_CHANNELS = 8
STEPPER_WINDOW_SIZE = 2

# Conv3d hyperparameters fixed by the module definition.
_KT1, _KH, _KW = 2, 11, 11          # conv1 kernel (2, 11, 11)
_PAD_T, _PAD_HW = 1, 5              # conv1 padding (1, 5, 5); conv2 is (0, 5, 5)
_COUT_PAD = 8                       # conv2 Cout (4) zero-padded to 8 -> 128 lanes


def _stepper_fused_kernel(xp_ref, band1_ref, bias1_ref, band2_ref, bias2_ref,
                          out_ref, hp_ref):
    """One batch element: conv1+bias+ReLU into VMEM scratch, then conv2+bias+ReLU.

    xp_ref:    (1, Tw, Hp, Wp*Cin)        f32   padded input window
    band1_ref: (KT1*KH, Wp*Cin, Wp*Ch)    bf16  conv1 row-band weights
    bias1_ref: (1, Wp*Ch)                 f32   (zero at the W-padding columns)
    band2_ref: (KH, Wp*Ch, W*CoutPad)     bf16  conv2 row-band weights
    bias2_ref: (1, W*CoutPad)             f32
    out_ref:   (1, Ws, H, W*CoutPad)      f32
    hp_ref:    (Ws, Hp, Wp*Ch)            f32   scratch = W/H zero-padded h
    """
    Ws, Hp, _ = hp_ref.shape
    H = out_ref.shape[2]
    KH = band2_ref.shape[0]
    KT = band1_ref.shape[0] // KH
    pad = (Hp - H) // 2
    bdt = band1_ref.dtype            # bfloat16 (MXU-native input dtype)

    bias1 = bias1_ref[...]
    bias2 = bias2_ref[...]

    # conv2 reads the zero rows/cols of hp; zero the scratch once per step.
    hp_ref[...] = jnp.zeros_like(hp_ref)

    # ---- Conv3d(Cin -> Ch, (2,11,11), pad (1,5,5)) + bias + ReLU ----------
    # Per output frame t: accumulate KT*KH lane-dense row-band GEMMs in f32.
    for t in range(Ws):
        acc = jnp.zeros((H, band1_ref.shape[2]), jnp.float32)
        for kt in range(KT):
            for kh in range(KH):
                lhs = xp_ref[0, t + kt, kh:kh + H, :].astype(bdt)
                acc += jnp.dot(lhs, band1_ref[kt * KH + kh],
                               preferred_element_type=jnp.float32)
        # Band output columns (and bias1) are zero at the W-padding positions,
        # so the W border of hp stays exactly 0 after bias + ReLU.
        hp_ref[t, pad:pad + H, :] = jnp.maximum(acc + bias1, 0.0)

    # ---- Conv3d(Ch -> Cout, (1,11,11), pad (0,5,5)) + bias + ReLU ---------
    for t in range(Ws):
        acc = jnp.zeros((H, band2_ref.shape[2]), jnp.float32)
        for kh in range(KH):
            lhs = hp_ref[t, kh:kh + H, :].astype(bdt)
            acc += jnp.dot(lhs, band2_ref[kh],
                           preferred_element_type=jnp.float32)
        out_ref[0, t] = jnp.maximum(acc + bias2, 0.0).astype(out_ref.dtype)


def prepare_stepper_params(w1, b1, w2, b2, *, width, pad=_PAD_HW):
    """Expand the Conv3d weights into W-direction band matrices (host, once).

    band1[kt*KH+kh][(w_in, cin), (w_out+pad, ch)] = w1[ch, cin, kt, kh, w_in-w_out]
    band2[kh]      [(w_in, ch),  (w_out, co)]     = w2[co, ch, 0, kh, w_in-w_out]
    conv1's output columns are laid out directly as conv2's W-zero-padded input;
    conv2's Cout is zero-padded to _COUT_PAD for full-tile stores.
    """
    w1 = np.asarray(w1, np.float32); b1 = np.asarray(b1, np.float32)
    w2 = np.asarray(w2, np.float32); b2 = np.asarray(b2, np.float32)
    ch, cin, kt1, kh1, kw1 = w1.shape
    cout, ch2, kt2, kh2, kw2 = w2.shape
    assert (kt1, kh1, kw1) == (_KT1, _KH, _KW) and ch2 == ch
    # Dead-time-step slicing in stepper_forward relies on conv2 having KT == 1
    # and no temporal padding.
    assert (kt2, kh2, kw2) == (1, _KH, _KW)
    cout_pad = _COUT_PAD
    wp = width + 2 * pad

    band1 = np.zeros((kt1 * kh1, wp * cin, wp * ch), np.float32)
    bias1 = np.zeros((1, wp * ch), np.float32)
    for kt in range(kt1):
        for kh in range(kh1):
            blk = band1[kt * kh1 + kh]
            for kw in range(kw1):
                for wo in range(width):
                    wi = wo + kw
                    blk[wi * cin:(wi + 1) * cin,
                        (wo + pad) * ch:(wo + pad + 1) * ch] = w1[:, :, kt, kh, kw].T
    for wo in range(width):
        bias1[0, (wo + pad) * ch:(wo + pad + 1) * ch] = b1

    band2 = np.zeros((kh2, wp * ch, width * cout_pad), np.float32)
    bias2 = np.zeros((1, width * cout_pad), np.float32)
    for kh in range(kh2):
        blk = band2[kh]
        for kw in range(kw2):
            for wo in range(width):
                wi = wo + kw
                blk[wi * ch:(wi + 1) * ch,
                    wo * cout_pad:wo * cout_pad + cout] = w2[:, :, 0, kh, kw].T
    for wo in range(width):
        bias2[0, wo * cout_pad:wo * cout_pad + cout] = b2

    return {
        "band1": jnp.asarray(band1, jnp.bfloat16),
        "bias1": jnp.asarray(bias1, jnp.float32),
        "band2": jnp.asarray(band2, jnp.bfloat16),
        "bias2": jnp.asarray(bias2, jnp.float32),
    }


def stepper_forward(frames, prep):
    """frames: (B, T, C, H, W) float32 — encoder output layout in the torch code."""
    # TODO(synk): encoder/decoder are externally injected nn.Modules with no
    # definition in the reference source; they are modeled as identity here.
    chunks = frames

    B, T, C, H, W = chunks.shape
    Ws, KT1, pad_t, pad = STEPPER_WINDOW_SIZE, _KT1, _PAD_T, _PAD_HW

    # Dead-time-step elimination: conv2 has KT=1 and no temporal padding, so
    # only the last Ws conv1 outputs are used; they read exactly the last
    # (Ws + KT1 - 1 - pad_t) real frames plus pad_t trailing zero frames.
    n_real = Ws + KT1 - 1 - pad_t
    assert n_real >= 1 and T >= n_real and Ws + KT1 - 1 >= pad_t

    x = jnp.transpose(chunks, (0, 1, 3, 4, 2))              # (B, T, H, W, C)
    x = x[:, T - n_real:]                                   # (B, n_real, H, W, C)
    x = jnp.pad(x, ((0, 0), (0, pad_t), (pad, pad), (pad, pad), (0, 0)))
    Tw, Hp, Wp = n_real + pad_t, H + 2 * pad, W + 2 * pad
    xp = x.reshape(B, Tw, Hp, Wp * C)                       # lanes = (w, cin)

    band1, bias1 = prep["band1"], prep["bias1"]
    band2, bias2 = prep["band2"], prep["bias2"]
    N1, N2 = band1.shape[2], band2.shape[2]
    cout_pad = N2 // W

    out = pl.pallas_call(
        _stepper_fused_kernel,
        out_shape=jax.ShapeDtypeStruct((B, Ws, H, N2), jnp.float32),
        grid=(B,),
        in_specs=[
            pl.BlockSpec((1, Tw, Hp, Wp * C), lambda b: (b, 0, 0, 0)),
            pl.BlockSpec(band1.shape, lambda b: (0, 0, 0)),
            pl.BlockSpec(bias1.shape, lambda b: (0, 0)),
            pl.BlockSpec(band2.shape, lambda b: (0, 0, 0)),
            pl.BlockSpec(bias2.shape, lambda b: (0, 0)),
        ],
        out_specs=pl.BlockSpec((1, Ws, H, N2), lambda b: (b, 0, 0, 0)),
        scratch_shapes=[pltpu.VMEM((Ws, Hp, N1), jnp.float32)],
        compiler_params=pltpu.CompilerParams(
            dimension_semantics=("parallel",)),
    )(xp, band1, bias1, band2, bias2)

    y = out.reshape(B, Ws, H, W, cout_pad)[..., :C]         # drop Cout zero-pad
    chunks_out = jnp.transpose(y, (0, 1, 4, 2, 3))          # (B, Ws, C, H, W)
    return chunks_out                                        # decoder(chunks_out)


# ---------------- pure-JAX reference (full computation, for correctness) ----
def _conv3d_bias_relu_ref(x, w, b, pad_t, pad_hw, to_bf16):
    if to_bf16:  # mirror the kernel's bf16 MXU inputs (accumulation stays f32)
        x = x.astype(jnp.bfloat16)
        w = w.astype(jnp.bfloat16)
    w_dhwio = jnp.transpose(w, (2, 3, 4, 1, 0))
    y = jax.lax.conv_general_dilated(
        x, w_dhwio, window_strides=(1, 1, 1),
        padding=((pad_t, pad_t), (pad_hw, pad_hw), (pad_hw, pad_hw)),
        dimension_numbers=("NDHWC", "DHWIO", "NDHWC"),
        preferred_element_type=jnp.float32)
    return jnp.maximum(y + b, 0.0)


def stepper_forward_ref(frames, params, to_bf16=True):
    x = jnp.transpose(frames, (0, 1, 3, 4, 2))
    h = _conv3d_bias_relu_ref(x, params["w1"], params["b1"], 1, 5, to_bf16)
    y = _conv3d_bias_relu_ref(h, params["w2"], params["b2"], 0, 5, to_bf16)
    y = y[:, -STEPPER_WINDOW_SIZE:]
    return jnp.transpose(y, (0, 1, 4, 2, 3))


if __name__ == "__main__":
    key = jax.random.PRNGKey(0)
    k_x, k_w1, k_b1, k_w2, k_b2 = jax.random.split(key, 5)

    B, T, H, W = 2, 4, 16, 16
    frames = jax.random.normal(k_x, (B, T, CHUNK_CHANNELS, H, W), jnp.float32)

    params = {
        "w1": 0.05 * jax.random.normal(
            k_w1, (STEPPER_HIDDEN_CHANNELS, CHUNK_CHANNELS, 2, 11, 11), jnp.float32),
        "b1": 0.01 * jax.random.normal(
            k_b1, (STEPPER_HIDDEN_CHANNELS,), jnp.float32),
        "w2": 0.05 * jax.random.normal(
            k_w2, (CHUNK_CHANNELS, STEPPER_HIDDEN_CHANNELS, 1, 11, 11), jnp.float32),
        "b2": 0.01 * jax.random.normal(
            k_b2, (CHUNK_CHANNELS,), jnp.float32),
    }

    prep = prepare_stepper_params(params["w1"], params["b1"],
                                  params["w2"], params["b2"], width=W)

    out = jax.jit(stepper_forward)(frames, prep)
    out = jax.block_until_ready(out)

    ref = stepper_forward_ref(frames, params)
    np.testing.assert_allclose(np.asarray(out), np.asarray(ref),
                               rtol=1e-2, atol=1e-2)
    assert out.shape == (B, STEPPER_WINDOW_SIZE, CHUNK_CHANNELS, H, W)
    print("KERNEL_OK")
</pallas_src>

<mosaic_0001>
module attributes {stable_mosaic.version = 11 : i64} {
  func.func @_stepper_fused_kernel(%arg0: i32, %arg1: memref<1x3x26x104xf32, #tpu.memory_space<vmem>>, %arg2: memref<22x104x208xbf16, #tpu.memory_space<vmem>>, %arg3: memref<1x208xf32, #tpu.memory_space<vmem>>, %arg4: memref<11x208x128xbf16, #tpu.memory_space<vmem>>, %arg5: memref<1x128xf32, #tpu.memory_space<vmem>>, %arg6: memref<1x2x16x128xf32, #tpu.memory_space<vmem>>, %arg7: memref<2x26x208xf32, #tpu.memory_space<vmem>>) attributes {dimension_semantics = [#tpu.dimension_semantics<parallel>], iteration_bounds = array<i64: 2>, scalar_prefetch = 0 : i64, scratch_operands = 1 : i64, tpu.core_type = #tpu.core_type<tc>, window_params = [{transform_indices = @transform_0, window_bounds = array<i64: 1, 3, 26, 104>}, {pipeline_mode = #tpu.pipeline_mode<synchronous>, transform_indices = @transform_1, window_bounds = array<i64: 22, 104, 208>}, {pipeline_mode = #tpu.pipeline_mode<synchronous>, transform_indices = @transform_2, window_bounds = array<i64: 1, 208>}, {pipeline_mode = #tpu.pipeline_mode<synchronous>, transform_indices = @transform_3, window_bounds = array<i64: 11, 208, 128>}, {pipeline_mode = #tpu.pipeline_mode<synchronous>, transform_indices = @transform_4, window_bounds = array<i64: 1, 128>}, {transform_indices = @transform_5, window_bounds = array<i64: 1, 2, 16, 128>}]} {
    %c0 = arith.constant 0 : index
    %c0_0 = arith.constant 0 : index
    %0 = vector.load %arg3[%c0, %c0_0] : memref<1x208xf32, #tpu.memory_space<vmem>>, vector<1x208xf32>
    %c0_1 = arith.constant 0 : index
    %c0_2 = arith.constant 0 : index
    %1 = vector.load %arg5[%c0_1, %c0_2] : memref<1x128xf32, #tpu.memory_space<vmem>>, vector<1x128xf32>
    %cst = arith.constant 0.000000e+00 : f32
    %2 = vector.broadcast %cst : f32 to vector<2x26x208xf32>
    %c0_3 = arith.constant 0 : index
    %c0_4 = arith.constant 0 : index
    %c0_5 = arith.constant 0 : index
    %3 = vector.load %arg7[%c0_3, %c0_4, %c0_5] : memref<2x26x208xf32, #tpu.memory_space<vmem>>, vector<2x26x208xf32>
    tpu.vector_store %arg7[%c0_3, %c0_4, %c0_5], %2 {strides = array<i32>} : memref<2x26x208xf32, #tpu.memory_space<vmem>>, vector<2x26x208xf32>,
    %cst_6 = arith.constant 0.000000e+00 : f32
    %4 = vector.broadcast %cst_6 : f32 to vector<16x208xf32>
    %c0_7 = arith.constant 0 : index
    %c0_8 = arith.constant 0 : index
    %c0_9 = arith.constant 0 : index
    %c0_10 = arith.constant 0 : index
    %5 = vector.load %arg1[%c0_7, %c0_8, %c0_9, %c0_10] : memref<1x3x26x104xf32, #tpu.memory_space<vmem>>, vector<1x1x16x104xf32>
    %6 = vector.shape_cast %5 : vector<1x1x16x104xf32> to vector<16x104xf32>
    %7 = arith.truncf %6 : vector<16x104xf32> to vector<16x104xbf16>
    %c0_11 = arith.constant 0 : index
    %c0_12 = arith.constant 0 : index
    %c0_13 = arith.constant 0 : index
    %8 = vector.load %arg2[%c0_11, %c0_12, %c0_13] : memref<22x104x208xbf16, #tpu.memory_space<vmem>>, vector<1x104x208xbf16>
    %9 = vector.shape_cast %8 : vector<1x104x208xbf16> to vector<104x208xbf16>
    %cst_14 = arith.constant dense<0.000000e+00> : vector<16x208xf32>
    %10 = tpu.matmul %7, %9, %cst_14 {dimension_numbers = #tpu.dot_dimension_numbers<[1], [0], [0], [1], [0, 0, 1, 1], [], []>} : vector<16x104xbf16>, vector<104x208xbf16>, vector<16x208xf32> -> vector<16x208xf32>
    %11 = arith.addf %4, %10 : vector<16x208xf32>
    %c0_15 = arith.constant 0 : index
    %c0_16 = arith.constant 0 : index
    %c1 = arith.constant 1 : index
    %c0_17 = arith.constant 0 : index
    %12 = vector.load %arg1[%c0_15, %c0_16, %c1, %c0_17] : memref<1x3x26x104xf32, #tpu.memory_space<vmem>>, vector<1x1x16x104xf32>
    %13 = vector.shape_cast %12 : vector<1x1x16x104xf32> to vector<16x104xf32>
    %14 = arith.truncf %13 : vector<16x104xf32> to vector<16x104xbf16>
    %c1_18 = arith.constant 1 : index
    %c0_19 = arith.constant 0 : index
    %c0_20 = arith.constant 0 : index
    %15 = vector.load %arg2[%c1_18, %c0_19, %c0_20] : memref<22x104x208xbf16, #tpu.memory_space<vmem>>, vector<1x104x208xbf16>
    %16 = vector.shape_cast %15 : vector<1x104x208xbf16> to vector<104x208xbf16>
    %cst_21 = arith.constant dense<0.000000e+00> : vector<16x208xf32>
    %17 = tpu.matmul %14, %16, %cst_21 {dimension_numbers = #tpu.dot_dimension_numbers<[1], [0], [0], [1], [0, 0, 1, 1], [], []>} : vector<16x104xbf16>, vector<104x208xbf16>, vector<16x208xf32> -> vector<16x208xf32>
    %18 = arith.addf %11, %17 : vector<16x208xf32>
    %c0_22 = arith.constant 0 : index
    %c0_23 = arith.constant 0 : index
    %c2 = arith.constant 2 : index
    %c0_24 = arith.constant 0 : index
    %19 = vector.load %arg1[%c0_22, %c0_23, %c2, %c0_24] : memref<1x3x26x104xf32, #tpu.memory_space<vmem>>, vector<1x1x16x104xf32>
    %20 = vector.shape_cast %19 : vector<1x1x16x104xf32> to vector<16x104xf32>
    %21 = arith.truncf %20 : vector<16x104xf32> to vector<16x104xbf16>
    %c2_25 = arith.constant 2 : index
    %c0_26 = arith.constant 0 : index
    %c0_27 = arith.constant 0 : index
    %22 = vector.load %arg2[%c2_25, %c0_26, %c0_27] : memref<22x104x208xbf16, #tpu.memory_space<vmem>>, vector<1x104x208xbf16>
    %23 = vector.shape_cast %22 : vector<1x104x208xbf16> to vector<104x208xbf16>
    %cst_28 = arith.constant dense<0.000000e+00> : vector<16x208xf32>
    %24 = tpu.matmul %21, %23, %cst_28 {dimension_numbers = #tpu.dot_dimension_numbers<[1], [0], [0], [1], [0, 0, 1, 1], [], []>} : vector<16x104xbf16>, vector<104x208xbf16>, vector<16x208xf32> -> vector<16x208xf32>
    %25 = arith.addf %18, %24 : vector<16x208xf32>
    %c0_29 = arith.constant 0 : index
    %c0_30 = arith.constant 0 : index
    %c3 = arith.constant 3 : index
    %c0_31 = arith.constant 0 : index
    %26 = vector.load %arg1[%c0_29, %c0_30, %c3, %c0_31] : memref<1x3x26x104xf32, #tpu.memory_space<vmem>>, vector<1x1x16x104xf32>
    %27 = vector.shape_cast %26 : vector<1x1x16x104xf32> to vector<16x104xf32>
    %28 = arith.truncf %27 : vector<16x104xf32> to vector<16x104xbf16>
    %c3_32 = arith.constant 3 : index
    %c0_33 = arith.constant 0 : index
    %c0_34 = arith.constant 0 : index
    %29 = vector.load %arg2[%c3_32, %c0_33, %c0_34] : memref<22x104x208xbf16, #tpu.memory_space<vmem>>, vector<1x104x208xbf16>
    %30 = vector.shape_cast %29 : vector<1x104x208xbf16> to vector<104x208xbf16>
    %cst_35 = arith.constant dense<0.000000e+00> : vector<16x208xf32>
    %31 = tpu.matmul %28, %30, %cst_35 {dimension_numbers = #tpu.dot_dimension_numbers<[1], [0], [0], [1], [0, 0, 1, 1], [], []>} : vector<16x104xbf16>, vector<104x208xbf16>, vector<16x208xf32> -> vector<16x208xf32>
    %32 = arith.addf %25, %31 : vector<16x208xf32>
    %c0_36 = arith.constant 0 : index
    %c0_37 = arith.constant 0 : index
    %c4 = arith.constant 4 : index
    %c0_38 = arith.constant 0 : index
    %33 = vector.load %arg1[%c0_36, %c0_37, %c4, %c0_38] : memref<1x3x26x104xf32, #tpu.memory_space<vmem>>, vector<1x1x16x104xf32>
    %34 = vector.shape_cast %33 : vector<1x1x16x104xf32> to vector<16x104xf32>
    %35 = arith.truncf %34 : vector<16x104xf32> to vector<16x104xbf16>
    %c4_39 = arith.constant 4 : index
    %c0_40 = arith.constant 0 : index
    %c0_41 = arith.constant 0 : index
    %36 = vector.load %arg2[%c4_39, %c0_40, %c0_41] : memref<22x104x208xbf16, #tpu.memory_space<vmem>>, vector<1x104x208xbf16>
    %37 = vector.shape_cast %36 : vector<1x104x208xbf16> to vector<104x208xbf16>
    %cst_42 = arith.constant dense<0.000000e+00> : vector<16x208xf32>
    %38 = tpu.matmul %35, %37, %cst_42 {dimension_numbers = #tpu.dot_dimension_numbers<[1], [0], [0], [1], [0, 0, 1, 1], [], []>} : vector<16x104xbf16>, vector<104x208xbf16>, vector<16x208xf32> -> vector<16x208xf32>
    %39 = arith.addf %32, %38 : vector<16x208xf32>
    %c0_43 = arith.constant 0 : index
    %c0_44 = arith.constant 0 : index
    %c5 = arith.constant 5 : index
    %c0_45 = arith.constant 0 : index
    %40 = vector.load %arg1[%c0_43, %c0_44, %c5, %c0_45] : memref<1x3x26x104xf32, #tpu.memory_space<vmem>>, vector<1x1x16x104xf32>
    %41 = vector.shape_cast %40 : vector<1x1x16x104xf32> to vector<16x104xf32>
    %42 = arith.truncf %41 : vector<16x104xf32> to vector<16x104xbf16>
    %c5_46 = arith.constant 5 : index
    %c0_47 = arith.constant 0 : index
    %c0_48 = arith.constant 0 : index
    %43 = vector.load %arg2[%c5_46, %c0_47, %c0_48] : memref<22x104x208xbf16, #tpu.memory_space<vmem>>, vector<1x104x208xbf16>
    %44 = vector.shape_cast %43 : vector<1x104x208xbf16> to vector<104x208xbf16>
    %cst_49 = arith.constant dense<0.000000e+00> : vector<16x208xf32>
    %45 = tpu.matmul %42, %44, %cst_49 {dimension_numbers = #tpu.dot_dimension_numbers<[1], [0], [0], [1], [0, 0, 1, 1], [], []>} : vector<16x104xbf16>, vector<104x208xbf16>, vector<16x208xf32> -> vector<16x208xf32>
    %46 = arith.addf %39, %45 : vector<16x208xf32>
    %c0_50 = arith.constant 0 : index
    %c0_51 = arith.constant 0 : index
    %c6 = arith.constant 6 : index
    %c0_52 = arith.constant 0 : index
    %47 = vector.load %arg1[%c0_50, %c0_51, %c6, %c0_52] : memref<1x3x26x104xf32, #tpu.memory_space<vmem>>, vector<1x1x16x104xf32>
    %48 = vector.shape_cast %47 : vector<1x1x16x104xf32> to vector<16x104xf32>
    %49 = arith.truncf %48 : vector<16x104xf32> to vector<16x104xbf16>
    %c6_53 = arith.constant 6 : index
    %c0_54 = arith.constant 0 : index
    %c0_55 = arith.constant 0 : index
    %50 = vector.load %arg2[%c6_53, %c0_54, %c0_55] : memref<22x104x208xbf16, #tpu.memory_space<vmem>>, vector<1x104x208xbf16>
    %51 = vector.shape_cast %50 : vector<1x104x208xbf16> to vector<104x208xbf16>
    %cst_56 = arith.constant dense<0.000000e+00> : vector<16x208xf32>
    %52 = tpu.matmul %49, %51, %cst_56 {dimension_numbers = #tpu.dot_dimension_numbers<[1], [0], [0], [1], [0, 0, 1, 1], [], []>} : vector<16x104xbf16>, vector<104x208xbf16>, vector<16x208xf32> -> vector<16x208xf32>
    %53 = arith.addf %46, %52 : vector<16x208xf32>
    %c0_57 = arith.constant 0 : index
    %c0_58 = arith.constant 0 : index
    %c7 = arith.constant 7 : index
    %c0_59 = arith.constant 0 : index
    %54 = vector.load %arg1[%c0_57, %c0_58, %c7, %c0_59] : memref<1x3x26x104xf32, #tpu.memory_space<vmem>>, vector<1x1x16x104xf32>
    %55 = vector.shape_cast %54 : vector<1x1x16x104xf32> to vector<16x104xf32>
    %56 = arith.truncf %55 : vector<16x104xf32> to vector<16x104xbf16>
    %c7_60 = arith.constant 7 : index
    %c0_61 = arith.constant 0 : index
    %c0_62 = arith.constant 0 : index
    %57 = vector.load %arg2[%c7_60, %c0_61, %c0_62] : memref<22x104x208xbf16, #tpu.memory_space<vmem>>, vector<1x104x208xbf16>
    %58 = vector.shape_cast %57 : vector<1x104x208xbf16> to vector<104x208xbf16>
    %cst_63 = arith.constant dense<0.000000e+00> : vector<16x208xf32>
    %59 = tpu.matmul %56, %58, %cst_63 {dimension_numbers = #tpu.dot_dimension_numbers<[1], [0], [0], [1], [0, 0, 1, 1], [], []>} : vector<16x104xbf16>, vector<104x208xbf16>, vector<16x208xf32> -> vector<16x208xf32>
    %60 = arith.addf %53, %59 : vector<16x208xf32>
    %c0_64 = arith.constant 0 : index
    %c0_65 = arith.constant 0 : index
    %c8 = arith.constant 8 : index
    %c0_66 = arith.constant 0 : index
    %61 = vector.load %arg1[%c0_64, %c0_65, %c8, %c0_66] : memref<1x3x26x104xf32, #tpu.memory_space<vmem>>, vector<1x1x16x104xf32>
    %62 = vector.shape_cast %61 : vector<1x1x16x104xf32> to vector<16x104xf32>
    %63 = arith.truncf %62 : vector<16x104xf32> to vector<16x104xbf16>
    %c8_67 = arith.constant 8 : index
    %c0_68 = arith.constant 0 : index
    %c0_69 = arith.constant 0 : index
    %64 = vector.load %arg2[%c8_67, %c0_68, %c0_69] : memref<22x104x208xbf16, #tpu.memory_space<vmem>>, vector<1x104x208xbf16>
    %65 = vector.shape_cast %64 : vector<1x104x208xbf16> to vector<104x208xbf16>
    %cst_70 = arith.constant dense<0.000000e+00> : vector<16x208xf32>
    %66 = tpu.matmul %63, %65, %cst_70 {dimension_numbers = #tpu.dot_dimension_numbers<[1], [0], [0], [1], [0, 0, 1, 1], [], []>} : vector<16x104xbf16>, vector<104x208xbf16>, vector<16x208xf32> -> vector<16x208xf32>
    %67 = arith.addf %60, %66 : vector<16x208xf32>
    %c0_71 = arith.constant 0 : index
    %c0_72 = arith.constant 0 : index
    %c9 = arith.constant 9 : index
    %c0_73 = arith.constant 0 : index
    %68 = vector.load %arg1[%c0_71, %c0_72, %c9, %c0_73] : memref<1x3x26x104xf32, #tpu.memory_space<vmem>>, vector<1x1x16x104xf32>
    %69 = vector.shape_cast %68 : vector<1x1x16x104xf32> to vector<16x104xf32>
    %70 = arith.truncf %69 : vector<16x104xf32> to vector<16x104xbf16>
    %c9_74 = arith.constant 9 : index
    %c0_75 = arith.constant 0 : index
    %c0_76 = arith.constant 0 : index
    %71 = vector.load %arg2[%c9_74, %c0_75, %c0_76] : memref<22x104x208xbf16, #tpu.memory_space<vmem>>, vector<1x104x208xbf16>
    %72 = vector.shape_cast %71 : vector<1x104x208xbf16> to vector<104x208xbf16>
    %cst_77 = arith.constant dense<0.000000e+00> : vector<16x208xf32>
    %73 = tpu.matmul %70, %72, %cst_77 {dimension_numbers = #tpu.dot_dimension_numbers<[1], [0], [0], [1], [0, 0, 1, 1], [], []>} : vector<16x104xbf16>, vector<104x208xbf16>, vector<16x208xf32> -> vector<16x208xf32>
    %74 = arith.addf %67, %73 : vector<16x208xf32>
    %c0_78 = arith.constant 0 : index
    %c0_79 = arith.constant 0 : index
    %c10 = arith.constant 10 : index
    %c0_80 = arith.constant 0 : index
    %75 = vector.load %arg1[%c0_78, %c0_79, %c10, %c0_80] : memref<1x3x26x104xf32, #tpu.memory_space<vmem>>, vector<1x1x16x104xf32>
    %76 = vector.shape_cast %75 : vector<1x1x16x104xf32> to vector<16x104xf32>
    %77 = arith.truncf %76 : vector<16x104xf32> to vector<16x104xbf16>
    %c10_81 = arith.constant 10 : index
    %c0_82 = arith.constant 0 : index
    %c0_83 = arith.constant 0 : index
    %78 = vector.load %arg2[%c10_81, %c0_82, %c0_83] : memref<22x104x208xbf16, #tpu.memory_space<vmem>>, vector<1x104x208xbf16>
    %79 = vector.shape_cast %78 : vector<1x104x208xbf16> to vector<104x208xbf16>
    %cst_84 = arith.constant dense<0.000000e+00> : vector<16x208xf32>
    %80 = tpu.matmul %77, %79, %cst_84 {dimension_numbers = #tpu.dot_dimension_numbers<[1], [0], [0], [1], [0, 0, 1, 1], [], []>} : vector<16x104xbf16>, vector<104x208xbf16>, vector<16x208xf32> -> vector<16x208xf32>
    %81 = arith.addf %74, %80 : vector<16x208xf32>
    %c0_85 = arith.constant 0 : index
    %c1_86 = arith.constant 1 : index
    %c0_87 = arith.constant 0 : index
    %c0_88 = arith.constant 0 : index
    %82 = vector.load %arg1[%c0_85, %c1_86, %c0_87, %c0_88] : memref<1x3x26x104xf32, #tpu.memory_space<vmem>>, vector<1x1x16x104xf32>
    %83 = vector.shape_cast %82 : vector<1x1x16x104xf32> to vector<16x104xf32>
    %84 = arith.truncf %83 : vector<16x104xf32> to vector<16x104xbf16>
    %c11 = arith.constant 11 : index
    %c0_89 = arith.constant 0 : index
    %c0_90 = arith.constant 0 : index
    %85 = vector.load %arg2[%c11, %c0_89, %c0_90] : memref<22x104x208xbf16, #tpu.memory_space<vmem>>, vector<1x104x208xbf16>
    %86 = vector.shape_cast %85 : vector<1x104x208xbf16> to vector<104x208xbf16>
    %cst_91 = arith.constant dense<0.000000e+00> : vector<16x208xf32>
    %87 = tpu.matmul %84, %86, %cst_91 {dimension_numbers = #tpu.dot_dimension_numbers<[1], [0], [0], [1], [0, 0, 1, 1], [], []>} : vector<16x104xbf16>, vector<104x208xbf16>, vector<16x208xf32> -> vector<16x208xf32>
    %88 = arith.addf %81, %87 : vector<16x208xf32>
    %c0_92 = arith.constant 0 : index
    %c1_93 = arith.constant 1 : index
    %c1_94 = arith.constant 1 : index
    %c0_95 = arith.constant 0 : index
    %89 = vector.load %arg1[%c0_92, %c1_93, %c1_94, %c0_95] : memref<1x3x26x104xf32, #tpu.memory_space<vmem>>, vector<1x1x16x104xf32>
    %90 = vector.shape_cast %89 : vector<1x1x16x104xf32> to vector<16x104xf32>
    %91 = arith.truncf %90 : vector<16x104xf32> to vector<16x104xbf16>
    %c12 = arith.constant 12 : index
    %c0_96 = arith.constant 0 : index
    %c0_97 = arith.constant 0 : index
    %92 = vector.load %arg2[%c12, %c0_96, %c0_97] : memref<22x104x208xbf16, #tpu.memory_space<vmem>>, vector<1x104x208xbf16>
    %93 = vector.shape_cast %92 : vector<1x104x208xbf16> to vector<104x208xbf16>
    %cst_98 = arith.constant dense<0.000000e+00> : vector<16x208xf32>
    %94 = tpu.matmul %91, %93, %cst_98 {dimension_numbers = #tpu.dot_dimension_numbers<[1], [0], [0], [1], [0, 0, 1, 1], [], []>} : vector<16x104xbf16>, vector<104x208xbf16>, vector<16x208xf32> -> vector<16x208xf32>
    %95 = arith.addf %88, %94 : vector<16x208xf32>
    %c0_99 = arith.constant 0 : index
    %c1_100 = arith.constant 1 : index
    %c2_101 = arith.constant 2 : index
    %c0_102 = arith.constant 0 : index
    %96 = vector.load %arg1[%c0_99, %c1_100, %c2_101, %c0_102] : memref<1x3x26x104xf32, #tpu.memory_space<vmem>>, vector<1x1x16x104xf32>
    %97 = vector.shape_cast %96 : vector<1x1x16x104xf32> to vector<16x104xf32>
    %98 = arith.truncf %97 : vector<16x104xf32> to vector<16x104xbf16>
    %c13 = arith.constant 13 : index
    %c0_103 = arith.constant 0 : index
    %c0_104 = arith.constant 0 : index
    %99 = vector.load %arg2[%c13, %c0_103, %c0_104] : memref<22x104x208xbf16, #tpu.memory_space<vmem>>, vector<1x104x208xbf16>
    %100 = vector.shape_cast %99 : vector<1x104x208xbf16> to vector<104x208xbf16>
    %cst_105 = arith.constant dense<0.000000e+00> : vector<16x208xf32>
    %101 = tpu.matmul %98, %100, %cst_105 {dimension_numbers = #tpu.dot_dimension_numbers<[1], [0], [0], [1], [0, 0, 1, 1], [], []>} : vector<16x104xbf16>, vector<104x208xbf16>, vector<16x208xf32> -> vector<16x208xf32>
    %102 = arith.addf %95, %101 : vector<16x208xf32>
    %c0_106 = arith.constant 0 : index
    %c1_107 = arith.constant 1 : index
    %c3_108 = arith.constant 3 : index
    %c0_109 = arith.constant 0 : index
    %103 = vector.load %arg1[%c0_106, %c1_107, %c3_108, %c0_109] : memref<1x3x26x104xf32, #tpu.memory_space<vmem>>, vector<1x1x16x104xf32>
    %104 = vector.shape_cast %103 : vector<1x1x16x104xf32> to vector<16x104xf32>
    %105 = arith.truncf %104 : vector<16x104xf32> to vector<16x104xbf16>
    %c14 = arith.constant 14 : index
    %c0_110 = arith.constant 0 : index
    %c0_111 = arith.constant 0 : index
    %106 = vector.load %arg2[%c14, %c0_110, %c0_111] : memref<22x104x208xbf16, #tpu.memory_space<vmem>>, vector<1x104x208xbf16>
    %107 = vector.shape_cast %106 : vector<1x104x208xbf16> to vector<104x208xbf16>
    %cst_112 = arith.constant dense<0.000000e+00> : vector<16x208xf32>
    %108 = tpu.matmul %105, %107, %cst_112 {dimension_numbers = #tpu.dot_dimension_numbers<[1], [0], [0], [1], [0, 0, 1, 1], [], []>} : vector<16x104xbf16>, vector<104x208xbf16>, vector<16x208xf32> -> vector<16x208xf32>
    %109 = arith.addf %102, %108 : vector<16x208xf32>
    %c0_113 = arith.constant 0 : index
    %c1_114 = arith.constant 1 : index
    %c4_115 = arith.constant 4 : index
    %c0_116 = arith.constant 0 : index
    %110 = vector.load %arg1[%c0_113, %c1_114, %c4_115, %c0_116] : memref<1x3x26x104xf32, #tpu.memory_space<vmem>>, vector<1x1x16x104xf32>
    %111 = vector.shape_cast %110 : vector<1x1x16x104xf32> to vector<16x104xf32>
    %112 = arith.truncf %111 : vector<16x104xf32> to vector<16x104xbf16>
    %c15 = arith.constant 15 : index
    %c0_117 = arith.constant 0 : index
    %c0_118 = arith.constant 0 : index
    %113 = vector.load %arg2[%c15, %c0_117, %c0_118] : memref<22x104x208xbf16, #tpu.memory_space<vmem>>, vector<1x104x208xbf16>
    %114 = vector.shape_cast %113 : vector<1x104x208xbf16> to vector<104x208xbf16>
    %cst_119 = arith.constant dense<0.000000e+00> : vector<16x208xf32>
    %115 = tpu.matmul %112, %114, %cst_119 {dimension_numbers = #tpu.dot_dimension_numbers<[1], [0], [0], [1], [0, 0, 1, 1], [], []>} : vector<16x104xbf16>, vector<104x208xbf16>, vector<16x208xf32> -> vector<16x208xf32>
    %116 = arith.addf %109, %115 : vector<16x208xf32>
    %c0_120 = arith.constant 0 : index
    %c1_121 = arith.constant 1 : index
    %c5_122 = arith.constant 5 : index
    %c0_123 = arith.constant 0 : index
    %117 = vector.load %arg1[%c0_120, %c1_121, %c5_122, %c0_123] : memref<1x3x26x104xf32, #tpu.memory_space<vmem>>, vector<1x1x16x104xf32>
    %118 = vector.shape_cast %117 : vector<1x1x16x104xf32> to vector<16x104xf32>
    %119 = arith.truncf %118 : vector<16x104xf32> to vector<16x104xbf16>
    %c16 = arith.constant 16 : index
    %c0_124 = arith.constant 0 : index
    %c0_125 = arith.constant 0 : index
    %120 = vector.load %arg2[%c16, %c0_124, %c0_125] : memref<22x104x208xbf16, #tpu.memory_space<vmem>>, vector<1x104x208xbf16>
    %121 = vector.shape_cast %120 : vector<1x104x208xbf16> to vector<104x208xbf16>
    %cst_126 = arith.constant dense<0.000000e+00> : vector<16x208xf32>
    %122 = tpu.matmul %119, %121, %cst_126 {dimension_numbers = #tpu.dot_dimension_numbers<[1], [0], [0], [1], [0, 0, 1, 1], [], []>} : vector<16x104xbf16>, vector<104x208xbf16>, vector<16x208xf32> -> vector<16x208xf32>
    %123 = arith.addf %116, %122 : vector<16x208xf32>
    %c0_127 = arith.constant 0 : index
    %c1_128 = arith.constant 1 : index
    %c6_129 = arith.constant 6 : index
    %c0_130 = arith.constant 0 : index
    %124 = vector.load %arg1[%c0_127, %c1_128, %c6_129, %c0_130] : memref<1x3x26x104xf32, #tpu.memory_space<vmem>>, vector<1x1x16x104xf32>
    %125 = vector.shape_cast %124 : vector<1x1x16x104xf32> to vector<16x104xf32>
    %126 = arith.truncf %125 : vector<16x104xf32> to vector<16x104xbf16>
    %c17 = arith.constant 17 : index
    %c0_131 = arith.constant 0 : index
    %c0_132 = arith.constant 0 : index
    %127 = vector.load %arg2[%c17, %c0_131, %c0_132] : memref<22x104x208xbf16, #tpu.memory_space<vmem>>, vector<1x104x208xbf16>
    %128 = vector.shape_cast %127 : vector<1x104x208xbf16> to vector<104x208xbf16>
    %cst_133 = arith.constant dense<0.000000e+00> : vector<16x208xf32>
    %129 = tpu.matmul %126, %128, %cst_133 {dimension_numbers = #tpu.dot_dimension_numbers<[1], [0], [0], [1], [0, 0, 1, 1], [], []>} : vector<16x104xbf16>, vector<104x208xbf16>, vector<16x208xf32> -> vector<16x208xf32>
    %130 = arith.addf %123, %129 : vector<16x208xf32>
    %c0_134 = arith.constant 0 : index
    %c1_135 = arith.constant 1 : index
    %c7_136 = arith.constant 7 : index
    %c0_137 = arith.constant 0 : index
    %131 = vector.load %arg1[%c0_134, %c1_135, %c7_136, %c0_137] : memref<1x3x26x104xf32, #tpu.memory_space<vmem>>, vector<1x1x16x104xf32>
    %132 = vector.shape_cast %131 : vector<1x1x16x104xf32> to vector<16x104xf32>
    %133 = arith.truncf %132 : vector<16x104xf32> to vector<16x104xbf16>
    %c18 = arith.constant 18 : index
    %c0_138 = arith.constant 0 : index
    %c0_139 = arith.constant 0 : index
    %134 = vector.load %arg2[%c18, %c0_138, %c0_139] : memref<22x104x208xbf16, #tpu.memory_space<vmem>>, vector<1x104x208xbf16>
    %135 = vector.shape_cast %134 : vector<1x104x208xbf16> to vector<104x208xbf16>
    %cst_140 = arith.constant dense<0.000000e+00> : vector<16x208xf32>
    %136 = tpu.matmul %133, %135, %cst_140 {dimension_numbers = #tpu.dot_dimension_numbers<[1], [0], [0], [1], [0, 0, 1, 1], [], []>} : vector<16x104xbf16>, vector<104x208xbf16>, vector<16x208xf32> -> vector<16x208xf32>
    %137 = arith.addf %130, %136 : vector<16x208xf32>
    %c0_141 = arith.constant 0 : index
    %c1_142 = arith.constant 1 : index
    %c8_143 = arith.constant 8 : index
    %c0_144 = arith.constant 0 : index
    %138 = vector.load %arg1[%c0_141, %c1_142, %c8_143, %c0_144] : memref<1x3x26x104xf32, #tpu.memory_space<vmem>>, vector<1x1x16x104xf32>
    %139 = vector.shape_cast %138 : vector<1x1x16x104xf32> to vector<16x104xf32>
    %140 = arith.truncf %139 : vector<16x104xf32> to vector<16x104xbf16>
    %c19 = arith.constant 19 : index
    %c0_145 = arith.constant 0 : index
    %c0_146 = arith.constant 0 : index
    %141 = vector.load %arg2[%c19, %c0_145, %c0_146] : memref<22x104x208xbf16, #tpu.memory_space<vmem>>, vector<1x104x208xbf16>
    %142 = vector.shape_cast %141 : vector<1x104x208xbf16> to vector<104x208xbf16>
    %cst_147 = arith.constant dense<0.000000e+00> : vector<16x208xf32>
    %143 = tpu.matmul %140, %142, %cst_147 {dimension_numbers = #tpu.dot_dimension_numbers<[1], [0], [0], [1], [0, 0, 1, 1], [], []>} : vector<16x104xbf16>, vector<104x208xbf16>, vector<16x208xf32> -> vector<16x208xf32>
    %144 = arith.addf %137, %143 : vector<16x208xf32>
    %c0_148 = arith.constant 0 : index
    %c1_149 = arith.constant 1 : index
    %c9_150 = arith.constant 9 : index
    %c0_151 = arith.constant 0 : index
    %145 = vector.load %arg1[%c0_148, %c1_149, %c9_150, %c0_151] : memref<1x3x26x104xf32, #tpu.memory_space<vmem>>, vector<1x1x16x104xf32>
    %146 = vector.shape_cast %145 : vector<1x1x16x104xf32> to vector<16x104xf32>
    %147 = arith.truncf %146 : vector<16x104xf32> to vector<16x104xbf16>
    %c20 = arith.constant 20 : index
    %c0_152 = arith.constant 0 : index
    %c0_153 = arith.constant 0 : index
    %148 = vector.load %arg2[%c20, %c0_152, %c0_153] : memref<22x104x208xbf16, #tpu.memory_space<vmem>>, vector<1x104x208xbf16>
    %149 = vector.shape_cast %148 : vector<1x104x208xbf16> to vector<104x208xbf16>
    %cst_154 = arith.constant dense<0.000000e+00> : vector<16x208xf32>
    %150 = tpu.matmul %147, %149, %cst_154 {dimension_numbers = #tpu.dot_dimension_numbers<[1], [0], [0], [1], [0, 0, 1, 1], [], []>} : vector<16x104xbf16>, vector<104x208xbf16>, vector<16x208xf32> -> vector<16x208xf32>
    %151 = arith.addf %144, %150 : vector<16x208xf32>
    %c0_155 = arith.constant 0 : index
    %c1_156 = arith.constant 1 : index
    %c10_157 = arith.constant 10 : index
    %c0_158 = arith.constant 0 : index
    %152 = vector.load %arg1[%c0_155, %c1_156, %c10_157, %c0_158] : memref<1x3x26x104xf32, #tpu.memory_space<vmem>>, vector<1x1x16x104xf32>
    %153 = vector.shape_cast %152 : vector<1x1x16x104xf32> to vector<16x104xf32>
    %154 = arith.truncf %153 : vector<16x104xf32> to vector<16x104xbf16>
    %c21 = arith.constant 21 : index
    %c0_159 = arith.constant 0 : index
    %c0_160 = arith.constant 0 : index
    %155 = vector.load %arg2[%c21, %c0_159, %c0_160] : memref<22x104x208xbf16, #tpu.memory_space<vmem>>, vector<1x104x208xbf16>
    %156 = vector.shape_cast %155 : vector<1x104x208xbf16> to vector<104x208xbf16>
    %cst_161 = arith.constant dense<0.000000e+00> : vector<16x208xf32>
    %157 = tpu.matmul %154, %156, %cst_161 {dimension_numbers = #tpu.dot_dimension_numbers<[1], [0], [0], [1], [0, 0, 1, 1], [], []>} : vector<16x104xbf16>, vector<104x208xbf16>, vector<16x208xf32> -> vector<16x208xf32>
    %158 = arith.addf %151, %157 : vector<16x208xf32>
    %159 = vector.broadcast %0 : vector<1x208xf32> to vector<16x208xf32>
    %160 = arith.addf %158, %159 : vector<16x208xf32>
    %cst_162 = arith.constant 0.000000e+00 : f32
    %161 = vector.broadcast %cst_162 : f32 to vector<16x208xf32>
    %162 = arith.maximumf %160, %161 : vector<16x208xf32>
    %c0_163 = arith.constant 0 : index
    %c5_164 = arith.constant 5 : index
    %c0_165 = arith.constant 0 : index
    %163 = vector.load %arg7[%c0_163, %c5_164, %c0_165] : memref<2x26x208xf32, #tpu.memory_space<vmem>>, vector<1x16x208xf32>
    %164 = vector.shape_cast %163 : vector<1x16x208xf32> to vector<16x208xf32>
    %165 = vector.shape_cast %162 : vector<16x208xf32> to vector<1x16x208xf32>
    tpu.vector_store %arg7[%c0_163, %c5_164, %c0_165], %165 {strides = array<i32>} : memref<2x26x208xf32, #tpu.memory_space<vmem>>, vector<1x16x208xf32>,
    %cst_166 = arith.constant 0.000000e+00 : f32
    %166 = vector.broadcast %cst_166 : f32 to vector<16x208xf32>
    %c0_167 = arith.constant 0 : index
    %c1_168 = arith.constant 1 : index
    %c0_169 = arith.constant 0 : index
    %c0_170 = arith.constant 0 : index
    %167 = vector.load %arg1[%c0_167, %c1_168, %c0_169, %c0_170] : memref<1x3x26x104xf32, #tpu.memory_space<vmem>>, vector<1x1x16x104xf32>
    %168 = vector.shape_cast %167 : vector<1x1x16x104xf32> to vector<16x104xf32>
    %169 = arith.truncf %168 : vector<16x104xf32> to vector<16x104xbf16>
    %c0_171 = arith.constant 0 : index
    %c0_172 = arith.constant 0 : index
    %c0_173 = arith.constant 0 : index
    %170 = vector.load %arg2[%c0_171, %c0_172, %c0_173] : memref<22x104x208xbf16, #tpu.memory_space<vmem>>, vector<1x104x208xbf16>
    %171 = vector.shape_cast %170 : vector<1x104x208xbf16> to vector<104x208xbf16>
    %cst_174 = arith.constant dense<0.000000e+00> : vector<16x208xf32>
    %172 = tpu.matmul %169, %171, %cst_174 {dimension_numbers = #tpu.dot_dimension_numbers<[1], [0], [0], [1], [0, 0, 1, 1], [], []>} : vector<16x104xbf16>, vector<104x208xbf16>, vector<16x208xf32> -> vector<16x208xf32>
    %173 = arith.addf %166, %172 : vector<16x208xf32>
    %c0_175 = arith.constant 0 : index
    %c1_176 = arith.constant 1 : index
    %c1_177 = arith.constant 1 : index
    %c0_178 = arith.constant 0 : index
    %174 = vector.load %arg1[%c0_175, %c1_176, %c1_177, %c0_178] : memref<1x3x26x104xf32, #tpu.memory_space<vmem>>, vector<1x1x16x104xf32>
    %175 = vector.shape_cast %174 : vector<1x1x16x104xf32> to vector<16x104xf32>
    %176 = arith.truncf %175 : vector<16x104xf32> to vector<16x104xbf16>
    %c1_179 = arith.constant 1 : index
    %c0_180 = arith.constant 0 : index
    %c0_181 = arith.constant 0 : index
    %177 = vector.load %arg2[%c1_179, %c0_180, %c0_181] : memref<22x104x208xbf16, #tpu.memory_space<vmem>>, vector<1x104x208xbf16>
    %178 = vector.shape_cast %177 : vector<1x104x208xbf16> to vector<104x208xbf16>
    %cst_182 = arith.constant dense<0.000000e+00> : vector<16x208xf32>
    %179 = tpu.matmul %176, %178, %cst_182 {dimension_numbers = #tpu.dot_dimension_numbers<[1], [0], [0], [1], [0, 0, 1, 1], [], []>} : vector<16x104xbf16>, vector<104x208xbf16>, vector<16x208xf32> -> vector<16x208xf32>
    %180 = arith.addf %173, %179 : vector<16x208xf32>
    %c0_183 = arith.constant 0 : index
    %c1_184 = arith.constant 1 : index
    %c2_185 = arith.constant 2 : index
    %c0_186 = arith.constant 0 : index
    %181 = vector.load %arg1[%c0_183, %c1_184, %c2_185, %c0_186] : memref<1x3x26x104xf32, #tpu.memory_space<vmem>>, vector<1x1x16x104xf32>
    %182 = vector.shape_cast %181 : vector<1x1x16x104xf32> to vector<16x104xf32>
    %183 = arith.truncf %182 : vector<16x104xf32> to vector<16x104xbf16>
    %c2_187 = arith.constant 2 : index
    %c0_188 = arith.constant 0 : index
    %c0_189 = arith.constant 0 : index
    %184 = vector.load %arg2[%c2_187, %c0_188, %c0_189] : memref<22x104x208xbf16, #tpu.memory_space<vmem>>, vector<1x104x208xbf16>
    %185 = vector.shape_cast %184 : vector<1x104x208xbf16> to vector<104x208xbf16>
    %cst_190 = arith.constant dense<0.000000e+00> : vector<16x208xf32>
    %186 = tpu.matmul %183, %185, %cst_190 {dimension_numbers = #tpu.dot_dimension_numbers<[1], [0], [0], [1], [0, 0, 1, 1], [], []>} : vector<16x104xbf16>, vector<104x208xbf16>, vector<16x208xf32> -> vector<16x208xf32>
    %187 = arith.addf %180, %186 : vector<16x208xf32>
    %c0_191 = arith.constant 0 : index
    %c1_192 = arith.constant 1 : index
    %c3_193 = arith.constant 3 : index
    %c0_194 = arith.constant 0 : index
    %188 = vector.load %arg1[%c0_191, %c1_192, %c3_193, %c0_194] : memref<1x3x26x104xf32, #tpu.memory_space<vmem>>, vector<1x1x16x104xf32>
    %189 = vector.shape_cast %188 : vector<1x1x16x104xf32> to vector<16x104xf32>
    %190 = arith.truncf %189 : vector<16x104xf32> to vector<16x104xbf16>
    %c3_195 = arith.constant 3 : index
    %c0_196 = arith.constant 0 : index
    %c0_197 = arith.constant 0 : index
    %191 = vector.load %arg2[%c3_195, %c0_196, %c0_197] : memref<22x104x208xbf16, #tpu.memory_space<vmem>>, vector<1x104x208xbf16>
    %192 = vector.shape_cast %191 : vector<1x104x208xbf16> to vector<104x208xbf16>
    %cst_198 = arith.constant dense<0.000000e+00> : vector<16x208xf32>
    %193 = tpu.matmul %190, %192, %cst_198 {dimension_numbers = #tpu.dot_dimension_numbers<[1], [0], [0], [1], [0, 0, 1, 1], [], []>} : vector<16x104xbf16>, vector<104x208xbf16>, vector<16x208xf32> -> vector<16x208xf32>
    %194 = arith.addf %187, %193 : vector<16x208xf32>
    %c0_199 = arith.constant 0 : index
    %c1_200 = arith.constant 1 : index
    %c4_201 = arith.constant 4 : index
    %c0_202 = arith.constant 0 : index
    %195 = vector.load %arg1[%c0_199, %c1_200, %c4_201, %c0_202] : memref<1x3x26x104xf32, #tpu.memory_space<vmem>>, vector<1x1x16x104xf32>
    %196 = vector.shape_cast %195 : vector<1x1x16x104xf32> to vector<16x104xf32>
    %197 = arith.truncf %196 : vector<16x104xf32> to vector<16x104xbf16>
    %c4_203 = arith.constant 4 : index
    %c0_204 = arith.constant 0 : index
    %c0_205 = arith.constant 0 : index
    %198 = vector.load %arg2[%c4_203, %c0_204, %c0_205] : memref<22x104x208xbf16, #tpu.memory_space<vmem>>, vector<1x104x208xbf16>
    %199 = vector.shape_cast %198 : vector<1x104x208xbf16> to vector<104x208xbf16>
    %cst_206 = arith.constant dense<0.000000e+00> : vector<16x208xf32>
    %200 = tpu.matmul %197, %199, %cst_206 {dimension_numbers = #tpu.dot_dimension_numbers<[1], [0], [0], [1], [0, 0, 1, 1], [], []>} : vector<16x104xbf16>, vector<104x208xbf16>, vector<16x208xf32> -> vector<16x208xf32>
    %201 = arith.addf %194, %200 : vector<16x208xf32>
    %c0_207 = arith.constant 0 : index
    %c1_208 = arith.constant 1 : index
    %c5_209 = arith.constant 5 : index
    %c0_210 = arith.constant 0 : index
    %202 = vector.load %arg1[%c0_207, %c1_208, %c5_209, %c0_210] : memref<1x3x26x104xf32, #tpu.memory_space<vmem>>, vector<1x1x16x104xf32>
    %203 = vector.shape_cast %202 : vector<1x1x16x104xf32> to vector<16x104xf32>
    %204 = arith.truncf %203 : vector<16x104xf32> to vector<16x104xbf16>
    %c5_211 = arith.constant 5 : index
    %c0_212 = arith.constant 0 : index
    %c0_213 = arith.constant 0 : index
    %205 = vector.load %arg2[%c5_211, %c0_212, %c0_213] : memref<22x104x208xbf16, #tpu.memory_space<vmem>>, vector<1x104x208xbf16>
    %206 = vector.shape_cast %205 : vector<1x104x208xbf16> to vector<104x208xbf16>
    %cst_214 = arith.constant dense<0.000000e+00> : vector<16x208xf32>
    %207 = tpu.matmul %204, %206, %cst_214 {dimension_numbers = #tpu.dot_dimension_numbers<[1], [0], [0], [1], [0, 0, 1, 1], [], []>} : vector<16x104xbf16>, vector<104x208xbf16>, vector<16x208xf32> -> vector<16x208xf32>
    %208 = arith.addf %201, %207 : vector<16x208xf32>
    %c0_215 = arith.constant 0 : index
    %c1_216 = arith.constant 1 : index
    %c6_217 = arith.constant 6 : index
    %c0_218 = arith.constant 0 : index
    %209 = vector.load %arg1[%c0_215, %c1_216, %c6_217, %c0_218] : memref<1x3x26x104xf32, #tpu.memory_space<vmem>>, vector<1x1x16x104xf32>
    %210 = vector.shape_cast %209 : vector<1x1x16x104xf32> to vector<16x104xf32>
    %211 = arith.truncf %210 : vector<16x104xf32> to vector<16x104xbf16>
    %c6_219 = arith.constant 6 : index
    %c0_220 = arith.constant 0 : index
    %c0_221 = arith.constant 0 : index
    %212 = vector.load %arg2[%c6_219, %c0_220, %c0_221] : memref<22x104x208xbf16, #tpu.memory_space<vmem>>, vector<1x104x208xbf16>
    %213 = vector.shape_cast %212 : vector<1x104x208xbf16> to vector<104x208xbf16>
    %cst_222 = arith.constant dense<0.000000e+00> : vector<16x208xf32>
    %214 = tpu.matmul %211, %213, %cst_222 {dimension_numbers = #tpu.dot_dimension_numbers<[1], [0], [0], [1], [0, 0, 1, 1], [], []>} : vector<16x104xbf16>, vector<104x208xbf16>, vector<16x208xf32> -> vector<16x208xf32>
    %215 = arith.addf %208, %214 : vector<16x208xf32>
    %c0_223 = arith.constant 0 : index
    %c1_224 = arith.constant 1 : index
    %c7_225 = arith.constant 7 : index
    %c0_226 = arith.constant 0 : index
    %216 = vector.load %arg1[%c0_223, %c1_224, %c7_225, %c0_226] : memref<1x3x26x104xf32, #tpu.memory_space<vmem>>, vector<1x1x16x104xf32>
    %217 = vector.shape_cast %216 : vector<1x1x16x104xf32> to vector<16x104xf32>
    %218 = arith.truncf %217 : vector<16x104xf32> to vector<16x104xbf16>
    %c7_227 = arith.constant 7 : index
    %c0_228 = arith.constant 0 : index
    %c0_229 = arith.constant 0 : index
    %219 = vector.load %arg2[%c7_227, %c0_228, %c0_229] : memref<22x104x208xbf16, #tpu.memory_space<vmem>>, vector<1x104x208xbf16>
    %220 = vector.shape_cast %219 : vector<1x104x208xbf16> to vector<104x208xbf16>
    %cst_230 = arith.constant dense<0.000000e+00> : vector<16x208xf32>
    %221 = tpu.matmul %218, %220, %cst_230 {dimension_numbers = #tpu.dot_dimension_numbers<[1], [0], [0], [1], [0, 0, 1, 1], [], []>} : vector<16x104xbf16>, vector<104x208xbf16>, vector<16x208xf32> -> vector<16x208xf32>
    %222 = arith.addf %215, %221 : vector<16x208xf32>
    %c0_231 = arith.constant 0 : index
    %c1_232 = arith.constant 1 : index
    %c8_233 = arith.constant 8 : index
    %c0_234 = arith.constant 0 : index
    %223 = vector.load %arg1[%c0_231, %c1_232, %c8_233, %c0_234] : memref<1x3x26x104xf32, #tpu.memory_space<vmem>>, vector<1x1x16x104xf32>
    %224 = vector.shape_cast %223 : vector<1x1x16x104xf32> to vector<16x104xf32>
    %225 = arith.truncf %224 : vector<16x104xf32> to vector<16x104xbf16>
    %c8_235 = arith.constant 8 : index
    %c0_236 = arith.constant 0 : index
    %c0_237 = arith.constant 0 : index
    %226 = vector.load %arg2[%c8_235, %c0_236, %c0_237] : memref<22x104x208xbf16, #tpu.memory_space<vmem>>, vector<1x104x208xbf16>
    %227 = vector.shape_cast %226 : vector<1x104x208xbf16> to vector<104x208xbf16>
    %cst_238 = arith.constant dense<0.000000e+00> : vector<16x208xf32>
    %228 = tpu.matmul %225, %227, %cst_238 {dimension_numbers = #tpu.dot_dimension_numbers<[1], [0], [0], [1], [0, 0, 1, 1], [], []>} : vector<16x104xbf16>, vector<104x208xbf16>, vector<16x208xf32> -> vector<16x208xf32>
    %229 = arith.addf %222, %228 : vector<16x208xf32>
    %c0_239 = arith.constant 0 : index
    %c1_240 = arith.constant 1 : index
    %c9_241 = arith.constant 9 : index
    %c0_242 = arith.constant 0 : index
    %230 = vector.load %arg1[%c0_239, %c1_240, %c9_241, %c0_242] : memref<1x3x26x104xf32, #tpu.memory_space<vmem>>, vector<1x1x16x104xf32>
    %231 = vector.shape_cast %230 : vector<1x1x16x104xf32> to vector<16x104xf32>
    %232 = arith.truncf %231 : vector<16x104xf32> to vector<16x104xbf16>
    %c9_243 = arith.constant 9 : index
    %c0_244 = arith.constant 0 : index
    %c0_245 = arith.constant 0 : index
    %233 = vector.load %arg2[%c9_243, %c0_244, %c0_245] : memref<22x104x208xbf16, #tpu.memory_space<vmem>>, vector<1x104x208xbf16>
    %234 = vector.shape_cast %233 : vector<1x104x208xbf16> to vector<104x208xbf16>
    %cst_246 = arith.constant dense<0.000000e+00> : vector<16x208xf32>
    %235 = tpu.matmul %232, %234, %cst_246 {dimension_numbers = #tpu.dot_dimension_numbers<[1], [0], [0], [1], [0, 0, 1, 1], [], []>} : vector<16x104xbf16>, vector<104x208xbf16>, vector<16x208xf32> -> vector<16x208xf32>
    %236 = arith.addf %229, %235 : vector<16x208xf32>
    %c0_247 = arith.constant 0 : index
    %c1_248 = arith.constant 1 : index
    %c10_249 = arith.constant 10 : index
    %c0_250 = arith.constant 0 : index
    %237 = vector.load %arg1[%c0_247, %c1_248, %c10_249, %c0_250] : memref<1x3x26x104xf32, #tpu.memory_space<vmem>>, vector<1x1x16x104xf32>
    %238 = vector.shape_cast %237 : vector<1x1x16x104xf32> to vector<16x104xf32>
    %239 = arith.truncf %238 : vector<16x104xf32> to vector<16x104xbf16>
    %c10_251 = arith.constant 10 : index
    %c0_252 = arith.constant 0 : index
    %c0_253 = arith.constant 0 : index
    %240 = vector.load %arg2[%c10_251, %c0_252, %c0_253] : memref<22x104x208xbf16, #tpu.memory_space<vmem>>, vector<1x104x208xbf16>
    %241 = vector.shape_cast %240 : vector<1x104x208xbf16> to vector<104x208xbf16>
    %cst_254 = arith.constant dense<0.000000e+00> : vector<16x208xf32>
    %242 = tpu.matmul %239, %241, %cst_254 {dimension_numbers = #tpu.dot_dimension_numbers<[1], [0], [0], [1], [0, 0, 1, 1], [], []>} : vector<16x104xbf16>, vector<104x208xbf16>, vector<16x208xf32> -> vector<16x208xf32>
    %243 = arith.addf %236, %242 : vector<16x208xf32>
    %c0_255 = arith.constant 0 : index
    %c2_256 = arith.constant 2 : index
    %c0_257 = arith.constant 0 : index
    %c0_258 = arith.constant 0 : index
    %244 = vector.load %arg1[%c0_255, %c2_256, %c0_257, %c0_258] : memref<1x3x26x104xf32, #tpu.memory_space<vmem>>, vector<1x1x16x104xf32>
    %245 = vector.shape_cast %244 : vector<1x1x16x104xf32> to vector<16x104xf32>
    %246 = arith.truncf %245 : vector<16x104xf32> to vector<16x104xbf16>
    %c11_259 = arith.constant 11 : index
    %c0_260 = arith.constant 0 : index
    %c0_261 = arith.constant 0 : index
    %247 = vector.load %arg2[%c11_259, %c0_260, %c0_261] : memref<22x104x208xbf16, #tpu.memory_space<vmem>>, vector<1x104x208xbf16>
    %248 = vector.shape_cast %247 : vector<1x104x208xbf16> to vector<104x208xbf16>
    %cst_262 = arith.constant dense<0.000000e+00> : vector<16x208xf32>
    %249 = tpu.matmul %246, %248, %cst_262 {dimension_numbers = #tpu.dot_dimension_numbers<[1], [0], [0], [1], [0, 0, 1, 1], [], []>} : vector<16x104xbf16>, vector<104x208xbf16>, vector<16x208xf32> -> vector<16x208xf32>
    %250 = arith.addf %243, %249 : vector<16x208xf32>
    %c0_263 = arith.constant 0 : index
    %c2_264 = arith.constant 2 : index
    %c1_265 = arith.constant 1 : index
    %c0_266 = arith.constant 0 : index
    %251 = vector.load %arg1[%c0_263, %c2_264, %c1_265, %c0_266] : memref<1x3x26x104xf32, #tpu.memory_space<vmem>>, vector<1x1x16x104xf32>
    %252 = vector.shape_cast %251 : vector<1x1x16x104xf32> to vector<16x104xf32>
    %253 = arith.truncf %252 : vector<16x104xf32> to vector<16x104xbf16>
    %c12_267 = arith.constant 12 : index
    %c0_268 = arith.constant 0 : index
    %c0_269 = arith.constant 0 : index
    %254 = vector.load %arg2[%c12_267, %c0_268, %c0_269] : memref<22x104x208xbf16, #tpu.memory_space<vmem>>, vector<1x104x208xbf16>
    %255 = vector.shape_cast %254 : vector<1x104x208xbf16> to vector<104x208xbf16>
    %cst_270 = arith.constant dense<0.000000e+00> : vector<16x208xf32>
    %256 = tpu.matmul %253, %255, %cst_270 {dimension_numbers = #tpu.dot_dimension_numbers<[1], [0], [0], [1], [0, 0, 1, 1], [], []>} : vector<16x104xbf16>, vector<104x208xbf16>, vector<16x208xf32> -> vector<16x208xf32>
    %257 = arith.addf %250, %256 : vector<16x208xf32>
    %c0_271 = arith.constant 0 : index
    %c2_272 = arith.constant 2 : index
    %c2_273 = arith.constant 2 : index
    %c0_274 = arith.constant 0 : index
    %258 = vector.load %arg1[%c0_271, %c2_272, %c2_273, %c0_274] : memref<1x3x26x104xf32, #tpu.memory_space<vmem>>, vector<1x1x16x104xf32>
    %259 = vector.shape_cast %258 : vector<1x1x16x104xf32> to vector<16x104xf32>
    %260 = arith.truncf %259 : vector<16x104xf32> to vector<16x104xbf16>
    %c13_275 = arith.constant 13 : index
    %c0_276 = arith.constant 0 : index
    %c0_277 = arith.constant 0 : index
    %261 = vector.load %arg2[%c13_275, %c0_276, %c0_277] : memref<22x104x208xbf16, #tpu.memory_space<vmem>>, vector<1x104x208xbf16>
    %262 = vector.shape_cast %261 : vector<1x104x208xbf16> to vector<104x208xbf16>
    %cst_278 = arith.constant dense<0.000000e+00> : vector<16x208xf32>
    %263 = tpu.matmul %260, %262, %cst_278 {dimension_numbers = #tpu.dot_dimension_numbers<[1], [0], [0], [1], [0, 0, 1, 1], [], []>} : vector<16x104xbf16>, vector<104x208xbf16>, vector<16x208xf32> -> vector<16x208xf32>
    %264 = arith.addf %257, %263 : vector<16x208xf32>
    %c0_279 = arith.constant 0 : index
    %c2_280 = arith.constant 2 : index
    %c3_281 = arith.constant 3 : index
    %c0_282 = arith.constant 0 : index
    %265 = vector.load %arg1[%c0_279, %c2_280, %c3_281, %c0_282] : memref<1x3x26x104xf32, #tpu.memory_space<vmem>>, vector<1x1x16x104xf32>
    %266 = vector.shape_cast %265 : vector<1x1x16x104xf32> to vector<16x104xf32>
    %267 = arith.truncf %266 : vector<16x104xf32> to vector<16x104xbf16>
    %c14_283 = arith.constant 14 : index
    %c0_284 = arith.constant 0 : index
    %c0_285 = arith.constant 0 : index
    %268 = vector.load %arg2[%c14_283, %c0_284, %c0_285] : memref<22x104x208xbf16, #tpu.memory_space<vmem>>, vector<1x104x208xbf16>
    %269 = vector.shape_cast %268 : vector<1x104x208xbf16> to vector<104x208xbf16>
    %cst_286 = arith.constant dense<0.000000e+00> : vector<16x208xf32>
    %270 = tpu.matmul %267, %269, %cst_286 {dimension_numbers = #tpu.dot_dimension_numbers<[1], [0], [0], [1], [0, 0, 1, 1], [], []>} : vector<16x104xbf16>, vector<104x208xbf16>, vector<16x208xf32> -> vector<16x208xf32>
    %271 = arith.addf %264, %270 : vector<16x208xf32>
    %c0_287 = arith.constant 0 : index
    %c2_288 = arith.constant 2 : index
    %c4_289 = arith.constant 4 : index
    %c0_290 = arith.constant 0 : index
    %272 = vector.load %arg1[%c0_287, %c2_288, %c4_289, %c0_290] : memref<1x3x26x104xf32, #tpu.memory_space<vmem>>, vector<1x1x16x104xf32>
    %273 = vector.shape_cast %272 : vector<1x1x16x104xf32> to vector<16x104xf32>
    %274 = arith.truncf %273 : vector<16x104xf32> to vector<16x104xbf16>
    %c15_291 = arith.constant 15 : index
    %c0_292 = arith.constant 0 : index
    %c0_293 = arith.constant 0 : index
    %275 = vector.load %arg2[%c15_291, %c0_292, %c0_293] : memref<22x104x208xbf16, #tpu.memory_space<vmem>>, vector<1x104x208xbf16>
    %276 = vector.shape_cast %275 : vector<1x104x208xbf16> to vector<104x208xbf16>
    %cst_294 = arith.constant dense<0.000000e+00> : vector<16x208xf32>
    %277 = tpu.matmul %274, %276, %cst_294 {dimension_numbers = #tpu.dot_dimension_numbers<[1], [0], [0], [1], [0, 0, 1, 1], [], []>} : vector<16x104xbf16>, vector<104x208xbf16>, vector<16x208xf32> -> vector<16x208xf32>
    %278 = arith.addf %271, %277 : vector<16x208xf32>
    %c0_295 = arith.constant 0 : index
    %c2_296 = arith.constant 2 : index
    %c5_297 = arith.constant 5 : index
    %c0_298 = arith.constant 0 : index
    %279 = vector.load %arg1[%c0_295, %c2_296, %c5_297, %c0_298] : memref<1x3x26x104xf32, #tpu.memory_space<vmem>>, vector<1x1x16x104xf32>
    %280 = vector.shape_cast %279 : vector<1x1x16x104xf32> to vector<16x104xf32>
    %281 = arith.truncf %280 : vector<16x104xf32> to vector<16x104xbf16>
    %c16_299 = arith.constant 16 : index
    %c0_300 = arith.constant 0 : index
    %c0_301 = arith.constant 0 : index
    %282 = vector.load %arg2[%c16_299, %c0_300, %c0_301] : memref<22x104x208xbf16, #tpu.memory_space<vmem>>, vector<1x104x208xbf16>
    %283 = vector.shape_cast %282 : vector<1x104x208xbf16> to vector<104x208xbf16>
    %cst_302 = arith.constant dense<0.000000e+00> : vector<16x208xf32>
    %284 = tpu.matmul %281, %283, %cst_302 {dimension_numbers = #tpu.dot_dimension_numbers<[1], [0], [0], [1], [0, 0, 1, 1], [], []>} : vector<16x104xbf16>, vector<104x208xbf16>, vector<16x208xf32> -> vector<16x208xf32>
    %285 = arith.addf %278, %284 : vector<16x208xf32>
    %c0_303 = arith.constant 0 : index
    %c2_304 = arith.constant 2 : index
    %c6_305 = arith.constant 6 : index
    %c0_306 = arith.constant 0 : index
    %286 = vector.load %arg1[%c0_303, %c2_304, %c6_305, %c0_306] : memref<1x3x26x104xf32, #tpu.memory_space<vmem>>, vector<1x1x16x104xf32>
    %287 = vector.shape_cast %286 : vector<1x1x16x104xf32> to vector<16x104xf32>
    %288 = arith.truncf %287 : vector<16x104xf32> to vector<16x104xbf16>
    %c17_307 = arith.constant 17 : index
    %c0_308 = arith.constant 0 : index
    %c0_309 = arith.constant 0 : index
    %289 = vector.load %arg2[%c17_307, %c0_308, %c0_309] : memref<22x104x208xbf16, #tpu.memory_space<vmem>>, vector<1x104x208xbf16>
    %290 = vector.shape_cast %289 : vector<1x104x208xbf16> to vector<104x208xbf16>
    %cst_310 = arith.constant dense<0.000000e+00> : vector<16x208xf32>
    %291 = tpu.matmul %288, %290, %cst_310 {dimension_numbers = #tpu.dot_dimension_numbers<[1], [0], [0], [1], [0, 0, 1, 1], [], []>} : vector<16x104xbf16>, vector<104x208xbf16>, vector<16x208xf32> -> vector<16x208xf32>
    %292 = arith.addf %285, %291 : vector<16x208xf32>
    %c0_311 = arith.constant 0 : index
    %c2_312 = arith.constant 2 : index
    %c7_313 = arith.constant 7 : index
    %c0_314 = arith.constant 0 : index
    %293 = vector.load %arg1[%c0_311, %c2_312, %c7_313, %c0_314] : memref<1x3x26x104xf32, #tpu.memory_space<vmem>>, vector<1x1x16x104xf32>
    %294 = vector.shape_cast %293 : vector<1x1x16x104xf32> to vector<16x104xf32>
    %295 = arith.truncf %294 : vector<16x104xf32> to vector<16x104xbf16>
    %c18_315 = arith.constant 18 : index
    %c0_316 = arith.constant 0 : index
    %c0_317 = arith.constant 0 : index
    %296 = vector.load %arg2[%c18_315, %c0_316, %c0_317] : memref<22x104x208xbf16, #tpu.memory_space<vmem>>, vector<1x104x208xbf16>
    %297 = vector.shape_cast %296 : vector<1x104x208xbf16> to vector<104x208xbf16>
    %cst_318 = arith.constant dense<0.000000e+00> : vector<16x208xf32>
    %298 = tpu.matmul %295, %297, %cst_318 {dimension_numbers = #tpu.dot_dimension_numbers<[1], [0], [0], [1], [0, 0, 1, 1], [], []>} : vector<16x104xbf16>, vector<104x208xbf16>, vector<16x208xf32> -> vector<16x208xf32>
    %299 = arith.addf %292, %298 : vector<16x208xf32>
    %c0_319 = arith.constant 0 : index
    %c2_320 = arith.constant 2 : index
    %c8_321 = arith.constant 8 : index
    %c0_322 = arith.constant 0 : index
    %300 = vector.load %arg1[%c0_319, %c2_320, %c8_321, %c0_322] : memref<1x3x26x104xf32, #tpu.memory_space<vmem>>, vector<1x1x16x104xf32>
    %301 = vector.shape_cast %300 : vector<1x1x16x104xf32> to vector<16x104xf32>
    %302 = arith.truncf %301 : vector<16x104xf32> to vector<16x104xbf16>
    %c19_323 = arith.constant 19 : index
    %c0_324 = arith.constant 0 : index
    %c0_325 = arith.constant 0 : index
    %303 = vector.load %arg2[%c19_323, %c0_324, %c0_325] : memref<22x104x208xbf16, #tpu.memory_space<vmem>>, vector<1x104x208xbf16>
    %304 = vector.shape_cast %303 : vector<1x104x208xbf16> to vector<104x208xbf16>
    %cst_326 = arith.constant dense<0.000000e+00> : vector<16x208xf32>
    %305 = tpu.matmul %302, %304, %cst_326 {dimension_numbers = #tpu.dot_dimension_numbers<[1], [0], [0], [1], [0, 0, 1, 1], [], []>} : vector<16x104xbf16>, vector<104x208xbf16>, vector<16x208xf32> -> vector<16x208xf32>
    %306 = arith.addf %299, %305 : vector<16x208xf32>
    %c0_327 = arith.constant 0 : index
    %c2_328 = arith.constant 2 : index
    %c9_329 = arith.constant 9 : index
    %c0_330 = arith.constant 0 : index
    %307 = vector.load %arg1[%c0_327, %c2_328, %c9_329, %c0_330] : memref<1x3x26x104xf32, #tpu.memory_space<vmem>>, vector<1x1x16x104xf32>
    %308 = vector.shape_cast %307 : vector<1x1x16x104xf32> to vector<16x104xf32>
    %309 = arith.truncf %308 : vector<16x104xf32> to vector<16x104xbf16>
    %c20_331 = arith.constant 20 : index
    %c0_332 = arith.constant 0 : index
    %c0_333 = arith.constant 0 : index
    %310 = vector.load %arg2[%c20_331, %c0_332, %c0_333] : memref<22x104x208xbf16, #tpu.memory_space<vmem>>, vector<1x104x208xbf16>
    %311 = vector.shape_cast %310 : vector<1x104x208xbf16> to vector<104x208xbf16>
    %cst_334 = arith.constant dense<0.000000e+00> : vector<16x208xf32>
    %312 = tpu.matmul %309, %311, %cst_334 {dimension_numbers = #tpu.dot_dimension_numbers<[1], [0], [0], [1], [0, 0, 1, 1], [], []>} : vector<16x104xbf16>, vector<104x208xbf16>, vector<16x208xf32> -> vector<16x208xf32>
    %313 = arith.addf %306, %312 : vector<16x208xf32>
    %c0_335 = arith.constant 0 : index
    %c2_336 = arith.constant 2 : index
    %c10_337 = arith.constant 10 : index
    %c0_338 = arith.constant 0 : index
    %314 = vector.load %arg1[%c0_335, %c2_336, %c10_337, %c0_338] : memref<1x3x26x104xf32, #tpu.memory_space<vmem>>, vector<1x1x16x104xf32>
    %315 = vector.shape_cast %314 : vector<1x1x16x104xf32> to vector<16x104xf32>
    %316 = arith.truncf %315 : vector<16x104xf32> to vector<16x104xbf16>
    %c21_339 = arith.constant 21 : index
    %c0_340 = arith.constant 0 : index
    %c0_341 = arith.constant 0 : index
    %317 = vector.load %arg2[%c21_339, %c0_340, %c0_341] : memref<22x104x208xbf16, #tpu.memory_space<vmem>>, vector<1x104x208xbf16>
    %318 = vector.shape_cast %317 : vector<1x104x208xbf16> to vector<104x208xbf16>
    %cst_342 = arith.constant dense<0.000000e+00> : vector<16x208xf32>
    %319 = tpu.matmul %316, %318, %cst_342 {dimension_numbers = #tpu.dot_dimension_numbers<[1], [0], [0], [1], [0, 0, 1, 1], [], []>} : vector<16x104xbf16>, vector<104x208xbf16>, vector<16x208xf32> -> vector<16x208xf32>
    %320 = arith.addf %313, %319 : vector<16x208xf32>
    %321 = vector.broadcast %0 : vector<1x208xf32> to vector<16x208xf32>
    %322 = arith.addf %320, %321 : vector<16x208xf32>
    %cst_343 = arith.constant 0.000000e+00 : f32
    %323 = vector.broadcast %cst_343 : f32 to vector<16x208xf32>
    %324 = arith.maximumf %322, %323 : vector<16x208xf32>
    %c1_344 = arith.constant 1 : index
    %c5_345 = arith.constant 5 : index
    %c0_346 = arith.constant 0 : index
    %325 = vector.load %arg7[%c1_344, %c5_345, %c0_346] : memref<2x26x208xf32, #tpu.memory_space<vmem>>, vector<1x16x208xf32>
    %326 = vector.shape_cast %325 : vector<1x16x208xf32> to vector<16x208xf32>
    %327 = vector.shape_cast %324 : vector<16x208xf32> to vector<1x16x208xf32>
    tpu.vector_store %arg7[%c1_344, %c5_345, %c0_346], %327 {strides = array<i32>} : memref<2x26x208xf32, #tpu.memory_space<vmem>>, vector<1x16x208xf32>,
    %cst_347 = arith.constant 0.000000e+00 : f32
    %328 = vector.broadcast %cst_347 : f32 to vector<16x128xf32>
    %c0_348 = arith.constant 0 : index
    %c0_349 = arith.constant 0 : index
    %c0_350 = arith.constant 0 : index
    %329 = vector.load %arg7[%c0_348, %c0_349, %c0_350] : memref<2x26x208xf32, #tpu.memory_space<vmem>>, vector<1x16x208xf32>
    %330 = vector.shape_cast %329 : vector<1x16x208xf32> to vector<16x208xf32>
    %331 = arith.truncf %330 : vector<16x208xf32> to vector<16x208xbf16>
    %c0_351 = arith.constant 0 : index
    %c0_352 = arith.constant 0 : index
    %c0_353 = arith.constant 0 : index
    %332 = vector.load %arg4[%c0_351, %c0_352, %c0_353] : memref<11x208x128xbf16, #tpu.memory_space<vmem>>, vector<1x208x128xbf16>
    %333 = vector.shape_cast %332 : vector<1x208x128xbf16> to vector<208x128xbf16>
    %cst_354 = arith.constant dense<0.000000e+00> : vector<16x128xf32>
    %334 = tpu.matmul %331, %333, %cst_354 {dimension_numbers = #tpu.dot_dimension_numbers<[1], [0], [0], [1], [0, 0, 1, 1], [], []>} : vector<16x208xbf16>, vector<208x128xbf16>, vector<16x128xf32> -> vector<16x128xf32>
    %335 = arith.addf %328, %334 : vector<16x128xf32>
    %c0_355 = arith.constant 0 : index
    %c1_356 = arith.constant 1 : index
    %c0_357 = arith.constant 0 : index
    %336 = vector.load %arg7[%c0_355, %c1_356, %c0_357] : memref<2x26x208xf32, #tpu.memory_space<vmem>>, vector<1x16x208xf32>
    %337 = vector.shape_cast %336 : vector<1x16x208xf32> to vector<16x208xf32>
    %338 = arith.truncf %337 : vector<16x208xf32> to vector<16x208xbf16>
    %c1_358 = arith.constant 1 : index
    %c0_359 = arith.constant 0 : index
    %c0_360 = arith.constant 0 : index
    %339 = vector.load %arg4[%c1_358, %c0_359, %c0_360] : memref<11x208x128xbf16, #tpu.memory_space<vmem>>, vector<1x208x128xbf16>
    %340 = vector.shape_cast %339 : vector<1x208x128xbf16> to vector<208x128xbf16>
    %cst_361 = arith.constant dense<0.000000e+00> : vector<16x128xf32>
    %341 = tpu.matmul %338, %340, %cst_361 {dimension_numbers = #tpu.dot_dimension_numbers<[1], [0], [0], [1], [0, 0, 1, 1], [], []>} : vector<16x208xbf16>, vector<208x128xbf16>, vector<16x128xf32> -> vector<16x128xf32>
    %342 = arith.addf %335, %341 : vector<16x128xf32>
    %c0_362 = arith.constant 0 : index
    %c2_363 = arith.constant 2 : index
    %c0_364 = arith.constant 0 : index
    %343 = vector.load %arg7[%c0_362, %c2_363, %c0_364] : memref<2x26x208xf32, #tpu.memory_space<vmem>>, vector<1x16x208xf32>
    %344 = vector.shape_cast %343 : vector<1x16x208xf32> to vector<16x208xf32>
    %345 = arith.truncf %344 : vector<16x208xf32> to vector<16x208xbf16>
    %c2_365 = arith.constant 2 : index
    %c0_366 = arith.constant 0 : index
    %c0_367 = arith.constant 0 : index
    %346 = vector.load %arg4[%c2_365, %c0_366, %c0_367] : memref<11x208x128xbf16, #tpu.memory_space<vmem>>, vector<1x208x128xbf16>
    %347 = vector.shape_cast %346 : vector<1x208x128xbf16> to vector<208x128xbf16>
    %cst_368 = arith.constant dense<0.000000e+00> : vector<16x128xf32>
    %348 = tpu.matmul %345, %347, %cst_368 {dimension_numbers = #tpu.dot_dimension_numbers<[1], [0], [0], [1], [0, 0, 1, 1], [], []>} : vector<16x208xbf16>, vector<208x128xbf16>, vector<16x128xf32> -> vector<16x128xf32>
    %349 = arith.addf %342, %348 : vector<16x128xf32>
    %c0_369 = arith.constant 0 : index
    %c3_370 = arith.constant 3 : index
    %c0_371 = arith.constant 0 : index
    %350 = vector.load %arg7[%c0_369, %c3_370, %c0_371] : memref<2x26x208xf32, #tpu.memory_space<vmem>>, vector<1x16x208xf32>
    %351 = vector.shape_cast %350 : vector<1x16x208xf32> to vector<16x208xf32>
    %352 = arith.truncf %351 : vector<16x208xf32> to vector<16x208xbf16>
    %c3_372 = arith.constant 3 : index
    %c0_373 = arith.constant 0 : index
    %c0_374 = arith.constant 0 : index
    %353 = vector.load %arg4[%c3_372, %c0_373, %c0_374] : memref<11x208x128xbf16, #tpu.memory_space<vmem>>, vector<1x208x128xbf16>
    %354 = vector.shape_cast %353 : vector<1x208x128xbf16> to vector<208x128xbf16>
    %cst_375 = arith.constant dense<0.000000e+00> : vector<16x128xf32>
    %355 = tpu.matmul %352, %354, %cst_375 {dimension_numbers = #tpu.dot_dimension_numbers<[1], [0], [0], [1], [0, 0, 1, 1], [], []>} : vector<16x208xbf16>, vector<208x128xbf16>, vector<16x128xf32> -> vector<16x128xf32>
    %356 = arith.addf %349, %355 : vector<16x128xf32>
    %c0_376 = arith.constant 0 : index
    %c4_377 = arith.constant 4 : index
    %c0_378 = arith.constant 0 : index
    %357 = vector.load %arg7[%c0_376, %c4_377, %c0_378] : memref<2x26x208xf32, #tpu.memory_space<vmem>>, vector<1x16x208xf32>
    %358 = vector.shape_cast %357 : vector<1x16x208xf32> to vector<16x208xf32>
    %359 = arith.truncf %358 : vector<16x208xf32> to vector<16x208xbf16>
    %c4_379 = arith.constant 4 : index
    %c0_380 = arith.constant 0 : index
    %c0_381 = arith.constant 0 : index
    %360 = vector.load %arg4[%c4_379, %c0_380, %c0_381] : memref<11x208x128xbf16, #tpu.memory_space<vmem>>, vector<1x208x128xbf16>
    %361 = vector.shape_cast %360 : vector<1x208x128xbf16> to vector<208x128xbf16>
    %cst_382 = arith.constant dense<0.000000e+00> : vector<16x128xf32>
    %362 = tpu.matmul %359, %361, %cst_382 {dimension_numbers = #tpu.dot_dimension_numbers<[1], [0], [0], [1], [0, 0, 1, 1], [], []>} : vector<16x208xbf16>, vector<208x128xbf16>, vector<16x128xf32> -> vector<16x128xf32>
    %363 = arith.addf %356, %362 : vector<16x128xf32>
    %c0_383 = arith.constant 0 : index
    %c5_384 = arith.constant 5 : index
    %c0_385 = arith.constant 0 : index
    %364 = vector.load %arg7[%c0_383, %c5_384, %c0_385] : memref<2x26x208xf32, #tpu.memory_space<vmem>>, vector<1x16x208xf32>
    %365 = vector.shape_cast %364 : vector<1x16x208xf32> to vector<16x208xf32>
    %366 = arith.truncf %365 : vector<16x208xf32> to vector<16x208xbf16>
    %c5_386 = arith.constant 5 : index
    %c0_387 = arith.constant 0 : index
    %c0_388 = arith.constant 0 : index
    %367 = vector.load %arg4[%c5_386, %c0_387, %c0_388] : memref<11x208x128xbf16, #tpu.memory_space<vmem>>, vector<1x208x128xbf16>
    %368 = vector.shape_cast %367 : vector<1x208x128xbf16> to vector<208x128xbf16>
    %cst_389 = arith.constant dense<0.000000e+00> : vector<16x128xf32>
    %369 = tpu.matmul %366, %368, %cst_389 {dimension_numbers = #tpu.dot_dimension_numbers<[1], [0], [0], [1], [0, 0, 1, 1], [], []>} : vector<16x208xbf16>, vector<208x128xbf16>, vector<16x128xf32> -> vector<16x128xf32>
    %370 = arith.addf %363, %369 : vector<16x128xf32>
    %c0_390 = arith.constant 0 : index
    %c6_391 = arith.constant 6 : index
    %c0_392 = arith.constant 0 : index
    %371 = vector.load %arg7[%c0_390, %c6_391, %c0_392] : memref<2x26x208xf32, #tpu.memory_space<vmem>>, vector<1x16x208xf32>
    %372 = vector.shape_cast %371 : vector<1x16x208xf32> to vector<16x208xf32>
    %373 = arith.truncf %372 : vector<16x208xf32> to vector<16x208xbf16>
    %c6_393 = arith.constant 6 : index
    %c0_394 = arith.constant 0 : index
    %c0_395 = arith.constant 0 : index
    %374 = vector.load %arg4[%c6_393, %c0_394, %c0_395] : memref<11x208x128xbf16, #tpu.memory_space<vmem>>, vector<1x208x128xbf16>
    %375 = vector.shape_cast %374 : vector<1x208x128xbf16> to vector<208x128xbf16>
    %cst_396 = arith.constant dense<0.000000e+00> : vector<16x128xf32>
    %376 = tpu.matmul %373, %375, %cst_396 {dimension_numbers = #tpu.dot_dimension_numbers<[1], [0], [0], [1], [0, 0, 1, 1], [], []>} : vector<16x208xbf16>, vector<208x128xbf16>, vector<16x128xf32> -> vector<16x128xf32>
    %377 = arith.addf %370, %376 : vector<16x128xf32>
    %c0_397 = arith.constant 0 : index
    %c7_398 = arith.constant 7 : index
    %c0_399 = arith.constant 0 : index
    %378 = vector.load %arg7[%c0_397, %c7_398, %c0_399] : memref<2x26x208xf32, #tpu.memory_space<vmem>>, vector<1x16x208xf32>
    %379 = vector.shape_cast %378 : vector<1x16x208xf32> to vector<16x208xf32>
    %380 = arith.truncf %379 : vector<16x208xf32> to vector<16x208xbf16>
    %c7_400 = arith.constant 7 : index
    %c0_401 = arith.constant 0 : index
    %c0_402 = arith.constant 0 : index
    %381 = vector.load %arg4[%c7_400, %c0_401, %c0_402] : memref<11x208x128xbf16, #tpu.memory_space<vmem>>, vector<1x208x128xbf16>
    %382 = vector.shape_cast %381 : vector<1x208x128xbf16> to vector<208x128xbf16>
    %cst_403 = arith.constant dense<0.000000e+00> : vector<16x128xf32>
    %383 = tpu.matmul %380, %382, %cst_403 {dimension_numbers = #tpu.dot_dimension_numbers<[1], [0], [0], [1], [0, 0, 1, 1], [], []>} : vector<16x208xbf16>, vector<208x128xbf16>, vector<16x128xf32> -> vector<16x128xf32>
    %384 = arith.addf %377, %383 : vector<16x128xf32>
    %c0_404 = arith.constant 0 : index
    %c8_405 = arith.constant 8 : index
    %c0_406 = arith.constant 0 : index
    %385 = vector.load %arg7[%c0_404, %c8_405, %c0_406] : memref<2x26x208xf32, #tpu.memory_space<vmem>>, vector<1x16x208xf32>
    %386 = vector.shape_cast %385 : vector<1x16x208xf32> to vector<16x208xf32>
    %387 = arith.truncf %386 : vector<16x208xf32> to vector<16x208xbf16>
    %c8_407 = arith.constant 8 : index
    %c0_408 = arith.constant 0 : index
    %c0_409 = arith.constant 0 : index
    %388 = vector.load %arg4[%c8_407, %c0_408, %c0_409] : memref<11x208x128xbf16, #tpu.memory_space<vmem>>, vector<1x208x128xbf16>
    %389 = vector.shape_cast %388 : vector<1x208x128xbf16> to vector<208x128xbf16>
    %cst_410 = arith.constant dense<0.000000e+00> : vector<16x128xf32>
    %390 = tpu.matmul %387, %389, %cst_410 {dimension_numbers = #tpu.dot_dimension_numbers<[1], [0], [0], [1], [0, 0, 1, 1], [], []>} : vector<16x208xbf16>, vector<208x128xbf16>, vector<16x128xf32> -> vector<16x128xf32>
    %391 = arith.addf %384, %390 : vector<16x128xf32>
    %c0_411 = arith.constant 0 : index
    %c9_412 = arith.constant 9 : index
    %c0_413 = arith.constant 0 : index
    %392 = vector.load %arg7[%c0_411, %c9_412, %c0_413] : memref<2x26x208xf32, #tpu.memory_space<vmem>>, vector<1x16x208xf32>
    %393 = vector.shape_cast %392 : vector<1x16x208xf32> to vector<16x208xf32>
    %394 = arith.truncf %393 : vector<16x208xf32> to vector<16x208xbf16>
    %c9_414 = arith.constant 9 : index
    %c0_415 = arith.constant 0 : index
    %c0_416 = arith.constant 0 : index
    %395 = vector.load %arg4[%c9_414, %c0_415, %c0_416] : memref<11x208x128xbf16, #tpu.memory_space<vmem>>, vector<1x208x128xbf16>
    %396 = vector.shape_cast %395 : vector<1x208x128xbf16> to vector<208x128xbf16>
    %cst_417 = arith.constant dense<0.000000e+00> : vector<16x128xf32>
    %397 = tpu.matmul %394, %396, %cst_417 {dimension_numbers = #tpu.dot_dimension_numbers<[1], [0], [0], [1], [0, 0, 1, 1], [], []>} : vector<16x208xbf16>, vector<208x128xbf16>, vector<16x128xf32> -> vector<16x128xf32>
    %398 = arith.addf %391, %397 : vector<16x128xf32>
    %c0_418 = arith.constant 0 : index
    %c10_419 = arith.constant 10 : index
    %c0_420 = arith.constant 0 : index
    %399 = vector.load %arg7[%c0_418, %c10_419, %c0_420] : memref<2x26x208xf32, #tpu.memory_space<vmem>>, vector<1x16x208xf32>
    %400 = vector.shape_cast %399 : vector<1x16x208xf32> to vector<16x208xf32>
    %401 = arith.truncf %400 : vector<16x208xf32> to vector<16x208xbf16>
    %c10_421 = arith.constant 10 : index
    %c0_422 = arith.constant 0 : index
    %c0_423 = arith.constant 0 : index
    %402 = vector.load %arg4[%c10_421, %c0_422, %c0_423] : memref<11x208x128xbf16, #tpu.memory_space<vmem>>, vector<1x208x128xbf16>
    %403 = vector.shape_cast %402 : vector<1x208x128xbf16> to vector<208x128xbf16>
    %cst_424 = arith.constant dense<0.000000e+00> : vector<16x128xf32>
    %404 = tpu.matmul %401, %403, %cst_424 {dimension_numbers = #tpu.dot_dimension_numbers<[1], [0], [0], [1], [0, 0, 1, 1], [], []>} : vector<16x208xbf16>, vector<208x128xbf16>, vector<16x128xf32> -> vector<16x128xf32>
    %405 = arith.addf %398, %404 : vector<16x128xf32>
    %406 = vector.broadcast %1 : vector<1x128xf32> to vector<16x128xf32>
    %407 = arith.addf %405, %406 : vector<16x128xf32>
    %cst_425 = arith.constant 0.000000e+00 : f32
    %408 = vector.broadcast %cst_425 : f32 to vector<16x128xf32>
    %409 = arith.maximumf %407, %408 : vector<16x128xf32>
    %c0_426 = arith.constant 0 : index
    %c0_427 = arith.constant 0 : index
    %c0_428 = arith.constant 0 : index
    %c0_429 = arith.constant 0 : index
    %410 = vector.load %arg6[%c0_426, %c0_427, %c0_428, %c0_429] : memref<1x2x16x128xf32, #tpu.memory_space<vmem>>, vector<1x1x16x128xf32>
    %411 = vector.shape_cast %410 : vector<1x1x16x128xf32> to vector<16x128xf32>
    %412 = vector.shape_cast %409 : vector<16x128xf32> to vector<1x1x16x128xf32>
    tpu.vector_store %arg6[%c0_426, %c0_427, %c0_428, %c0_429], %412 {strides = array<i32>} : memref<1x2x16x128xf32, #tpu.memory_space<vmem>>, vector<1x1x16x128xf32>,
    %cst_430 = arith.constant 0.000000e+00 : f32
    %413 = vector.broadcast %cst_430 : f32 to vector<16x128xf32>
    %c1_431 = arith.constant 1 : index
    %c0_432 = arith.constant 0 : index
    %c0_433 = arith.constant 0 : index
    %414 = vector.load %arg7[%c1_431, %c0_432, %c0_433] : memref<2x26x208xf32, #tpu.memory_space<vmem>>, vector<1x16x208xf32>
    %415 = vector.shape_cast %414 : vector<1x16x208xf32> to vector<16x208xf32>
    %416 = arith.truncf %415 : vector<16x208xf32> to vector<16x208xbf16>
    %c0_434 = arith.constant 0 : index
    %c0_435 = arith.constant 0 : index
    %c0_436 = arith.constant 0 : index
    %417 = vector.load %arg4[%c0_434, %c0_435, %c0_436] : memref<11x208x128xbf16, #tpu.memory_space<vmem>>, vector<1x208x128xbf16>
    %418 = vector.shape_cast %417 : vector<1x208x128xbf16> to vector<208x128xbf16>
    %cst_437 = arith.constant dense<0.000000e+00> : vector<16x128xf32>
    %419 = tpu.matmul %416, %418, %cst_437 {dimension_numbers = #tpu.dot_dimension_numbers<[1], [0], [0], [1], [0, 0, 1, 1], [], []>} : vector<16x208xbf16>, vector<208x128xbf16>, vector<16x128xf32> -> vector<16x128xf32>
    %420 = arith.addf %413, %419 : vector<16x128xf32>
    %c1_438 = arith.constant 1 : index
    %c1_439 = arith.constant 1 : index
    %c0_440 = arith.constant 0 : index
    %421 = vector.load %arg7[%c1_438, %c1_439, %c0_440] : memref<2x26x208xf32, #tpu.memory_space<vmem>>, vector<1x16x208xf32>
    %422 = vector.shape_cast %421 : vector<1x16x208xf32> to vector<16x208xf32>
    %423 = arith.truncf %422 : vector<16x208xf32> to vector<16x208xbf16>
    %c1_441 = arith.constant 1 : index
    %c0_442 = arith.constant 0 : index
    %c0_443 = arith.constant 0 : index
    %424 = vector.load %arg4[%c1_441, %c0_442, %c0_443] : memref<11x208x128xbf16, #tpu.memory_space<vmem>>, vector<1x208x128xbf16>
    %425 = vector.shape_cast %424 : vector<1x208x128xbf16> to vector<208x128xbf16>
    %cst_444 = arith.constant dense<0.000000e+00> : vector<16x128xf32>
    %426 = tpu.matmul %423, %425, %cst_444 {dimension_numbers = #tpu.dot_dimension_numbers<[1], [0], [0], [1], [0, 0, 1, 1], [], []>} : vector<16x208xbf16>, vector<208x128xbf16>, vector<16x128xf32> -> vector<16x128xf32>
    %427 = arith.addf %420, %426 : vector<16x128xf32>
    %c1_445 = arith.constant 1 : index
    %c2_446 = arith.constant 2 : index
    %c0_447 = arith.constant 0 : index
    %428 = vector.load %arg7[%c1_445, %c2_446, %c0_447] : memref<2x26x208xf32, #tpu.memory_space<vmem>>, vector<1x16x208xf32>
    %429 = vector.shape_cast %428 : vector<1x16x208xf32> to vector<16x208xf32>
    %430 = arith.truncf %429 : vector<16x208xf32> to vector<16x208xbf16>
    %c2_448 = arith.constant 2 : index
    %c0_449 = arith.constant 0 : index
    %c0_450 = arith.constant 0 : index
    %431 = vector.load %arg4[%c2_448, %c0_449, %c0_450] : memref<11x208x128xbf16, #tpu.memory_space<vmem>>, vector<1x208x128xbf16>
    %432 = vector.shape_cast %431 : vector<1x208x128xbf16> to vector<208x128xbf16>
    %cst_451 = arith.constant dense<0.000000e+00> : vector<16x128xf32>
    %433 = tpu.matmul %430, %432, %cst_451 {dimension_numbers = #tpu.dot_dimension_numbers<[1], [0], [0], [1], [0, 0, 1, 1], [], []>} : vector<16x208xbf16>, vector<208x128xbf16>, vector<16x128xf32> -> vector<16x128xf32>
    %434 = arith.addf %427, %433 : vector<16x128xf32>
    %c1_452 = arith.constant 1 : index
    %c3_453 = arith.constant 3 : index
    %c0_454 = arith.constant 0 : index
    %435 = vector.load %arg7[%c1_452, %c3_453, %c0_454] : memref<2x26x208xf32, #tpu.memory_space<vmem>>, vector<1x16x208xf32>
    %436 = vector.shape_cast %435 : vector<1x16x208xf32> to vector<16x208xf32>
    %437 = arith.truncf %436 : vector<16x208xf32> to vector<16x208xbf16>
    %c3_455 = arith.constant 3 : index
    %c0_456 = arith.constant 0 : index
    %c0_457 = arith.constant 0 : index
    %438 = vector.load %arg4[%c3_455, %c0_456, %c0_457] : memref<11x208x128xbf16, #tpu.memory_space<vmem>>, vector<1x208x128xbf16>
    %439 = vector.shape_cast %438 : vector<1x208x128xbf16> to vector<208x128xbf16>
    %cst_458 = arith.constant dense<0.000000e+00> : vector<16x128xf32>
    %440 = tpu.matmul %437, %439, %cst_458 {dimension_numbers = #tpu.dot_dimension_numbers<[1], [0], [0], [1], [0, 0, 1, 1], [], []>} : vector<16x208xbf16>, vector<208x128xbf16>, vector<16x128xf32> -> vector<16x128xf32>
    %441 = arith.addf %434, %440 : vector<16x128xf32>
    %c1_459 = arith.constant 1 : index
    %c4_460 = arith.constant 4 : index
    %c0_461 = arith.constant 0 : index
    %442 = vector.load %arg7[%c1_459, %c4_460, %c0_461] : memref<2x26x208xf32, #tpu.memory_space<vmem>>, vector<1x16x208xf32>
    %443 = vector.shape_cast %442 : vector<1x16x208xf32> to vector<16x208xf32>
    %444 = arith.truncf %443 : vector<16x208xf32> to vector<16x208xbf16>
    %c4_462 = arith.constant 4 : index
    %c0_463 = arith.constant 0 : index
    %c0_464 = arith.constant 0 : index
    %445 = vector.load %arg4[%c4_462, %c0_463, %c0_464] : memref<11x208x128xbf16, #tpu.memory_space<vmem>>, vector<1x208x128xbf16>
    %446 = vector.shape_cast %445 : vector<1x208x128xbf16> to vector<208x128xbf16>
    %cst_465 = arith.constant dense<0.000000e+00> : vector<16x128xf32>
    %447 = tpu.matmul %444, %446, %cst_465 {dimension_numbers = #tpu.dot_dimension_numbers<[1], [0], [0], [1], [0, 0, 1, 1], [], []>} : vector<16x208xbf16>, vector<208x128xbf16>, vector<16x128xf32> -> vector<16x128xf32>
    %448 = arith.addf %441, %447 : vector<16x128xf32>
    %c1_466 = arith.constant 1 : index
    %c5_467 = arith.constant 5 : index
    %c0_468 = arith.constant 0 : index
    %449 = vector.load %arg7[%c1_466, %c5_467, %c0_468] : memref<2x26x208xf32, #tpu.memory_space<vmem>>, vector<1x16x208xf32>
    %450 = vector.shape_cast %449 : vector<1x16x208xf32> to vector<16x208xf32>
    %451 = arith.truncf %450 : vector<16x208xf32> to vector<16x208xbf16>
    %c5_469 = arith.constant 5 : index
    %c0_470 = arith.constant 0 : index
    %c0_471 = arith.constant 0 : index
    %452 = vector.load %arg4[%c5_469, %c0_470, %c0_471] : memref<11x208x128xbf16, #tpu.memory_space<vmem>>, vector<1x208x128xbf16>
    %453 = vector.shape_cast %452 : vector<1x208x128xbf16> to vector<208x128xbf16>
    %cst_472 = arith.constant dense<0.000000e+00> : vector<16x128xf32>
    %454 = tpu.matmul %451, %453, %cst_472 {dimension_numbers = #tpu.dot_dimension_numbers<[1], [0], [0], [1], [0, 0, 1, 1], [], []>} : vector<16x208xbf16>, vector<208x128xbf16>, vector<16x128xf32> -> vector<16x128xf32>
    %455 = arith.addf %448, %454 : vector<16x128xf32>
    %c1_473 = arith.constant 1 : index
    %c6_474 = arith.constant 6 : index
    %c0_475 = arith.constant 0 : index
    %456 = vector.load %arg7[%c1_473, %c6_474, %c0_475] : memref<2x26x208xf32, #tpu.memory_space<vmem>>, vector<1x16x208xf32>
    %457 = vector.shape_cast %456 : vector<1x16x208xf32> to vector<16x208xf32>
    %458 = arith.truncf %457 : vector<16x208xf32> to vector<16x208xbf16>
    %c6_476 = arith.constant 6 : index
    %c0_477 = arith.constant 0 : index
    %c0_478 = arith.constant 0 : index
    %459 = vector.load %arg4[%c6_476, %c0_477, %c0_478] : memref<11x208x128xbf16, #tpu.memory_space<vmem>>, vector<1x208x128xbf16>
    %460 = vector.shape_cast %459 : vector<1x208x128xbf16> to vector<208x128xbf16>
    %cst_479 = arith.constant dense<0.000000e+00> : vector<16x128xf32>
    %461 = tpu.matmul %458, %460, %cst_479 {dimension_numbers = #tpu.dot_dimension_numbers<[1], [0], [0], [1], [0, 0, 1, 1], [], []>} : vector<16x208xbf16>, vector<208x128xbf16>, vector<16x128xf32> -> vector<16x128xf32>
    %462 = arith.addf %455, %461 : vector<16x128xf32>
    %c1_480 = arith.constant 1 : index
    %c7_481 = arith.constant 7 : index
    %c0_482 = arith.constant 0 : index
    %463 = vector.load %arg7[%c1_480, %c7_481, %c0_482] : memref<2x26x208xf32, #tpu.memory_space<vmem>>, vector<1x16x208xf32>
    %464 = vector.shape_cast %463 : vector<1x16x208xf32> to vector<16x208xf32>
    %465 = arith.truncf %464 : vector<16x208xf32> to vector<16x208xbf16>
    %c7_483 = arith.constant 7 : index
    %c0_484 = arith.constant 0 : index
    %c0_485 = arith.constant 0 : index
    %466 = vector.load %arg4[%c7_483, %c0_484, %c0_485] : memref<11x208x128xbf16, #tpu.memory_space<vmem>>, vector<1x208x128xbf16>
    %467 = vector.shape_cast %466 : vector<1x208x128xbf16> to vector<208x128xbf16>
    %cst_486 = arith.constant dense<0.000000e+00> : vector<16x128xf32>
    %468 = tpu.matmul %465, %467, %cst_486 {dimension_numbers = #tpu.dot_dimension_numbers<[1], [0], [0], [1], [0, 0, 1, 1], [], []>} : vector<16x208xbf16>, vector<208x128xbf16>, vector<16x128xf32> -> vector<16x128xf32>
    %469 = arith.addf %462, %468 : vector<16x128xf32>
    %c1_487 = arith.constant 1 : index
    %c8_488 = arith.constant 8 : index
    %c0_489 = arith.constant 0 : index
    %470 = vector.load %arg7[%c1_487, %c8_488, %c0_489] : memref<2x26x208xf32, #tpu.memory_space<vmem>>, vector<1x16x208xf32>
    %471 = vector.shape_cast %470 : vector<1x16x208xf32> to vector<16x208xf32>
    %472 = arith.truncf %471 : vector<16x208xf32> to vector<16x208xbf16>
    %c8_490 = arith.constant 8 : index
    %c0_491 = arith.constant 0 : index
    %c0_492 = arith.constant 0 : index
    %473 = vector.load %arg4[%c8_490, %c0_491, %c0_492] : memref<11x208x128xbf16, #tpu.memory_space<vmem>>, vector<1x208x128xbf16>
    %474 = vector.shape_cast %473 : vector<1x208x128xbf16> to vector<208x128xbf16>
    %cst_493 = arith.constant dense<0.000000e+00> : vector<16x128xf32>
    %475 = tpu.matmul %472, %474, %cst_493 {dimension_numbers = #tpu.dot_dimension_numbers<[1], [0], [0], [1], [0, 0, 1, 1], [], []>} : vector<16x208xbf16>, vector<208x128xbf16>, vector<16x128xf32> -> vector<16x128xf32>
    %476 = arith.addf %469, %475 : vector<16x128xf32>
    %c1_494 = arith.constant 1 : index
    %c9_495 = arith.constant 9 : index
    %c0_496 = arith.constant 0 : index
    %477 = vector.load %arg7[%c1_494, %c9_495, %c0_496] : memref<2x26x208xf32, #tpu.memory_space<vmem>>, vector<1x16x208xf32>
    %478 = vector.shape_cast %477 : vector<1x16x208xf32> to vector<16x208xf32>
    %479 = arith.truncf %478 : vector<16x208xf32> to vector<16x208xbf16>
    %c9_497 = arith.constant 9 : index
    %c0_498 = arith.constant 0 : index
    %c0_499 = arith.constant 0 : index
    %480 = vector.load %arg4[%c9_497, %c0_498, %c0_499] : memref<11x208x128xbf16, #tpu.memory_space<vmem>>, vector<1x208x128xbf16>
    %481 = vector.shape_cast %480 : vector<1x208x128xbf16> to vector<208x128xbf16>
    %cst_500 = arith.constant dense<0.000000e+00> : vector<16x128xf32>
    %482 = tpu.matmul %479, %481, %cst_500 {dimension_numbers = #tpu.dot_dimension_numbers<[1], [0], [0], [1], [0, 0, 1, 1], [], []>} : vector<16x208xbf16>, vector<208x128xbf16>, vector<16x128xf32> -> vector<16x128xf32>
    %483 = arith.addf %476, %482 : vector<16x128xf32>
    %c1_501 = arith.constant 1 : index
    %c10_502 = arith.constant 10 : index
    %c0_503 = arith.constant 0 : index
    %484 = vector.load %arg7[%c1_501, %c10_502, %c0_503] : memref<2x26x208xf32, #tpu.memory_space<vmem>>, vector<1x16x208xf32>
    %485 = vector.shape_cast %484 : vector<1x16x208xf32> to vector<16x208xf32>
    %486 = arith.truncf %485 : vector<16x208xf32> to vector<16x208xbf16>
    %c10_504 = arith.constant 10 : index
    %c0_505 = arith.constant 0 : index
    %c0_506 = arith.constant 0 : index
    %487 = vector.load %arg4[%c10_504, %c0_505, %c0_506] : memref<11x208x128xbf16, #tpu.memory_space<vmem>>, vector<1x208x128xbf16>
    %488 = vector.shape_cast %487 : vector<1x208x128xbf16> to vector<208x128xbf16>
    %cst_507 = arith.constant dense<0.000000e+00> : vector<16x128xf32>
    %489 = tpu.matmul %486, %488, %cst_507 {dimension_numbers = #tpu.dot_dimension_numbers<[1], [0], [0], [1], [0, 0, 1, 1], [], []>} : vector<16x208xbf16>, vector<208x128xbf16>, vector<16x128xf32> -> vector<16x128xf32>
    %490 = arith.addf %483, %489 : vector<16x128xf32>
    %491 = vector.broadcast %1 : vector<1x128xf32> to vector<16x128xf32>
    %492 = arith.addf %490, %491 : vector<16x128xf32>
    %cst_508 = arith.constant 0.000000e+00 : f32
    %493 = vector.broadcast %cst_508 : f32 to vector<16x128xf32>
    %494 = arith.maximumf %492, %493 : vector<16x128xf32>
    %c0_509 = arith.constant 0 : index
    %c1_510 = arith.constant 1 : index
    %c0_511 = arith.constant 0 : index
    %c0_512 = arith.constant 0 : index
    %495 = vector.load %arg6[%c0_509, %c1_510, %c0_511, %c0_512] : memref<1x2x16x128xf32, #tpu.memory_space<vmem>>, vector<1x1x16x128xf32>
    %496 = vector.shape_cast %495 : vector<1x1x16x128xf32> to vector<16x128xf32>
    %497 = vector.shape_cast %494 : vector<16x128xf32> to vector<1x1x16x128xf32>
    tpu.vector_store %arg6[%c0_509, %c1_510, %c0_511, %c0_512], %497 {strides = array<i32>} : memref<1x2x16x128xf32, #tpu.memory_space<vmem>>, vector<1x1x16x128xf32>,
    return
  }
  func.func @transform_0(%arg0: i32) -> (i32, i32, i32, i32) {
    %c0_i32 = arith.constant 0 : i32
    %c0_i32_0 = arith.constant 0 : i32
    %c0_i32_1 = arith.constant 0 : i32
    %c0_i32_2 = arith.constant 0 : i32
    return %arg0, %c0_i32, %c0_i32_0, %c0_i32_1 : i32, i32, i32, i32
  }
  func.func @transform_1(%arg0: i32) -> (i32, i32, i32) {
    %c0_i32 = arith.constant 0 : i32
    %c0_i32_0 = arith.constant 0 : i32
    %c0_i32_1 = arith.constant 0 : i32
    %c0_i32_2 = arith.constant 0 : i32
    return %c0_i32, %c0_i32_0, %c0_i32_1 : i32, i32, i32
  }
  func.func @transform_2(%arg0: i32) -> (i32, i32) {
    %c0_i32 = arith.constant 0 : i32
    %c0_i32_0 = arith.constant 0 : i32
    %c0_i32_1 = arith.constant 0 : i32
    return %c0_i32, %c0_i32_0 : i32, i32
  }
  func.func @transform_3(%arg0: i32) -> (i32, i32, i32) {
    %c0_i32 = arith.constant 0 : i32
    %c0_i32_0 = arith.constant 0 : i32
    %c0_i32_1 = arith.constant 0 : i32
    %c0_i32_2 = arith.constant 0 : i32
    return %c0_i32, %c0_i32_0, %c0_i32_1 : i32, i32, i32
  }
  func.func @transform_4(%arg0: i32) -> (i32, i32) {
    %c0_i32 = arith.constant 0 : i32
    %c0_i32_0 = arith.constant 0 : i32
    %c0_i32_1 = arith.constant 0 : i32
    return %c0_i32, %c0_i32_0 : i32, i32
  }
  func.func @transform_5(%arg0: i32) -> (i32, i32, i32, i32) {
    %c0_i32 = arith.constant 0 : i32
    %c0_i32_0 = arith.constant 0 : i32
    %c0_i32_1 = arith.constant 0 : i32
    %c0_i32_2 = arith.constant 0 : i32
    return %arg0, %c0_i32, %c0_i32_0, %c0_i32_1 : i32, i32, i32, i32
  }
}

</mosaic_0001>

<bundles_post_ra>
// kernel: stepper_forward.1
= control target key start
LH: loop header
LB: loop body
LE: loop exit
PB: predicated region body
PF: predicated region fallthrough
CT: control target
= control target key end

     0   :  { %10 = vsyncpa [#allocation4], 0  ;;  %s13247_s18 = smov 0   ;;  %s16225_s0 = inlined_call_operand.vmem [shape: f32[2,3,26,104], index: 0, kind: input, shape index: {}]   ;;  %s16226_s1 = inlined_call_operand.vmem [shape: bf16[22,104,208], index: 1, kind: input, shape index: {}]   ;;  %s16227_s2 = inlined_call_operand.vmem [shape: f32[1,208], index: 2, kind: input, shape index: {}]   ;;  %s16228_s3 = inlined_call_operand.hbm [shape: bf16[11,208,128], index: 3, kind: input, shape index: {}]   ;;  %s16229_s4 = inlined_call_operand.vmem [shape: f32[1,128], index: 4, kind: input, shape index: {}]   ;;  %s16230_s5 = inlined_call_operand.vmem [shape: f32[2,2,16,128], index: 5, kind: output, shape index: {}]  }
   0x1 LB: > { %s13253_s19 = sadd.s32 4294967295, %s13210_s18   ;;  %p10336_p0 = scmp.ge.s32.totalorder %s13210_s18, 1  ;;  %s13210_s18 = sphi %s13247_s18, %s16_s18  }
   0x2   : > { %p157_p1 = scmp.lt.s32.totalorder %s13210_s18, 3  ;;  %s13212_s20 = smov [#allocation3]  }
   0x3   : > { %s175_s21 = sshll.u32 %s13212_s20, 4  ;;  %p11983_p3 = scmp.eq.s32.totalorder %s13253_s19, 0  ;;  %s176_s21 = int_to_ptr.vmem [resolvable:$true] %s175_s21 }
   0x4   : > { %p13257_p2 = pnand %p10336_p0, %p157_p1  ;;  %s13185_s23 = scalar_lea.vmem %s176_s21, 18304 }
   0x5   : > { %p13186_p7 = scmp.ne.s32.totalorder %s176_s21, %s13185_s23  ;;  %p13193_p10 = scmp.lt.s32.totalorder %s176_s21, %s176_s21 }
   0x6   : > { %p11979_p4 = pneg %p13257_p2  ;;  %p13194_p11 = scmp.lt.s32.totalorder %s13185_s23, %s13185_s23 }
   0x8   : > { %p11980_p5 = pnand %p11983_p3, %p11979_p4  ;;  %p13195_p12 = por %p13194_p11, %p13193_p10 }
   0xa   : > { %p13176_p6 = pneg %p11980_p5 }
   0xc   : > { %p13188_p8 = pnand %p13186_p7, %p13176_p6 }
   0xe   : > { %p13189_p9 = pneg %p13188_p8 }
  0x10   : > { %p13196_p13 = pnand %p13195_p12, %p13189_p9 }
  0x12   : > { %13199 = shalt.err (!%p13196_p13)
}
  0x13   : > { %s13213_s24 = smov 64   ;;  %s13214_s25 = smov 4  }
  0x14   : > { %11982 = dma.hbm_to_vmem [thread:$0]  (!%p11980_p5), %s16228_s3, 18304, %s176_s21, [#allocation4], %s13213_s24, %s13213_s24, %s13214_s25  }
  0x15   : > { %202 = sbr.rel (%p13257_p2) target bundleno = 1424 (0x590), region = 40 }
  0x1a   : > { %13205 = dma.done.wait (%p11983_p3), [#allocation4], 18304  }
  0x1b   : > { %13207 = vsyncadd (%p11983_p3), [#allocation4], 4294948992  ;;  %v16231_v0 = vmov 0   ;;  %v10356_v1 = vld [vmem:[%s16226_s1 + $0xc8] sm:$0xff]  ;;  %vm363_vm0 = vcmask 1043456   ;;  %v276_v2 = vld [vmem:[%s16226_s1 + $0x60] sm:$0xff] }
  0x1c   : > { %402 = vmatprep.mubr.bf16.mxu0 %v16231_v0  ;;  %519 = vmatprep.mubr.bf16.mxu1 %v16231_v0  ;;  %v10370_v3 = vcombine.high %v10356_v1, %v10356_v1  ;;  %v10386_v4 = vcombine.high %v276_v2, %v276_v2  ;;  %v10369_v5 = vcombine.low %v10356_v1, %v10356_v1  ;;  %v12002_v7 = vld [vmem:[%s16226_s1 + $0xbc] ss:$8 sps:$4 sm:$0xff]   ;;  %v12006_v11 = vld [vmem:[%s16226_s1 + $0xb8] ss:$8 sps:$4 sm:$0xff]   ;;  %v12008_v13 = vld [vmem:[%s16226_s1 + $0xac] ss:$8 sps:$4 sm:$0xff]  }
  0x1d   : > { %v10385_v6 = vcombine.low %v276_v2, %v276_v2  ;;  %v12004_v8 = vld [vmem:[%s16226_s1 + $0x54] ss:$8 sps:$4 sm:$0xff]   ;;  %v12007_v12 = vld [vmem:[%s16226_s1 + $0x50] ss:$8 sps:$4 sm:$0xff]   ;;  %v12010_v14 = vld [vmem:[%s16226_s1 + $0x44] ss:$8 sps:$4 sm:$0xff]  }
  0x1e   : > { %10371 = vmatprep.subr.msk.bf16.mxu0 %vm363_vm0, %v10370_v3  ;;  %10387 = vmatprep.subr.msk.bf16.mxu1 %vm363_vm0, %v10386_v4  ;;  %v365_v9 = vsel %vm363_vm0, %v10369_v5, 0  ;;  %v12012_v15 = vld [vmem:[%s16226_s1 + $0xa8] ss:$8 sps:$4 sm:$0xff]   ;;  %p230_p0 = scmp.lt.s32.totalorder %s13253_s19, 1  ;;  %v12014_v17 = vld [vmem:[%s16226_s1 + $0x9c] ss:$8 sps:$4 sm:$0xff]  }
  0x1f   : > { %v482_v10 = vsel %vm363_vm0, %v10385_v6, 0  ;;  %373 = vmatpush1.bf16.msra.mxu0 %v365_v9  ;;  %v12013_v16 = vld [vmem:[%s16226_s1 + $0x40] ss:$8 sps:$4 sm:$0xff]   ;;  %v12016_v18 = vld [vmem:[%s16226_s1 + $0x34] ss:$8 sps:$4 sm:$0xff]   ;;  %vm359_vm1 = vcmask 850944  }
  0x20   : > { %490 = vmatpush1.bf16.msra.mxu1 %v482_v10  ;;  %374 = vmatprep.subr.bf16.mxu0 %v12002_v7  ;;  %v12018_v19 = vld [vmem:[%s16226_s1 + $0x98] ss:$8 sps:$4 sm:$0xff]   ;;  %s16266_s19 = smov (!%p230_p0, %s13253_s19), 1  ;;  %v12020_v21 = vld [vmem:[%s16226_s1 + $0x8c] ss:$8 sps:$4 sm:$0xff]   ;;  %vm244_vm2 = vcmask 654336  }
  0x21   : > { %491 = vmatprep.subr.bf16.mxu1 %v12004_v8  ;;  %v12019_v20 = vld [vmem:[%s16226_s1 + $0x30] ss:$8 sps:$4 sm:$0xff]   ;;  %v12022_v22 = vld [vmem:[%s16226_s1 + $0x24] ss:$8 sps:$4 sm:$0xff]   ;;  %s11974_s12 = smul.u32 96, %s16266_s19  ;;  %vm251_vm3 = vcmask 648192  }
  0x22   : > { %v12024_v23 = vld [vmem:[%s16226_s1 + $0x88] ss:$8 sps:$4 sm:$0xff]   ;;  %v12026_v25 = vld [vmem:[%s16226_s1 + $0x7c] ss:$8 sps:$4 sm:$0xff]   ;;  %v12030_v27 = vld [vmem:[%s16226_s1 + $0x78] ss:$8 sps:$4 sm:$0xff]  }
  0x23   : > { %375 = vmatpush1.bf16.msra.mxu0 %v12006_v11  ;;  %v12025_v24 = vld [vmem:[%s16226_s1 + $0x20] ss:$8 sps:$4 sm:$0xff]   ;;  %v12028_v26 = vld [vmem:[%s16226_s1 + $0x14] ss:$8 sps:$4 sm:$0xff]   ;;  %v12031_v28 = vld [vmem:[%s16226_s1 + $0x10] ss:$8 sps:$4 sm:$0xff]   ;;  %s13358_s6 = scalar_lea.vmem %s16225_s0, %s11974_s12 }
  0x24   : > { %492 = vmatpush1.bf16.msra.mxu1 %v12007_v12  ;;  %376 = vmatprep.subr.bf16.mxu0 %v12008_v13  ;;  %v12032_v29 = vld [vmem:[%s16226_s1 + $0x6c] ss:$8 sps:$4 sm:$0xff]   ;;  %v12036_v32 = vld [vmem:[%s16226_s1 + $0x68] ss:$8 sps:$4 sm:$0xff]   ;;  %v10430_v35 = vld [vmem:[%s16226_s1 + $0x198] sm:$0xff]  ;;  %vm3328_vm4 = vcmask 654341  }
  0x25   : > { %493 = vmatprep.subr.bf16.mxu1 %v12010_v14  ;;  %v12034_v30 = vld [vmem:[%s16226_s1 + $0x4] ss:$8 sps:$4 sm:$0xff]   ;;  %v10401_v31 = vld [vmem:[%s16226_s1 + $0x130] sm:$0xff]  ;;  %v12037_v33 = vld [vmem:[%s16226_s1] ss:$8 sps:$4 sm:$0xff]   ;;  %v10444_v40 = vcombine.high %v10430_v35, %v10430_v35  ;;  %v10443_v42 = vcombine.low %v10430_v35, %v10430_v35  ;;  %vm3314_vm5 = vcmask 1044480  }
  0x26   : > { %v277_v34 = vld [vmem:[%s13358_s6 + $0x1] sm:$0xff]  ;;  %v13377_v36 = vld [vmem:[%s13358_s6 + $0x9] sm:$0xff]  ;;  %v10415_v39 = vcombine.high %v10401_v31, %v10401_v31  ;;  %v10414_v41 = vcombine.low %v10401_v31, %v10401_v31  ;;  %v12050_v51 = vld [vmem:[%s16226_s1 + $0x114] ss:$8 sps:$4 sm:$0xff]   ;;  %vm3333_vm6 = vcmask 651264   ;;  %vm6749_vm8 = vcmask 1046528  }
  0x27   : > { %377 = vmatpush1.bf16.msra.mxu0 %v12012_v15  ;;  %v261_v37 = vld [vmem:[%s13358_s6] sm:$0xff]  ;;  %v13381_v38 = vld [vmem:[%s13358_s6 + $0x8] sm:$0xff]  ;;  %v279_v43 = vpack.c.bf16 %v13377_v36, %v277_v34  ;;  %v754_v47 = vsel %vm363_vm0, %v10443_v42, 0  ;;  %v12048_v53 = vld [vmem:[%s16226_s1 + $0x110] ss:$8 sps:$4 sm:$0xff]   ;;  %vm7115_vm10 = vcmask 1045504  }
  0x28   : > { %494 = vmatpush1.bf16.msra.mxu1 %v12013_v16  ;;  %378 = vmatprep.subr.bf16.mxu0 %v12014_v17  ;;  %v263_v44 = vpack.c.bf16 %v13381_v38, %v261_v37  ;;  %v12044_v45 = vld [vmem:[%s16226_s1 + $0x124] ss:$8 sps:$4 sm:$0xff]   ;;  %v616_v46 = vsel %vm363_vm0, %v10414_v41, 0  ;;  %v12042_v49 = vld [vmem:[%s16226_s1 + $0x120] ss:$8 sps:$4 sm:$0xff]   ;;  %s11973_s8 = sshll.u32 %s16266_s19, 5 }
  0x29   : > { %495 = vmatprep.subr.bf16.mxu1 %v12016_v18  ;;  %v12047_v48 = vld [vmem:[%s16226_s1 + $0x18c] ss:$8 sps:$4 sm:$0xff]   ;;  %v12045_v50 = vld [vmem:[%s16226_s1 + $0x188] ss:$8 sps:$4 sm:$0xff]   ;;  %v12053_v52 = vld [vmem:[%s16226_s1 + $0x17c] ss:$8 sps:$4 sm:$0xff]   ;;  %s16165_s10 = scalar_lea.vmem %s16230_s5, %s11973_s8 }
  0x2a   : > { %v12051_v54 = vld [vmem:[%s16226_s1 + $0x178] ss:$8 sps:$4 sm:$0xff]   ;;  %v12056_v55 = vld [vmem:[%s16226_s1 + $0x104] ss:$8 sps:$4 sm:$0xff]   ;;  %v12057_v58 = vld [vmem:[%s16226_s1 + $0x168] ss:$8 sps:$4 sm:$0xff]  }
  0x2b   : > { %379 = vmatpush1.bf16.msra.mxu0 %v12018_v19  ;;  %v12059_v56 = vld [vmem:[%s16226_s1 + $0x16c] ss:$8 sps:$4 sm:$0xff]   ;;  %v12054_v57 = vld [vmem:[%s16226_s1 + $0x100] ss:$8 sps:$4 sm:$0xff]   ;;  %v12065_v60 = vld [vmem:[%s16226_s1 + $0x15c] ss:$8 sps:$4 sm:$0xff]  }
  0x2c   : > { %496 = vmatpush1.bf16.msra.mxu1 %v12019_v20  ;;  %380 = vmatprep.subr.bf16.mxu0 %v12020_v21  ;;  %v12062_v59 = vld [vmem:[%s16226_s1 + $0xf4] ss:$8 sps:$4 sm:$0xff]   ;;  %v12060_v61 = vld [vmem:[%s16226_s1 + $0xf0] ss:$8 sps:$4 sm:$0xff]   ;;  %v12068_v63 = vld [vmem:[%s16226_s1 + $0xe4] ss:$8 sps:$4 sm:$0xff]  }
  0x2d   : > { %497 = vmatprep.subr.bf16.mxu1 %v12022_v22  ;;  %v12063_v62 = vld [vmem:[%s16226_s1 + $0x158] ss:$8 sps:$4 sm:$0xff]   ;;  %v12071_v1 = vld [vmem:[%s16226_s1 + $0x14c] ss:$8 sps:$4 sm:$0xff]   ;;  %v12069_v3 = vld [vmem:[%s16226_s1 + $0x148] ss:$8 sps:$4 sm:$0xff]  }
  0x2e   : > { %v12066_v2 = vld [vmem:[%s16226_s1 + $0xe0] ss:$8 sps:$4 sm:$0xff]   ;;  %v12074_v4 = vld [vmem:[%s16226_s1 + $0xd4] ss:$8 sps:$4 sm:$0xff]   ;;  %v12072_v7 = vld [vmem:[%s16226_s1 + $0xd0] ss:$8 sps:$4 sm:$0xff]  }
  0x2f   : > { %381 = vmatpush1.bf16.msra.mxu0 %v12024_v23  ;;  %v12077_v5 = vld [vmem:[%s16226_s1 + $0x13c] ss:$8 sps:$4 sm:$0xff]   ;;  %v12075_v8 = vld [vmem:[%s16226_s1 + $0x138] ss:$8 sps:$4 sm:$0xff]   ;;  %v10488_v9 = vld [vmem:[%s16226_s1 + $0x268] sm:$0xff] }
  0x30   : > { %498 = vmatpush1.bf16.msra.mxu1 %v12025_v24  ;;  %382 = vmatprep.subr.bf16.mxu0 %v12026_v25  ;;  %v10459_v6 = vld [vmem:[%s16226_s1 + $0x200] sm:$0xff]  ;;  %v13473_v11 = vld [vmem:[%s13358_s6 + $0xa] sm:$0xff]  ;;  %v10502_v15 = vcombine.high %v10488_v9, %v10488_v9  ;;  %v10501_v17 = vcombine.low %v10488_v9, %v10488_v9  ;;  %v12084_v20 = vld [vmem:[%s16226_s1 + $0x1f4] ss:$8 sps:$4 sm:$0xff]   ;;  %vm6440_vm7 = vsmask.f32 7424 }
  0x31   : > { %499 = vmatprep.subr.bf16.mxu1 %v12028_v26  ;;  %v530_v10 = vld [vmem:[%s13358_s6 + $0x2] sm:$0xff]  ;;  %v669_v13 = vld [vmem:[%s13358_s6 + $0xb] sm:$0xff]  ;;  %v10473_v14 = vcombine.high %v10459_v6, %v10459_v6  ;;  %v10472_v16 = vcombine.low %v10459_v6, %v10459_v6  ;;  %vm6916_vm9 = vsmask.f32 6400  ;;  %vm7282_vm11 = vsmask.f32 5376 }
  0x32   : > { %v668_v12 = vld [vmem:[%s13358_s6 + $0x3] sm:$0xff]  ;;  %v532_v18 = vpack.c.bf16 %v13473_v11, %v530_v10  ;;  %v1030_v22 = vsel %vm363_vm0, %v10501_v17, 0  ;;  %v12082_v24 = vld [vmem:[%s16226_s1 + $0x1f0] ss:$8 sps:$4 sm:$0xff]   ;;  %v12105_v35 = vld [vmem:[%s16226_s1 + $0x22c] ss:$8 sps:$4 sm:$0xff]  }
  0x33   : > { %383 = vmatpush1.bf16.msra.mxu0 %v12030_v27  ;;  %v670_v19 = vpack.c.bf16 %v669_v13, %v668_v12  ;;  %v892_v21 = vsel %vm363_vm0, %v10472_v16, 0  ;;  %v12087_v23 = vld [vmem:[%s16226_s1 + $0x25c] ss:$8 sps:$4 sm:$0xff]   ;;  %v12085_v25 = vld [vmem:[%s16226_s1 + $0x258] ss:$8 sps:$4 sm:$0xff]  }
  0x34   : > { %500 = vmatpush1.bf16.msra.mxu1 %v12031_v28  ;;  %384 = vmatprep.subr.bf16.mxu0 %v12032_v29  ;;  %v12090_v26 = vld [vmem:[%s16226_s1 + $0x1e4] ss:$8 sps:$4 sm:$0xff]   ;;  %v12088_v28 = vld [vmem:[%s16226_s1 + $0x1e0] ss:$8 sps:$4 sm:$0xff]   ;;  %v12106_v42 = vld [vmem:[%s16226_s1 + $0x1b0] ss:$8 sps:$4 sm:$0xff]  }
  0x35   : > { %501 = vmatprep.subr.bf16.mxu1 %v12034_v30  ;;  %v12093_v27 = vld [vmem:[%s16226_s1 + $0x24c] ss:$8 sps:$4 sm:$0xff]   ;;  %v12091_v29 = vld [vmem:[%s16226_s1 + $0x248] ss:$8 sps:$4 sm:$0xff]   ;;  %v12099_v31 = vld [vmem:[%s16226_s1 + $0x23c] ss:$8 sps:$4 sm:$0xff]  }
  0x36   : > { %v12096_v30 = vld [vmem:[%s16226_s1 + $0x1d4] ss:$8 sps:$4 sm:$0xff]   ;;  %v12102_v34 = vld [vmem:[%s16226_s1 + $0x1c4] ss:$8 sps:$4 sm:$0xff]   ;;  %v12100_v37 = vld [vmem:[%s16226_s1 + $0x1c0] ss:$8 sps:$4 sm:$0xff]  }
  0x37   : > { %385 = vmatpush1.bf16.msra.mxu0 %v12036_v32  ;;  %v12094_v32 = vld [vmem:[%s16226_s1 + $0x1d0] ss:$8 sps:$4 sm:$0xff]   ;;  %v12111_v41 = vld [vmem:[%s16226_s1 + $0x21c] ss:$8 sps:$4 sm:$0xff]   ;;  %v12134_v9 = vld [vmem:[%s16226_s1 + $0x2a0] ss:$8 sps:$4 sm:$0xff]  }
  0x38   : > { %502 = vmatpush1.bf16.msra.mxu1 %v12037_v33  ;;  %10416 = vmatprep.subr.msk.bf16.mxu0 %vm363_vm0, %v10415_v39  ;;  %v12097_v33 = vld [vmem:[%s16226_s1 + $0x238] ss:$8 sps:$4 sm:$0xff]   ;;  %v12103_v39 = vld [vmem:[%s16226_s1 + $0x228] ss:$8 sps:$4 sm:$0xff]   ;;  %v12142_v12 = vld [vmem:[%s16226_s1 + $0x294] ss:$8 sps:$4 sm:$0xff]  }
  0x39   : > { %10445 = vmatprep.subr.msk.bf16.mxu1 %vm363_vm0, %v10444_v40  ;;  %v12108_v40 = vld [vmem:[%s16226_s1 + $0x1b4] ss:$8 sps:$4 sm:$0xff]   ;;  %v12131_v6 = vld [vmem:[%s16226_s1 + $0x318] ss:$8 sps:$4 sm:$0xff]   ;;  %v12137_v10 = vld [vmem:[%s16226_s1 + $0x308] ss:$8 sps:$4 sm:$0xff]  }
  0x3a   : > { %10372 = vmatmul.mubr.msk.bf16.vlgmr.msra.gmra.mxu0 %vm359_vm1, %v279_v43  ;;  %v12109_v43 = vld [vmem:[%s16226_s1 + $0x218] ss:$8 sps:$4 sm:$0xff]   ;;  %v12145_v13 = vld [vmem:[%s16226_s1 + $0x2fc] ss:$8 sps:$4 sm:$0xff]   ;;  %v12151_v17 = vld [vmem:[%s16226_s1 + $0x2ec] ss:$8 sps:$4 sm:$0xff]  }
  0x3b   : > { %10388 = vmatmul.mubr.msk.bf16.vlgmr.msra.gmra.mxu1 %vm359_vm1, %v263_v44  ;;  %624 = vmatpush1.bf16.msra.mxu0 %v616_v46  ;;  %v12114_v44 = vld [vmem:[%s16226_s1 + $0x1a4] ss:$8 sps:$4 sm:$0xff]   ;;  %v10517_v46 = vld [vmem:[%s16226_s1 + $0x2d0] sm:$0xff]  ;;  %vm7648_vm12 = vsmask.f32 4352 }
  0x3c   : > { %762 = vmatpush1.bf16.msra.mxu1 %v754_v47  ;;  %625 = vmatprep.subr.bf16.mxu0 %v12044_v45  ;;  %v12117_v45 = vld [vmem:[%s16226_s1 + $0x20c] ss:$8 sps:$4 sm:$0xff]   ;;  %v12112_v47 = vld [vmem:[%s16226_s1 + $0x1a0] ss:$8 sps:$4 sm:$0xff]  }
  0x3d   : > { %763 = vmatprep.subr.bf16.mxu1 %v12047_v48  ;;  %653 = vmatprep.mubr.bf16.mxu0 %v16231_v0  ;;  %v12115_v48 = vld [vmem:[%s16226_s1 + $0x208] ss:$8 sps:$4 sm:$0xff]   ;;  %v12148_v16 = vld [vmem:[%s16226_s1 + $0x284] ss:$8 sps:$4 sm:$0xff]  }
  0x3e   : > { %791 = vmatprep.mubr.bf16.mxu1 %v16231_v0 }
  0x3f   : > { %626 = vmatpush1.bf16.msra.mxu0 %v12042_v49  ;;  %v806_v49 = vld [vmem:[%s13358_s6 + $0x4] sm:$0xff] }
  0x40   : > { %764 = vmatpush1.bf16.msra.mxu1 %v12045_v50  ;;  %627 = vmatprep.subr.bf16.mxu0 %v12050_v51  ;;  %v10546_v50 = vld [vmem:[%s16226_s1 + $0x338] sm:$0xff]  ;;  %v807_v51 = vld [vmem:[%s13358_s6 + $0xc] sm:$0xff] }
  0x41   : > { %765 = vmatprep.subr.bf16.mxu1 %v12053_v52  ;;  %v944_v52 = vld [vmem:[%s13358_s6 + $0x5] sm:$0xff] }
  0x43   : > { %628 = vmatpush1.bf16.msra.mxu0 %v12048_v53  ;;  %v945_v53 = vld [vmem:[%s13358_s6 + $0xd] sm:$0xff] }
  0x44   : > { %766 = vmatpush1.bf16.msra.mxu1 %v12051_v54  ;;  %629 = vmatprep.subr.bf16.mxu0 %v12056_v55  ;;  %v10531_v54 = vcombine.high %v10517_v46, %v10517_v46  ;;  %v10560_v55 = vcombine.high %v10546_v50, %v10546_v50 }
  0x45   : > { %767 = vmatprep.subr.bf16.mxu1 %v12059_v56  ;;  %v10530_v56 = vcombine.low %v10517_v46, %v10517_v46  ;;  %v12168_v46 = vld [vmem:[%s16226_s1 + $0x380] ss:$8 sps:$4 sm:$0xff]  }
  0x47   : > { %630 = vmatpush1.bf16.msra.mxu0 %v12054_v57  ;;  %v10559_v57 = vcombine.low %v10546_v50, %v10546_v50  ;;  %v12174_v50 = vld [vmem:[%s16226_s1 + $0x370] ss:$8 sps:$4 sm:$0xff]  }
  0x48   : > { %768 = vmatpush1.bf16.msra.mxu1 %v12057_v58  ;;  %631 = vmatprep.subr.bf16.mxu0 %v12062_v59  ;;  %v808_v58 = vpack.c.bf16 %v807_v51, %v806_v49  ;;  %v946_v59 = vpack.c.bf16 %v945_v53, %v944_v52  ;;  %v12179_v49 = vld [vmem:[%s16226_s1 + $0x3dc] ss:$8 sps:$4 sm:$0xff]   ;;  %v12177_v51 = vld [vmem:[%s16226_s1 + $0x3d8] ss:$8 sps:$4 sm:$0xff]   ;;  %v12185_v53 = vld [vmem:[%s16226_s1 + $0x3cc] ss:$8 sps:$4 sm:$0xff]  }
  0x49   : > { %769 = vmatprep.subr.bf16.mxu1 %v12065_v60  ;;  %v12124_v60 = vld [vmem:[%s16226_s1 + $0x2c4] ss:$8 sps:$4 sm:$0xff]  }
  0x4a   : > { %v12182_v52 = vld [vmem:[%s16226_s1 + $0x364] ss:$8 sps:$4 sm:$0xff]  }
  0x4b   : > { %632 = vmatpush1.bf16.msra.mxu0 %v12060_v61  ;;  %v1168_v61 = vsel %vm363_vm0, %v10530_v56, 0  ;;  %v12188_v56 = vld [vmem:[%s16226_s1 + $0x354] ss:$8 sps:$4 sm:$0xff]  }
  0x4c   : > { %770 = vmatpush1.bf16.msra.mxu1 %v12063_v62  ;;  %633 = vmatprep.subr.bf16.mxu0 %v12068_v63  ;;  %v1306_v62 = vsel %vm363_vm0, %v10559_v57, 0  ;;  %v12127_v63 = vld [vmem:[%s16226_s1 + $0x32c] ss:$8 sps:$4 sm:$0xff]   ;;  %v12191_v57 = vld [vmem:[%s16226_s1 + $0x3bc] ss:$8 sps:$4 sm:$0xff]  }
  0x4d   : > { %771 = vmatprep.subr.bf16.mxu1 %v12071_v1  ;;  %v12122_v1 = vld [vmem:[%s16226_s1 + $0x2c0] ss:$8 sps:$4 sm:$0xff]  }
  0x4f   : > { %634 = vmatpush1.bf16.msra.mxu0 %v12066_v2  ;;  %v12125_v2 = vld [vmem:[%s16226_s1 + $0x328] ss:$8 sps:$4 sm:$0xff]  }
  0x50   : > { %772 = vmatpush1.bf16.msra.mxu1 %v12069_v3  ;;  %635 = vmatprep.subr.bf16.mxu0 %v12074_v4  ;;  %v12130_v3 = vld [vmem:[%s16226_s1 + $0x2b4] ss:$8 sps:$4 sm:$0xff]  }
  0x51   : > { %773 = vmatprep.subr.bf16.mxu1 %v12077_v5  ;;  %v12133_v4 = vld [vmem:[%s16226_s1 + $0x31c] ss:$8 sps:$4 sm:$0xff]   ;;  %v12128_v5 = vld [vmem:[%s16226_s1 + $0x2b0] ss:$8 sps:$4 sm:$0xff]  }
  0x53   : > { %636 = vmatpush1.bf16.msra.mxu0 %v12072_v7  ;;  %v12136_v7 = vld [vmem:[%s16226_s1 + $0x2a4] ss:$8 sps:$4 sm:$0xff]  }
  0x54   : > { %774 = vmatpush1.bf16.msra.mxu1 %v12075_v8  ;;  %10474 = vmatprep.subr.msk.bf16.mxu0 %vm363_vm0, %v10473_v14  ;;  %v12139_v8 = vld [vmem:[%s16226_s1 + $0x30c] ss:$8 sps:$4 sm:$0xff]   ;;  %v12140_v14 = vld [vmem:[%s16226_s1 + $0x290] ss:$8 sps:$4 sm:$0xff]  }
  0x55   : > { %10503 = vmatprep.subr.msk.bf16.mxu1 %vm363_vm0, %v10502_v15  ;;  %v12143_v15 = vld [vmem:[%s16226_s1 + $0x2f8] ss:$8 sps:$4 sm:$0xff]  }
  0x56   : > { %10417 = vmatmul.mubr.msk.bf16.vlgmr.msra.gmra.mxu0 %vm359_vm1, %v532_v18  ;;  %v12146_v18 = vld [vmem:[%s16226_s1 + $0x280] ss:$8 sps:$4 sm:$0xff]  }
  0x57   : > { %10446 = vmatmul.mubr.msk.bf16.vlgmr.msra.gmra.mxu1 %vm359_vm1, %v670_v19  ;;  %900 = vmatpush1.bf16.msra.mxu0 %v892_v21  ;;  %v12149_v19 = vld [vmem:[%s16226_s1 + $0x2e8] ss:$8 sps:$4 sm:$0xff]   ;;  %v12157_v21 = vld [vmem:[%s16226_s1 + $0x2dc] ss:$8 sps:$4 sm:$0xff]  }
  0x58   : > { %1038 = vmatpush1.bf16.msra.mxu1 %v1030_v22  ;;  %901 = vmatprep.subr.bf16.mxu0 %v12084_v20  ;;  %v12154_v20 = vld [vmem:[%s16226_s1 + $0x274] ss:$8 sps:$4 sm:$0xff]   ;;  %v10575_v22 = vld [vmem:[%s16226_s1 + $0x3a0] sm:$0xff] }
  0x59   : > { %1039 = vmatprep.subr.bf16.mxu1 %v12087_v23  ;;  %929 = vmatprep.mubr.bf16.mxu0 %v16231_v0  ;;  %v12152_v23 = vld [vmem:[%s16226_s1 + $0x270] ss:$8 sps:$4 sm:$0xff]  }
  0x5a   : > { %1067 = vmatprep.mubr.bf16.mxu1 %v16231_v0 }
  0x5b   : > { %902 = vmatpush1.bf16.msra.mxu0 %v12082_v24  ;;  %v12155_v24 = vld [vmem:[%s16226_s1 + $0x2d8] ss:$8 sps:$4 sm:$0xff]  }
  0x5c   : > { %1040 = vmatpush1.bf16.msra.mxu1 %v12085_v25  ;;  %903 = vmatprep.subr.bf16.mxu0 %v12090_v26  ;;  %v10604_v25 = vld [vmem:[%s16226_s1 + $0x408] sm:$0xff] }
  0x5d   : > { %1041 = vmatprep.subr.bf16.mxu1 %v12093_v27  ;;  %v1082_v26 = vld [vmem:[%s13358_s6 + $0x6] sm:$0xff]  ;;  %v1083_v27 = vld [vmem:[%s13358_s6 + $0xe] sm:$0xff] }
  0x5f   : > { %904 = vmatpush1.bf16.msra.mxu0 %v12088_v28  ;;  %v1220_v28 = vld [vmem:[%s13358_s6 + $0x7] sm:$0xff] }
  0x60   : > { %1042 = vmatpush1.bf16.msra.mxu1 %v12091_v29  ;;  %905 = vmatprep.subr.bf16.mxu0 %v12096_v30  ;;  %v1221_v29 = vld [vmem:[%s13358_s6 + $0xf] sm:$0xff]  ;;  %v10589_v30 = vcombine.high %v10575_v22, %v10575_v22 }
  0x61   : > { %1043 = vmatprep.subr.bf16.mxu1 %v12099_v31  ;;  %v10618_v31 = vcombine.high %v10604_v25, %v10604_v25 }
  0x63   : > { %906 = vmatpush1.bf16.msra.mxu0 %v12094_v32  ;;  %v10588_v32 = vcombine.low %v10575_v22, %v10575_v22  ;;  %v12214_v22 = vld [vmem:[%s16226_s1 + $0x440] ss:$8 sps:$4 sm:$0xff]  }
  0x64   : > { %1044 = vmatpush1.bf16.msra.mxu1 %v12097_v33  ;;  %907 = vmatprep.subr.bf16.mxu0 %v12102_v34  ;;  %v10617_v33 = vcombine.low %v10604_v25, %v10604_v25  ;;  %v1084_v34 = vpack.c.bf16 %v1083_v27, %v1082_v26  ;;  %v12225_v25 = vld [vmem:[%s16226_s1 + $0x49c] ss:$8 sps:$4 sm:$0xff]   ;;  %v12220_v26 = vld [vmem:[%s16226_s1 + $0x430] ss:$8 sps:$4 sm:$0xff]  }
  0x65   : > { %1045 = vmatprep.subr.bf16.mxu1 %v12105_v35  ;;  %v1222_v35 = vpack.c.bf16 %v1221_v29, %v1220_v28  ;;  %v12223_v27 = vld [vmem:[%s16226_s1 + $0x498] ss:$8 sps:$4 sm:$0xff]   ;;  %v12228_v28 = vld [vmem:[%s16226_s1 + $0x424] ss:$8 sps:$4 sm:$0xff]  }
  0x66   : > { %v12231_v29 = vld [vmem:[%s16226_s1 + $0x48c] ss:$8 sps:$4 sm:$0xff]  }
  0x67   : > { %908 = vmatpush1.bf16.msra.mxu0 %v12100_v37  ;;  %v12164_v37 = vld [vmem:[%s16226_s1 + $0x394] ss:$8 sps:$4 sm:$0xff]  }
  0x68   : > { %1046 = vmatpush1.bf16.msra.mxu1 %v12103_v39  ;;  %909 = vmatprep.subr.bf16.mxu0 %v12108_v40  ;;  %v1444_v39 = vsel %vm363_vm0, %v10588_v32, 0  ;;  %v1582_v40 = vsel %vm363_vm0, %v10617_v33, 0  ;;  %v12234_v32 = vld [vmem:[%s16226_s1 + $0x414] ss:$8 sps:$4 sm:$0xff]  }
  0x69   : > { %1047 = vmatprep.subr.bf16.mxu1 %v12111_v41  ;;  %v12167_v41 = vld [vmem:[%s16226_s1 + $0x3fc] ss:$8 sps:$4 sm:$0xff]  }
  0x6a   : > { %v12237_v33 = vld [vmem:[%s16226_s1 + $0x47c] ss:$8 sps:$4 sm:$0xff]  }
  0x6b   : > { %910 = vmatpush1.bf16.msra.mxu0 %v12106_v42  ;;  %v12162_v42 = vld [vmem:[%s16226_s1 + $0x390] ss:$8 sps:$4 sm:$0xff]  }
  0x6c   : > { %1048 = vmatpush1.bf16.msra.mxu1 %v12109_v43  ;;  %911 = vmatprep.subr.bf16.mxu0 %v12114_v44  ;;  %v12165_v43 = vld [vmem:[%s16226_s1 + $0x3f8] ss:$8 sps:$4 sm:$0xff]   ;;  %v12170_v44 = vld [vmem:[%s16226_s1 + $0x384] ss:$8 sps:$4 sm:$0xff]  }
  0x6d   : > { %1049 = vmatprep.subr.bf16.mxu1 %v12117_v45  ;;  %v12173_v45 = vld [vmem:[%s16226_s1 + $0x3ec] ss:$8 sps:$4 sm:$0xff]  }
  0x6f   : > { %912 = vmatpush1.bf16.msra.mxu0 %v12112_v47  ;;  %v12171_v47 = vld [vmem:[%s16226_s1 + $0x3e8] ss:$8 sps:$4 sm:$0xff]  }
  0x70   : > { %1050 = vmatpush1.bf16.msra.mxu1 %v12115_v48  ;;  %10532 = vmatprep.subr.msk.bf16.mxu0 %vm363_vm0, %v10531_v54  ;;  %v12176_v48 = vld [vmem:[%s16226_s1 + $0x374] ss:$8 sps:$4 sm:$0xff]   ;;  %v12180_v54 = vld [vmem:[%s16226_s1 + $0x360] ss:$8 sps:$4 sm:$0xff]  }
  0x71   : > { %10561 = vmatprep.subr.msk.bf16.mxu1 %vm363_vm0, %v10560_v55  ;;  %v12183_v55 = vld [vmem:[%s16226_s1 + $0x3c8] ss:$8 sps:$4 sm:$0xff]  }
  0x72   : > { %10475 = vmatmul.mubr.msk.bf16.vlgmr.msra.gmra.mxu0 %vm359_vm1, %v808_v58  ;;  %v12186_v58 = vld [vmem:[%s16226_s1 + $0x350] ss:$8 sps:$4 sm:$0xff]  }
  0x73   : > { %10504 = vmatmul.mubr.msk.bf16.vlgmr.msra.gmra.mxu1 %vm359_vm1, %v946_v59  ;;  %1176 = vmatpush1.bf16.msra.mxu0 %v1168_v61  ;;  %v12189_v59 = vld [vmem:[%s16226_s1 + $0x3b8] ss:$8 sps:$4 sm:$0xff]   ;;  %v12197_v61 = vld [vmem:[%s16226_s1 + $0x3ac] ss:$8 sps:$4 sm:$0xff]  }
  0x74   : > { %1314 = vmatpush1.bf16.msra.mxu1 %v1306_v62  ;;  %1177 = vmatprep.subr.bf16.mxu0 %v12124_v60  ;;  %v12194_v60 = vld [vmem:[%s16226_s1 + $0x344] ss:$8 sps:$4 sm:$0xff]   ;;  %v10633_v62 = vld [vmem:[%s16226_s1 + $0x470] sm:$0xff] }
  0x75   : > { %1315 = vmatprep.subr.bf16.mxu1 %v12127_v63  ;;  %1205 = vmatprep.mubr.bf16.mxu0 %v16231_v0  ;;  %v12192_v63 = vld [vmem:[%s16226_s1 + $0x340] ss:$8 sps:$4 sm:$0xff]  }
  0x76   : > { %1343 = vmatprep.mubr.bf16.mxu1 %v16231_v0 }
  0x77   : > { %1178 = vmatpush1.bf16.msra.mxu0 %v12122_v1  ;;  %v12195_v1 = vld [vmem:[%s16226_s1 + $0x3a8] ss:$8 sps:$4 sm:$0xff]  }
  0x78   : > { %1316 = vmatpush1.bf16.msra.mxu1 %v12125_v2  ;;  %1179 = vmatprep.subr.bf16.mxu0 %v12130_v3  ;;  %v10664_v2 = vld [vmem:[%s16226_s1 + $0x4d8] sm:$0xff]  ;;  %v1359_v3 = vld [vmem:[%s13358_s6 + $0x10] sm:$0xff] }
  0x79   : > { %1317 = vmatprep.subr.bf16.mxu1 %v12133_v4  ;;  %v1497_v4 = vld [vmem:[%s13358_s6 + $0x11] sm:$0xff] }
  0x7b   : > { %1180 = vmatpush1.bf16.msra.mxu0 %v12128_v5  ;;  %v10647_v5 = vcombine.high %v10633_v62, %v10633_v62 }
  0x7c   : > { %1318 = vmatpush1.bf16.msra.mxu1 %v12131_v6  ;;  %1181 = vmatprep.subr.bf16.mxu0 %v12136_v7  ;;  %v10678_v6 = vcombine.high %v10664_v2, %v10664_v2  ;;  %v10646_v7 = vcombine.low %v10633_v62, %v10633_v62  ;;  %v12262_v62 = vld [vmem:[%s16226_s1 + $0x504] ss:$8 sps:$4 sm:$0xff]  }
  0x7d   : > { %1319 = vmatprep.subr.bf16.mxu1 %v12139_v8  ;;  %v10677_v8 = vcombine.low %v10664_v2, %v10664_v2  ;;  %v12263_v2 = vld [vmem:[%s16226_s1 + $0x568] ss:$8 sps:$4 sm:$0xff]  }
  0x7f   : > { %1182 = vmatpush1.bf16.msra.mxu0 %v12134_v9  ;;  %v1360_v9 = vpack.c.bf16 %v1359_v3, %v13381_v38  ;;  %v12207_v38 = vld [vmem:[%s16226_s1 + $0x4cc] ss:$8 sps:$4 sm:$0xff]  }
  0x80   : > { %1320 = vmatpush1.bf16.msra.mxu1 %v12137_v10  ;;  %1183 = vmatprep.subr.bf16.mxu0 %v12142_v12  ;;  %v1498_v10 = vpack.c.bf16 %v1497_v4, %v13377_v36  ;;  %v1720_v12 = vsel %vm363_vm0, %v10646_v7, 0  ;;  %v12202_v36 = vld [vmem:[%s16226_s1 + $0x460] ss:$8 sps:$4 sm:$0xff]   ;;  %v12268_v3 = vld [vmem:[%s16226_s1 + $0x4f4] ss:$8 sps:$4 sm:$0xff]  }
  0x81   : > { %1321 = vmatprep.subr.bf16.mxu1 %v12145_v13  ;;  %v1859_v13 = vsel %vm363_vm0, %v10677_v8, 0  ;;  %v12271_v4 = vld [vmem:[%s16226_s1 + $0x55c] ss:$8 sps:$4 sm:$0xff]   ;;  %v12277_v8 = vld [vmem:[%s16226_s1 + $0x54c] ss:$8 sps:$4 sm:$0xff]  }
  0x82   : > { %v12274_v7 = vld [vmem:[%s16226_s1 + $0x4e4] ss:$8 sps:$4 sm:$0xff]  }
  0x83   : > { %1184 = vmatpush1.bf16.msra.mxu0 %v12140_v14  ;;  %v12204_v14 = vld [vmem:[%s16226_s1 + $0x464] ss:$8 sps:$4 sm:$0xff]  }
  0x84   : > { %1322 = vmatpush1.bf16.msra.mxu1 %v12143_v15  ;;  %1185 = vmatprep.subr.bf16.mxu0 %v12148_v16  ;;  %v12205_v15 = vld [vmem:[%s16226_s1 + $0x4c8] ss:$8 sps:$4 sm:$0xff]   ;;  %v12210_v16 = vld [vmem:[%s16226_s1 + $0x454] ss:$8 sps:$4 sm:$0xff]  }
  0x85   : > { %1323 = vmatprep.subr.bf16.mxu1 %v12151_v17  ;;  %v12213_v17 = vld [vmem:[%s16226_s1 + $0x4bc] ss:$8 sps:$4 sm:$0xff]  }
  0x87   : > { %1186 = vmatpush1.bf16.msra.mxu0 %v12146_v18  ;;  %v12208_v18 = vld [vmem:[%s16226_s1 + $0x450] ss:$8 sps:$4 sm:$0xff]  }
  0x88   : > { %1324 = vmatpush1.bf16.msra.mxu1 %v12149_v19  ;;  %1187 = vmatprep.subr.bf16.mxu0 %v12154_v20  ;;  %v12211_v19 = vld [vmem:[%s16226_s1 + $0x4b8] ss:$8 sps:$4 sm:$0xff]   ;;  %v12216_v20 = vld [vmem:[%s16226_s1 + $0x444] ss:$8 sps:$4 sm:$0xff]  }
  0x89   : > { %1325 = vmatprep.subr.bf16.mxu1 %v12157_v21  ;;  %v12219_v21 = vld [vmem:[%s16226_s1 + $0x4ac] ss:$8 sps:$4 sm:$0xff]  }
  0x8b   : > { %1188 = vmatpush1.bf16.msra.mxu0 %v12152_v23  ;;  %v12217_v23 = vld [vmem:[%s16226_s1 + $0x4a8] ss:$8 sps:$4 sm:$0xff]  }
  0x8c   : > { %1326 = vmatpush1.bf16.msra.mxu1 %v12155_v24  ;;  %10590 = vmatprep.subr.msk.bf16.mxu0 %vm363_vm0, %v10589_v30  ;;  %v12222_v24 = vld [vmem:[%s16226_s1 + $0x434] ss:$8 sps:$4 sm:$0xff]   ;;  %v12226_v30 = vld [vmem:[%s16226_s1 + $0x420] ss:$8 sps:$4 sm:$0xff]  }
  0x8d   : > { %10619 = vmatprep.subr.msk.bf16.mxu1 %vm363_vm0, %v10618_v31  ;;  %v12229_v31 = vld [vmem:[%s16226_s1 + $0x488] ss:$8 sps:$4 sm:$0xff]  }
  0x8e   : > { %10533 = vmatmul.mubr.msk.bf16.vlgmr.msra.gmra.mxu0 %vm359_vm1, %v1084_v34  ;;  %v10695_v34 = vld [vmem:[%s16226_s1 + $0x540] sm:$0xff] }
  0x8f   : > { %10562 = vmatmul.mubr.msk.bf16.vlgmr.msra.gmra.mxu1 %vm359_vm1, %v1222_v35  ;;  %1452 = vmatpush1.bf16.msra.mxu0 %v1444_v39  ;;  %v12232_v35 = vld [vmem:[%s16226_s1 + $0x410] ss:$8 sps:$4 sm:$0xff]  }
  0x90   : > { %1590 = vmatpush1.bf16.msra.mxu1 %v1582_v40  ;;  %1453 = vmatprep.subr.bf16.mxu0 %v12164_v37  ;;  %v12235_v37 = vld [vmem:[%s16226_s1 + $0x478] ss:$8 sps:$4 sm:$0xff]   ;;  %v10726_v40 = vld [vmem:[%s16226_s1 + $0x5a8] sm:$0xff] }
  0x91   : > { %1591 = vmatprep.subr.bf16.mxu1 %v12167_v41  ;;  %1481 = vmatprep.mubr.bf16.mxu0 %v16231_v0  ;;  %v1635_v39 = vld [vmem:[%s13358_s6 + $0x12] sm:$0xff]  ;;  %v10650_v41 = vld [vmem:[%s13358_s6 + $0x20] sm:$0xff] }
  0x92   : > { %1619 = vmatprep.mubr.bf16.mxu1 %v16231_v0 }
  0x93   : > { %1454 = vmatpush1.bf16.msra.mxu0 %v12162_v42  ;;  %v13837_v42 = vld [vmem:[%s13358_s6 + $0x28] sm:$0xff] }
  0x94   : > { %1592 = vmatpush1.bf16.msra.mxu1 %v12165_v43  ;;  %1455 = vmatprep.subr.bf16.mxu0 %v12170_v44  ;;  %v10709_v43 = vcombine.high %v10695_v34, %v10695_v34  ;;  %v10740_v44 = vcombine.high %v10726_v40, %v10726_v40 }
  0x95   : > { %1593 = vmatprep.subr.bf16.mxu1 %v12173_v45  ;;  %v10708_v45 = vcombine.low %v10695_v34, %v10695_v34  ;;  %v12294_v34 = vld [vmem:[%s16226_s1 + $0x5e0] ss:$8 sps:$4 sm:$0xff]  }
  0x97   : > { %1456 = vmatpush1.bf16.msra.mxu0 %v12168_v46  ;;  %v10739_v46 = vcombine.low %v10726_v40, %v10726_v40  ;;  %v12300_v40 = vld [vmem:[%s16226_s1 + $0x5d0] ss:$8 sps:$4 sm:$0xff]  }
  0x98   : > { %1594 = vmatpush1.bf16.msra.mxu1 %v12171_v47  ;;  %1457 = vmatprep.subr.bf16.mxu0 %v12176_v48  ;;  %v1636_v47 = vpack.c.bf16 %v1635_v39, %v13473_v11  ;;  %v1775_v48 = vpack.c.bf16 %v13837_v42, %v10650_v41  ;;  %v12247_v11 = vld [vmem:[%s16226_s1 + $0x59c] ss:$8 sps:$4 sm:$0xff]   ;;  %v12303_v41 = vld [vmem:[%s16226_s1 + $0x638] ss:$8 sps:$4 sm:$0xff]  }
  0x99   : > { %1595 = vmatprep.subr.bf16.mxu1 %v12179_v49  ;;  %v12244_v49 = vld [vmem:[%s16226_s1 + $0x534] ss:$8 sps:$4 sm:$0xff]  }
  0x9a   : > { %v12305_v39 = vld [vmem:[%s16226_s1 + $0x63c] ss:$8 sps:$4 sm:$0xff]  }
  0x9b   : > { %1458 = vmatpush1.bf16.msra.mxu0 %v12174_v50  ;;  %v1997_v50 = vsel %vm363_vm0, %v10708_v45, 0  ;;  %v12306_v45 = vld [vmem:[%s16226_s1 + $0x5c0] ss:$8 sps:$4 sm:$0xff]  }
  0x9c   : > { %1596 = vmatpush1.bf16.msra.mxu1 %v12177_v51  ;;  %1459 = vmatprep.subr.bf16.mxu0 %v12182_v52  ;;  %v2135_v51 = vsel %vm363_vm0, %v10739_v46, 0  ;;  %v12242_v52 = vld [vmem:[%s16226_s1 + $0x530] ss:$8 sps:$4 sm:$0xff]  }
  0x9d   : > { %1597 = vmatprep.subr.bf16.mxu1 %v12185_v53  ;;  %v12245_v53 = vld [vmem:[%s16226_s1 + $0x598] ss:$8 sps:$4 sm:$0xff]   ;;  %v12309_v46 = vld [vmem:[%s16226_s1 + $0x628] ss:$8 sps:$4 sm:$0xff]  }
  0x9f   : > { %1460 = vmatpush1.bf16.msra.mxu0 %v12180_v54  ;;  %v12250_v54 = vld [vmem:[%s16226_s1 + $0x524] ss:$8 sps:$4 sm:$0xff]  }
  0xa0   : > { %1598 = vmatpush1.bf16.msra.mxu1 %v12183_v55  ;;  %1461 = vmatprep.subr.bf16.mxu0 %v12188_v56  ;;  %v12253_v55 = vld [vmem:[%s16226_s1 + $0x58c] ss:$8 sps:$4 sm:$0xff]   ;;  %v12248_v56 = vld [vmem:[%s16226_s1 + $0x520] ss:$8 sps:$4 sm:$0xff]  }
  0xa1   : > { %1599 = vmatprep.subr.bf16.mxu1 %v12191_v57  ;;  %v12251_v57 = vld [vmem:[%s16226_s1 + $0x588] ss:$8 sps:$4 sm:$0xff]  }
  0xa3   : > { %1462 = vmatpush1.bf16.msra.mxu0 %v12186_v58  ;;  %v12256_v58 = vld [vmem:[%s16226_s1 + $0x514] ss:$8 sps:$4 sm:$0xff]  }
  0xa4   : > { %1600 = vmatpush1.bf16.msra.mxu1 %v12189_v59  ;;  %1463 = vmatprep.subr.bf16.mxu0 %v12194_v60  ;;  %v12259_v59 = vld [vmem:[%s16226_s1 + $0x57c] ss:$8 sps:$4 sm:$0xff]   ;;  %v12254_v60 = vld [vmem:[%s16226_s1 + $0x510] ss:$8 sps:$4 sm:$0xff]  }
  0xa5   : > { %1601 = vmatprep.subr.bf16.mxu1 %v12197_v61  ;;  %v12257_v61 = vld [vmem:[%s16226_s1 + $0x578] ss:$8 sps:$4 sm:$0xff]  }
  0xa7   : > { %1464 = vmatpush1.bf16.msra.mxu0 %v12192_v63  ;;  %v12265_v63 = vld [vmem:[%s16226_s1 + $0x56c] ss:$8 sps:$4 sm:$0xff]  }
  0xa8   : > { %1602 = vmatpush1.bf16.msra.mxu1 %v12195_v1  ;;  %10648 = vmatprep.subr.msk.bf16.mxu0 %vm363_vm0, %v10647_v5  ;;  %v12260_v1 = vld [vmem:[%s16226_s1 + $0x500] ss:$8 sps:$4 sm:$0xff]   ;;  %v12266_v5 = vld [vmem:[%s16226_s1 + $0x4f0] ss:$8 sps:$4 sm:$0xff]  }
  0xa9   : > { %10679 = vmatprep.subr.msk.bf16.mxu1 %vm363_vm0, %v10678_v6  ;;  %v12269_v6 = vld [vmem:[%s16226_s1 + $0x558] ss:$8 sps:$4 sm:$0xff]  }
  0xaa   : > { %10591 = vmatmul.mubr.msk.bf16.vlgmr.msra.gmra.mxu0 %vm359_vm1, %v1360_v9  ;;  %v10757_v9 = vld [vmem:[%s16226_s1 + $0x610] sm:$0xff] }
  0xab   : > { %10620 = vmatmul.mubr.msk.bf16.vlgmr.msra.gmra.mxu1 %vm359_vm1, %v1498_v10  ;;  %1728 = vmatpush1.bf16.msra.mxu0 %v1720_v12  ;;  %v12272_v10 = vld [vmem:[%s16226_s1 + $0x4e0] ss:$8 sps:$4 sm:$0xff]  }
  0xac   : > { %1867 = vmatpush1.bf16.msra.mxu1 %v1859_v13  ;;  %1729 = vmatprep.subr.bf16.mxu0 %v12204_v14  ;;  %v12275_v12 = vld [vmem:[%s16226_s1 + $0x548] ss:$8 sps:$4 sm:$0xff]   ;;  %v10788_v14 = vld [vmem:[%s16226_s1 + $0x678] sm:$0xff] }
  0xad   : > { %1868 = vmatprep.subr.bf16.mxu1 %v12207_v38  ;;  %1757 = vmatprep.mubr.bf16.mxu0 %v16231_v0  ;;  %v10681_v13 = vld [vmem:[%s13358_s6 + $0x21] sm:$0xff]  ;;  %v13929_v38 = vld [vmem:[%s13358_s6 + $0x29] sm:$0xff] }
  0xae   : > { %1896 = vmatprep.mubr.bf16.mxu1 %v16231_v0 }
  0xaf   : > { %1730 = vmatpush1.bf16.msra.mxu0 %v12202_v36  ;;  %v10712_v36 = vld [vmem:[%s13358_s6 + $0x22] sm:$0xff] }
  0xb0   : > { %1869 = vmatpush1.bf16.msra.mxu1 %v12205_v15  ;;  %1731 = vmatprep.subr.bf16.mxu0 %v12210_v16  ;;  %v13933_v15 = vld [vmem:[%s13358_s6 + $0x2a] sm:$0xff]  ;;  %v10771_v16 = vcombine.high %v10757_v9, %v10757_v9 }
  0xb1   : > { %1870 = vmatprep.subr.bf16.mxu1 %v12213_v17  ;;  %v10802_v17 = vcombine.high %v10788_v14, %v10788_v14 }
  0xb3   : > { %1732 = vmatpush1.bf16.msra.mxu0 %v12208_v18  ;;  %v10770_v18 = vcombine.low %v10757_v9, %v10757_v9  ;;  %v12336_v9 = vld [vmem:[%s16226_s1 + $0x6b4] ss:$8 sps:$4 sm:$0xff]  }
  0xb4   : > { %1871 = vmatpush1.bf16.msra.mxu1 %v12211_v19  ;;  %1733 = vmatprep.subr.bf16.mxu0 %v12216_v20  ;;  %v10801_v19 = vcombine.low %v10788_v14, %v10788_v14  ;;  %v1913_v20 = vpack.c.bf16 %v13929_v38, %v10681_v13  ;;  %v12337_v13 = vld [vmem:[%s16226_s1 + $0x718] ss:$8 sps:$4 sm:$0xff]   ;;  %v12342_v14 = vld [vmem:[%s16226_s1 + $0x6a4] ss:$8 sps:$4 sm:$0xff]  }
  0xb5   : > { %1872 = vmatprep.subr.bf16.mxu1 %v12219_v21  ;;  %v2051_v21 = vpack.c.bf16 %v13933_v15, %v10712_v36  ;;  %v12345_v36 = vld [vmem:[%s16226_s1 + $0x70c] ss:$8 sps:$4 sm:$0xff]  }
  0xb7   : > { %1734 = vmatpush1.bf16.msra.mxu0 %v12214_v22  ;;  %v12284_v22 = vld [vmem:[%s16226_s1 + $0x604] ss:$8 sps:$4 sm:$0xff]  }
  0xb8   : > { %1873 = vmatpush1.bf16.msra.mxu1 %v12217_v23  ;;  %1735 = vmatprep.subr.bf16.mxu0 %v12222_v24  ;;  %v2273_v23 = vsel %vm363_vm0, %v10770_v18, 0  ;;  %v2411_v24 = vsel %vm363_vm0, %v10801_v19, 0  ;;  %v12348_v18 = vld [vmem:[%s16226_s1 + $0x694] ss:$8 sps:$4 sm:$0xff]  }
  0xb9   : > { %1874 = vmatprep.subr.bf16.mxu1 %v12225_v25  ;;  %v12287_v25 = vld [vmem:[%s16226_s1 + $0x66c] ss:$8 sps:$4 sm:$0xff]   ;;  %v12351_v19 = vld [vmem:[%s16226_s1 + $0x6fc] ss:$8 sps:$4 sm:$0xff]  }
  0xbb   : > { %1736 = vmatpush1.bf16.msra.mxu0 %v12220_v26  ;;  %v12282_v26 = vld [vmem:[%s16226_s1 + $0x600] ss:$8 sps:$4 sm:$0xff]  }
  0xbc   : > { %1875 = vmatpush1.bf16.msra.mxu1 %v12223_v27  ;;  %1737 = vmatprep.subr.bf16.mxu0 %v12228_v28  ;;  %v12285_v27 = vld [vmem:[%s16226_s1 + $0x668] ss:$8 sps:$4 sm:$0xff]   ;;  %v12290_v28 = vld [vmem:[%s16226_s1 + $0x5f4] ss:$8 sps:$4 sm:$0xff]  }
  0xbd   : > { %1876 = vmatprep.subr.bf16.mxu1 %v12231_v29  ;;  %v12293_v29 = vld [vmem:[%s16226_s1 + $0x65c] ss:$8 sps:$4 sm:$0xff]  }
  0xbf   : > { %1738 = vmatpush1.bf16.msra.mxu0 %v12226_v30  ;;  %v12288_v30 = vld [vmem:[%s16226_s1 + $0x5f0] ss:$8 sps:$4 sm:$0xff]  }
  0xc0   : > { %1877 = vmatpush1.bf16.msra.mxu1 %v12229_v31  ;;  %1739 = vmatprep.subr.bf16.mxu0 %v12234_v32  ;;  %v12291_v31 = vld [vmem:[%s16226_s1 + $0x658] ss:$8 sps:$4 sm:$0xff]   ;;  %v12296_v32 = vld [vmem:[%s16226_s1 + $0x5e4] ss:$8 sps:$4 sm:$0xff]  }
  0xc1   : > { %1878 = vmatprep.subr.bf16.mxu1 %v12237_v33  ;;  %v12299_v33 = vld [vmem:[%s16226_s1 + $0x64c] ss:$8 sps:$4 sm:$0xff]  }
  0xc3   : > { %1740 = vmatpush1.bf16.msra.mxu0 %v12232_v35  ;;  %v12297_v35 = vld [vmem:[%s16226_s1 + $0x648] ss:$8 sps:$4 sm:$0xff]  }
  0xc4   : > { %1879 = vmatpush1.bf16.msra.mxu1 %v12235_v37  ;;  %10710 = vmatprep.subr.msk.bf16.mxu0 %vm363_vm0, %v10709_v43  ;;  %v12302_v37 = vld [vmem:[%s16226_s1 + $0x5d4] ss:$8 sps:$4 sm:$0xff]   ;;  %v12308_v43 = vld [vmem:[%s16226_s1 + $0x5c4] ss:$8 sps:$4 sm:$0xff]  }
  0xc5   : > { %10741 = vmatprep.subr.msk.bf16.mxu1 %vm363_vm0, %v10740_v44  ;;  %v12311_v44 = vld [vmem:[%s16226_s1 + $0x62c] ss:$8 sps:$4 sm:$0xff]  }
  0xc6   : > { %10649 = vmatmul.mubr.msk.bf16.vlgmr.msra.gmra.mxu0 %vm359_vm1, %v1636_v47  ;;  %v12314_v47 = vld [vmem:[%s16226_s1 + $0x5b4] ss:$8 sps:$4 sm:$0xff]  }
  0xc7   : > { %10680 = vmatmul.mubr.msk.bf16.vlgmr.msra.gmra.mxu1 %vm359_vm1, %v1775_v48  ;;  %2005 = vmatpush1.bf16.msra.mxu0 %v1997_v50  ;;  %v12317_v48 = vld [vmem:[%s16226_s1 + $0x61c] ss:$8 sps:$4 sm:$0xff]   ;;  %v12312_v50 = vld [vmem:[%s16226_s1 + $0x5b0] ss:$8 sps:$4 sm:$0xff]  }
  0xc8   : > { %2143 = vmatpush1.bf16.msra.mxu1 %v2135_v51  ;;  %2006 = vmatprep.subr.bf16.mxu0 %v12244_v49  ;;  %v10819_v49 = vld [vmem:[%s16226_s1 + $0x6e0] sm:$0xff] }
  0xc9   : > { %2144 = vmatprep.subr.bf16.mxu1 %v12247_v11  ;;  %2034 = vmatprep.mubr.bf16.mxu0 %v16231_v0  ;;  %v12315_v51 = vld [vmem:[%s16226_s1 + $0x618] ss:$8 sps:$4 sm:$0xff]  }
  0xca   : > { %2172 = vmatprep.mubr.bf16.mxu1 %v16231_v0  ;;  %v10743_v11 = vld [vmem:[%s13358_s6 + $0x23] sm:$0xff] }
  0xcb   : > { %2007 = vmatpush1.bf16.msra.mxu0 %v12242_v52  ;;  %v10850_v52 = vld [vmem:[%s16226_s1 + $0x748] sm:$0xff] }
  0xcc   : > { %2145 = vmatpush1.bf16.msra.mxu1 %v12245_v53  ;;  %2008 = vmatprep.subr.bf16.mxu0 %v12250_v54  ;;  %v10744_v53 = vld [vmem:[%s13358_s6 + $0x2b] sm:$0xff] }
  0xcd   : > { %2146 = vmatprep.subr.bf16.mxu1 %v12253_v55  ;;  %v10774_v54 = vld [vmem:[%s13358_s6 + $0x24] sm:$0xff]  ;;  %v10775_v55 = vld [vmem:[%s13358_s6 + $0x2c] sm:$0xff] }
  0xcf   : > { %2009 = vmatpush1.bf16.msra.mxu0 %v12248_v56  ;;  %v10833_v56 = vcombine.high %v10819_v49, %v10819_v49 }
  0xd0   : > { %2147 = vmatpush1.bf16.msra.mxu1 %v12251_v57  ;;  %2010 = vmatprep.subr.bf16.mxu0 %v12256_v58  ;;  %v10864_v57 = vcombine.high %v10850_v52, %v10850_v52  ;;  %v10832_v58 = vcombine.low %v10819_v49, %v10819_v49  ;;  %v12368_v49 = vld [vmem:[%s16226_s1 + $0x790] ss:$8 sps:$4 sm:$0xff]  }
  0xd1   : > { %2148 = vmatprep.subr.bf16.mxu1 %v12259_v59  ;;  %v10863_v59 = vcombine.low %v10850_v52, %v10850_v52  ;;  %v12374_v52 = vld [vmem:[%s16226_s1 + $0x780] ss:$8 sps:$4 sm:$0xff]  }
  0xd3   : > { %2011 = vmatpush1.bf16.msra.mxu0 %v12254_v60  ;;  %v2189_v60 = vpack.c.bf16 %v10744_v53, %v10743_v11  ;;  %v12379_v11 = vld [vmem:[%s16226_s1 + $0x7ec] ss:$8 sps:$4 sm:$0xff]   ;;  %v12377_v53 = vld [vmem:[%s16226_s1 + $0x7e8] ss:$8 sps:$4 sm:$0xff]  }
  0xd4   : > { %2149 = vmatpush1.bf16.msra.mxu1 %v12257_v61  ;;  %2012 = vmatprep.subr.bf16.mxu0 %v12262_v62  ;;  %v2327_v61 = vpack.c.bf16 %v10775_v55, %v10774_v54  ;;  %v12324_v62 = vld [vmem:[%s16226_s1 + $0x6d4] ss:$8 sps:$4 sm:$0xff]  }
  0xd5   : > { %2150 = vmatprep.subr.bf16.mxu1 %v12265_v63  ;;  %v2549_v63 = vsel %vm363_vm0, %v10832_v58, 0  ;;  %v12382_v54 = vld [vmem:[%s16226_s1 + $0x774] ss:$8 sps:$4 sm:$0xff]   ;;  %v12388_v58 = vld [vmem:[%s16226_s1 + $0x764] ss:$8 sps:$4 sm:$0xff]  }
  0xd6   : > { %v12385_v55 = vld [vmem:[%s16226_s1 + $0x7dc] ss:$8 sps:$4 sm:$0xff]  }
  0xd7   : > { %2013 = vmatpush1.bf16.msra.mxu0 %v12260_v1  ;;  %v2687_v1 = vsel %vm363_vm0, %v10863_v59, 0  ;;  %v12391_v59 = vld [vmem:[%s16226_s1 + $0x7cc] ss:$8 sps:$4 sm:$0xff]  }
  0xd8   : > { %2151 = vmatpush1.bf16.msra.mxu1 %v12263_v2  ;;  %2014 = vmatprep.subr.bf16.mxu0 %v12268_v3  ;;  %v12327_v2 = vld [vmem:[%s16226_s1 + $0x73c] ss:$8 sps:$4 sm:$0xff]   ;;  %v12322_v3 = vld [vmem:[%s16226_s1 + $0x6d0] ss:$8 sps:$4 sm:$0xff]  }
  0xd9   : > { %2152 = vmatprep.subr.bf16.mxu1 %v12271_v4  ;;  %v12325_v4 = vld [vmem:[%s16226_s1 + $0x738] ss:$8 sps:$4 sm:$0xff]  }
  0xdb   : > { %2015 = vmatpush1.bf16.msra.mxu0 %v12266_v5  ;;  %v12330_v5 = vld [vmem:[%s16226_s1 + $0x6c4] ss:$8 sps:$4 sm:$0xff]  }
  0xdc   : > { %2153 = vmatpush1.bf16.msra.mxu1 %v12269_v6  ;;  %2016 = vmatprep.subr.bf16.mxu0 %v12274_v7  ;;  %v12333_v6 = vld [vmem:[%s16226_s1 + $0x72c] ss:$8 sps:$4 sm:$0xff]   ;;  %v12328_v7 = vld [vmem:[%s16226_s1 + $0x6c0] ss:$8 sps:$4 sm:$0xff]  }
  0xdd   : > { %2154 = vmatprep.subr.bf16.mxu1 %v12277_v8  ;;  %v12331_v8 = vld [vmem:[%s16226_s1 + $0x728] ss:$8 sps:$4 sm:$0xff]  }
  0xdf   : > { %2017 = vmatpush1.bf16.msra.mxu0 %v12272_v10  ;;  %v12339_v10 = vld [vmem:[%s16226_s1 + $0x71c] ss:$8 sps:$4 sm:$0xff]  }
  0xe0   : > { %2155 = vmatpush1.bf16.msra.mxu1 %v12275_v12  ;;  %10772 = vmatprep.subr.msk.bf16.mxu0 %vm363_vm0, %v10771_v16  ;;  %v12334_v12 = vld [vmem:[%s16226_s1 + $0x6b0] ss:$8 sps:$4 sm:$0xff]   ;;  %v12340_v16 = vld [vmem:[%s16226_s1 + $0x6a0] ss:$8 sps:$4 sm:$0xff]  }
  0xe1   : > { %10803 = vmatprep.subr.msk.bf16.mxu1 %vm363_vm0, %v10802_v17  ;;  %v12343_v17 = vld [vmem:[%s16226_s1 + $0x708] ss:$8 sps:$4 sm:$0xff]  }
  0xe2   : > { %10711 = vmatmul.mubr.msk.bf16.vlgmr.msra.gmra.mxu0 %vm359_vm1, %v1913_v20  ;;  %v12346_v20 = vld [vmem:[%s16226_s1 + $0x690] ss:$8 sps:$4 sm:$0xff]  }
  0xe3   : > { %10742 = vmatmul.mubr.msk.bf16.vlgmr.msra.gmra.mxu1 %vm359_vm1, %v2051_v21  ;;  %2281 = vmatpush1.bf16.msra.mxu0 %v2273_v23  ;;  %v12349_v21 = vld [vmem:[%s16226_s1 + $0x6f8] ss:$8 sps:$4 sm:$0xff]   ;;  %v12357_v23 = vld [vmem:[%s16226_s1 + $0x6ec] ss:$8 sps:$4 sm:$0xff]  }
  0xe4   : > { %2419 = vmatpush1.bf16.msra.mxu1 %v2411_v24  ;;  %2282 = vmatprep.subr.bf16.mxu0 %v12284_v22  ;;  %v12354_v22 = vld [vmem:[%s16226_s1 + $0x684] ss:$8 sps:$4 sm:$0xff]   ;;  %v10881_v24 = vld [vmem:[%s16226_s1 + $0x7b0] sm:$0xff] }
  0xe5   : > { %2420 = vmatprep.subr.bf16.mxu1 %v12287_v25  ;;  %2310 = vmatprep.mubr.bf16.mxu0 %v16231_v0  ;;  %v10912_v25 = vld [vmem:[%s16226_s1 + $0x818] sm:$0xff] }
  0xe6   : > { %2448 = vmatprep.mubr.bf16.mxu1 %v16231_v0 }
  0xe7   : > { %2283 = vmatpush1.bf16.msra.mxu0 %v12282_v26  ;;  %v12352_v26 = vld [vmem:[%s16226_s1 + $0x680] ss:$8 sps:$4 sm:$0xff]  }
  0xe8   : > { %2421 = vmatpush1.bf16.msra.mxu1 %v12285_v27  ;;  %2284 = vmatprep.subr.bf16.mxu0 %v12290_v28  ;;  %v12355_v27 = vld [vmem:[%s16226_s1 + $0x6e8] ss:$8 sps:$4 sm:$0xff]  }
  0xe9   : > { %2422 = vmatprep.subr.bf16.mxu1 %v12293_v29  ;;  %v10805_v28 = vld [vmem:[%s13358_s6 + $0x25] sm:$0xff]  ;;  %v10806_v29 = vld [vmem:[%s13358_s6 + $0x2d] sm:$0xff] }
  0xeb   : > { %2285 = vmatpush1.bf16.msra.mxu0 %v12288_v30  ;;  %v10836_v30 = vld [vmem:[%s13358_s6 + $0x26] sm:$0xff] }
  0xec   : > { %2423 = vmatpush1.bf16.msra.mxu1 %v12291_v31  ;;  %2286 = vmatprep.subr.bf16.mxu0 %v12296_v32  ;;  %v10837_v31 = vld [vmem:[%s13358_s6 + $0x2e] sm:$0xff]  ;;  %v10895_v32 = vcombine.high %v10881_v24, %v10881_v24 }
  0xed   : > { %2424 = vmatprep.subr.bf16.mxu1 %v12299_v33  ;;  %v10926_v33 = vcombine.high %v10912_v25, %v10912_v25 }
  0xef   : > { %2287 = vmatpush1.bf16.msra.mxu0 %v12294_v34  ;;  %v10894_v34 = vcombine.low %v10881_v24, %v10881_v24  ;;  %v12416_v24 = vld [vmem:[%s16226_s1 + $0x854] ss:$8 sps:$4 sm:$0xff]  }
  0xf0   : > { %2425 = vmatpush1.bf16.msra.mxu1 %v12297_v35  ;;  %2288 = vmatprep.subr.bf16.mxu0 %v12302_v37  ;;  %v10925_v35 = vcombine.low %v10912_v25, %v10912_v25  ;;  %v2465_v37 = vpack.c.bf16 %v10806_v29, %v10805_v28  ;;  %v12419_v25 = vld [vmem:[%s16226_s1 + $0x8bc] ss:$8 sps:$4 sm:$0xff]   ;;  %v12425_v29 = vld [vmem:[%s16226_s1 + $0x8ac] ss:$8 sps:$4 sm:$0xff]  }
  0xf1   : > { %2426 = vmatprep.subr.bf16.mxu1 %v12305_v39  ;;  %v2603_v39 = vpack.c.bf16 %v10837_v31, %v10836_v30  ;;  %v12422_v28 = vld [vmem:[%s16226_s1 + $0x844] ss:$8 sps:$4 sm:$0xff]   ;;  %v12420_v30 = vld [vmem:[%s16226_s1 + $0x840] ss:$8 sps:$4 sm:$0xff]  }
  0xf2   : > { %v12423_v31 = vld [vmem:[%s16226_s1 + $0x8a8] ss:$8 sps:$4 sm:$0xff]  }
  0xf3   : > { %2289 = vmatpush1.bf16.msra.mxu0 %v12300_v40  ;;  %v12364_v40 = vld [vmem:[%s16226_s1 + $0x7a4] ss:$8 sps:$4 sm:$0xff]  }
  0xf4   : > { %2427 = vmatpush1.bf16.msra.mxu1 %v12303_v41  ;;  %2290 = vmatprep.subr.bf16.mxu0 %v12308_v43  ;;  %v2825_v41 = vsel %vm363_vm0, %v10894_v34, 0  ;;  %v2963_v43 = vsel %vm363_vm0, %v10925_v35, 0  ;;  %v12426_v34 = vld [vmem:[%s16226_s1 + $0x830] ss:$8 sps:$4 sm:$0xff]  }
  0xf5   : > { %2428 = vmatprep.subr.bf16.mxu1 %v12311_v44  ;;  %v12367_v44 = vld [vmem:[%s16226_s1 + $0x80c] ss:$8 sps:$4 sm:$0xff]   ;;  %v12429_v35 = vld [vmem:[%s16226_s1 + $0x898] ss:$8 sps:$4 sm:$0xff]  }
  0xf7   : > { %2291 = vmatpush1.bf16.msra.mxu0 %v12306_v45  ;;  %v12362_v45 = vld [vmem:[%s16226_s1 + $0x7a0] ss:$8 sps:$4 sm:$0xff]  }
  0xf8   : > { %2429 = vmatpush1.bf16.msra.mxu1 %v12309_v46  ;;  %2292 = vmatprep.subr.bf16.mxu0 %v12314_v47  ;;  %v12365_v46 = vld [vmem:[%s16226_s1 + $0x808] ss:$8 sps:$4 sm:$0xff]   ;;  %v12370_v47 = vld [vmem:[%s16226_s1 + $0x794] ss:$8 sps:$4 sm:$0xff]  }
  0xf9   : > { %2430 = vmatprep.subr.bf16.mxu1 %v12317_v48  ;;  %v12373_v48 = vld [vmem:[%s16226_s1 + $0x7fc] ss:$8 sps:$4 sm:$0xff]  }
  0xfb   : > { %2293 = vmatpush1.bf16.msra.mxu0 %v12312_v50  ;;  %v12371_v50 = vld [vmem:[%s16226_s1 + $0x7f8] ss:$8 sps:$4 sm:$0xff]  }
  0xfc   : > { %2431 = vmatpush1.bf16.msra.mxu1 %v12315_v51  ;;  %10834 = vmatprep.subr.msk.bf16.mxu0 %vm363_vm0, %v10833_v56  ;;  %v12376_v51 = vld [vmem:[%s16226_s1 + $0x784] ss:$8 sps:$4 sm:$0xff]   ;;  %v12380_v56 = vld [vmem:[%s16226_s1 + $0x770] ss:$8 sps:$4 sm:$0xff]  }
  0xfd   : > { %10865 = vmatprep.subr.msk.bf16.mxu1 %vm363_vm0, %v10864_v57  ;;  %v12383_v57 = vld [vmem:[%s16226_s1 + $0x7d8] ss:$8 sps:$4 sm:$0xff]  }
  0xfe   : > { %10773 = vmatmul.mubr.msk.bf16.vlgmr.msra.gmra.mxu0 %vm359_vm1, %v2189_v60  ;;  %v12386_v60 = vld [vmem:[%s16226_s1 + $0x760] ss:$8 sps:$4 sm:$0xff]  }
  0xff   : > { %10804 = vmatmul.mubr.msk.bf16.vlgmr.msra.gmra.mxu1 %vm359_vm1, %v2327_v61  ;;  %2557 = vmatpush1.bf16.msra.mxu0 %v2549_v63  ;;  %v12389_v61 = vld [vmem:[%s16226_s1 + $0x7c8] ss:$8 sps:$4 sm:$0xff]   ;;  %v12397_v63 = vld [vmem:[%s16226_s1 + $0x7bc] ss:$8 sps:$4 sm:$0xff]  }
 0x100   : > { %2695 = vmatpush1.bf16.msra.mxu1 %v2687_v1  ;;  %2558 = vmatprep.subr.bf16.mxu0 %v12324_v62  ;;  %v12394_v62 = vld [vmem:[%s16226_s1 + $0x754] ss:$8 sps:$4 sm:$0xff]   ;;  %v10943_v1 = vld [vmem:[%s16226_s1 + $0x880] sm:$0xff] }
 0x101   : > { %2696 = vmatprep.subr.bf16.mxu1 %v12327_v2  ;;  %2586 = vmatprep.mubr.bf16.mxu0 %v16231_v0  ;;  %v10974_v2 = vld [vmem:[%s16226_s1 + $0x8e8] sm:$0xff] }
 0x102   : > { %2724 = vmatprep.mubr.bf16.mxu1 %v16231_v0 }
 0x103   : > { %2559 = vmatpush1.bf16.msra.mxu0 %v12322_v3  ;;  %v12392_v3 = vld [vmem:[%s16226_s1 + $0x750] ss:$8 sps:$4 sm:$0xff]  }
 0x104   : > { %2697 = vmatpush1.bf16.msra.mxu1 %v12325_v4  ;;  %2560 = vmatprep.subr.bf16.mxu0 %v12330_v5  ;;  %v12395_v4 = vld [vmem:[%s16226_s1 + $0x7b8] ss:$8 sps:$4 sm:$0xff]   ;;  %v10867_v5 = vld [vmem:[%s13358_s6 + $0x27] sm:$0xff] }
 0x105   : > { %2698 = vmatprep.subr.bf16.mxu1 %v12333_v6  ;;  %v10868_v6 = vld [vmem:[%s13358_s6 + $0x2f] sm:$0xff] }
 0x107   : > { %2561 = vmatpush1.bf16.msra.mxu0 %v12328_v7  ;;  %v10899_v7 = vld [vmem:[%s13358_s6 + $0x30] sm:$0xff] }
 0x108   : > { %2699 = vmatpush1.bf16.msra.mxu1 %v12331_v8  ;;  %2562 = vmatprep.subr.bf16.mxu0 %v12336_v9  ;;  %v10957_v8 = vcombine.high %v10943_v1, %v10943_v1  ;;  %v10988_v9 = vcombine.high %v10974_v2, %v10974_v2 }
 0x109   : > { %2700 = vmatprep.subr.bf16.mxu1 %v12339_v10  ;;  %v10956_v10 = vcombine.low %v10943_v1, %v10943_v1  ;;  %v12462_v1 = vld [vmem:[%s16226_s1 + $0x8c] ss:$8 sps:$4 sm:$0xff]  }
 0x10b   : > { %2563 = vmatpush1.bf16.msra.mxu0 %v12334_v12  ;;  %v10987_v12 = vcombine.low %v10974_v2, %v10974_v2  ;;  %v12465_v2 = vld [vmem:[%s16226_s1 + $0x24] ss:$8 sps:$4 sm:$0xff]  }
 0x10c   : > { %2701 = vmatpush1.bf16.msra.mxu1 %v12337_v13  ;;  %2564 = vmatprep.subr.bf16.mxu0 %v12342_v14  ;;  %v2741_v13 = vpack.c.bf16 %v10868_v6, %v10867_v5  ;;  %v2879_v14 = vpack.c.bf16 %v10899_v7, %v13837_v42  ;;  %v12402_v42 = vld [vmem:[%s16226_s1 + $0x870] ss:$8 sps:$4 sm:$0xff]   ;;  %v12468_v5 = vld [vmem:[%s16226_s1 + $0x7c] ss:$8 sps:$4 sm:$0xff]  }
 0x10d   : > { %2702 = vmatprep.subr.bf16.mxu1 %v12345_v36  ;;  %v12404_v36 = vld [vmem:[%s16226_s1 + $0x874] ss:$8 sps:$4 sm:$0xff]   ;;  %v12466_v7 = vld [vmem:[%s16226_s1 + $0x78] ss:$8 sps:$4 sm:$0xff]  }
 0x10e   : > { %v12471_v6 = vld [vmem:[%s16226_s1 + $0x14] ss:$8 sps:$4 sm:$0xff]  }
 0x10f   : > { %2565 = vmatpush1.bf16.msra.mxu0 %v12340_v16  ;;  %v3101_v16 = vsel %vm363_vm0, %v10956_v10, 0  ;;  %v12477_v10 = vld [vmem:[%s16226_s1 + $0x4] ss:$8 sps:$4 sm:$0xff]  }
 0x110   : > { %2703 = vmatpush1.bf16.msra.mxu1 %v12343_v17  ;;  %2566 = vmatprep.subr.bf16.mxu0 %v12348_v18  ;;  %v3239_v17 = vsel %vm363_vm0, %v10987_v12, 0  ;;  %v12407_v18 = vld [vmem:[%s16226_s1 + $0x8dc] ss:$8 sps:$4 sm:$0xff]   ;;  %v11054_v12 = vld [vmem:[%s16226_s1 + $0x130] sm:$0xff] }
 0x111   : > { %2704 = vmatprep.subr.bf16.mxu1 %v12351_v19  ;;  %v12405_v19 = vld [vmem:[%s16226_s1 + $0x8d8] ss:$8 sps:$4 sm:$0xff]  }
 0x113   : > { %2567 = vmatpush1.bf16.msra.mxu0 %v12346_v20  ;;  %v12410_v20 = vld [vmem:[%s16226_s1 + $0x864] ss:$8 sps:$4 sm:$0xff]  }
 0x114   : > { %2705 = vmatpush1.bf16.msra.mxu1 %v12349_v21  ;;  %2568 = vmatprep.subr.bf16.mxu0 %v12354_v22  ;;  %v12413_v21 = vld [vmem:[%s16226_s1 + $0x8cc] ss:$8 sps:$4 sm:$0xff]   ;;  %v12408_v22 = vld [vmem:[%s16226_s1 + $0x860] ss:$8 sps:$4 sm:$0xff]  }
 0x115   : > { %2706 = vmatprep.subr.bf16.mxu1 %v12357_v23  ;;  %v12411_v23 = vld [vmem:[%s16226_s1 + $0x8c8] ss:$8 sps:$4 sm:$0xff]  }
 0x117   : > { %2569 = vmatpush1.bf16.msra.mxu0 %v12352_v26  ;;  %v12414_v26 = vld [vmem:[%s16226_s1 + $0x850] ss:$8 sps:$4 sm:$0xff]  }
 0x118   : > { %2707 = vmatpush1.bf16.msra.mxu1 %v12355_v27  ;;  %10896 = vmatprep.subr.msk.bf16.mxu0 %vm363_vm0, %v10895_v32  ;;  %v12417_v27 = vld [vmem:[%s16226_s1 + $0x8b8] ss:$8 sps:$4 sm:$0xff]   ;;  %v12428_v32 = vld [vmem:[%s16226_s1 + $0x834] ss:$8 sps:$4 sm:$0xff]  }
 0x119   : > { %10927 = vmatprep.subr.msk.bf16.mxu1 %vm363_vm0, %v10926_v33  ;;  %v12431_v33 = vld [vmem:[%s16226_s1 + $0x89c] ss:$8 sps:$4 sm:$0xff]  }
 0x11a   : > { %10835 = vmatmul.mubr.msk.bf16.vlgmr.msra.gmra.mxu0 %vm359_vm1, %v2465_v37  ;;  %v12434_v37 = vld [vmem:[%s16226_s1 + $0x824] ss:$8 sps:$4 sm:$0xff]  }
 0x11b   : > { %10866 = vmatmul.mubr.msk.bf16.vlgmr.msra.gmra.mxu1 %vm359_vm1, %v2603_v39  ;;  %2833 = vmatpush1.bf16.msra.mxu0 %v2825_v41  ;;  %v12437_v39 = vld [vmem:[%s16226_s1 + $0x88c] ss:$8 sps:$4 sm:$0xff]   ;;  %v3350_v41 = vld [vmem:[%s16226_s1 + $0x60] sm:$0xff] }
 0x11c   : > { %2971 = vmatpush1.bf16.msra.mxu1 %v2963_v43  ;;  %2834 = vmatprep.subr.bf16.mxu0 %v12364_v40  ;;  %v11007_v40 = vld [vmem:[%s16226_s1 + $0xc8] sm:$0xff] }
 0x11d   : > { %2972 = vmatprep.subr.bf16.mxu1 %v12367_v44  ;;  %2862 = vmatprep.mubr.bf16.mxu0 %v16231_v0  ;;  %v12432_v43 = vld [vmem:[%s16226_s1 + $0x820] ss:$8 sps:$4 sm:$0xff]  }
 0x11e   : > { %3000 = vmatprep.mubr.bf16.mxu1 %v16231_v0  ;;  %v12435_v44 = vld [vmem:[%s16226_s1 + $0x888] ss:$8 sps:$4 sm:$0xff]  }
 0x11f   : > { %2835 = vmatpush1.bf16.msra.mxu0 %v12362_v45  ;;  %v10930_v45 = vld [vmem:[%s13358_s6 + $0x31] sm:$0xff] }
 0x120   : > { %2973 = vmatpush1.bf16.msra.mxu1 %v12365_v46  ;;  %2836 = vmatprep.subr.bf16.mxu0 %v12370_v47  ;;  %v10961_v46 = vld [vmem:[%s13358_s6 + $0x32] sm:$0xff]  ;;  %v11021_v47 = vcombine.high %v11007_v40, %v11007_v40 }
 0x121   : > { %2974 = vmatprep.subr.bf16.mxu1 %v12373_v48  ;;  %v11037_v48 = vcombine.high %v3350_v41, %v3350_v41 }
 0x123   : > { %2837 = vmatpush1.bf16.msra.mxu0 %v12368_v49  ;;  %v11020_v49 = vcombine.low %v11007_v40, %v11007_v40  ;;  %v12497_v40 = vld [vmem:[%s16226_s1 + $0x168] ss:$8 sps:$4 sm:$0xff]  }
 0x124   : > { %2975 = vmatpush1.bf16.msra.mxu1 %v12371_v50  ;;  %2838 = vmatprep.subr.bf16.mxu0 %v12376_v51  ;;  %v11036_v50 = vcombine.low %v3350_v41, %v3350_v41  ;;  %v3017_v51 = vpack.c.bf16 %v10930_v45, %v13929_v38  ;;  %v12447_v38 = vld [vmem:[%s16226_s1 + $0x54] ss:$8 sps:$4 sm:$0xff]   ;;  %v12503_v45 = vld [vmem:[%s16226_s1 + $0x158] ss:$8 sps:$4 sm:$0xff]  }
 0x125   : > { %2976 = vmatprep.subr.bf16.mxu1 %v12379_v11  ;;  %v3155_v11 = vpack.c.bf16 %v10961_v46, %v13933_v15  ;;  %v12442_v15 = vld [vmem:[%s16226_s1 + $0xb8] ss:$8 sps:$4 sm:$0xff]   ;;  %v12502_v41 = vld [vmem:[%s16226_s1 + $0xf4] ss:$8 sps:$4 sm:$0xff]   ;;  %v12508_v46 = vld [vmem:[%s16226_s1 + $0xe4] ss:$8 sps:$4 sm:$0xff]  }
 0x127   : > { %2839 = vmatpush1.bf16.msra.mxu0 %v12374_v52  ;;  %v12444_v52 = vld [vmem:[%s16226_s1 + $0xbc] ss:$8 sps:$4 sm:$0xff]  }
 0x128   : > { %2977 = vmatpush1.bf16.msra.mxu1 %v12377_v53  ;;  %2840 = vmatprep.subr.bf16.mxu0 %v12382_v54  ;;  %v3436_v53 = vsel %vm363_vm0, %v11020_v49, 0  ;;  %v3553_v54 = vsel %vm363_vm0, %v11036_v50, 0  ;;  %v12509_v49 = vld [vmem:[%s16226_s1 + $0x148] ss:$8 sps:$4 sm:$0xff]   ;;  %v12514_v50 = vld [vmem:[%s16226_s1 + $0xd4] ss:$8 sps:$4 sm:$0xff]  }
 0x129   : > { %2978 = vmatprep.subr.bf16.mxu1 %v12385_v55  ;;  %v12445_v55 = vld [vmem:[%s16226_s1 + $0x50] ss:$8 sps:$4 sm:$0xff]  }
 0x12b   : > { %2841 = vmatpush1.bf16.msra.mxu0 %v12380_v56  ;;  %v12450_v56 = vld [vmem:[%s16226_s1 + $0xac] ss:$8 sps:$4 sm:$0xff]  }
 0x12c   : > { %2979 = vmatpush1.bf16.msra.mxu1 %v12383_v57  ;;  %2842 = vmatprep.subr.bf16.mxu0 %v12388_v58  ;;  %v12453_v57 = vld [vmem:[%s16226_s1 + $0x44] ss:$8 sps:$4 sm:$0xff]   ;;  %v12448_v58 = vld [vmem:[%s16226_s1 + $0xa8] ss:$8 sps:$4 sm:$0xff]  }
 0x12d   : > { %2980 = vmatprep.subr.bf16.mxu1 %v12391_v59  ;;  %v12451_v59 = vld [vmem:[%s16226_s1 + $0x40] ss:$8 sps:$4 sm:$0xff]  }
 0x12f   : > { %2843 = vmatpush1.bf16.msra.mxu0 %v12386_v60  ;;  %v12456_v60 = vld [vmem:[%s16226_s1 + $0x9c] ss:$8 sps:$4 sm:$0xff]  }
 0x130   : > { %2981 = vmatpush1.bf16.msra.mxu1 %v12389_v61  ;;  %2844 = vmatprep.subr.bf16.mxu0 %v12394_v62  ;;  %v12459_v61 = vld [vmem:[%s16226_s1 + $0x34] ss:$8 sps:$4 sm:$0xff]   ;;  %v12454_v62 = vld [vmem:[%s16226_s1 + $0x98] ss:$8 sps:$4 sm:$0xff]  }
 0x131   : > { %2982 = vmatprep.subr.bf16.mxu1 %v12397_v63  ;;  %v12457_v63 = vld [vmem:[%s16226_s1 + $0x30] ss:$8 sps:$4 sm:$0xff]  }
 0x133   : > { %2845 = vmatpush1.bf16.msra.mxu0 %v12392_v3  ;;  %v12460_v3 = vld [vmem:[%s16226_s1 + $0x88] ss:$8 sps:$4 sm:$0xff]  }
 0x134   : > { %2983 = vmatpush1.bf16.msra.mxu1 %v12395_v4  ;;  %10958 = vmatprep.subr.msk.bf16.mxu0 %vm363_vm0, %v10957_v8  ;;  %v12463_v4 = vld [vmem:[%s16226_s1 + $0x20] ss:$8 sps:$4 sm:$0xff]   ;;  %v12469_v8 = vld [vmem:[%s16226_s1 + $0x10] ss:$8 sps:$4 sm:$0xff]  }
 0x135   : > { %10989 = vmatprep.subr.msk.bf16.mxu1 %vm363_vm0, %v10988_v9  ;;  %v12474_v9 = vld [vmem:[%s16226_s1 + $0x6c] ss:$8 sps:$4 sm:$0xff]  }
 0x136   : > { %10897 = vmatmul.mubr.msk.bf16.vlgmr.msra.gmra.mxu0 %vm359_vm1, %v2741_v13  ;;  %v11085_v13 = vld [vmem:[%s16226_s1 + $0x198] sm:$0xff] }
 0x137   : > { %10928 = vmatmul.mubr.msk.bf16.vlgmr.msra.gmra.mxu1 %vm359_vm1, %v2879_v14  ;;  %3109 = vmatpush1.bf16.msra.mxu0 %v3101_v16  ;;  %v12472_v14 = vld [vmem:[%s16226_s1 + $0x68] ss:$8 sps:$4 sm:$0xff]  }
 0x138   : > { %3247 = vmatpush1.bf16.msra.mxu1 %v3239_v17  ;;  %3110 = vmatprep.subr.bf16.mxu0 %v12404_v36  ;;  %v12475_v36 = vld [vmem:[%s16226_s1] ss:$8 sps:$4 sm:$0xff]  }
 0x139   : > { %3248 = vmatprep.subr.bf16.mxu1 %v12407_v18  ;;  %3138 = vmatprep.mubr.bf16.mxu0 %v16231_v0  ;;  %v10993_v16 = vld [vmem:[%s13358_s6 + $0x21] sm:$0xff]  ;;  %v10994_v17 = vld [vmem:[%s13358_s6 + $0x29] sm:$0xff] }
 0x13a   : > { %3276 = vmatprep.mubr.bf16.mxu1 %v16231_v0  ;;  %v10991_v18 = vld [vmem:[%s13358_s6 + $0x20] sm:$0xff] }
 0x13b   : > { %3111 = vmatpush1.bf16.msra.mxu0 %v12402_v42  ;;  %v10992_v42 = vld [vmem:[%s13358_s6 + $0x28] sm:$0xff] }
 0x13c   : > { %3249 = vmatpush1.bf16.msra.mxu1 %v12405_v19  ;;  %3112 = vmatprep.subr.bf16.mxu0 %v12410_v20  ;;  %v11068_v19 = vcombine.high %v11054_v12, %v11054_v12  ;;  %v11099_v20 = vcombine.high %v11085_v13, %v11085_v13 }
 0x13d   : > { %3250 = vmatprep.subr.bf16.mxu1 %v12413_v21  ;;  %v11067_v21 = vcombine.low %v11054_v12, %v11054_v12  ;;  %v12533_v12 = vld [vmem:[%s16226_s1 + $0x24c] ss:$8 sps:$4 sm:$0xff]  }
 0x13f   : > { %3113 = vmatpush1.bf16.msra.mxu0 %v12408_v22  ;;  %v11098_v22 = vcombine.low %v11085_v13, %v11085_v13 }
 0x140   : > { %3251 = vmatpush1.bf16.msra.mxu1 %v12411_v23  ;;  %3114 = vmatprep.subr.bf16.mxu0 %v12416_v24  ;;  %v3353_v23 = vpack.c.bf16 %v10994_v17, %v10993_v16  ;;  %v3337_v24 = vpack.c.bf16 %v10992_v42, %v10991_v18  ;;  %v12536_v17 = vld [vmem:[%s16226_s1 + $0x1d4] ss:$8 sps:$4 sm:$0xff]  }
 0x141   : > { %3252 = vmatprep.subr.bf16.mxu1 %v12419_v25  ;;  %v12484_v25 = vld [vmem:[%s16226_s1 + $0x124] ss:$8 sps:$4 sm:$0xff]  }
 0x142   : > { %v12539_v18 = vld [vmem:[%s16226_s1 + $0x23c] ss:$8 sps:$4 sm:$0xff]  }
 0x143   : > { %3115 = vmatpush1.bf16.msra.mxu0 %v12414_v26  ;;  %v3686_v26 = vsel %vm363_vm0, %v11067_v21, 0  ;;  %v12534_v21 = vld [vmem:[%s16226_s1 + $0x1d0] ss:$8 sps:$4 sm:$0xff]  }
 0x144   : > { %3253 = vmatpush1.bf16.msra.mxu1 %v12417_v27  ;;  %3116 = vmatprep.subr.bf16.mxu0 %v12422_v28  ;;  %v3823_v27 = vsel %vm363_vm0, %v11098_v22, 0  ;;  %v12487_v28 = vld [vmem:[%s16226_s1 + $0x18c] ss:$8 sps:$4 sm:$0xff]   ;;  %v12537_v22 = vld [vmem:[%s16226_s1 + $0x238] ss:$8 sps:$4 sm:$0xff]  }
 0x145   : > { %3254 = vmatprep.subr.bf16.mxu1 %v12425_v29  ;;  %v12482_v29 = vld [vmem:[%s16226_s1 + $0x120] ss:$8 sps:$4 sm:$0xff]  }
 0x147   : > { %3117 = vmatpush1.bf16.msra.mxu0 %v12420_v30  ;;  %v12485_v30 = vld [vmem:[%s16226_s1 + $0x188] ss:$8 sps:$4 sm:$0xff]  }
 0x148   : > { %3255 = vmatpush1.bf16.msra.mxu1 %v12423_v31  ;;  %3118 = vmatprep.subr.bf16.mxu0 %v12428_v32  ;;  %v12490_v31 = vld [vmem:[%s16226_s1 + $0x114] ss:$8 sps:$4 sm:$0xff]  }
 0x149   : > { %3256 = vmatprep.subr.bf16.mxu1 %v12431_v33  ;;  %v12493_v32 = vld [vmem:[%s16226_s1 + $0x17c] ss:$8 sps:$4 sm:$0xff]   ;;  %v12488_v33 = vld [vmem:[%s16226_s1 + $0x110] ss:$8 sps:$4 sm:$0xff]  }
 0x14b   : > { %3119 = vmatpush1.bf16.msra.mxu0 %v12426_v34  ;;  %v12491_v34 = vld [vmem:[%s16226_s1 + $0x178] ss:$8 sps:$4 sm:$0xff]  }
 0x14c   : > { %3257 = vmatpush1.bf16.msra.mxu1 %v12429_v35  ;;  %3120 = vmatprep.subr.bf16.mxu0 %v12434_v37  ;;  %v12496_v35 = vld [vmem:[%s16226_s1 + $0x104] ss:$8 sps:$4 sm:$0xff]  }
 0x14d   : > { %3258 = vmatprep.subr.bf16.mxu1 %v12437_v39  ;;  %v12499_v37 = vld [vmem:[%s16226_s1 + $0x16c] ss:$8 sps:$4 sm:$0xff]   ;;  %v12494_v39 = vld [vmem:[%s16226_s1 + $0x100] ss:$8 sps:$4 sm:$0xff]  }
 0x14f   : > { %3121 = vmatpush1.bf16.msra.mxu0 %v12432_v43  ;;  %v12505_v43 = vld [vmem:[%s16226_s1 + $0x15c] ss:$8 sps:$4 sm:$0xff]  }
 0x150   : > { %3259 = vmatpush1.bf16.msra.mxu1 %v12435_v44  ;;  %11022 = vmatprep.subr.msk.bf16.mxu0 %vm363_vm0, %v11021_v47  ;;  %v12500_v44 = vld [vmem:[%s16226_s1 + $0xf0] ss:$8 sps:$4 sm:$0xff]   ;;  %v12511_v47 = vld [vmem:[%s16226_s1 + $0x14c] ss:$8 sps:$4 sm:$0xff]  }
 0x151   : > { %11038 = vmatprep.subr.msk.bf16.mxu1 %vm363_vm0, %v11037_v48  ;;  %v12506_v48 = vld [vmem:[%s16226_s1 + $0xe0] ss:$8 sps:$4 sm:$0xff]  }
 0x152   : > { %10959 = vmatmul.mubr.msk.bf16.vlgmr.msra.gmra.mxu0 %vm359_vm1, %v3017_v51  ;;  %v12517_v51 = vld [vmem:[%s16226_s1 + $0x13c] ss:$8 sps:$4 sm:$0xff]  }
 0x153   : > { %10990 = vmatmul.mubr.msk.bf16.vlgmr.msra.gmra.mxu1 %vm359_vm1, %v3155_v11  ;;  %3444 = vmatpush1.bf16.msra.mxu0 %v3436_v53  ;;  %v11116_v11 = vld [vmem:[%s16226_s1 + $0x200] sm:$0xff]  ;;  %v12512_v53 = vld [vmem:[%s16226_s1 + $0xd0] ss:$8 sps:$4 sm:$0xff]  }
 0x154   : > { %3561 = vmatpush1.bf16.msra.mxu1 %v3553_v54  ;;  %3445 = vmatprep.subr.bf16.mxu0 %v12444_v52  ;;  %v11147_v52 = vld [vmem:[%s16226_s1 + $0x268] sm:$0xff]  ;;  %v12515_v54 = vld [vmem:[%s16226_s1 + $0x138] ss:$8 sps:$4 sm:$0xff]  }
 0x155   : > { %3562 = vmatprep.subr.bf16.mxu1 %v12447_v38  ;;  %3473 = vmatprep.mubr.bf16.mxu0 %v16231_v0  ;;  %v11040_v38 = vld [vmem:[%s13358_s6 + $0x22] sm:$0xff] }
 0x156   : > { %3590 = vmatprep.mubr.bf16.mxu1 %v16231_v0 }
 0x157   : > { %3446 = vmatpush1.bf16.msra.mxu0 %v12442_v15  ;;  %v11041_v15 = vld [vmem:[%s13358_s6 + $0x2a] sm:$0xff] }
 0x158   : > { %3563 = vmatpush1.bf16.msra.mxu1 %v12445_v55  ;;  %3447 = vmatprep.subr.bf16.mxu0 %v12450_v56  ;;  %v11071_v55 = vld [vmem:[%s13358_s6 + $0x23] sm:$0xff]  ;;  %v11072_v56 = vld [vmem:[%s13358_s6 + $0x2b] sm:$0xff] }
 0x159   : > { %3564 = vmatprep.subr.bf16.mxu1 %v12453_v57  ;;  %v11129_v57 = vcombine.low %v11116_v11, %v11116_v11 }
 0x15b   : > { %3448 = vmatpush1.bf16.msra.mxu0 %v12448_v58  ;;  %v11160_v58 = vcombine.low %v11147_v52, %v11147_v52 }
 0x15c   : > { %3565 = vmatpush1.bf16.msra.mxu1 %v12451_v59  ;;  %3449 = vmatprep.subr.bf16.mxu0 %v12456_v60  ;;  %v11130_v59 = vcombine.high %v11116_v11, %v11116_v11  ;;  %v11161_v60 = vcombine.high %v11147_v52, %v11147_v52 }
 0x15d   : > { %3566 = vmatprep.subr.bf16.mxu1 %v12459_v61  ;;  %v14477_v61 = vpop.f32.mrf.mxu0 }
 0x15f   : > { %3450 = vmatpush1.bf16.msra.mxu0 %v12454_v62  ;;  %v14479_v62 = vpop.f32.mrf.mxu1 }
 0x160   : > { %3567 = vmatpush1.bf16.msra.mxu1 %v12457_v63  ;;  %3451 = vmatprep.subr.bf16.mxu0 %v12462_v1  ;;  %v3603_v63 = vpack.c.bf16 %v11041_v15, %v11040_v38  ;;  %v3740_v1 = vpack.c.bf16 %v11072_v56, %v11071_v55 }
 0x161   : > { %3568 = vmatprep.subr.bf16.mxu1 %v12465_v2  ;;  %v3960_v2 = vsel %vm363_vm0, %v11129_v57, 0 }
 0x163   : > { %3452 = vmatpush1.bf16.msra.mxu0 %v12460_v3  ;;  %v4097_v3 = vsel %vm363_vm0, %v11160_v58, 0 }
 0x164   : > { %3569 = vmatpush1.bf16.msra.mxu1 %v12463_v4  ;;  %3453 = vmatprep.subr.bf16.mxu0 %v12468_v5  ;;  %v12524_v4 = vld [vmem:[%s16226_s1 + $0x1f4] ss:$8 sps:$4 sm:$0xff]  }
 0x165   : > { %3570 = vmatprep.subr.bf16.mxu1 %v12471_v6  ;;  %v12527_v5 = vld [vmem:[%s16226_s1 + $0x25c] ss:$8 sps:$4 sm:$0xff]   ;;  %v14491_v6 = vpop.f32.mrf.mxu0 }
 0x167   : > { %3454 = vmatpush1.bf16.msra.mxu0 %v12466_v7  ;;  %v14493_v7 = vpop.f32.mrf.mxu1  ;;  %v14509_v13 = vpop.f32.mrf.mxu0 }
 0x168   : > { %3571 = vmatpush1.bf16.msra.mxu1 %v12469_v8  ;;  %3455 = vmatprep.subr.bf16.mxu0 %v12474_v9  ;;  %v12522_v8 = vld [vmem:[%s16226_s1 + $0x1f0] ss:$8 sps:$4 sm:$0xff]  }
 0x169   : > { %3572 = vmatprep.subr.bf16.mxu1 %v12477_v10  ;;  %v12525_v9 = vld [vmem:[%s16226_s1 + $0x258] ss:$8 sps:$4 sm:$0xff]   ;;  %v12530_v10 = vld [vmem:[%s16226_s1 + $0x1e4] ss:$8 sps:$4 sm:$0xff]   ;;  %v14519_v16 = vpop.f32.mrf.mxu1  ;;  %v14527_v42 = vpop.f32.mrf.mxu0 }
 0x16b   : > { %3456 = vmatpush1.bf16.msra.mxu0 %v12472_v14  ;;  %v12528_v14 = vld [vmem:[%s16226_s1 + $0x1e0] ss:$8 sps:$4 sm:$0xff]  }
 0x16c   : > { %3573 = vmatpush1.bf16.msra.mxu1 %v12475_v36  ;;  %11069 = vmatprep.subr.msk.bf16.mxu0 %vm363_vm0, %v11068_v19  ;;  %v12531_v36 = vld [vmem:[%s16226_s1 + $0x248] ss:$8 sps:$4 sm:$0xff]   ;;  %v14529_v19 = vpop.f32.mrf.mxu1 }
 0x16d   : > { %11100 = vmatprep.subr.msk.bf16.mxu1 %vm363_vm0, %v11099_v20  ;;  %v14531_v20 = vpop.f32.mrf.mxu0 }
 0x16e   : > { %11023 = vmatmul.mubr.msk.bf16.vlgmr.msra.gmra.mxu0 %vm359_vm1, %v3353_v23  ;;  %v14539_v23 = vpop.f32.mrf.mxu1 }
 0x16f   : > { %11039 = vmatmul.mubr.msk.bf16.vlgmr.msra.gmra.mxu1 %vm359_vm1, %v3337_v24  ;;  %3694 = vmatpush1.bf16.msra.mxu0 %v3686_v26  ;;  %v12542_v24 = vld [vmem:[%s16226_s1 + $0x1c4] ss:$8 sps:$4 sm:$0xff]   ;;  %v13216_v26 = vmov 0.0  }
 0x170   : > { %3831 = vmatpush1.bf16.msra.mxu1 %v3823_v27  ;;  %3695 = vmatprep.subr.bf16.mxu0 %v12484_v25  ;;  %v12545_v25 = vld [vmem:[%s16226_s1 + $0x22c] ss:$8 sps:$4 sm:$0xff]   ;;  %243 = vst [vmem:[#allocation2] sm:$0xff] %v13216_v26  ;;  %248 = vst [vmem:[#allocation2 + $0x20] sm:$0xff] %v13216_v26  ;;  %v12540_v27 = vld [vmem:[%s16226_s1 + $0x1c0] ss:$8 sps:$4 sm:$0xff]  }
 0x171   : > { %3832 = vmatprep.subr.bf16.mxu1 %v12487_v28  ;;  %3723 = vmatprep.mubr.bf16.mxu0 %v16231_v0  ;;  %250 = vst [vmem:[#allocation2 + $0x30] sm:$0x3] %v13216_v26  ;;  %253 = vst [vmem:[#allocation2 + $0x40] sm:$0xff] %v13216_v26  ;;  %v12543_v28 = vld [vmem:[%s16226_s1 + $0x228] ss:$8 sps:$4 sm:$0xff]  }
 0x172   : > { %3860 = vmatprep.mubr.bf16.mxu1 %v16231_v0  ;;  %257 = vst [vmem:[#allocation2 + $0x60] sm:$0xff] %v13216_v26  ;;  %259 = vst [vmem:[#allocation2 + $0x70] sm:$0x3] %v13216_v26 }
 0x173   : > { %3696 = vmatpush1.bf16.msra.mxu0 %v12482_v29  ;;  %v14559_v29 = vpop.f32.mrf.mxu0  ;;  %245 = vst.msk [vmem:[#allocation2 + $0x8] sm:$0xff] %vm244_vm2, %v13216_v26  ;;  %247 = vst.msk [vmem:[#allocation2 + $0x18] sm:$0xff] %vm244_vm2, %v13216_v26 }
 0x174   : > { %3833 = vmatpush1.bf16.msra.mxu1 %v12485_v30  ;;  %3697 = vmatprep.subr.bf16.mxu0 %v12490_v31  ;;  %v14561_v30 = vpop.f32.mrf.mxu1  ;;  %v12548_v31 = vld [vmem:[%s16226_s1 + $0x1b4] ss:$8 sps:$4 sm:$0xff]   ;;  %249 = vst.msk [vmem:[#allocation2 + $0x28] sm:$0xff] %vm244_vm2, %v13216_v26  ;;  %254 = vst.msk [vmem:[#allocation2 + $0x48] sm:$0xff] %vm244_vm2, %v13216_v26 }
 0x175   : > { %3834 = vmatprep.subr.bf16.mxu1 %v12493_v32  ;;  %v12551_v32 = vld [vmem:[%s16226_s1 + $0x21c] ss:$8 sps:$4 sm:$0xff]   ;;  %256 = vst.msk [vmem:[#allocation2 + $0x58] sm:$0xff] %vm244_vm2, %v13216_v26  ;;  %258 = vst.msk [vmem:[#allocation2 + $0x68] sm:$0xff] %vm244_vm2, %v13216_v26 }
 0x176   : > { %252 = vst.msk [vmem:[#allocation2 + $0x38] sm:$0x3] %vm251_vm3, %v13216_v26  ;;  %260 = vst.msk [vmem:[#allocation2 + $0x78] sm:$0x3] %vm251_vm3, %v13216_v26  ;;  %v12628_v26 = vld [vmem:[%s16226_s1 + $0x354] ss:$8 sps:$4 sm:$0xff]  }
 0x177   : > { %3698 = vmatpush1.bf16.msra.mxu0 %v12488_v33  ;;  %v12546_v33 = vld [vmem:[%s16226_s1 + $0x1b0] ss:$8 sps:$4 sm:$0xff]  }
 0x178   : > { %3835 = vmatpush1.bf16.msra.mxu1 %v12491_v34  ;;  %3699 = vmatprep.subr.bf16.mxu0 %v12496_v35  ;;  %v12549_v34 = vld [vmem:[%s16226_s1 + $0x218] ss:$8 sps:$4 sm:$0xff]   ;;  %v12554_v35 = vld [vmem:[%s16226_s1 + $0x1a4] ss:$8 sps:$4 sm:$0xff]  }
 0x179   : > { %3836 = vmatprep.subr.bf16.mxu1 %v12499_v37  ;;  %v14578_v37 = vpop.f32.mrf.mxu0 }
 0x17b   : > { %3700 = vmatpush1.bf16.msra.mxu0 %v12494_v39  ;;  %v14580_v39 = vpop.f32.mrf.mxu1 }
 0x17c   : > { %3837 = vmatpush1.bf16.msra.mxu1 %v12497_v40  ;;  %3701 = vmatprep.subr.bf16.mxu0 %v12502_v41  ;;  %v12557_v40 = vld [vmem:[%s16226_s1 + $0x20c] ss:$8 sps:$4 sm:$0xff]  }
 0x17d   : > { %3838 = vmatprep.subr.bf16.mxu1 %v12505_v43  ;;  %v11178_v41 = vld [vmem:[%s16226_s1 + $0x2d0] sm:$0xff]  ;;  %v12552_v43 = vld [vmem:[%s16226_s1 + $0x1a0] ss:$8 sps:$4 sm:$0xff]   ;;  %v14615_v11 = vpop.f32.mrf.mxu1 }
 0x17f   : > { %3702 = vmatpush1.bf16.msra.mxu0 %v12500_v44  ;;  %v12555_v44 = vld [vmem:[%s16226_s1 + $0x208] ss:$8 sps:$4 sm:$0xff]   ;;  %v14619_v15 = vpop.f32.mrf.mxu1 }
 0x180   : > { %3839 = vmatpush1.bf16.msra.mxu1 %v12503_v45  ;;  %3703 = vmatprep.subr.bf16.mxu0 %v12508_v46  ;;  %v11102_v45 = vld [vmem:[%s13358_s6 + $0x24] sm:$0xff]  ;;  %v11103_v46 = vld [vmem:[%s13358_s6 + $0x2c] sm:$0xff] }
 0x181   : > { %3840 = vmatprep.subr.bf16.mxu1 %v12511_v47  ;;  %v11133_v47 = vld [vmem:[%s13358_s6 + $0x25] sm:$0xff]  ;;  %v3877_v55 = vpack.c.bf16 %v11103_v46, %v11102_v45  ;;  %v12594_v45 = vld [vmem:[%s16226_s1 + $0x274] ss:$8 sps:$4 sm:$0xff]  }
 0x182   : > { %v12597_v46 = vld [vmem:[%s16226_s1 + $0x2dc] ss:$8 sps:$4 sm:$0xff]  }
 0x183   : > { %3704 = vmatpush1.bf16.msra.mxu0 %v12506_v48  ;;  %v11209_v48 = vld [vmem:[%s16226_s1 + $0x338] sm:$0xff] }
 0x184   : > { %3841 = vmatpush1.bf16.msra.mxu1 %v12509_v49  ;;  %3705 = vmatprep.subr.bf16.mxu0 %v12514_v50  ;;  %v14612_v49 = vpop.f32.mrf.mxu0  ;;  %v11134_v50 = vld [vmem:[%s13358_s6 + $0x2d] sm:$0xff]  ;;  %v11223_v52 = vcombine.high %v11209_v48, %v11209_v48 }
 0x185   : > { %3842 = vmatprep.subr.bf16.mxu1 %v12517_v51  ;;  %v11192_v51 = vcombine.high %v11178_v41, %v11178_v41  ;;  %v4014_v56 = vpack.c.bf16 %v11134_v50, %v11133_v47  ;;  %v11271_v50 = vld [vmem:[%s16226_s1 + $0x408] sm:$0xff] }
 0x186   : > { %v14617_v38 = vpop.f32.mrf.mxu0 }
 0x187   : > { %3706 = vmatpush1.bf16.msra.mxu0 %v12512_v53  ;;  %v11191_v53 = vcombine.low %v11178_v41, %v11178_v41  ;;  %v12586_v41 = vld [vmem:[%s16226_s1 + $0x280] ss:$8 sps:$4 sm:$0xff]  }
 0x188   : > { %3843 = vmatpush1.bf16.msra.mxu1 %v12515_v54  ;;  %11131 = vmatprep.subr.msk.bf16.mxu0 %vm363_vm0, %v11130_v59  ;;  %v11222_v54 = vcombine.low %v11209_v48, %v11209_v48  ;;  %v12564_v59 = vld [vmem:[%s16226_s1 + $0x2c4] ss:$8 sps:$4 sm:$0xff]  }
 0x189   : > { %11162 = vmatprep.subr.msk.bf16.mxu1 %vm363_vm0, %v11161_v60  ;;  %v4234_v57 = vsel %vm363_vm0, %v11191_v53, 0  ;;  %v12567_v60 = vld [vmem:[%s16226_s1 + $0x32c] ss:$8 sps:$4 sm:$0xff]   ;;  %v11240_v48 = vld [vmem:[%s16226_s1 + $0x3a0] sm:$0xff] }
 0x18a   : > { %11070 = vmatmul.mubr.msk.bf16.vlgmr.msra.gmra.mxu0 %vm359_vm1, %v3603_v63  ;;  %v4371_v58 = vsel %vm363_vm0, %v11222_v54, 0  ;;  %v14631_v63 = vpop.f32.mrf.mxu0  ;;  %v11164_v53 = vld [vmem:[%s13358_s6 + $0x26] sm:$0xff]  ;;  %v11165_v54 = vld [vmem:[%s13358_s6 + $0x2e] sm:$0xff] }
 0x18b   : > { %11101 = vmatmul.mubr.msk.bf16.vlgmr.msra.gmra.mxu1 %vm359_vm1, %v3740_v1  ;;  %3968 = vmatpush1.bf16.msra.mxu0 %v3960_v2  ;;  %v14633_v1 = vpop.f32.mrf.mxu1  ;;  %v12562_v2 = vld [vmem:[%s16226_s1 + $0x2c0] ss:$8 sps:$4 sm:$0xff]  }
 0x18c   : > { %4105 = vmatpush1.bf16.msra.mxu1 %v4097_v3  ;;  %3969 = vmatprep.subr.bf16.mxu0 %v12524_v4  ;;  %v12565_v3 = vld [vmem:[%s16226_s1 + $0x328] ss:$8 sps:$4 sm:$0xff]   ;;  %v12570_v4 = vld [vmem:[%s16226_s1 + $0x2b4] ss:$8 sps:$4 sm:$0xff]  }
 0x18d   : > { %4106 = vmatprep.subr.bf16.mxu1 %v12527_v5  ;;  %3997 = vmatprep.mubr.bf16.mxu0 %v16231_v0  ;;  %v12573_v5 = vld [vmem:[%s16226_s1 + $0x31c] ss:$8 sps:$4 sm:$0xff]  }
 0x18e   : > { %4134 = vmatprep.mubr.bf16.mxu1 %v16231_v0 }
 0x18f   : > { %3970 = vmatpush1.bf16.msra.mxu0 %v12522_v8  ;;  %v14649_v8 = vpop.f32.mrf.mxu0 }
 0x190   : > { %4107 = vmatpush1.bf16.msra.mxu1 %v12525_v9  ;;  %3971 = vmatprep.subr.bf16.mxu0 %v12530_v10  ;;  %v12568_v9 = vld [vmem:[%s16226_s1 + $0x2b0] ss:$8 sps:$4 sm:$0xff]  }
 0x191   : > { %4108 = vmatprep.subr.bf16.mxu1 %v12533_v12  ;;  %v12571_v10 = vld [vmem:[%s16226_s1 + $0x318] ss:$8 sps:$4 sm:$0xff]   ;;  %v14659_v12 = vpop.f32.mrf.mxu1 }
 0x193   : > { %3972 = vmatpush1.bf16.msra.mxu0 %v12528_v14  ;;  %v12576_v14 = vld [vmem:[%s16226_s1 + $0x2a4] ss:$8 sps:$4 sm:$0xff]  }
 0x194   : > { %4109 = vmatpush1.bf16.msra.mxu1 %v12531_v36  ;;  %3973 = vmatprep.subr.bf16.mxu0 %v12536_v17  ;;  %v12579_v36 = vld [vmem:[%s16226_s1 + $0x30c] ss:$8 sps:$4 sm:$0xff]   ;;  %v14667_v17 = vpop.f32.mrf.mxu0 }
 0x195   : > { %4110 = vmatprep.subr.bf16.mxu1 %v12539_v18  ;;  %v14669_v18 = vpop.f32.mrf.mxu1 }
 0x197   : > { %3974 = vmatpush1.bf16.msra.mxu0 %v12534_v21  ;;  %v14671_v21 = vpop.f32.mrf.mxu0 }
 0x198   : > { %4111 = vmatpush1.bf16.msra.mxu1 %v12537_v22  ;;  %3975 = vmatprep.subr.bf16.mxu0 %v12542_v24  ;;  %v12574_v22 = vld [vmem:[%s16226_s1 + $0x2a0] ss:$8 sps:$4 sm:$0xff]  }
 0x199   : > { %4112 = vmatprep.subr.bf16.mxu1 %v12545_v25  ;;  %v12577_v24 = vld [vmem:[%s16226_s1 + $0x308] ss:$8 sps:$4 sm:$0xff]   ;;  %v14679_v25 = vpop.f32.mrf.mxu1 }
 0x19b   : > { %3976 = vmatpush1.bf16.msra.mxu0 %v12540_v27  ;;  %v12582_v27 = vld [vmem:[%s16226_s1 + $0x294] ss:$8 sps:$4 sm:$0xff]  }
 0x19c   : > { %4113 = vmatpush1.bf16.msra.mxu1 %v12543_v28  ;;  %3977 = vmatprep.subr.bf16.mxu0 %v12548_v31  ;;  %v12585_v28 = vld [vmem:[%s16226_s1 + $0x2fc] ss:$8 sps:$4 sm:$0xff]   ;;  %v12580_v31 = vld [vmem:[%s16226_s1 + $0x290] ss:$8 sps:$4 sm:$0xff]  }
 0x19d   : > { %4114 = vmatprep.subr.bf16.mxu1 %v12551_v32  ;;  %v14690_v32 = vpop.f32.mrf.mxu0 }
 0x19f   : > { %3978 = vmatpush1.bf16.msra.mxu0 %v12546_v33  ;;  %v12583_v33 = vld [vmem:[%s16226_s1 + $0x2f8] ss:$8 sps:$4 sm:$0xff]  }
 0x1a0   : > { %4115 = vmatpush1.bf16.msra.mxu1 %v12549_v34  ;;  %3979 = vmatprep.subr.bf16.mxu0 %v12554_v35  ;;  %v14695_v34 = vpop.f32.mrf.mxu1  ;;  %v12588_v35 = vld [vmem:[%s16226_s1 + $0x284] ss:$8 sps:$4 sm:$0xff]  }
 0x1a1   : > { %4116 = vmatprep.subr.bf16.mxu1 %v12557_v40  ;;  %v12591_v40 = vld [vmem:[%s16226_s1 + $0x2ec] ss:$8 sps:$4 sm:$0xff]  }
 0x1a2   : > { %v14717_v47 = vpop.f32.mrf.mxu1 }
 0x1a3   : > { %3980 = vmatpush1.bf16.msra.mxu0 %v12552_v43  ;;  %v12589_v43 = vld [vmem:[%s16226_s1 + $0x2e8] ss:$8 sps:$4 sm:$0xff]  }
 0x1a4   : > { %4117 = vmatpush1.bf16.msra.mxu1 %v12555_v44  ;;  %11193 = vmatprep.subr.msk.bf16.mxu0 %vm363_vm0, %v11192_v51  ;;  %v14709_v44 = vpop.f32.mrf.mxu0  ;;  %v12592_v51 = vld [vmem:[%s16226_s1 + $0x270] ss:$8 sps:$4 sm:$0xff]  }
 0x1a5   : > { %11224 = vmatprep.subr.msk.bf16.mxu1 %vm363_vm0, %v11223_v52  ;;  %v12595_v52 = vld [vmem:[%s16226_s1 + $0x2d8] ss:$8 sps:$4 sm:$0xff]  }
 0x1a6   : > { %11132 = vmatmul.mubr.msk.bf16.vlgmr.msra.gmra.mxu0 %vm359_vm1, %v3877_v55  ;;  %v14733_v55 = vpop.f32.mrf.mxu0 }
 0x1a7   : > { %11163 = vmatmul.mubr.msk.bf16.vlgmr.msra.gmra.mxu1 %vm359_vm1, %v4014_v56  ;;  %4242 = vmatpush1.bf16.msra.mxu0 %v4234_v57  ;;  %v11195_v56 = vld [vmem:[%s13358_s6 + $0x27] sm:$0xff]  ;;  %v11196_v57 = vld [vmem:[%s13358_s6 + $0x2f] sm:$0xff] }
 0x1a8   : > { %4379 = vmatpush1.bf16.msra.mxu1 %v4371_v58  ;;  %4243 = vmatprep.subr.bf16.mxu0 %v12564_v59  ;;  %v11253_v58 = vcombine.low %v11240_v48, %v11240_v48  ;;  %v11284_v59 = vcombine.low %v11271_v50, %v11271_v50 }
 0x1a9   : > { %4380 = vmatprep.subr.bf16.mxu1 %v12567_v60  ;;  %4271 = vmatprep.mubr.bf16.mxu0 %v16231_v0  ;;  %v14737_v60 = vpop.f32.mrf.mxu1 }
 0x1aa   : > { %4408 = vmatprep.mubr.bf16.mxu1 %v16231_v0 }
 0x1ab   : > { %4244 = vmatpush1.bf16.msra.mxu0 %v12562_v2  ;;  %v11254_v2 = vcombine.high %v11240_v48, %v11240_v48  ;;  %v12616_v48 = vld [vmem:[%s16226_s1 + $0x374] ss:$8 sps:$4 sm:$0xff]  }
 0x1ac   : > { %4381 = vmatpush1.bf16.msra.mxu1 %v12565_v3  ;;  %4245 = vmatprep.subr.bf16.mxu0 %v12570_v4  ;;  %v11285_v3 = vcombine.high %v11271_v50, %v11271_v50  ;;  %v14739_v4 = vpop.f32.mrf.mxu0  ;;  %v12619_v50 = vld [vmem:[%s16226_s1 + $0x3dc] ss:$8 sps:$4 sm:$0xff]  }
 0x1ad   : > { %4382 = vmatprep.subr.bf16.mxu1 %v12573_v5  ;;  %v14741_v5 = vpop.f32.mrf.mxu1 }
 0x1af   : > { %4246 = vmatpush1.bf16.msra.mxu0 %v12568_v9  ;;  %v4151_v9 = vpack.c.bf16 %v11165_v54, %v11164_v53  ;;  %v12614_v54 = vld [vmem:[%s16226_s1 + $0x370] ss:$8 sps:$4 sm:$0xff]  }
 0x1b0   : > { %4383 = vmatpush1.bf16.msra.mxu1 %v12571_v10  ;;  %4247 = vmatprep.subr.bf16.mxu0 %v12576_v14  ;;  %v4288_v10 = vpack.c.bf16 %v11196_v57, %v11195_v56  ;;  %v4508_v14 = vsel %vm363_vm0, %v11253_v58, 0  ;;  %v12617_v56 = vld [vmem:[%s16226_s1 + $0x3d8] ss:$8 sps:$4 sm:$0xff]   ;;  %v12622_v58 = vld [vmem:[%s16226_s1 + $0x364] ss:$8 sps:$4 sm:$0xff]  }
 0x1b1   : > { %4384 = vmatprep.subr.bf16.mxu1 %v12579_v36  ;;  %v4645_v36 = vsel %vm363_vm0, %v11284_v59, 0  ;;  %v12625_v59 = vld [vmem:[%s16226_s1 + $0x3cc] ss:$8 sps:$4 sm:$0xff]  }
 0x1b3   : > { %4248 = vmatpush1.bf16.msra.mxu0 %v12574_v22  ;;  %v12604_v22 = vld [vmem:[%s16226_s1 + $0x394] ss:$8 sps:$4 sm:$0xff]  }
 0x1b4   : > { %4385 = vmatpush1.bf16.msra.mxu1 %v12577_v24  ;;  %4249 = vmatprep.subr.bf16.mxu0 %v12582_v27  ;;  %v12607_v24 = vld [vmem:[%s16226_s1 + $0x3fc] ss:$8 sps:$4 sm:$0xff]   ;;  %v14753_v27 = vpop.f32.mrf.mxu0 }
 0x1b5   : > { %4386 = vmatprep.subr.bf16.mxu1 %v12585_v28  ;;  %v14755_v28 = vpop.f32.mrf.mxu1 }
 0x1b7   : > { %4250 = vmatpush1.bf16.msra.mxu0 %v12580_v31  ;;  %v12602_v31 = vld [vmem:[%s16226_s1 + $0x390] ss:$8 sps:$4 sm:$0xff]  }
 0x1b8   : > { %4387 = vmatpush1.bf16.msra.mxu1 %v12583_v33  ;;  %4251 = vmatprep.subr.bf16.mxu0 %v12588_v35  ;;  %v12605_v33 = vld [vmem:[%s16226_s1 + $0x3f8] ss:$8 sps:$4 sm:$0xff]   ;;  %v12610_v35 = vld [vmem:[%s16226_s1 + $0x384] ss:$8 sps:$4 sm:$0xff]  }
 0x1b9   : > { %4388 = vmatprep.subr.bf16.mxu1 %v12591_v40  ;;  %v12613_v40 = vld [vmem:[%s16226_s1 + $0x3ec] ss:$8 sps:$4 sm:$0xff]  }
 0x1bb   : > { %4252 = vmatpush1.bf16.msra.mxu0 %v12586_v41  ;;  %v14771_v41 = vpop.f32.mrf.mxu0 }
 0x1bc   : > { %4389 = vmatpush1.bf16.msra.mxu1 %v12589_v43  ;;  %4253 = vmatprep.subr.bf16.mxu0 %v12594_v45  ;;  %v12608_v43 = vld [vmem:[%s16226_s1 + $0x380] ss:$8 sps:$4 sm:$0xff]   ;;  %v14778_v45 = vpop.f32.mrf.mxu1 }
 0x1bd   : > { %4390 = vmatprep.subr.bf16.mxu1 %v12597_v46  ;;  %v12611_v46 = vld [vmem:[%s16226_s1 + $0x3e8] ss:$8 sps:$4 sm:$0xff]  }
 0x1bf   : > { %4254 = vmatpush1.bf16.msra.mxu0 %v12592_v51  ;;  %v14789_v51 = vpop.f32.mrf.mxu0 }
 0x1c0   : > { %4391 = vmatpush1.bf16.msra.mxu1 %v12595_v52  ;;  %11255 = vmatprep.subr.msk.bf16.mxu0 %vm363_vm0, %v11254_v2  ;;  %v14791_v52 = vpop.f32.mrf.mxu1  ;;  %v12620_v2 = vld [vmem:[%s16226_s1 + $0x360] ss:$8 sps:$4 sm:$0xff]  }
 0x1c1   : > { %11286 = vmatprep.subr.msk.bf16.mxu1 %vm363_vm0, %v11285_v3  ;;  %v14793_v53 = vpop.f32.mrf.mxu0 }
 0x1c2   : > { %11194 = vmatmul.mubr.msk.bf16.vlgmr.msra.gmra.mxu0 %vm359_vm1, %v4151_v9  ;;  %v14801_v57 = vpop.f32.mrf.mxu1  ;;  %v12623_v9 = vld [vmem:[%s16226_s1 + $0x3c8] ss:$8 sps:$4 sm:$0xff]  }
 0x1c3   : > { %11225 = vmatmul.mubr.msk.bf16.vlgmr.msra.gmra.mxu1 %vm359_vm1, %v4288_v10  ;;  %4516 = vmatpush1.bf16.msra.mxu0 %v4508_v14  ;;  %v14814_v3 = vpop.f32.mrf.mxu0  ;;  %v12631_v14 = vld [vmem:[%s16226_s1 + $0x3bc] ss:$8 sps:$4 sm:$0xff]  }
 0x1c4   : > { %4653 = vmatpush1.bf16.msra.mxu1 %v4645_v36  ;;  %4517 = vmatprep.subr.bf16.mxu0 %v12604_v22  ;;  %v14819_v10 = vpop.f32.mrf.mxu1  ;;  %v12626_v36 = vld [vmem:[%s16226_s1 + $0x350] ss:$8 sps:$4 sm:$0xff]  }
 0x1c5   : > { %4654 = vmatprep.subr.bf16.mxu1 %v12607_v24  ;;  %4545 = vmatprep.mubr.bf16.mxu0 %v16231_v0  ;;  %16238 = vst [vmem:[#allocation6_spill] sm:$0xff] %v14819_v10  ;;  %v12629_v22 = vld [vmem:[%s16226_s1 + $0x3b8] ss:$8 sps:$4 sm:$0xff]   ;;  %v14833_v24 = vpop.f32.mrf.mxu0 }
 0x1c6   : > { %4682 = vmatprep.mubr.bf16.mxu1 %v16231_v0  ;;  %16239 = vst [vmem:[#allocation7_spill] sm:$0xff] %v14833_v24  ;;  %v522_v0 = vadd.f32 %v14479_v62, %v14477_v61  ;;  %v12644_v61 = vld [vmem:[%s16226_s1 + $0x464] ss:$8 sps:$4 sm:$0xff]  }
 0x1c7   : > { %4518 = vmatpush1.bf16.msra.mxu0 %v12602_v31  ;;  %v12634_v31 = vld [vmem:[%s16226_s1 + $0x344] ss:$8 sps:$4 sm:$0xff]  }
 0x1c8   : > { %4655 = vmatpush1.bf16.msra.mxu1 %v12605_v33  ;;  %4519 = vmatprep.subr.bf16.mxu0 %v12610_v35  ;;  %v12637_v33 = vld [vmem:[%s16226_s1 + $0x3ac] ss:$8 sps:$4 sm:$0xff]   ;;  %v14841_v35 = vpop.f32.mrf.mxu1 }
 0x1c9   : > { %4656 = vmatprep.subr.bf16.mxu1 %v12613_v40  ;;  %16240 = vst [vmem:[#allocation8_spill] sm:$0xff] %v14841_v35  ;;  %v11302_v40 = vld [vmem:[%s16226_s1 + $0x470] sm:$0xff] }
 0x1ca   : > { %v12647_v62 = vld [vmem:[%s16226_s1 + $0x4cc] ss:$8 sps:$4 sm:$0xff]  }
 0x1cb   : > { %4520 = vmatpush1.bf16.msra.mxu0 %v12608_v43  ;;  %v11333_v43 = vld [vmem:[%s16226_s1 + $0x4d8] sm:$0xff] }
 0x1cc   : > { %4657 = vmatpush1.bf16.msra.mxu1 %v12611_v46  ;;  %4521 = vmatprep.subr.bf16.mxu0 %v12616_v48  ;;  %v12632_v46 = vld [vmem:[%s16226_s1 + $0x340] ss:$8 sps:$4 sm:$0xff]  }
 0x1cd   : > { %4658 = vmatprep.subr.bf16.mxu1 %v12619_v50  ;;  %v12635_v48 = vld [vmem:[%s16226_s1 + $0x3a8] ss:$8 sps:$4 sm:$0xff]   ;;  %v14855_v50 = vpop.f32.mrf.mxu0 }
 0x1ce   : > { %16241 = vst [vmem:[#allocation9_spill] sm:$0xff] %v14855_v50 }
 0x1cf   : > { %4522 = vmatpush1.bf16.msra.mxu0 %v12614_v54  ;;  %v11227_v54 = vld [vmem:[%s13358_s6 + $0x30] sm:$0xff] }
 0x1d0   : > { %4659 = vmatpush1.bf16.msra.mxu1 %v12617_v56  ;;  %4523 = vmatprep.subr.bf16.mxu0 %v12622_v58  ;;  %v11258_v56 = vld [vmem:[%s13358_s6 + $0x31] sm:$0xff]  ;;  %v11315_v58 = vcombine.low %v11302_v40, %v11302_v40 }
 0x1d1   : > { %4660 = vmatprep.subr.bf16.mxu1 %v12625_v59  ;;  %v11346_v59 = vcombine.low %v11333_v43, %v11333_v43 }
 0x1d2   : > { %v4782_v24 = vsel %vm363_vm0, %v11315_v58, 0  ;;  %v12656_v58 = vld [vmem:[%s16226_s1 + $0x444] ss:$8 sps:$4 sm:$0xff]  }
 0x1d3   : > { %4524 = vmatpush1.bf16.msra.mxu0 %v12620_v2  ;;  %v14859_v2 = vpop.f32.mrf.mxu1 }
 0x1d4   : > { %4661 = vmatpush1.bf16.msra.mxu1 %v12623_v9  ;;  %4525 = vmatprep.subr.bf16.mxu0 %v12628_v26  ;;  %v11316_v9 = vcombine.high %v11302_v40, %v11302_v40  ;;  %v11347_v26 = vcombine.high %v11333_v43, %v11333_v43  ;;  %v524_v40 = vadd.f32 %v14493_v7, %v14491_v6  ;;  %v12645_v6 = vld [vmem:[%s16226_s1 + $0x4c8] ss:$8 sps:$4 sm:$0xff]  }
 0x1d5   : > { %4662 = vmatprep.subr.bf16.mxu1 %v12631_v14  ;;  %v14861_v14 = vpop.f32.mrf.mxu0  ;;  %v14865_v35 = vpop.f32.mrf.mxu1  ;;  %v528_v7 = vadd.f32 %v14529_v19, %v14527_v42  ;;  %v12648_v42 = vld [vmem:[%s16226_s1 + $0x450] ss:$8 sps:$4 sm:$0xff]   ;;  %v16242_v19 = vmov 0  }
 0x1d7   : > { %4526 = vmatpush1.bf16.msra.mxu0 %v12626_v36  ;;  %v13164_v36 = vld [vmem:[%s13358_s6 + $0x28] sm:$0xff]  ;;  %v14882_v43 = vpop.f32.mrf.mxu0 }
 0x1d8   : > { %4663 = vmatpush1.bf16.msra.mxu1 %v12629_v22  ;;  %4527 = vmatprep.subr.bf16.mxu0 %v12634_v31  ;;  %v4425_v10 = vpack.c.bf16 %v11227_v54, %v13164_v36  ;;  %v13165_v22 = vld [vmem:[%s13358_s6 + $0x29] sm:$0xff]  ;;  %v4920_v31 = vsel %vm363_vm0, %v11346_v59, 0 }
 0x1d9   : > { %4664 = vmatprep.subr.bf16.mxu1 %v12637_v33  ;;  %v4562_v50 = vpack.c.bf16 %v11258_v56, %v13165_v22  ;;  %v664_v33 = vadd.f32 %v14531_v20, %v522_v0  ;;  %v526_v0 = vadd.f32 %v14519_v16, %v14509_v13  ;;  %v665_v20 = vadd.f32 %v14559_v29, %v524_v40  ;;  %v12650_v13 = vld [vmem:[%s16226_s1 + $0x454] ss:$8 sps:$4 sm:$0xff]  }
 0x1da   : > { %v12653_v16 = vld [vmem:[%s16226_s1 + $0x4bc] ss:$8 sps:$4 sm:$0xff]  }
 0x1db   : > { %4528 = vmatpush1.bf16.msra.mxu0 %v12632_v46  ;;  %v14884_v46 = vpop.f32.mrf.mxu1  ;;  %v666_v29 = vadd.f32 %v14578_v37, %v526_v0  ;;  %v803_v56 = vadd.f32 %v14561_v30, %v665_v20  ;;  %v12651_v37 = vld [vmem:[%s16226_s1 + $0x4b8] ss:$8 sps:$4 sm:$0xff]  }
 0x1dc   : > { %4665 = vmatpush1.bf16.msra.mxu1 %v12635_v48  ;;  %11317 = vmatprep.subr.msk.bf16.mxu0 %vm363_vm0, %v11316_v9  ;;  %v12642_v48 = vld [vmem:[%s16226_s1 + $0x460] ss:$8 sps:$4 sm:$0xff]  }
 0x1dd   : > { %11348 = vmatprep.subr.msk.bf16.mxu1 %vm363_vm0, %v11347_v26  ;;  %v14916_v54 = vpop.f32.mrf.mxu1  ;;  %v941_v30 = vadd.f32 %v14631_v63, %v803_v56  ;;  %v12657_v63 = vld [vmem:[%s16226_s1 + $0x4a8] ss:$8 sps:$4 sm:$0xff]   ;;  %v12663_v20 = vld [vmem:[%s16226_s1 + $0x498] ss:$8 sps:$4 sm:$0xff]  }
 0x1de   : > { %11256 = vmatmul.mubr.msk.bf16.vlgmr.msra.gmra.mxu0 %vm359_vm1, %v4425_v10  ;;  %v802_v10 = vadd.f32 %v14539_v23, %v664_v33  ;;  %v667_v23 = vadd.f32 %v14612_v49, %v528_v7  ;;  %v12659_v49 = vld [vmem:[%s16226_s1 + $0x4ac] ss:$8 sps:$4 sm:$0xff]   ;;  %v12672_v56 = vld [vmem:[%s16226_s1 + $0x410] ss:$8 sps:$4 sm:$0xff]  }
 0x1df   : > { %11287 = vmatmul.mubr.msk.bf16.vlgmr.msra.gmra.mxu1 %vm359_vm1, %v4562_v50  ;;  %4790 = vmatpush1.bf16.msra.mxu0 %v4782_v24  ;;  %v14907_v24 = vpop.f32.mrf.mxu0  ;;  %v14934_v36 = vpop.f32.mrf.mxu1 }
 0x1e0   : > { %4928 = vmatpush1.bf16.msra.mxu1 %v4920_v31  ;;  %4791 = vmatprep.subr.bf16.mxu0 %v12644_v61  ;;  %v940_v50 = vadd.f32 %v14617_v38, %v802_v10  ;;  %v804_v38 = vadd.f32 %v14580_v39, %v666_v29  ;;  %v805_v9 = vadd.f32 %v14615_v11, %v667_v23  ;;  %v12654_v39 = vld [vmem:[%s16226_s1 + $0x440] ss:$8 sps:$4 sm:$0xff]   ;;  %v12665_v61 = vld [vmem:[%s16226_s1 + $0x49c] ss:$8 sps:$4 sm:$0xff]  }
 0x1e1   : > { %4929 = vmatprep.subr.bf16.mxu1 %v12647_v62  ;;  %4819 = vmatprep.mubr.bf16.mxu0 %v16242_v19  ;;  %v14930_v59 = vpop.f32.mrf.mxu0  ;;  %v14947_v33 = vpop.f32.mrf.mxu1  ;;  %v1079_v62 = vadd.f32 %v14633_v1, %v941_v30 }
 0x1e2   : > { %4957 = vmatprep.mubr.bf16.mxu1 %v16242_v19  ;;  %v1078_v26 = vadd.f32 %v14619_v15, %v940_v50  ;;  %v942_v22 = vadd.f32 %v14649_v8, %v804_v38  ;;  %v943_v11 = vadd.f32 %v14667_v17, %v805_v9  ;;  %v12662_v8 = vld [vmem:[%s16226_s1 + $0x434] ss:$8 sps:$4 sm:$0xff]   ;;  %v12660_v17 = vld [vmem:[%s16226_s1 + $0x430] ss:$8 sps:$4 sm:$0xff]  }
 0x1e3   : > { %4792 = vmatpush1.bf16.msra.mxu0 %v12642_v48  ;;  %v14937_v31 = vpop.f32.mrf.mxu0  ;;  %v1217_v40 = vadd.f32 %v14690_v32, %v1079_v62  ;;  %v12671_v32 = vld [vmem:[%s16226_s1 + $0x48c] ss:$8 sps:$4 sm:$0xff]  }
 0x1e4   : > { %4930 = vmatpush1.bf16.msra.mxu1 %v12645_v6  ;;  %4793 = vmatprep.subr.bf16.mxu0 %v12650_v13  ;;  %v1216_v15 = vadd.f32 %v14671_v21, %v1078_v26  ;;  %v1080_v21 = vadd.f32 %v14659_v12, %v942_v22  ;;  %v1081_v48 = vadd.f32 %v14669_v18, %v943_v11  ;;  %v14968_v6 = vpop.f32.mrf.mxu1  ;;  %v12668_v12 = vld [vmem:[%s16226_s1 + $0x424] ss:$8 sps:$4 sm:$0xff]   ;;  %v12666_v18 = vld [vmem:[%s16226_s1 + $0x420] ss:$8 sps:$4 sm:$0xff]  }
 0x1e5   : > { %4931 = vmatprep.subr.bf16.mxu1 %v12653_v16  ;;  %v14961_v0 = vpop.f32.mrf.mxu0  ;;  %v1355_v16 = vadd.f32 %v14695_v34, %v1217_v40  ;;  %v11364_v34 = vld [vmem:[%s16226_s1 + $0x540] sm:$0xff] }
 0x1e6   : > { %v1354_v1 = vadd.f32 %v14679_v25, %v1216_v15  ;;  %v1218_v7 = vadd.f32 %v14709_v44, %v1080_v21  ;;  %v12669_v25 = vld [vmem:[%s16226_s1 + $0x488] ss:$8 sps:$4 sm:$0xff]   ;;  %v1219_v10 = vadd.f32 %v14733_v55, %v1081_v48  ;;  %v12674_v44 = vld [vmem:[%s16226_s1 + $0x414] ss:$8 sps:$4 sm:$0xff]   ;;  %v14994_v23 = vpop.f32.mrf.mxu1  ;;  %v11377_v26 = vcombine.low %v11364_v34, %v11364_v34  ;;  %v16243_v48 = vld [vmem:[#allocation7_spill] sm:$0xff] }
 0x1e7   : > { %4794 = vmatpush1.bf16.msra.mxu0 %v12648_v42  ;;  %v14986_v29 = vpop.f32.mrf.mxu0  ;;  %v12677_v42 = vld [vmem:[%s16226_s1 + $0x47c] ss:$8 sps:$4 sm:$0xff]   ;;  %v11395_v55 = vld [vmem:[%s16226_s1 + $0x5a8] sm:$0xff]  ;;  %v1493_v50 = vadd.f32 %v14753_v27, %v1355_v16 }
 0x1e8   : > { %4932 = vmatpush1.bf16.msra.mxu1 %v12651_v37  ;;  %4795 = vmatprep.subr.bf16.mxu0 %v12656_v58  ;;  %v1492_v13 = vadd.f32 %v14739_v4, %v1354_v1  ;;  %v1356_v4 = vadd.f32 %v14717_v47, %v1218_v7  ;;  %v12675_v37 = vld [vmem:[%s16226_s1 + $0x478] ss:$8 sps:$4 sm:$0xff]   ;;  %v11320_v27 = vld [vmem:[%s13358_s6 + $0x48] sm:$0xff]  ;;  %v11408_v22 = vcombine.low %v11395_v55, %v11395_v55  ;;  %v5057_v40 = vsel %vm363_vm0, %v11377_v26, 0 }
 0x1e9   : > { %4933 = vmatprep.subr.bf16.mxu1 %v12659_v49  ;;  %v11289_v58 = vld [vmem:[%s13358_s6 + $0x32] sm:$0xff]  ;;  %v1357_v49 = vadd.f32 %v14737_v60, %v1219_v10  ;;  %v15014_v9 = vpop.f32.mrf.mxu0  ;;  %v11319_v47 = vld [vmem:[%s13358_s6 + $0x40] sm:$0xff]  ;;  %v11378_v60 = vcombine.high %v11364_v34, %v11364_v34  ;;  %v11409_v11 = vcombine.high %v11395_v55, %v11395_v55 }
 0x1ea   : > { %v1630_v38 = vadd.f32 %v14741_v5, %v1492_v13  ;;  %v1494_v30 = vadd.f32 %v14771_v41, %v1356_v4  ;;  %v1631_v5 = vadd.f32 %v14755_v28, %v1493_v50  ;;  %v12685_v13 = vld [vmem:[%s16226_s1 + $0x598] ss:$8 sps:$4 sm:$0xff]   ;;  %v12690_v16 = vld [vmem:[%s16226_s1 + $0x524] ss:$8 sps:$4 sm:$0xff]  }
 0x1eb   : > { %4796 = vmatpush1.bf16.msra.mxu0 %v12654_v39  ;;  %v1495_v39 = vadd.f32 %v14789_v51, %v1357_v49  ;;  %v15023_v15 = vpop.f32.mrf.mxu0  ;;  %v12697_v26 = vld [vmem:[%s16226_s1 + $0x578] ss:$8 sps:$4 sm:$0xff]  }
 0x1ec   : > { %4934 = vmatpush1.bf16.msra.mxu1 %v12657_v63  ;;  %4797 = vmatprep.subr.bf16.mxu0 %v12662_v8  ;;  %v15019_v63 = vpop.f32.mrf.mxu1  ;;  %v1768_v41 = vadd.f32 %v14793_v53, %v1630_v38  ;;  %v1632_v21 = vadd.f32 %v14778_v45, %v1494_v30  ;;  %v1769_v51 = vadd.f32 %v14814_v3, %v1631_v5  ;;  %v12684_v53 = vld [vmem:[%s16226_s1 + $0x534] ss:$8 sps:$4 sm:$0xff]  }
 0x1ed   : > { %4935 = vmatprep.subr.bf16.mxu1 %v12665_v61  ;;  %v13166_v61 = vld [vmem:[%s13358_s6 + $0x2a] sm:$0xff]  ;;  %v1633_v28 = vadd.f32 %v14791_v52, %v1495_v39  ;;  %v12687_v45 = vld [vmem:[%s16226_s1 + $0x59c] ss:$8 sps:$4 sm:$0xff]  }
 0x1ee   : > { %v15025_v8 = vpop.f32.mrf.mxu1  ;;  %v4699_v62 = vpack.c.bf16 %v11289_v58, %v13166_v61  ;;  %v1907_v3 = vadd.f32 %v14801_v57, %v1768_v41  ;;  %v1770_v1 = vadd.f32 %v16243_v48, %v1632_v21  ;;  %v12682_v57 = vld [vmem:[%s16226_s1 + $0x530] ss:$8 sps:$4 sm:$0xff]   ;;  %v12700_v41 = vld [vmem:[%s16226_s1 + $0x500] ss:$8 sps:$4 sm:$0xff]  }
 0x1ef   : > { %4798 = vmatpush1.bf16.msra.mxu0 %v12660_v17  ;;  %v4837_v17 = vpack.c.bf16 %v11320_v27, %v11319_v47  ;;  %v12694_v47 = vld [vmem:[%s16226_s1 + $0x510] ss:$8 sps:$4 sm:$0xff]  }
 0x1f0   : > { %4936 = vmatpush1.bf16.msra.mxu1 %v12663_v20  ;;  %4799 = vmatprep.subr.bf16.mxu0 %v12668_v12  ;;  %v5194_v20 = vsel %vm363_vm0, %v11408_v22, 0  ;;  %v15043_v12 = vpop.f32.mrf.mxu0  ;;  %v15046_v7 = vpop.f32.mrf.mxu1  ;;  %v2045_v10 = vadd.f32 %v14861_v14, %v1907_v3  ;;  %v12693_v14 = vld [vmem:[%s16226_s1 + $0x58c] ss:$8 sps:$4 sm:$0xff]   ;;  %v12703_v61 = vld [vmem:[%s16226_s1 + $0x568] ss:$8 sps:$4 sm:$0xff]  }
 0x1f1   : > { %4937 = vmatprep.subr.bf16.mxu1 %v12671_v32  ;;  %v16244_v32 = vld [vmem:[#allocation9_spill] sm:$0xff] }
 0x1f2   : > { %v1771_v52 = vadd.f32 %v16244_v32, %v1633_v28  ;;  %v2592_v55 = vpop.f32.mrf.mxu0  ;;  %v15069_v50 = vpop.f32.mrf.mxu1  ;;  %v12706_v28 = vld [vmem:[%s16226_s1 + $0x4f0] ss:$8 sps:$4 sm:$0xff]  }
 0x1f3   : > { %4800 = vmatpush1.bf16.msra.mxu0 %v12666_v18  ;;  %v16245_v18 = vld [vmem:[#allocation6_spill] sm:$0xff]  ;;  %v11426_v3 = vld [vmem:[%s16226_s1 + $0x610] sm:$0xff] }
 0x1f4   : > { %4938 = vmatpush1.bf16.msra.mxu1 %v12669_v25  ;;  %4801 = vmatprep.subr.bf16.mxu0 %v12674_v44  ;;  %v1908_v25 = vadd.f32 %v16245_v18, %v1769_v51  ;;  %v16246_v44 = vld [vmem:[#allocation8_spill] sm:$0xff]  ;;  %v1910_v4 = vadd.f32 %v14859_v2, %v1771_v52  ;;  %v12696_v2 = vld [vmem:[%s16226_s1 + $0x514] ss:$8 sps:$4 sm:$0xff]   ;;  %v2594_v30 = vpop.f32.mrf.mxu0  ;;  %v15091_v27 = vpop.f32.mrf.mxu1 }
 0x1f5   : > { %4939 = vmatprep.subr.bf16.mxu1 %v12677_v42  ;;  %v1909_v42 = vadd.f32 %v16246_v44, %v1770_v1 }
 0x1f6   : > { %v2046_v34 = vadd.f32 %v14882_v43, %v1908_v25  ;;  %v12691_v43 = vld [vmem:[%s16226_s1 + $0x588] ss:$8 sps:$4 sm:$0xff]   ;;  %v2048_v49 = vadd.f32 %v14930_v59, %v1910_v4  ;;  %v3292_v59 = vlaneseq }
 0x1f7   : > { %4802 = vmatpush1.bf16.msra.mxu0 %v12672_v56  ;;  %v12688_v56 = vld [vmem:[%s16226_s1 + $0x520] ss:$8 sps:$4 sm:$0xff]   ;;  %v2047_v58 = vadd.f32 %v14907_v24, %v1909_v42  ;;  %v3002_v5 = vpop.f32.mrf.mxu1 }
 0x1f8   : > { %4940 = vmatpush1.bf16.msra.mxu1 %v12675_v37  ;;  %11379 = vmatprep.subr.msk.bf16.mxu0 %vm363_vm0, %v11378_v60  ;;  %v2183_v37 = vadd.f32 %v14865_v35, %v2045_v10  ;;  %v12699_v35 = vld [vmem:[%s16226_s1 + $0x57c] ss:$8 sps:$4 sm:$0xff]   ;;  %v2184_v24 = vadd.f32 %v14884_v46, %v2046_v34  ;;  %v2864_v60 = vpop.f32.mrf.mxu0  ;;  %v12712_v10 = vld [vmem:[%s16226_s1 + $0x4e0] ss:$8 sps:$4 sm:$0xff]  }
 0x1f9   : > { %11410 = vmatprep.subr.msk.bf16.mxu1 %vm363_vm0, %v11409_v11  ;;  %v2185_v22 = vadd.f32 %v14916_v54, %v2047_v58  ;;  %v12702_v46 = vld [vmem:[%s16226_s1 + $0x504] ss:$8 sps:$4 sm:$0xff]   ;;  %v2186_v11 = vadd.f32 %v14934_v36, %v2048_v49  ;;  %v12708_v36 = vld [vmem:[%s16226_s1 + $0x4f4] ss:$8 sps:$4 sm:$0xff]   ;;  %v241_v42 = vld [vmem:[%s16227_s2] sm:$0x3] }
 0x1fa   : > { %11318 = vmatmul.mubr.msk.bf16.vlgmr.msra.gmra.mxu0 %vm359_vm1, %v4699_v62  ;;  %v2321_v38 = vadd.f32 %v14937_v31, %v2183_v37  ;;  %v2322_v39 = vadd.f32 %v14961_v0, %v2184_v24  ;;  %v12705_v31 = vld [vmem:[%s16226_s1 + $0x56c] ss:$8 sps:$4 sm:$0xff]   ;;  %v15113_v62 = vshrl.u32 %v3292_v59, 7  ;;  %v2866_v51 = vpop.f32.mrf.mxu0 }
 0x1fb   : > { %11349 = vmatmul.mubr.msk.bf16.vlgmr.msra.gmra.mxu1 %vm359_vm1, %v4837_v17  ;;  %5065 = vmatpush1.bf16.msra.mxu0 %v5057_v40  ;;  %v2323_v0 = vadd.f32 %v14986_v29, %v2185_v22  ;;  %v2324_v17 = vadd.f32 %v15014_v9, %v2186_v11  ;;  %v3004_v40 = vpop.f32.mrf.mxu1  ;;  %v11382_v34 = vld [vmem:[%s13358_s6 + $0x4a] sm:$0xff] }
 0x1fc   : > { %5202 = vmatpush1.bf16.msra.mxu1 %v5194_v20  ;;  %5066 = vmatprep.subr.bf16.mxu0 %v12684_v53  ;;  %v2459_v54 = vadd.f32 %v14947_v33, %v2321_v38  ;;  %v12711_v33 = vld [vmem:[%s16226_s1 + $0x55c] ss:$8 sps:$4 sm:$0xff]   ;;  %v2460_v29 = vadd.f32 %v14968_v6, %v2322_v39  ;;  %v12709_v6 = vld [vmem:[%s16226_s1 + $0x558] ss:$8 sps:$4 sm:$0xff]   ;;  %v3294_v53 = vsub.s32 0, %v15113_v62 }
 0x1fd   : > { %5203 = vmatprep.subr.bf16.mxu1 %v12687_v45  ;;  %5094 = vmatprep.mubr.bf16.mxu0 %v16242_v19  ;;  %v2461_v9 = vadd.f32 %v14994_v23, %v2323_v0  ;;  %v12714_v45 = vld [vmem:[%s16226_s1 + $0x4e4] ss:$8 sps:$4 sm:$0xff]   ;;  %v3006_v52 = vpop.f32.mrf.mxu1 }
 0x1fe   : > { %5231 = vmatprep.mubr.bf16.mxu1 %v16242_v19  ;;  %v2597_v21 = vadd.f32 %v15023_v15, %v2459_v54  ;;  %v2598_v20 = vadd.f32 %v15043_v12, %v2460_v29  ;;  %v2462_v15 = vadd.f32 %v15019_v63, %v2324_v17  ;;  %v12717_v23 = vld [vmem:[%s16226_s1 + $0x54c] ss:$8 sps:$4 sm:$0xff]   ;;  %v11457_v63 = vld [vmem:[%s16226_s1 + $0x678] sm:$0xff]  ;;  %v2868_v12 = vpop.f32.mrf.mxu0 }
 0x1ff   : > { %5067 = vmatpush1.bf16.msra.mxu0 %v12682_v57  ;;  %v2599_v1 = vadd.f32 %v2592_v55, %v2461_v9  ;;  %v11350_v57 = vld [vmem:[%s13358_s6 + $0x41] sm:$0xff]  ;;  %v11470_v44 = vcombine.low %v11457_v63, %v11457_v63  ;;  %v3008_v58 = vpop.f32.mrf.mxu1  ;;  %v11471_v49 = vcombine.high %v11457_v63, %v11457_v63  ;;  %v12727_v22 = vld [vmem:[%s16226_s1 + $0x66c] ss:$8 sps:$4 sm:$0xff]  }
 0x200   : > { %5204 = vmatpush1.bf16.msra.mxu1 %v12685_v13  ;;  %5068 = vmatprep.subr.bf16.mxu0 %v12690_v16  ;;  %v2735_v48 = vadd.f32 %v15025_v8, %v2597_v21  ;;  %v2600_v32 = vadd.f32 %v2594_v30, %v2462_v15  ;;  %v2736_v18 = vadd.f32 %v15046_v7, %v2598_v20  ;;  %v12715_v8 = vld [vmem:[%s16226_s1 + $0x548] ss:$8 sps:$4 sm:$0xff]   ;;  %v3298_v7 = vsub.s32 1, %v15113_v62  ;;  %v12730_v29 = vld [vmem:[%s16226_s1 + $0x5f4] ss:$8 sps:$4 sm:$0xff]  }
 0x201   : > { %5205 = vmatprep.subr.bf16.mxu1 %v12693_v14  ;;  %v11351_v13 = vld [vmem:[%s13358_s6 + $0x49] sm:$0xff]  ;;  %v11439_v14 = vcombine.low %v11426_v3, %v11426_v3  ;;  %v2737_v55 = vadd.f32 %v15069_v50, %v2599_v1  ;;  %v5468_v38 = vsel %vm363_vm0, %v11470_v44, 0  ;;  %v12733_v21 = vld [vmem:[%s16226_s1 + $0x65c] ss:$8 sps:$4 sm:$0xff]  }
 0x202   : > { %v2873_v25 = vadd.f32 %v2864_v60, %v2735_v48  ;;  %v11381_v16 = vld [vmem:[%s13358_s6 + $0x42] sm:$0xff]  ;;  %v2874_v4 = vadd.f32 %v2866_v51, %v2736_v18  ;;  %v2738_v37 = vadd.f32 %v15091_v27, %v2600_v32  ;;  %v4974_v59 = vpack.c.bf16 %v11351_v13, %v11350_v57  ;;  %v12739_v48 = vld [vmem:[%s16226_s1 + $0x64c] ss:$8 sps:$4 sm:$0xff]  }
 0x203   : > { %5069 = vmatpush1.bf16.msra.mxu0 %v12688_v56  ;;  %v2870_v56 = vpop.f32.mrf.mxu0  ;;  %v5331_v24 = vsel %vm363_vm0, %v11439_v14, 0  ;;  %v12724_v27 = vld [vmem:[%s16226_s1 + $0x604] ss:$8 sps:$4 sm:$0xff]   ;;  %v12725_v62 = vld [vmem:[%s16226_s1 + $0x668] ss:$8 sps:$4 sm:$0xff]  }
 0x204   : > { %5206 = vmatpush1.bf16.msra.mxu1 %v12691_v43  ;;  %5070 = vmatprep.subr.bf16.mxu0 %v12696_v2  ;;  %v11440_v43 = vcombine.high %v11426_v3, %v11426_v3  ;;  %v3011_v2 = vadd.f32 %v3002_v5, %v2873_v25  ;;  %v2876_v30 = vadd.f32 %v2870_v56, %v2738_v37  ;;  %v12736_v63 = vld [vmem:[%s16226_s1 + $0x5e4] ss:$8 sps:$4 sm:$0xff]   ;;  %v12737_v57 = vld [vmem:[%s16226_s1 + $0x648] ss:$8 sps:$4 sm:$0xff]   ;;  %v12742_v13 = vld [vmem:[%s16226_s1 + $0x5d4] ss:$8 sps:$4 sm:$0xff]  }
 0x205   : > { %5207 = vmatprep.subr.bf16.mxu1 %v12699_v35  ;;  %v2875_v35 = vadd.f32 %v2868_v12, %v2737_v55  ;;  %v3012_v39 = vadd.f32 %v3004_v40, %v2874_v4  ;;  %v12743_v55 = vld [vmem:[%s16226_s1 + $0x638] ss:$8 sps:$4 sm:$0xff]   ;;  %v12748_v56 = vld [vmem:[%s16226_s1 + $0x5c4] ss:$8 sps:$4 sm:$0xff]  }
 0x206   : > { %v3014_v17 = vadd.f32 %v3008_v58, %v2876_v30  ;;  %v12751_v37 = vld [vmem:[%s16226_s1 + $0x62c] ss:$8 sps:$4 sm:$0xff]   ;;  %v12746_v58 = vld [vmem:[%s16226_s1 + $0x5c0] ss:$8 sps:$4 sm:$0xff]  }
 0x207   : > { %5071 = vmatpush1.bf16.msra.mxu0 %v12694_v47  ;;  %v3013_v5 = vadd.f32 %v3006_v52, %v2875_v35  ;;  %v11488_v35 = vld [vmem:[%s16226_s1 + $0x6e0] sm:$0xff] }
 0x208   : > { %5208 = vmatpush1.bf16.msra.mxu1 %v12697_v26  ;;  %5072 = vmatprep.subr.bf16.mxu0 %v12702_v46  ;;  %v5111_v26 = vpack.c.bf16 %v11382_v34, %v11381_v16  ;;  %v15172_v46 = vrot.slane %v241_v42, %v3294_v53  ;;  %v12745_v16 = vld [vmem:[%s16226_s1 + $0x63c] ss:$8 sps:$4 sm:$0xff]   ;;  %v12740_v34 = vld [vmem:[%s16226_s1 + $0x5d0] ss:$8 sps:$4 sm:$0xff]  }
 0x209   : > { %5209 = vmatprep.subr.bf16.mxu1 %v12705_v31  ;;  %v12755_v30 = vld [vmem:[%s16226_s1 + $0x618] ss:$8 sps:$4 sm:$0xff]  }
 0x20a   : > { %16247 = vst [vmem:[#allocation7_spill] sm:$0xff] %v15172_v46 }
 0x20b   : > { %5073 = vmatpush1.bf16.msra.mxu0 %v12700_v41  ;;  %v15176_v41 = vrot.slane %v241_v42, %v3298_v7 }
 0x20c   : > { %5210 = vmatpush1.bf16.msra.mxu1 %v12703_v61  ;;  %5074 = vmatprep.subr.bf16.mxu0 %v12708_v36  ;;  %v12722_v61 = vld [vmem:[%s16226_s1 + $0x600] ss:$8 sps:$4 sm:$0xff]  }
 0x20d   : > { %5211 = vmatprep.subr.bf16.mxu1 %v12711_v33  ;;  %16248 = vst [vmem:[#allocation9_spill] sm:$0xff] %v15176_v41 }
 0x20f   : > { %5075 = vmatpush1.bf16.msra.mxu0 %v12706_v28 }
 0x210   : > { %5212 = vmatpush1.bf16.msra.mxu1 %v12709_v6  ;;  %5076 = vmatprep.subr.bf16.mxu0 %v12714_v45  ;;  %v12728_v45 = vld [vmem:[%s16226_s1 + $0x5f0] ss:$8 sps:$4 sm:$0xff]  }
 0x211   : > { %5213 = vmatprep.subr.bf16.mxu1 %v12717_v23  ;;  %v12731_v23 = vld [vmem:[%s16226_s1 + $0x658] ss:$8 sps:$4 sm:$0xff]  }
 0x212   : > { %v3140_v47 = vpop.f32.mrf.mxu0 }
 0x213   : > { %v3278_v50 = vpop.f32.mrf.mxu1  ;;  %v3149_v60 = vadd.f32 %v3140_v47, %v3011_v2  ;;  %5077 = vmatpush1.bf16.msra.mxu0 %v12712_v10  ;;  %v12757_v2 = vld [vmem:[%s16226_s1 + $0x61c] ss:$8 sps:$4 sm:$0xff]  }
 0x214   : > { %5214 = vmatpush1.bf16.msra.mxu1 %v12715_v8  ;;  %v3142_v31 = vpop.f32.mrf.mxu0  ;;  %11441 = vmatprep.subr.msk.bf16.mxu0 %vm363_vm0, %v11440_v43  ;;  %v12734_v8 = vld [vmem:[%s16226_s1 + $0x5e0] ss:$8 sps:$4 sm:$0xff]  }
 0x215   : > { %v3280_v11 = vpop.f32.mrf.mxu1  ;;  %11472 = vmatprep.subr.msk.bf16.mxu1 %vm363_vm0, %v11471_v49  ;;  %v3287_v54 = vadd.f32 %v3278_v50, %v3149_v60  ;;  %v3150_v0 = vadd.f32 %v3142_v31, %v3012_v39  ;;  %v12749_v43 = vld [vmem:[%s16226_s1 + $0x628] ss:$8 sps:$4 sm:$0xff]   ;;  %v12754_v49 = vld [vmem:[%s16226_s1 + $0x5b4] ss:$8 sps:$4 sm:$0xff]   ;;  %v11501_v39 = vcombine.low %v11488_v35, %v11488_v35 }
 0x216   : > { %v3144_v36 = vpop.f32.mrf.mxu0  ;;  %11380 = vmatmul.mubr.msk.bf16.vlgmr.msra.gmra.mxu0 %vm359_vm1, %v4974_v59  ;;  %v11412_v47 = vld [vmem:[%s13358_s6 + $0x43] sm:$0xff]  ;;  %v11413_v50 = vld [vmem:[%s13358_s6 + $0x4b] sm:$0xff] }
 0x217   : > { %v3282_v33 = vpop.f32.mrf.mxu1  ;;  %11411 = vmatmul.mubr.msk.bf16.vlgmr.msra.gmra.mxu1 %vm359_vm1, %v5111_v26  ;;  %v3302_v51 = vadd.f32 %v15172_v46, %v3287_v54  ;;  %v3288_v40 = vadd.f32 %v3280_v11, %v3150_v0  ;;  %v3151_v9 = vadd.f32 %v3144_v36, %v3013_v5  ;;  %5339 = vmatpush1.bf16.msra.mxu0 %v5331_v24  ;;  %v11519_v24 = vld [vmem:[%s16226_s1 + $0x748] sm:$0xff]  ;;  %v5605_v5 = vsel %vm363_vm0, %v11501_v39, 0  ;;  %v12764_v0 = vld [vmem:[%s16226_s1 + $0x6d4] ss:$8 sps:$4 sm:$0xff]  }
 0x218   : > { %5476 = vmatpush1.bf16.msra.mxu1 %v5468_v38  ;;  %v3146_v20 = vpop.f32.mrf.mxu0  ;;  %5340 = vmatprep.subr.bf16.mxu0 %v12724_v27  ;;  %v12752_v38 = vld [vmem:[%s16226_s1 + $0x5b0] ss:$8 sps:$4 sm:$0xff]   ;;  %v11443_v59 = vld [vmem:[%s13358_s6 + $0x44] sm:$0xff]  ;;  %v11502_v27 = vcombine.high %v11488_v35, %v11488_v35  ;;  %v11532_v60 = vcombine.low %v11519_v24, %v11519_v24  ;;  %v5248_v31 = vpack.c.bf16 %v11413_v50, %v11412_v47  ;;  %v12822_v50 = vld [vmem:[%s16226_s1 + $0x774] ss:$8 sps:$4 sm:$0xff]  }
 0x219   : > { %5477 = vmatprep.subr.bf16.mxu1 %v12727_v22  ;;  %v3306_v28 = vmax.f32 %v3302_v51, 0.0  ;;  %v3303_v6 = vadd.f32 %v15176_v41, %v3288_v40  ;;  %v3289_v15 = vadd.f32 %v3282_v33, %v3151_v9  ;;  %v3152_v53 = vadd.f32 %v3146_v20, %v3014_v17  ;;  %5368 = vmatprep.mubr.bf16.mxu0 %v16242_v19  ;;  %v3284_v3 = vpop.f32.mrf.mxu1  ;;  %v11444_v26 = vld [vmem:[%s13358_s6 + $0x4c] sm:$0xff]  ;;  %v12765_v17 = vld [vmem:[%s16226_s1 + $0x738] ss:$8 sps:$4 sm:$0xff]   ;;  %v12776_v51 = vld [vmem:[%s16226_s1 + $0x6b4] ss:$8 sps:$4 sm:$0xff]  }
 0x21a   : > { %5505 = vmatprep.mubr.bf16.mxu1 %v16242_v19  ;;  %v11533_v22 = vcombine.high %v11519_v24, %v11519_v24  ;;  %v5385_v11 = vpack.c.bf16 %v11444_v26, %v11443_v59  ;;  %v5742_v54 = vsel %vm363_vm0, %v11532_v60, 0  ;;  %v12770_v36 = vld [vmem:[%s16226_s1 + $0x6c4] ss:$8 sps:$4 sm:$0xff]   ;;  %v12774_v9 = vld [vmem:[%s16226_s1 + $0x6b0] ss:$8 sps:$4 sm:$0xff]  }
 0x21b   : > { %v3315_v1 = vrot.slane %v3306_v28, 3  ;;  %v3307_v12 = vmax.f32 %v3303_v6, 0.0  ;;  %v3304_v32 = vadd.f32 %v15172_v46, %v3289_v15  ;;  %v3290_v52 = vadd.f32 %v3284_v3, %v3152_v53  ;;  %5341 = vmatpush1.bf16.msra.mxu0 %v12722_v61  ;;  %v12767_v61 = vld [vmem:[%s16226_s1 + $0x73c] ss:$8 sps:$4 sm:$0xff]   ;;  %v12773_v33 = vld [vmem:[%s16226_s1 + $0x72c] ss:$8 sps:$4 sm:$0xff]  }
 0x21c   : > { %5478 = vmatpush1.bf16.msra.mxu1 %v12725_v62  ;;  %5342 = vmatprep.subr.bf16.mxu0 %v12730_v29  ;;  %v12762_v62 = vld [vmem:[%s16226_s1 + $0x6d0] ss:$8 sps:$4 sm:$0xff]   ;;  %v12768_v29 = vld [vmem:[%s16226_s1 + $0x6c0] ss:$8 sps:$4 sm:$0xff]   ;;  %v12779_v40 = vld [vmem:[%s16226_s1 + $0x71c] ss:$8 sps:$4 sm:$0xff]  }
 0x21d   : > { %5479 = vmatprep.subr.bf16.mxu1 %v12733_v21  ;;  %3327 = vst [vmem:[#allocation2] sm:$0xe0] %v3315_v1  ;;  %v3316_v18 = vrot.slane %v3307_v12, 3  ;;  %v3308_v25 = vmax.f32 %v3304_v32, 0.0  ;;  %v3305_v10 = vadd.f32 %v15176_v41, %v3290_v52  ;;  %v12771_v21 = vld [vmem:[%s16226_s1 + $0x728] ss:$8 sps:$4 sm:$0xff]  }
 0x21e   : > { %v12777_v20 = vld [vmem:[%s16226_s1 + $0x718] ss:$8 sps:$4 sm:$0xff]   ;;  %v12782_v28 = vld [vmem:[%s16226_s1 + $0x6a4] ss:$8 sps:$4 sm:$0xff]   ;;  %v12783_v53 = vld [vmem:[%s16226_s1 + $0x708] ss:$8 sps:$4 sm:$0xff]  }
 0x21f   : > { %3329 = vst.msk [vmem:[#allocation2 + $0x8] sm:$0xe0] %vm3328_vm4, %v3316_v18  ;;  %v3317_v14 = vrot.slane %v3308_v25, 3  ;;  %v3309_v44 = vmax.f32 %v3305_v10, 0.0  ;;  %5343 = vmatpush1.bf16.msra.mxu0 %v12728_v45  ;;  %v12785_v6 = vld [vmem:[%s16226_s1 + $0x70c] ss:$8 sps:$4 sm:$0xff]  }
 0x220   : > { %5480 = vmatpush1.bf16.msra.mxu1 %v12731_v23  ;;  %5344 = vmatprep.subr.bf16.mxu0 %v12736_v63  ;;  %v12780_v15 = vld [vmem:[%s16226_s1 + $0x6a0] ss:$8 sps:$4 sm:$0xff]   ;;  %v12788_v45 = vld [vmem:[%s16226_s1 + $0x694] ss:$8 sps:$4 sm:$0xff]   ;;  %v12786_v3 = vld [vmem:[%s16226_s1 + $0x690] ss:$8 sps:$4 sm:$0xff]  }
 0x221   : > { %5481 = vmatprep.subr.bf16.mxu1 %v12739_v48  ;;  %v3318_v42 = vsel %vm3314_vm5, %v3315_v1, %v3317_v14  ;;  %3332 = vst [vmem:[#allocation2 + $0x20] sm:$0x1f] %v3317_v14  ;;  %v3319_v7 = vrot.slane %v3309_v44, 3  ;;  %v12791_v23 = vld [vmem:[%s16226_s1 + $0x6fc] ss:$8 sps:$4 sm:$0xff]   ;;  %v11550_v12 = vld [vmem:[%s16226_s1 + $0x7b0] sm:$0xff] }
 0x222   : > { %3330 = vst [vmem:[#allocation2 + $0x10] sm:$0xff] %v3318_v42  ;;  %v12789_v63 = vld [vmem:[%s16226_s1 + $0x6f8] ss:$8 sps:$4 sm:$0xff]   ;;  %v12794_v48 = vld [vmem:[%s16226_s1 + $0x684] ss:$8 sps:$4 sm:$0xff]   ;;  %v11564_v14 = vcombine.high %v11550_v12, %v11550_v12 }
 0x223   : > { %v3320_v4 = vsel %vm3314_vm5, %v3316_v18, %v3319_v7  ;;  %3334 = vst.msk [vmem:[#allocation2 + $0x28] sm:$0x1f] %vm3333_vm6, %v3319_v7  ;;  %5345 = vmatpush1.bf16.msra.mxu0 %v12734_v8  ;;  %v12797_v1 = vld [vmem:[%s16226_s1 + $0x6ec] ss:$8 sps:$4 sm:$0xff]   ;;  %v11581_v32 = vld [vmem:[%s16226_s1 + $0x818] sm:$0xff] }
 0x224   : > { %5482 = vmatpush1.bf16.msra.mxu1 %v12737_v57  ;;  %3331 = vst.msk [vmem:[#allocation2 + $0x18] sm:$0xff] %vm244_vm2, %v3320_v4  ;;  %5346 = vmatprep.subr.bf16.mxu0 %v12742_v13  ;;  %v12792_v52 = vld [vmem:[%s16226_s1 + $0x680] ss:$8 sps:$4 sm:$0xff]   ;;  %v11475_v10 = vld [vmem:[%s13358_s6 + $0x4d] sm:$0xff]  ;;  %v11563_v13 = vcombine.low %v11550_v12, %v11550_v12  ;;  %v11595_v44 = vcombine.high %v11581_v32, %v11581_v32  ;;  %v12825_v59 = vld [vmem:[%s16226_s1 + $0x7dc] ss:$8 sps:$4 sm:$0xff]  }
 0x225   : > { %5483 = vmatprep.subr.bf16.mxu1 %v12745_v16  ;;  %v12795_v18 = vld [vmem:[%s16226_s1 + $0x6e8] ss:$8 sps:$4 sm:$0xff]   ;;  %v11594_v16 = vcombine.low %v11581_v32, %v11581_v32  ;;  %v12804_v4 = vld [vmem:[%s16226_s1 + $0x7a4] ss:$8 sps:$4 sm:$0xff]   ;;  %v12811_v35 = vld [vmem:[%s16226_s1 + $0x7f8] ss:$8 sps:$4 sm:$0xff]  }
 0x226   : > { %v11474_v25 = vld [vmem:[%s13358_s6 + $0x45] sm:$0xff]  ;;  %v11506_v57 = vld [vmem:[%s13358_s6 + $0x4e] sm:$0xff] }
 0x227   : > { %5347 = vmatpush1.bf16.msra.mxu0 %v12740_v34  ;;  %v11505_v8 = vld [vmem:[%s13358_s6 + $0x46] sm:$0xff]  ;;  %v5522_v42 = vpack.c.bf16 %v11475_v10, %v11474_v25  ;;  %v5879_v34 = vsel %vm363_vm0, %v11563_v13, 0  ;;  %v12820_v26 = vld [vmem:[%s16226_s1 + $0x770] ss:$8 sps:$4 sm:$0xff]   ;;  %v12856_v32 = vld [vmem:[%s16226_s1 + $0x854] ss:$8 sps:$4 sm:$0xff]  }
 0x228   : > { %5484 = vmatpush1.bf16.msra.mxu1 %v12743_v55  ;;  %5348 = vmatprep.subr.bf16.mxu0 %v12748_v56  ;;  %v5659_v7 = vpack.c.bf16 %v11506_v57, %v11505_v8  ;;  %v6016_v55 = vsel %vm363_vm0, %v11594_v16, 0  ;;  %v12807_v56 = vld [vmem:[%s16226_s1 + $0x80c] ss:$8 sps:$4 sm:$0xff]   ;;  %v12817_v47 = vld [vmem:[%s16226_s1 + $0x7e8] ss:$8 sps:$4 sm:$0xff]  }
 0x229   : > { %5485 = vmatprep.subr.bf16.mxu1 %v12751_v37  ;;  %v12802_v37 = vld [vmem:[%s16226_s1 + $0x7a0] ss:$8 sps:$4 sm:$0xff]   ;;  %v12816_v24 = vld [vmem:[%s16226_s1 + $0x784] ss:$8 sps:$4 sm:$0xff]   ;;  %v12854_v25 = vld [vmem:[%s16226_s1 + $0x850] ss:$8 sps:$4 sm:$0xff]  }
 0x22a   : > { %v12831_v39 = vld [vmem:[%s16226_s1 + $0x7cc] ss:$8 sps:$4 sm:$0xff]   ;;  %v12826_v60 = vld [vmem:[%s16226_s1 + $0x760] ss:$8 sps:$4 sm:$0xff]  }
 0x22b   : > { %5349 = vmatpush1.bf16.msra.mxu0 %v12746_v58  ;;  %v12805_v58 = vld [vmem:[%s16226_s1 + $0x808] ss:$8 sps:$4 sm:$0xff]   ;;  %v12857_v10 = vld [vmem:[%s16226_s1 + $0x8b8] ss:$8 sps:$4 sm:$0xff]   ;;  %v12862_v8 = vld [vmem:[%s16226_s1 + $0x844] ss:$8 sps:$4 sm:$0xff]  }
 0x22c   : > { %5486 = vmatpush1.bf16.msra.mxu1 %v12749_v43  ;;  %5350 = vmatprep.subr.bf16.mxu0 %v12754_v49  ;;  %v12810_v43 = vld [vmem:[%s16226_s1 + $0x794] ss:$8 sps:$4 sm:$0xff]   ;;  %v12851_v12 = vld [vmem:[%s16226_s1 + $0x8c8] ss:$8 sps:$4 sm:$0xff]  }
 0x22d   : > { %5487 = vmatprep.subr.bf16.mxu1 %v12757_v2  ;;  %v12813_v49 = vld [vmem:[%s16226_s1 + $0x7fc] ss:$8 sps:$4 sm:$0xff]   ;;  %v12808_v2 = vld [vmem:[%s16226_s1 + $0x790] ss:$8 sps:$4 sm:$0xff]   ;;  %v12865_v57 = vld [vmem:[%s16226_s1 + $0x8ac] ss:$8 sps:$4 sm:$0xff]  }
 0x22e   : > { %v6406_v13 = vld [vmem:[#allocation2 + $0x8] sm:$0xfe] }
 0x22f   : > { %5351 = vmatpush1.bf16.msra.mxu0 %v12752_v38  ;;  %v12819_v38 = vld [vmem:[%s16226_s1 + $0x7ec] ss:$8 sps:$4 sm:$0xff]   ;;  %v12860_v16 = vld [vmem:[%s16226_s1 + $0x840] ss:$8 sps:$4 sm:$0xff]  }
 0x230   : > { %5488 = vmatpush1.bf16.msra.mxu1 %v12755_v30  ;;  %11503 = vmatprep.subr.msk.bf16.mxu0 %vm363_vm0, %v11502_v27  ;;  %v12814_v30 = vld [vmem:[%s16226_s1 + $0x780] ss:$8 sps:$4 sm:$0xff]  }
 0x231   : > { %11534 = vmatprep.subr.msk.bf16.mxu1 %vm363_vm0, %v11533_v22  ;;  %v12823_v27 = vld [vmem:[%s16226_s1 + $0x7d8] ss:$8 sps:$4 sm:$0xff]   ;;  %v12828_v22 = vld [vmem:[%s16226_s1 + $0x764] ss:$8 sps:$4 sm:$0xff]  }
 0x232   : > { %11442 = vmatmul.mubr.msk.bf16.vlgmr.msra.gmra.mxu0 %vm359_vm1, %v5248_v31  ;;  %v12829_v31 = vld [vmem:[%s16226_s1 + $0x7c8] ss:$8 sps:$4 sm:$0xff]  }
 0x233   : > { %11473 = vmatmul.mubr.msk.bf16.vlgmr.msra.gmra.mxu1 %vm359_vm1, %v5385_v11  ;;  %5613 = vmatpush1.bf16.msra.mxu0 %v5605_v5  ;;  %v11612_v11 = vld [vmem:[%s16226_s1 + $0x880] sm:$0xff]  ;;  %v11643_v5 = vld [vmem:[%s16226_s1 + $0x8e8] sm:$0xff] }
 0x234   : > { %5750 = vmatpush1.bf16.msra.mxu1 %v5742_v54  ;;  %5614 = vmatprep.subr.bf16.mxu0 %v12764_v0  ;;  %v12834_v54 = vld [vmem:[%s16226_s1 + $0x754] ss:$8 sps:$4 sm:$0xff]  }
 0x235   : > { %5751 = vmatprep.subr.bf16.mxu1 %v12767_v61  ;;  %5642 = vmatprep.mubr.bf16.mxu0 %v16242_v19  ;;  %v12837_v0 = vld [vmem:[%s16226_s1 + $0x7bc] ss:$8 sps:$4 sm:$0xff]   ;;  %v12832_v61 = vld [vmem:[%s16226_s1 + $0x750] ss:$8 sps:$4 sm:$0xff]  }
 0x236   : > { %5779 = vmatprep.mubr.bf16.mxu1 %v16242_v19 }
 0x237   : > { %5615 = vmatpush1.bf16.msra.mxu0 %v12762_v62  ;;  %v12835_v62 = vld [vmem:[%s16226_s1 + $0x7b8] ss:$8 sps:$4 sm:$0xff]  }
 0x238   : > { %5752 = vmatpush1.bf16.msra.mxu1 %v12765_v17  ;;  %5616 = vmatprep.subr.bf16.mxu0 %v12770_v36  ;;  %v11536_v17 = vld [vmem:[%s13358_s6 + $0x47] sm:$0xff]  ;;  %v11537_v36 = vld [vmem:[%s13358_s6 + $0x4f] sm:$0xff] }
 0x239   : > { %5753 = vmatprep.subr.bf16.mxu1 %v12773_v33  ;;  %v11625_v33 = vcombine.low %v11612_v11, %v11612_v11 }
 0x23b   : > { %5617 = vmatpush1.bf16.msra.mxu0 %v12768_v29  ;;  %v11656_v29 = vcombine.low %v11643_v5, %v11643_v5 }
 0x23c   : > { %5754 = vmatpush1.bf16.msra.mxu1 %v12771_v21  ;;  %5618 = vmatprep.subr.bf16.mxu0 %v12776_v51  ;;  %v11568_v21 = vld [vmem:[%s13358_s6 + $0x50] sm:$0xff]  ;;  %v11626_v51 = vcombine.high %v11612_v11, %v11612_v11  ;;  %v6374_v11 = vld [vmem:[#allocation2 + $0x8] sm:$0xff] }
 0x23d   : > { %5755 = vmatprep.subr.bf16.mxu1 %v12779_v40  ;;  %v11657_v40 = vcombine.high %v11643_v5, %v11643_v5  ;;  %v12880_v5 = vld [vmem:[#allocation3 + $0x98] sm:$0xff]  }
 0x23f   : > { %5619 = vmatpush1.bf16.msra.mxu0 %v12774_v9  ;;  %v6153_v9 = vsel %vm363_vm0, %v11625_v33, 0  ;;  %v12885_v33 = vld [vmem:[#allocation3 + $0x20] sm:$0xff]  }
 0x240   : > { %5756 = vmatpush1.bf16.msra.mxu1 %v12777_v20  ;;  %5620 = vmatprep.subr.bf16.mxu0 %v12782_v28  ;;  %v6290_v20 = vsel %vm363_vm0, %v11656_v29, 0  ;;  %v5796_v28 = vpack.c.bf16 %v11537_v36, %v11536_v17  ;;  %v12883_v17 = vld [vmem:[#allocation3 + $0x28] sm:$0xff]   ;;  %v12886_v29 = vld [vmem:[#allocation3 + $0x80] sm:$0xff]  }
 0x241   : > { %5757 = vmatprep.subr.bf16.mxu1 %v12785_v6  ;;  %v13167_v6 = vld [vmem:[%s13358_s6 + $0x48] sm:$0xff] }
 0x242   : > { %v12884_v36 = vld [vmem:[#allocation3 + $0x88] sm:$0xff]  }
 0x243   : > { %5621 = vmatpush1.bf16.msra.mxu0 %v12780_v15  ;;  %v5933_v15 = vpack.c.bf16 %v11568_v21, %v13167_v6  ;;  %v12887_v21 = vld [vmem:[#allocation3 + $0x18] sm:$0xff]   ;;  %v12893_v6 = vld [vmem:[#allocation3] sm:$0xff]  }
 0x244   : > { %5758 = vmatpush1.bf16.msra.mxu1 %v12783_v53  ;;  %5622 = vmatprep.subr.bf16.mxu0 %v12788_v45  ;;  %v12844_v53 = vld [vmem:[%s16226_s1 + $0x874] ss:$8 sps:$4 sm:$0xff]  }
 0x245   : > { %5759 = vmatprep.subr.bf16.mxu1 %v12791_v23  ;;  %v12847_v45 = vld [vmem:[%s16226_s1 + $0x8dc] ss:$8 sps:$4 sm:$0xff]   ;;  %v12842_v23 = vld [vmem:[%s16226_s1 + $0x870] ss:$8 sps:$4 sm:$0xff]  }
 0x247   : > { %5623 = vmatpush1.bf16.msra.mxu0 %v12786_v3  ;;  %v12845_v3 = vld [vmem:[%s16226_s1 + $0x8d8] ss:$8 sps:$4 sm:$0xff]  }
 0x248   : > { %5760 = vmatpush1.bf16.msra.mxu1 %v12789_v63  ;;  %5624 = vmatprep.subr.bf16.mxu0 %v12794_v48  ;;  %v12850_v63 = vld [vmem:[%s16226_s1 + $0x864] ss:$8 sps:$4 sm:$0xff]  }
 0x249   : > { %5761 = vmatprep.subr.bf16.mxu1 %v12797_v1  ;;  %v12853_v48 = vld [vmem:[%s16226_s1 + $0x8cc] ss:$8 sps:$4 sm:$0xff]   ;;  %v12848_v1 = vld [vmem:[%s16226_s1 + $0x860] ss:$8 sps:$4 sm:$0xff]  }
 0x24b   : > { %5625 = vmatpush1.bf16.msra.mxu0 %v12792_v52  ;;  %v12859_v52 = vld [vmem:[%s16226_s1 + $0x8bc] ss:$8 sps:$4 sm:$0xff]  }
 0x24c   : > { %5762 = vmatpush1.bf16.msra.mxu1 %v12795_v18  ;;  %11565 = vmatprep.subr.msk.bf16.mxu0 %vm363_vm0, %v11564_v14  ;;  %v15485_v18 = vld [vmem:[#allocation2 + $0x18] sm:$0xff]  ;;  %v12863_v14 = vld [vmem:[%s16226_s1 + $0x8a8] ss:$8 sps:$4 sm:$0xff]  }
 0x24d   : > { %11596 = vmatprep.subr.msk.bf16.mxu1 %vm363_vm0, %v11595_v44  ;;  %v6410_v44 = vpack.c.bf16 %v15485_v18, %v6406_v13  ;;  %v12900_v13 = vld [vmem:[#allocation3 + $0xb0] sm:$0xff]  }
 0x24e   : > { %11504 = vmatmul.mubr.msk.bf16.vlgmr.msra.gmra.mxu0 %vm359_vm1, %v5522_v42  ;;  %v12868_v42 = vld [vmem:[%s16226_s1 + $0x834] ss:$8 sps:$4 sm:$0xff]  }
 0x24f   : > { %11535 = vmatmul.mubr.msk.bf16.vlgmr.msra.gmra.mxu1 %vm359_vm1, %v5659_v7  ;;  %5887 = vmatpush1.bf16.msra.mxu0 %v5879_v34  ;;  %v12871_v7 = vld [vmem:[%s16226_s1 + $0x89c] ss:$8 sps:$4 sm:$0xff]   ;;  %v6408_v34 = vld [vmem:[#allocation2 + $0x28] sm:$0x1] }
 0x250   : > { %6024 = vmatpush1.bf16.msra.mxu1 %v6016_v55  ;;  %5888 = vmatprep.subr.bf16.mxu0 %v12804_v4  ;;  %v12866_v55 = vld [vmem:[%s16226_s1 + $0x830] ss:$8 sps:$4 sm:$0xff]  }
 0x251   : > { %6025 = vmatprep.subr.bf16.mxu1 %v12807_v56  ;;  %5916 = vmatprep.mubr.bf16.mxu0 %v16242_v19  ;;  %v12869_v4 = vld [vmem:[%s16226_s1 + $0x898] ss:$8 sps:$4 sm:$0xff]   ;;  %v6456_v56 = vshll.u32 %v6410_v44, 16 }
 0x252   : > { %6053 = vmatprep.mubr.bf16.mxu1 %v16242_v19 }
 0x253   : > { %5889 = vmatpush1.bf16.msra.mxu0 %v12802_v37  ;;  %v12874_v37 = vld [vmem:[%s16226_s1 + $0x824] ss:$8 sps:$4 sm:$0xff]  }
 0x254   : > { %6026 = vmatpush1.bf16.msra.mxu1 %v12805_v58  ;;  %5890 = vmatprep.subr.bf16.mxu0 %v12810_v43  ;;  %v12877_v58 = vld [vmem:[%s16226_s1 + $0x88c] ss:$8 sps:$4 sm:$0xff]   ;;  %v6412_v43 = vpack.c.bf16 %v6408_v34, %v6408_v34 }
 0x255   : > { %6027 = vmatprep.subr.bf16.mxu1 %v12813_v49  ;;  %v12872_v49 = vld [vmem:[%s16226_s1 + $0x820] ss:$8 sps:$4 sm:$0xff]  }
 0x257   : > { %5891 = vmatpush1.bf16.msra.mxu0 %v12808_v2  ;;  %v12875_v2 = vld [vmem:[%s16226_s1 + $0x888] ss:$8 sps:$4 sm:$0xff]  }
 0x258   : > { %6028 = vmatpush1.bf16.msra.mxu1 %v12811_v35  ;;  %5892 = vmatprep.subr.bf16.mxu0 %v12816_v24  ;;  %v11599_v35 = vld [vmem:[%s13358_s6 + $0x51] sm:$0xff] }
 0x259   : > { %6029 = vmatprep.subr.bf16.mxu1 %v12819_v38  ;;  %v11630_v24 = vld [vmem:[%s13358_s6 + $0x52] sm:$0xff]  ;;  %v6458_v38 = vrot.slane %v6456_v56, 1  ;;  %v6711_v56 = vld [vmem:[#allocation2 + $0x8] sm:$0xfc] }
 0x25b   : > { %5893 = vmatpush1.bf16.msra.mxu0 %v12814_v30  ;;  %v6454_v30 = vshrl.u32 %v6410_v44, 16  ;;  %v12901_v44 = vld [vmem:[#allocation3 + $0x48] sm:$0xff]  }
 0x25c   : > { %6030 = vmatpush1.bf16.msra.mxu1 %v12817_v47  ;;  %5894 = vmatprep.subr.bf16.mxu0 %v12822_v50  ;;  %v6461_v47 = vshll.u32 %v6412_v43, 16  ;;  %v12878_v50 = vld [vmem:[#allocation3 + $0xa0] sm:$0xff]  }
 0x25d   : > { %6031 = vmatprep.subr.bf16.mxu1 %v12825_v59  ;;  %v13168_v59 = vld [vmem:[%s13358_s6 + $0x49] sm:$0xff] }
 0x25f   : > { %5895 = vmatpush1.bf16.msra.mxu0 %v12820_v26  ;;  %v6070_v26 = vpack.c.bf16 %v11599_v35, %v13168_v59  ;;  %v12903_v35 = vld [vmem:[#allocation3 + $0x40] sm:$0xff]  }
 0x260   : > { %6032 = vmatpush1.bf16.msra.mxu1 %v12823_v27  ;;  %5896 = vmatprep.subr.bf16.mxu0 %v12828_v22  ;;  %v13169_v27 = vld [vmem:[%s13358_s6 + $0x4a] sm:$0xff] }
 0x261   : > { %6033 = vmatprep.subr.bf16.mxu1 %v12831_v39  ;;  %v6207_v22 = vpack.c.bf16 %v11630_v24, %v13169_v27  ;;  %v6459_v39 = vor.u32 %v6458_v38, %v6454_v30 }
 0x263   : > { %5897 = vmatpush1.bf16.msra.mxu0 %v12826_v60  ;;  %v6463_v60 = vrot.slane %v6461_v47, 1 }
 0x264   : > { %6034 = vmatpush1.bf16.msra.mxu1 %v12829_v31  ;;  %5898 = vmatprep.subr.bf16.mxu0 %v12834_v54  ;;  %v12879_v31 = vld [vmem:[#allocation3 + $0x38] sm:$0xff]  }
 0x265   : > { %6035 = vmatprep.subr.bf16.mxu1 %v12837_v0  ;;  %v6464_v54 = vsel %vm6440_vm7, %v6459_v39, %v6463_v60  ;;  %v6378_v0 = vpack.c.bf16 %v15485_v18, %v6374_v11  ;;  %v6373_v39 = vld [vmem:[#allocation2] sm:$0xff]  ;;  %v12905_v60 = vld [vmem:[#allocation3 + $0x170] sm:$0xff]  }
 0x267   : > { %5899 = vmatpush1.bf16.msra.mxu0 %v12832_v61  ;;  %v12881_v61 = vld [vmem:[#allocation3 + $0x30] sm:$0xff]  }
 0x268   : > { %6036 = vmatpush1.bf16.msra.mxu1 %v12835_v62  ;;  %11627 = vmatprep.subr.msk.bf16.mxu0 %vm363_vm0, %v11626_v51  ;;  %v12882_v62 = vld [vmem:[#allocation3 + $0x90] sm:$0xff]   ;;  %v12888_v51 = vld [vmem:[#allocation3 + $0x78] sm:$0xff]  }
 0x269   : > { %11658 = vmatprep.subr.msk.bf16.mxu1 %vm363_vm0, %v11657_v40  ;;  %v12889_v40 = vld [vmem:[#allocation3 + $0x10] sm:$0xff]  }
 0x26a   : > { %11566 = vmatmul.mubr.msk.bf16.vlgmr.msra.gmra.mxu0 %vm359_vm1, %v5796_v28  ;;  %v12892_v28 = vld [vmem:[#allocation3 + $0x68] sm:$0xff]  }
 0x26b   : > { %11597 = vmatmul.mubr.msk.bf16.vlgmr.msra.gmra.mxu1 %vm359_vm1, %v5933_v15  ;;  %6161 = vmatpush1.bf16.msra.mxu0 %v6153_v9  ;;  %v12890_v9 = vld [vmem:[#allocation3 + $0x70] sm:$0xff]   ;;  %v12894_v15 = vld [vmem:[#allocation3 + $0xc8] sm:$0xff]  }
 0x26c   : > { %6298 = vmatpush1.bf16.msra.mxu1 %v6290_v20  ;;  %6162 = vmatprep.subr.bf16.mxu0 %v12844_v53  ;;  %v12891_v20 = vld [vmem:[#allocation3 + $0x8] sm:$0xff]   ;;  %v12895_v53 = vld [vmem:[#allocation3 + $0x60] sm:$0xff]  }
 0x26d   : > { %6299 = vmatprep.subr.bf16.mxu1 %v12847_v45  ;;  %6190 = vmatprep.mubr.bf16.mxu0 %v16242_v19  ;;  %v15558_v45 = vld [vmem:[#allocation2 + $0x10] sm:$0xff] }
 0x26e   : > { %6327 = vmatprep.mubr.bf16.mxu1 %v16242_v19 }
 0x26f   : > { %6163 = vmatpush1.bf16.msra.mxu0 %v12842_v23  ;;  %v12896_v23 = vld [vmem:[#allocation3 + $0xc0] sm:$0xff]  }
 0x270   : > { %6300 = vmatpush1.bf16.msra.mxu1 %v12845_v3  ;;  %6164 = vmatprep.subr.bf16.mxu0 %v12850_v63  ;;  %v12897_v3 = vld [vmem:[#allocation3 + $0x58] sm:$0xff]   ;;  %v6405_v63 = vld [vmem:[#allocation2] sm:$0xfe] }
 0x271   : > { %6301 = vmatprep.subr.bf16.mxu1 %v12853_v48  ;;  %v6409_v48 = vpack.c.bf16 %v15558_v45, %v6405_v63 }
 0x273   : > { %6165 = vmatpush1.bf16.msra.mxu0 %v12848_v1  ;;  %v6884_v1 = vld [vmem:[#allocation2 + $0x28] sm:$0x7] }
 0x274   : > { %6302 = vmatpush1.bf16.msra.mxu1 %v12851_v12  ;;  %6166 = vmatprep.subr.bf16.mxu0 %v12856_v32  ;;  %v12898_v12 = vld [vmem:[#allocation3 + $0xb8] sm:$0xff]   ;;  %v6882_v32 = vld [vmem:[#allocation2 + $0x8] sm:$0xf8] }
 0x275   : > { %6303 = vmatprep.subr.bf16.mxu1 %v12859_v52  ;;  %v12899_v52 = vld [vmem:[#allocation3 + $0x50] sm:$0xff]  }
 0x277   : > { %6167 = vmatpush1.bf16.msra.mxu0 %v12854_v25  ;;  %v6407_v25 = vld [vmem:[#allocation2 + $0x20] sm:$0x1] }
 0x278   : > { %6304 = vmatpush1.bf16.msra.mxu1 %v12857_v10  ;;  %6168 = vmatprep.subr.bf16.mxu0 %v12862_v8  ;;  %v6886_v10 = vpack.c.bf16 %v15485_v18, %v6882_v32  ;;  %v6888_v8 = vpack.c.bf16 %v6884_v1, %v6884_v1  ;;  %v12914_v1 = vld [vmem:[#allocation3 + $0xe0] sm:$0xff]  }
 0x279   : > { %6305 = vmatprep.subr.bf16.mxu1 %v12865_v57  ;;  %v6444_v57 = vshll.u32 %v6409_v48, 16 }
 0x27a   : > { %v6943_v34 = vshrl.u32 %v6888_v8, 16 }
 0x27b   : > { %6169 = vmatpush1.bf16.msra.mxu0 %v12860_v16  ;;  %v6411_v16 = vpack.c.bf16 %v6407_v25, %v6407_v25  ;;  %v12916_v25 = vld [vmem:[#allocation3 + $0xd8] sm:$0xff]  }
 0x27c   : > { %6306 = vmatpush1.bf16.msra.mxu1 %v12863_v14  ;;  %6170 = vmatprep.subr.bf16.mxu0 %v12868_v42  ;;  %v6713_v14 = vld [vmem:[#allocation2 + $0x28] sm:$0x3]  ;;  %v6935_v42 = vshrl.u32 %v6886_v10, 16  ;;  %v6945_v30 = vrot.slane %v6943_v34, 1  ;;  %v12920_v34 = vld [vmem:[#allocation3 + $0x130] sm:$0xff]  }
 0x27d   : > { %6307 = vmatprep.subr.bf16.mxu1 %v12871_v7  ;;  %v6938_v7 = vshll.u32 %v6886_v10, 16  ;;  %v6449_v43 = vshll.u32 %v6411_v16, 16 }
 0x27e   : > { %v6937_v24 = vrot.slane %v6935_v42, 1 }
 0x27f   : > { %6171 = vmatpush1.bf16.msra.mxu0 %v12866_v55  ;;  %v6946_v55 = vshll.u32 %v6888_v8, 16  ;;  %v6940_v38 = vrot.slane %v6938_v7, 2  ;;  %v6451_v59 = vrot.slane %v6449_v43, 1  ;;  %v12923_v43 = vld [vmem:[#allocation3 + $0x190] sm:$0xff]  }
 0x280   : > { %6308 = vmatpush1.bf16.msra.mxu1 %v12869_v4  ;;  %6172 = vmatprep.subr.bf16.mxu0 %v12874_v37  ;;  %v6446_v4 = vrot.slane %v6444_v57, 1  ;;  %v12902_v37 = vld [vmem:[#allocation3 + $0xa8] sm:$0xff]   ;;  %v12917_v57 = vld [vmem:[#allocation3 + $0x140] sm:$0xff]  }
 0x281   : > { %6309 = vmatprep.subr.bf16.mxu1 %v12877_v58  ;;  %v6442_v58 = vshrl.u32 %v6409_v48, 16  ;;  %v6948_v47 = vrot.slane %v6946_v55, 2  ;;  %v12913_v48 = vld [vmem:[#allocation3 + $0x150] sm:$0xff]   ;;  %v12921_v55 = vld [vmem:[#allocation3 + $0x198] sm:$0xff]  }
 0x283   : > { %6173 = vmatpush1.bf16.msra.mxu0 %v12872_v49  ;;  %v6715_v49 = vpack.c.bf16 %v15485_v18, %v6711_v56  ;;  %v6949_v11 = vor.u32 %v6948_v47, %v6945_v30  ;;  %v12924_v47 = vld [vmem:[#allocation3 + $0x120] sm:$0xff]  }
 0x284   : > { %6310 = vmatpush1.bf16.msra.mxu1 %v12875_v2  ;;  %6547 = vmatprep.subr.bf16.mxu0 %v16242_v19  ;;  %v6717_v2 = vpack.c.bf16 %v6713_v14, %v6713_v14 }
 0x285   : > { %6669 = vmatprep.subr.bf16.mxu1 %v16242_v19  ;;  %v6753_v27 = vrot.slane %v6715_v49, 1  ;;  %v6881_v49 = vld [vmem:[#allocation2] sm:$0xf8] }
 0x286   : > { %11628 = vmatmul.mubr.msk.bf16.vlgmr.msra.gmra.mxu0 %vm359_vm1, %v6070_v26  ;;  %v12904_v26 = vld [vmem:[#allocation3 + $0x108] sm:$0xff]  }
 0x287   : > { %11659 = vmatmul.mubr.msk.bf16.vlgmr.msra.gmra.mxu1 %vm359_vm1, %v6207_v22  ;;  %6548 = vmatpush1.bf16.msra.mxu0 %v12878_v50  ;;  %v6447_v50 = vor.u32 %v6446_v4, %v6442_v58  ;;  %v6754_v22 = vrot.slane %v6717_v2, 1  ;;  %v6883_v58 = vld [vmem:[#allocation2 + $0x20] sm:$0x7]  ;;  %v7250_v2 = vld [vmem:[#allocation2 + $0x28] sm:$0x1f] }
 0x288   : > { %11673 = vmatprep.mubr.msk.bf16.mxu0 %vm244_vm2, %v6464_v54  ;;  %6670 = vmatpush1.bf16.msra.mxu1 %v12879_v31  ;;  %v6941_v31 = vor.u32 %v6940_v38, %v6937_v24  ;;  %v6377_v54 = vpack.c.bf16 %v15558_v45, %v6373_v39  ;;  %v6885_v38 = vpack.c.bf16 %v15558_v45, %v6881_v49 }
 0x289   : > { %11687 = vmatprep.mubr.msk.bf16.mxu1 %vm244_vm2, %v6378_v0  ;;  %6549 = vmatprep.subr.bf16.mxu0 %v16242_v19  ;;  %v15575_v0 = vpop.f32.mrf.mxu0  ;;  %v6887_v30 = vpack.c.bf16 %v6883_v58, %v6883_v58 }
 0x28a   : > { %6671 = vmatprep.subr.bf16.mxu1 %v16242_v19 }
 0x28b   : > { %6550 = vmatpush1.bf16.msra.mxu0 %v12880_v5  ;;  %v6452_v5 = vsel %vm6440_vm7, %v6447_v50, %v6451_v59  ;;  %v7248_v50 = vld [vmem:[#allocation2 + $0x8] sm:$0xe0] }
 0x28c   : > { %6672 = vmatpush1.bf16.msra.mxu1 %v12881_v61  ;;  %6551 = vmatprep.subr.bf16.mxu0 %v16242_v19  ;;  %v15577_v61 = vpop.f32.mrf.mxu1  ;;  %v12925_v59 = vld [vmem:[#allocation3 + $0x188] sm:$0xff]  }
 0x28d   : > { %6673 = vmatprep.subr.bf16.mxu1 %v16242_v19 }
 0x28f   : > { %6552 = vmatpush1.bf16.msra.mxu0 %v12882_v62  ;;  %v6755_v62 = vsel %vm6749_vm8, %v6753_v27, %v6754_v22  ;;  %v7254_v27 = vpack.c.bf16 %v7250_v2, %v7250_v2  ;;  %v12929_v2 = vld [vmem:[#allocation3 + $0x178] sm:$0xff]  }
 0x290   : > { %6674 = vmatpush1.bf16.msra.mxu1 %v12883_v17  ;;  %6553 = vmatprep.subr.bf16.mxu0 %v16242_v19  ;;  %v12906_v17 = vld [vmem:[#allocation3 + $0x100] sm:$0xff]  }
 0x291   : > { %6675 = vmatprep.subr.bf16.mxu1 %v16242_v19 }
 0x293   : > { %6554 = vmatpush1.bf16.msra.mxu0 %v12884_v36  ;;  %v6950_v36 = vsel %vm6916_vm9, %v6941_v31, %v6949_v11  ;;  %v6918_v31 = vshrl.u32 %v6885_v38, 16  ;;  %v6921_v11 = vshll.u32 %v6885_v38, 16 }
 0x294   : > { %6676 = vmatpush1.bf16.msra.mxu1 %v12885_v33  ;;  %6555 = vmatprep.subr.bf16.mxu0 %v16242_v19  ;;  %v12907_v33 = vld [vmem:[#allocation3 + $0x168] sm:$0xff]  }
 0x295   : > { %6677 = vmatprep.subr.bf16.mxu1 %v16242_v19 }
 0x297   : > { %6556 = vmatpush1.bf16.msra.mxu0 %v12886_v29  ;;  %v15584_v29 = vpop.f32.mrf.mxu0 }
 0x298   : > { %6678 = vmatpush1.bf16.msra.mxu1 %v12887_v21  ;;  %6557 = vmatprep.subr.bf16.mxu0 %v16242_v19  ;;  %v15586_v21 = vpop.f32.mrf.mxu1 }
 0x299   : > { %6679 = vmatprep.subr.bf16.mxu1 %v16242_v19 }
 0x29b   : > { %6558 = vmatpush1.bf16.msra.mxu0 %v12888_v51  ;;  %v12908_v51 = vld [vmem:[#allocation3 + $0xf8] sm:$0xff]  }
 0x29c   : > { %6680 = vmatpush1.bf16.msra.mxu1 %v12889_v40  ;;  %6559 = vmatprep.subr.bf16.mxu0 %v16242_v19  ;;  %v12909_v40 = vld [vmem:[#allocation3 + $0x160] sm:$0xff]  }
 0x29d   : > { %6681 = vmatprep.subr.bf16.mxu1 %v16242_v19 }
 0x29f   : > { %6560 = vmatpush1.bf16.msra.mxu0 %v12890_v9  ;;  %v15591_v9 = vpop.f32.mrf.mxu0 }
 0x2a0   : > { %6682 = vmatpush1.bf16.msra.mxu1 %v12891_v20  ;;  %6561 = vmatprep.subr.bf16.mxu0 %v16242_v19  ;;  %v15593_v20 = vpop.f32.mrf.mxu1 }
 0x2a1   : > { %6683 = vmatprep.subr.bf16.mxu1 %v16242_v19 }
 0x2a3   : > { %6562 = vmatpush1.bf16.msra.mxu0 %v12892_v28  ;;  %v12910_v28 = vld [vmem:[#allocation3 + $0xf0] sm:$0xff]  }
 0x2a4   : > { %6684 = vmatpush1.bf16.msra.mxu1 %v12893_v6  ;;  %6569 = vmatprep.subr.bf16.mxu0 %v16242_v19  ;;  %v12911_v6 = vld [vmem:[#allocation3 + $0x158] sm:$0xff]  }
 0x2a5   : > { %6691 = vmatprep.subr.bf16.mxu1 %v16242_v19 }
 0x2a7   : > { %6570 = vmatpush2.bf16.msra.mxu0 %v12894_v15  ;;  %v15597_v15 = vpop.f32.mrf.mxu0 }
 0x2a8   : > { %6692 = vmatpush2.bf16.msra.mxu1 %v12895_v53  ;;  %6571 = vmatprep.subr.bf16.mxu0 %v16242_v19  ;;  %v15599_v53 = vpop.f32.mrf.mxu1 }
 0x2a9   : > { %6693 = vmatprep.subr.bf16.mxu1 %v16242_v19 }
 0x2aa   : > { %v15603_v63 = vpop.f32.mrf.mxu1 }
 0x2ab   : > { %6572 = vmatpush2.bf16.msra.mxu0 %v12896_v23  ;;  %v12912_v23 = vld [vmem:[#allocation3 + $0xe8] sm:$0xff]  }
 0x2ac   : > { %6694 = vmatpush2.bf16.msra.mxu1 %v12897_v3  ;;  %6573 = vmatprep.subr.bf16.mxu0 %v16242_v19  ;;  %v15601_v3 = vpop.f32.mrf.mxu0  ;;  %v15609_v32 = vpop.f32.mrf.mxu1 }
 0x2ad   : > { %6695 = vmatprep.subr.bf16.mxu1 %v16242_v19 }
 0x2ae   : > { %v15615_v8 = vpop.f32.mrf.mxu1 }
 0x2af   : > { %6574 = vmatpush2.bf16.msra.mxu0 %v12898_v12  ;;  %v15607_v12 = vpop.f32.mrf.mxu0 }
 0x2b0   : > { %6696 = vmatpush2.bf16.msra.mxu1 %v12899_v52  ;;  %6575 = vmatprep.subr.bf16.mxu0 %v16242_v19  ;;  %v12915_v52 = vld [vmem:[#allocation3 + $0x148] sm:$0xff]   ;;  %v15621_v14 = vpop.f32.mrf.mxu1 }
 0x2b1   : > { %6697 = vmatprep.subr.bf16.mxu1 %v16242_v19  ;;  %v15613_v10 = vpop.f32.mrf.mxu0 }
 0x2b2   : > { %v15627_v7 = vpop.f32.mrf.mxu1 }
 0x2b3   : > { %6576 = vmatpush2.bf16.msra.mxu0 %v12900_v13  ;;  %v12918_v13 = vld [vmem:[#allocation3 + $0xd0] sm:$0xff]   ;;  %v15619_v16 = vpop.f32.mrf.mxu0 }
 0x2b4   : > { %6698 = vmatpush2.bf16.msra.mxu1 %v12901_v44  ;;  %6577 = vmatprep.subr.bf16.mxu0 %v16242_v19  ;;  %v12919_v44 = vld [vmem:[#allocation3 + $0x138] sm:$0xff]   ;;  %v15633_v56 = vpop.f32.mrf.mxu1 }
 0x2b5   : > { %6699 = vmatprep.subr.bf16.mxu1 %v16242_v19  ;;  %v15625_v42 = vpop.f32.mrf.mxu0 }
 0x2b6   : > { %v15639_v24 = vpop.f32.mrf.mxu1 }
 0x2b7   : > { %6578 = vmatpush2.bf16.msra.mxu0 %v12902_v37  ;;  %v15631_v4 = vpop.f32.mrf.mxu0  ;;  %v12922_v37 = vld [vmem:[#allocation3 + $0x128] sm:$0xff]  }
 0x2b8   : > { %6700 = vmatpush2.bf16.msra.mxu1 %v12903_v35  ;;  %6838 = vmatprep.subr.bf16.mxu0 %v16242_v19  ;;  %v15647_v39 = vpop.f32.mrf.mxu1 }
 0x2b9   : > { %7033 = vmatprep.subr.bf16.mxu1 %v16242_v19  ;;  %v15637_v35 = vpop.f32.mrf.mxu0 }
 0x2ba   : > { %6580 = vmatmul.mubr.bf16.vlgmr.msra.gmra.mxu0 %v6452_v5  ;;  %v6926_v5 = vshrl.u32 %v6887_v30, 16 }
 0x2bb   : > { %6702 = vmatmul.mubr.bf16.vlgmr.msra.gmra.mxu1 %v6377_v54  ;;  %6839 = vmatpush1.bf16.msra.mxu0 %v12904_v26  ;;  %v7252_v26 = vpack.c.bf16 %v15485_v18, %v7248_v50  ;;  %v15645_v22 = vpop.f32.mrf.mxu0  ;;  %v6929_v54 = vshll.u32 %v6887_v30, 16 }
 0x2bc   : > { %11701 = vmatprep.mubr.msk.bf16.mxu0 %vm244_vm2, %v6755_v62  ;;  %7034 = vmatpush1.bf16.msra.mxu1 %v12905_v60  ;;  %v6712_v60 = vld [vmem:[#allocation2 + $0x20] sm:$0x3]  ;;  %v12926_v62 = vld [vmem:[#allocation3 + $0x118] sm:$0xff]  }
 0x2bd   : > { %11715 = vmatprep.mubr.msk.bf16.mxu1 %vm244_vm2, %v6950_v36  ;;  %6840 = vmatprep.subr.bf16.mxu0 %v16242_v19  ;;  %v7079_v36 = vld [vmem:[#allocation2 + $0x28] sm:$0xf] }
 0x2be   : > { %7035 = vmatprep.subr.bf16.mxu1 %v16242_v19  ;;  %v7083_v58 = vpack.c.bf16 %v7079_v36, %v7079_v36 }
 0x2bf   : > { %6841 = vmatpush1.bf16.msra.mxu0 %v12906_v17  ;;  %v6710_v17 = vld [vmem:[#allocation2] sm:$0xfc] }
 0x2c0   : > { %7036 = vmatpush1.bf16.msra.mxu1 %v12907_v33  ;;  %6842 = vmatprep.subr.bf16.mxu0 %v16242_v19  ;;  %v15649_v33 = vpop.f32.mrf.mxu0 }
 0x2c1   : > { %7037 = vmatprep.subr.bf16.mxu1 %v16242_v19 }
 0x2c3   : > { %6843 = vmatpush1.bf16.msra.mxu0 %v12908_v51  ;;  %v15651_v51 = vpop.f32.mrf.mxu1 }
 0x2c4   : > { %7038 = vmatpush1.bf16.msra.mxu1 %v12909_v40  ;;  %6844 = vmatprep.subr.bf16.mxu0 %v16242_v19  ;;  %v12927_v40 = vld [vmem:[#allocation3 + $0x180] sm:$0xff]  }
 0x2c5   : > { %7039 = vmatprep.subr.bf16.mxu1 %v16242_v19  ;;  %v15659_v49 = vpop.f32.mrf.mxu1 }
 0x2c7   : > { %6845 = vmatpush1.bf16.msra.mxu0 %v12910_v28  ;;  %v7301_v28 = vshrl.u32 %v7252_v26, 16 }
 0x2c8   : > { %7040 = vmatpush1.bf16.msra.mxu1 %v12911_v6  ;;  %6846 = vmatprep.subr.bf16.mxu0 %v16242_v19  ;;  %v7304_v6 = vshll.u32 %v7252_v26, 16 }
 0x2c9   : > { %7041 = vmatprep.subr.bf16.mxu1 %v16242_v19  ;;  %v7303_v38 = vrot.slane %v7301_v28, 2 }
 0x2ca   : > { %v7306_v30 = vrot.slane %v7304_v6, 3 }
 0x2cb   : > { %6847 = vmatpush1.bf16.msra.mxu0 %v12912_v23  ;;  %v7309_v23 = vshrl.u32 %v7254_v27, 16 }
 0x2cc   : > { %7042 = vmatpush1.bf16.msra.mxu1 %v12913_v48  ;;  %6848 = vmatprep.subr.bf16.mxu0 %v16242_v19  ;;  %v7312_v48 = vshll.u32 %v7254_v27, 16 }
 0x2cd   : > { %7043 = vmatprep.subr.bf16.mxu1 %v16242_v19 }
 0x2ce   : > { %v7314_v50 = vrot.slane %v7312_v48, 3 }
 0x2cf   : > { %6849 = vmatpush1.bf16.msra.mxu0 %v12914_v1  ;;  %v6714_v1 = vpack.c.bf16 %v15558_v45, %v6710_v17  ;;  %v7307_v17 = vor.u32 %v7306_v30, %v7303_v38 }
 0x2d0   : > { %7044 = vmatpush1.bf16.msra.mxu1 %v12915_v52  ;;  %6850 = vmatprep.subr.bf16.mxu0 %v16242_v19  ;;  %v6716_v52 = vpack.c.bf16 %v6712_v60, %v6712_v60 }
 0x2d1   : > { %7045 = vmatprep.subr.bf16.mxu1 %v16242_v19 }
 0x2d2   : > { %v6751_v26 = vrot.slane %v6716_v52, 1 }
 0x2d3   : > { %6851 = vmatpush1.bf16.msra.mxu0 %v12916_v25  ;;  %v6920_v25 = vrot.slane %v6918_v31, 1 }
 0x2d4   : > { %7046 = vmatpush1.bf16.msra.mxu1 %v12917_v57  ;;  %6852 = vmatprep.subr.bf16.mxu0 %v16242_v19  ;;  %v6923_v57 = vrot.slane %v6921_v11, 2  ;;  %v7120_v11 = vrot.slane %v7083_v58, 2  ;;  %v12936_v58 = vld [vmem:[#allocation3 + $0x1c0] sm:$0xff]  }
 0x2d5   : > { %7047 = vmatprep.subr.bf16.mxu1 %v16242_v19 }
 0x2d6   : > { %v6924_v27 = vor.u32 %v6923_v57, %v6920_v25  ;;  %v12933_v25 = vld [vmem:[#allocation3 + $0x238] sm:$0xff]  }
 0x2d7   : > { %6853 = vmatpush1.bf16.msra.mxu0 %v12918_v13  ;;  %v6928_v13 = vrot.slane %v6926_v5, 1 }
 0x2d8   : > { %7048 = vmatpush1.bf16.msra.mxu1 %v12919_v44  ;;  %6860 = vmatprep.subr.bf16.mxu0 %v16242_v19  ;;  %v6931_v44 = vrot.slane %v6929_v54, 2  ;;  %v15665_v54 = vpop.f32.mrf.mxu1 }
 0x2d9   : > { %7055 = vmatprep.subr.bf16.mxu1 %v16242_v19 }
 0x2da   : > { %v6932_v60 = vor.u32 %v6931_v44, %v6928_v13  ;;  %v12934_v44 = vld [vmem:[#allocation3 + $0x1c8] sm:$0xff]  }
 0x2db   : > { %6861 = vmatpush2.bf16.msra.mxu0 %v12920_v34  ;;  %v7077_v34 = vld [vmem:[#allocation2 + $0x8] sm:$0xf0] }
 0x2dc   : > { %7056 = vmatpush2.bf16.msra.mxu1 %v12921_v55  ;;  %6862 = vmatprep.subr.bf16.mxu0 %v16242_v19  ;;  %v12928_v55 = vld [vmem:[#allocation3 + $0x110] sm:$0xff]   ;;  %v6933_v28 = vsel %vm6916_vm9, %v6924_v27, %v6932_v60 }
 0x2dd   : > { %7057 = vmatprep.subr.bf16.mxu1 %v16242_v19  ;;  %v12940_v27 = vld [vmem:[#allocation3 + $0x1b0] sm:$0xff]  }
 0x2df   : > { %6863 = vmatpush2.bf16.msra.mxu0 %v12922_v37  ;;  %v7081_v37 = vpack.c.bf16 %v15485_v18, %v7077_v34  ;;  %v12930_v18 = vld [vmem:[#allocation3 + $0x1d8] sm:$0xff]   ;;  %v12935_v34 = vld [vmem:[#allocation3 + $0x230] sm:$0xff]  }
 0x2e0   : > { %7058 = vmatpush2.bf16.msra.mxu1 %v12923_v43  ;;  %6864 = vmatprep.subr.bf16.mxu0 %v16242_v19  ;;  %v15657_v43 = vpop.f32.mrf.mxu0 }
 0x2e1   : > { %7059 = vmatprep.subr.bf16.mxu1 %v16242_v19  ;;  %v7119_v31 = vrot.slane %v7081_v37, 2 }
 0x2e2   : > { %v15663_v5 = vpop.f32.mrf.mxu0 }
 0x2e3   : > { %6865 = vmatpush2.bf16.msra.mxu0 %v12924_v47  ;;  %v7311_v47 = vrot.slane %v7309_v23, 2  ;;  %v7121_v6 = vsel %vm7115_vm10, %v7119_v31, %v7120_v11  ;;  %v12932_v23 = vld [vmem:[#allocation3 + $0x1d0] sm:$0xff]   ;;  %v12941_v31 = vld [vmem:[#allocation3 + $0x218] sm:$0xff]   ;;  %v12942_v11 = vld [vmem:[#allocation3 + $0x1a8] sm:$0xff]  }
 0x2e4   : > { %7060 = vmatpush2.bf16.msra.mxu1 %v12925_v59  ;;  %6866 = vmatprep.subr.bf16.mxu0 %v16242_v19  ;;  %v6750_v59 = vrot.slane %v6714_v1, 1  ;;  %v15672_v48 = vpop.f32.mrf.mxu0  ;;  %v15674_v1 = vpop.f32.mrf.mxu1 }
 0x2e5   : > { %7061 = vmatprep.subr.bf16.mxu1 %v16242_v19  ;;  %v7315_v36 = vor.u32 %v7314_v50, %v7311_v47  ;;  %v12938_v47 = vld [vmem:[#allocation3 + $0x1b8] sm:$0xff]   ;;  %v12939_v50 = vld [vmem:[#allocation3 + $0x220] sm:$0xff]  }
 0x2e6   : > { %v15680_v57 = vpop.f32.mrf.mxu0  ;;  %v15682_v13 = vpop.f32.mrf.mxu1 }
 0x2e7   : > { %6867 = vmatpush2.bf16.msra.mxu0 %v12926_v62  ;;  %v12931_v62 = vld [vmem:[#allocation3 + $0x240] sm:$0xff]   ;;  %v7316_v52 = vsel %vm7282_vm11, %v7307_v17, %v7315_v36  ;;  %v12943_v36 = vld [vmem:[#allocation3 + $0x210] sm:$0xff]  }
 0x2e8   : > { %7062 = vmatpush2.bf16.msra.mxu1 %v12927_v40  ;;  %6868 = vmatprep.subr.bf16.mxu0 %v16242_v19  ;;  %v6752_v40 = vsel %vm6749_vm8, %v6750_v59, %v6751_v26  ;;  %v15689_v37 = vpop.f32.mrf.mxu1 }
 0x2e9   : > { %7063 = vmatprep.subr.bf16.mxu1 %v16242_v19 }
 0x2ea   : > { %v15695_v30 = vpop.f32.mrf.mxu1 }
 0x2eb   : > { %6869 = vmatpush2.bf16.msra.mxu0 %v12928_v55  ;;  %v15687_v55 = vpop.f32.mrf.mxu0 }
 0x2ec   : > { %7064 = vmatpush2.bf16.msra.mxu1 %v12929_v2  ;;  %7204 = vmatprep.subr.bf16.mxu0 %v16242_v19  ;;  %v12937_v2 = vld [vmem:[#allocation3 + $0x228] sm:$0xff]   ;;  %v15701_v26 = vpop.f32.mrf.mxu1 }
 0x2ed   : > { %7399 = vmatprep.subr.bf16.mxu1 %v16242_v19  ;;  %v15693_v38 = vpop.f32.mrf.mxu0 }
 0x2ee   : > { %6871 = vmatmul.mubr.bf16.vlgmr.msra.gmra.mxu0 %v6752_v40  ;;  %v12944_v40 = vld [vmem:[#allocation3 + $0x1a0] sm:$0xff]  }
 0x2ef   : > { %7066 = vmatmul.mubr.bf16.vlgmr.msra.gmra.mxu1 %v6933_v28  ;;  %7205 = vmatpush1.bf16.msra.mxu0 %v12930_v18  ;;  %v15699_v59 = vpop.f32.mrf.mxu0  ;;  %v15705_v18 = vpop.f32.mrf.mxu1 }
 0x2f0   : > { %11729 = vmatprep.mubr.msk.bf16.mxu0 %vm244_vm2, %v7121_v6  ;;  %7400 = vmatpush1.bf16.msra.mxu1 %v12931_v62 }
 0x2f1   : > { %11743 = vmatprep.mubr.msk.bf16.mxu1 %vm244_vm2, %v7316_v52  ;;  %7206 = vmatprep.subr.bf16.mxu0 %v16242_v19  ;;  %v15703_v60 = vpop.f32.mrf.mxu0  ;;  %v15711_v17 = vpop.f32.mrf.mxu1  ;;  %v12946_v52 = vld [vmem:[#allocation3 + $0x200] sm:$0xff]  }
 0x2f2   : > { %7401 = vmatprep.subr.bf16.mxu1 %v16242_v19 }
 0x2f3   : > { %7207 = vmatpush1.bf16.msra.mxu0 %v12932_v23  ;;  %v15709_v62 = vpop.f32.mrf.mxu0  ;;  %v15717_v6 = vpop.f32.mrf.mxu1  ;;  %v12945_v23 = vld [vmem:[#allocation3 + $0x208] sm:$0xff]  }
 0x2f4   : > { %7402 = vmatpush1.bf16.msra.mxu1 %v12933_v25  ;;  %7208 = vmatprep.subr.bf16.mxu0 %v16242_v19  ;;  %16249 = vst [vmem:[#allocation6_spill] sm:$0xff] %v15717_v6 }
 0x2f5   : > { %7403 = vmatprep.subr.bf16.mxu1 %v16242_v19  ;;  %v15715_v28 = vpop.f32.mrf.mxu0 }
 0x2f7   : > { %7209 = vmatpush1.bf16.msra.mxu0 %v12934_v44  ;;  %v15721_v25 = vpop.f32.mrf.mxu0  ;;  %v15723_v44 = vpop.f32.mrf.mxu1 }
 0x2f8   : > { %7404 = vmatpush1.bf16.msra.mxu1 %v12935_v34  ;;  %7210 = vmatprep.subr.bf16.mxu0 %v16242_v19  ;;  %16250 = vst [vmem:[#allocation8_spill] sm:$0xff] %v15723_v44  ;;  %v12947_v34 = vld [vmem:[#allocation3 + $0x268] sm:$0xff]   ;;  %v15747_v44 = vld [vmem:[#allocation2 + $0x18] sm:$0xff] }
 0x2f9   : > { %7405 = vmatprep.subr.bf16.mxu1 %v16242_v19 }
 0x2fb   : > { %7211 = vmatpush1.bf16.msra.mxu0 %v12936_v58  ;;  %v15727_v58 = vpop.f32.mrf.mxu0 }
 0x2fc   : > { %7406 = vmatpush1.bf16.msra.mxu1 %v12937_v2  ;;  %7212 = vmatprep.subr.bf16.mxu0 %v16242_v19  ;;  %16251 = vst [vmem:[#allocation10_spill] sm:$0xff] %v15727_v58  ;;  %v15729_v2 = vpop.f32.mrf.mxu1 }
 0x2fd   : > { %7407 = vmatprep.subr.bf16.mxu1 %v16242_v19  ;;  %16252 = vst [vmem:[#allocation11_spill] sm:$0xff] %v15729_v2  ;;  %v15738_v41 = vpop.f32.mrf.mxu0  ;;  %v7078_v2 = vld [vmem:[#allocation2 + $0x20] sm:$0xf] }
 0x2fe   : > { %16253 = vst [vmem:[#allocation12_spill] sm:$0xff] %v15738_v41  ;;  %v15740_v46 = vpop.f32.mrf.mxu1 }
 0x2ff   : > { %7213 = vmatpush1.bf16.msra.mxu0 %v12938_v47  ;;  %v3593_v47 = vadd.f32 %v15577_v61, %v15575_v0  ;;  %16254 = vst [vmem:[#allocation13_spill] sm:$0xff] %v15740_v46 }
 0x300   : > { %7408 = vmatpush1.bf16.msra.mxu1 %v12939_v50  ;;  %7214 = vmatprep.subr.bf16.mxu0 %v16242_v19  ;;  %v12948_v50 = vld [vmem:[#allocation3 + $0x1f8] sm:$0xff]  }
 0x301   : > { %7409 = vmatprep.subr.bf16.mxu1 %v16242_v19 }
 0x303   : > { %7215 = vmatpush1.bf16.msra.mxu0 %v12940_v27  ;;  %v7249_v27 = vld [vmem:[#allocation2 + $0x20] sm:$0x1f] }
 0x304   : > { %7410 = vmatpush1.bf16.msra.mxu1 %v12941_v31  ;;  %7216 = vmatprep.subr.bf16.mxu0 %v16242_v19  ;;  %v12949_v31 = vld [vmem:[#allocation3 + $0x260] sm:$0xff]   ;;  %v7253_v61 = vpack.c.bf16 %v7249_v27, %v7249_v27  ;;  %v3599_v27 = vadd.f32 %v15599_v53, %v15597_v15 }
 0x305   : > { %7411 = vmatprep.subr.bf16.mxu1 %v16242_v19 }
 0x306   : > { %v7292_v6 = vshrl.u32 %v7253_v61, 16  ;;  %v3737_v15 = vadd.f32 %v15619_v16, %v3599_v27 }
 0x307   : > { %7217 = vmatpush1.bf16.msra.mxu0 %v12942_v11  ;;  %v3595_v11 = vadd.f32 %v15586_v21, %v15584_v29  ;;  %v12950_v29 = vld [vmem:[#allocation3 + $0x1f0] sm:$0xff]   ;;  %v7614_v21 = vld [vmem:[#allocation2 + $0x8] sm:$0x80] }
 0x308   : > { %7412 = vmatpush1.bf16.msra.mxu1 %v12943_v36  ;;  %7218 = vmatprep.subr.bf16.mxu0 %v16242_v19  ;;  %v3734_v36 = vadd.f32 %v15601_v3, %v3593_v47  ;;  %v12951_v3 = vld [vmem:[#allocation3 + $0x258] sm:$0xff]   ;;  %v7076_v47 = vld [vmem:[#allocation2] sm:$0xf0]  ;;  %v7618_v46 = vpack.c.bf16 %v15747_v44, %v7614_v21  ;;  %v7295_v21 = vshll.u32 %v7253_v61, 16  ;;  %v7294_v27 = vrot.slane %v7292_v6, 2 }
 0x309   : > { %7413 = vmatprep.subr.bf16.mxu1 %v16242_v19 }
 0x30b   : > { %7219 = vmatpush1.bf16.msra.mxu0 %v12944_v40  ;;  %v7247_v40 = vld [vmem:[#allocation2] sm:$0xe0] }
 0x30c   : > { %7414 = vmatpush1.bf16.msra.mxu1 %v12945_v23  ;;  %7226 = vmatprep.subr.bf16.mxu0 %v16242_v19  ;;  %v7616_v23 = vld [vmem:[#allocation2 + $0x28] sm:$0x7f]  ;;  %v7251_v0 = vpack.c.bf16 %v15558_v45, %v7247_v40 }
 0x30d   : > { %7421 = vmatprep.subr.bf16.mxu1 %v16242_v19  ;;  %v7620_v40 = vpack.c.bf16 %v7616_v23, %v7616_v23  ;;  %v7445_v23 = vld [vmem:[#allocation2 + $0x28] sm:$0x3f] }
 0x30e   : > { %v7287_v41 = vshll.u32 %v7251_v0, 16 }
 0x30f   : > { %7227 = vmatpush2.bf16.msra.mxu0 %v12946_v52  ;;  %v3597_v52 = vadd.f32 %v15593_v20, %v15591_v9  ;;  %v3871_v9 = vadd.f32 %v15603_v63, %v3734_v36  ;;  %v12952_v63 = vld [vmem:[#allocation3 + $0x1e8] sm:$0xff]  }
 0x310   : > { %7422 = vmatpush2.bf16.msra.mxu1 %v12947_v34  ;;  %7228 = vmatprep.subr.bf16.mxu0 %v16242_v19  ;;  %v3735_v34 = vadd.f32 %v15607_v12, %v3595_v11  ;;  %v7080_v12 = vpack.c.bf16 %v15558_v45, %v7076_v47  ;;  %v7284_v11 = vshrl.u32 %v7251_v0, 16  ;;  %v7443_v36 = vld [vmem:[#allocation2 + $0x8] sm:$0xc0]  ;;  %v12953_v45 = vld [vmem:[#allocation3 + $0x250] sm:$0xff]   ;;  %v7670_v47 = vshll.u32 %v7618_v46, 16 }
 0x311   : > { %7423 = vmatprep.subr.bf16.mxu1 %v16242_v19  ;;  %v3736_v20 = vadd.f32 %v15613_v10, %v3597_v52  ;;  %v4008_v53 = vadd.f32 %v15625_v42, %v3871_v9  ;;  %v7082_v10 = vpack.c.bf16 %v7078_v2, %v7078_v2  ;;  %v7667_v52 = vshrl.u32 %v7618_v46, 16 }
 0x312   : > { %v3872_v58 = vadd.f32 %v15609_v32, %v3735_v34  ;;  %v7675_v0 = vshrl.u32 %v7620_v40, 16  ;;  %v7447_v16 = vpack.c.bf16 %v15747_v44, %v7443_v36  ;;  %v7449_v42 = vpack.c.bf16 %v7445_v23, %v7445_v23 }
 0x313   : > { %7229 = vmatpush2.bf16.msra.mxu0 %v12948_v50  ;;  %v15756_v50 = vpop.f32.mrf.mxu0  ;;  %v3873_v61 = vadd.f32 %v15615_v8, %v3736_v20  ;;  %v7297_v9 = vrot.slane %v7295_v21, 3  ;;  %v3874_v46 = vadd.f32 %v15621_v14, %v3737_v15  ;;  %v7672_v6 = vrot.slane %v7670_v47, 4  ;;  %v12956_v47 = vld [vmem:[#allocation3 + $0x2a8] sm:$0xff]  }
 0x314   : > { %7424 = vmatpush2.bf16.msra.mxu1 %v12949_v31  ;;  %7230 = vmatprep.subr.bf16.mxu0 %v16242_v19  ;;  %v15758_v31 = vpop.f32.mrf.mxu1  ;;  %v4009_v32 = vadd.f32 %v15631_v4, %v3872_v58  ;;  %v12954_v4 = vld [vmem:[#allocation3 + $0x1e0] sm:$0xff]   ;;  %v7116_v58 = vrot.slane %v7080_v12, 2  ;;  %v7677_v21 = vrot.slane %v7675_v0, 3  ;;  %v7117_v12 = vrot.slane %v7082_v10, 2 }
 0x315   : > { %7425 = vmatprep.subr.bf16.mxu1 %v16242_v19  ;;  %16255 = vst [vmem:[#allocation14_spill] sm:$0xff] %v15758_v31  ;;  %v7678_v31 = vshll.u32 %v7620_v40, 16  ;;  %v15768_v34 = vpop.f32.mrf.mxu0  ;;  %v4145_v40 = vadd.f32 %v15627_v7, %v4008_v53  ;;  %v4010_v8 = vadd.f32 %v15637_v35, %v3873_v61  ;;  %v4011_v7 = vadd.f32 %v15645_v22, %v3874_v46  ;;  %v12957_v22 = vld [vmem:[#allocation3 + $0x310] sm:$0xff]   ;;  %v12959_v46 = vld [vmem:[#allocation3 + $0x308] sm:$0xff]  }
 0x316   : > { %v15770_v2 = vpop.f32.mrf.mxu1  ;;  %v4146_v14 = vadd.f32 %v15633_v56, %v4009_v32  ;;  %v7298_v53 = vor.u32 %v7297_v9, %v7294_v27 }
 0x317   : > { %7231 = vmatpush2.bf16.msra.mxu0 %v12950_v29  ;;  %v7286_v29 = vrot.slane %v7284_v11, 2  ;;  %v15775_v20 = vpop.f32.mrf.mxu0  ;;  %v12955_v11 = vld [vmem:[#allocation3 + $0x248] sm:$0xff]   ;;  %v7680_v36 = vrot.slane %v7678_v31, 4  ;;  %v4282_v35 = vadd.f32 %v15649_v33, %v4145_v40  ;;  %v4147_v61 = vadd.f32 %v15639_v24, %v4010_v8 }
 0x318   : > { %7426 = vmatpush2.bf16.msra.mxu1 %v12951_v3  ;;  %7232 = vmatprep.subr.bf16.mxu0 %v16242_v19  ;;  %v7289_v3 = vrot.slane %v7287_v41, 3  ;;  %v15777_v23 = vpop.f32.mrf.mxu1  ;;  %v7669_v41 = vrot.slane %v7667_v52, 3  ;;  %v4283_v52 = vadd.f32 %v15657_v43, %v4146_v14  ;;  %v4148_v0 = vadd.f32 %v15647_v39, %v4011_v7  ;;  %v12958_v39 = vld [vmem:[#allocation3 + $0x2a0] sm:$0xff]   ;;  %v12963_v14 = vld [vmem:[#allocation3 + $0x2f8] sm:$0xff]  }
 0x319   : > { %7427 = vmatprep.subr.bf16.mxu1 %v16242_v19  ;;  %v15786_v31 = vpop.f32.mrf.mxu0  ;;  %v7681_v10 = vor.u32 %v7680_v36, %v7677_v21  ;;  %v4419_v32 = vadd.f32 %v15651_v51, %v4282_v35  ;;  %v4284_v24 = vadd.f32 %v15663_v5, %v4147_v61  ;;  %v7118_v43 = vsel %vm7115_vm10, %v7116_v58, %v7117_v12  ;;  %v12962_v36 = vld [vmem:[#allocation3 + $0x290] sm:$0xff]   ;;  %v16256_v12 = vld [vmem:[#allocation10_spill] sm:$0xff] }
 0x31a   : > { %v7290_v15 = vor.u32 %v7289_v3, %v7286_v29  ;;  %v15788_v56 = vpop.f32.mrf.mxu1  ;;  %v7673_v33 = vor.u32 %v7672_v6, %v7669_v41  ;;  %v4420_v29 = vadd.f32 %v15659_v49, %v4283_v52  ;;  %v4285_v3 = vadd.f32 %v15672_v48, %v4148_v0  ;;  %v12967_v0 = vld [vmem:[#allocation3 + $0x2e8] sm:$0xff]  }
 0x31b   : > { %7233 = vmatpush2.bf16.msra.mxu0 %v12952_v63  ;;  %v7485_v63 = vrot.slane %v7447_v16, 3  ;;  %v4556_v27 = vadd.f32 %v15680_v57, %v4419_v32  ;;  %v15801_v51 = vpop.f32.mrf.mxu0  ;;  %v4421_v49 = vadd.f32 %v15665_v54, %v4284_v24  ;;  %v12961_v54 = vld [vmem:[#allocation3 + $0x300] sm:$0xff]   ;;  %v16261_v32 = vld [vmem:[#allocation13_spill] sm:$0xff] }
 0x31c   : > { %7428 = vmatpush2.bf16.msra.mxu1 %v12953_v45  ;;  %7234 = vmatprep.subr.bf16.mxu0 %v16242_v19  ;;  %v7486_v45 = vrot.slane %v7449_v42, 3  ;;  %v7299_v16 = vsel %vm7282_vm11, %v7290_v15, %v7298_v53  ;;  %v15803_v5 = vpop.f32.mrf.mxu1  ;;  %v7682_v9 = vsel %vm7648_vm12, %v7673_v33, %v7681_v10  ;;  %v4557_v48 = vadd.f32 %v15687_v55, %v4420_v29  ;;  %v12964_v53 = vld [vmem:[#allocation3 + $0x288] sm:$0xff]   ;;  %v12966_v10 = vld [vmem:[#allocation3 + $0x280] sm:$0xff]  }
 0x31d   : > { %7429 = vmatprep.subr.bf16.mxu1 %v16242_v19  ;;  %v4422_v57 = vadd.f32 %v15674_v1, %v4285_v3  ;;  %v4693_v40 = vadd.f32 %v15682_v13, %v4556_v27  ;;  %v4558_v8 = vadd.f32 %v15693_v38, %v4421_v49  ;;  %v15815_v58 = vpop.f32.mrf.mxu0  ;;  %v16262_v3 = vld [vmem:[#allocation14_spill] sm:$0xff]  ;;  %v12969_v49 = vld [vmem:[#allocation3 + $0x2e0] sm:$0xff]  }
 0x31e   : > { %v7487_v42 = vsel %vm3314_vm5, %v7485_v63, %v7486_v45  ;;  %v4694_v55 = vadd.f32 %v15689_v37, %v4557_v48 }
 0x31f   : > { %7235 = vmatpush2.bf16.msra.mxu0 %v12954_v4  ;;  %v12960_v4 = vld [vmem:[#allocation3 + $0x298] sm:$0xff]   ;;  %v4559_v41 = vadd.f32 %v15699_v59, %v4422_v57  ;;  %v4830_v1 = vadd.f32 %v15703_v60, %v4693_v40  ;;  %v5644_v13 = vpop.f32.mrf.mxu0  ;;  %v4695_v6 = vadd.f32 %v15695_v30, %v4558_v8  ;;  %v12970_v8 = vld [vmem:[#allocation3 + $0x270] sm:$0xff]  }
 0x320   : > { %7430 = vmatpush2.bf16.msra.mxu1 %v12955_v11  ;;  %7570 = vmatprep.subr.bf16.mxu0 %v16242_v19  ;;  %v15817_v11 = vpop.f32.mrf.mxu1  ;;  %v4831_v21 = vadd.f32 %v15709_v62, %v4694_v55  ;;  %v12971_v55 = vld [vmem:[#allocation3 + $0x2d8] sm:$0xff]  }
 0x321   : > { %7765 = vmatprep.subr.bf16.mxu1 %v16242_v19  ;;  %v4696_v37 = vadd.f32 %v15701_v26, %v4559_v41  ;;  %v4968_v59 = vadd.f32 %v15705_v18, %v4830_v1  ;;  %v4832_v60 = vadd.f32 %v15715_v28, %v4695_v6  ;;  %v5646_v7 = vpop.f32.mrf.mxu0  ;;  %v12965_v26 = vld [vmem:[#allocation3 + $0x2f0] sm:$0xff]   ;;  %v16257_v18 = vld [vmem:[#allocation6_spill] sm:$0xff]  ;;  %v16258_v28 = vld [vmem:[#allocation12_spill] sm:$0xff] }
 0x322   : > { %7237 = vmatmul.mubr.bf16.vlgmr.msra.gmra.mxu0 %v7118_v43  ;;  %v15824_v38 = vpop.f32.mrf.mxu1  ;;  %v4969_v30 = vadd.f32 %v15711_v17, %v4831_v21  ;;  %v12973_v6 = vld [vmem:[#allocation3 + $0x338] sm:$0xff]  }
 0x323   : > { %7432 = vmatmul.mubr.bf16.vlgmr.msra.gmra.mxu1 %v7299_v16  ;;  %7571 = vmatpush1.bf16.msra.mxu0 %v12956_v47  ;;  %v4833_v62 = vadd.f32 %v15721_v25, %v4696_v37  ;;  %v5105_v15 = vadd.f32 %v16256_v12, %v4968_v59  ;;  %v4970_v63 = vadd.f32 %v16257_v18, %v4832_v60  ;;  %v5648_v61 = vpop.f32.mrf.mxu0  ;;  %v16259_v47 = vld [vmem:[#allocation8_spill] sm:$0xff] }
 0x324   : > { %11757 = vmatprep.mubr.msk.bf16.mxu0 %vm244_vm2, %v7487_v42  ;;  %7766 = vmatpush1.bf16.msra.mxu1 %v12957_v22  ;;  %v15833_v35 = vpop.f32.mrf.mxu1  ;;  %v5106_v45 = vadd.f32 %v16258_v28, %v4969_v30  ;;  %v16260_v22 = vld [vmem:[#allocation11_spill] sm:$0xff] }
 0x325   : > { %11771 = vmatprep.mubr.msk.bf16.mxu1 %vm244_vm2, %v7682_v9  ;;  %7572 = vmatprep.subr.bf16.mxu0 %v16242_v19  ;;  %v4971_v17 = vadd.f32 %v16259_v47, %v4833_v62  ;;  %v5242_v25 = vadd.f32 %v16260_v22, %v5105_v15  ;;  %v5107_v33 = vadd.f32 %v15756_v50, %v4970_v63  ;;  %v5650_v42 = vpop.f32.mrf.mxu0  ;;  %v15869_v15 = vld [vmem:[#allocation2 + $0x28] sm:$0xff]  ;;  %v15871_v63 = vld [vmem:[#allocation2 + $0x10] sm:$0xff] }
 0x326   : > { %7767 = vmatprep.subr.bf16.mxu1 %v16242_v19  ;;  %v5785_v52 = vpop.f32.mrf.mxu1  ;;  %v5243_v24 = vadd.f32 %v16261_v32, %v5106_v45 }
 0x327   : > { %7573 = vmatpush1.bf16.msra.mxu0 %v12958_v39  ;;  %v5108_v43 = vadd.f32 %v15768_v34, %v4971_v17  ;;  %v5379_v16 = vadd.f32 %v15775_v20, %v5242_v25  ;;  %v5244_v27 = vadd.f32 %v16262_v3, %v5107_v33  ;;  %v12968_v39 = vld [vmem:[#allocation3 + $0x278] sm:$0xff]   ;;  %v12976_v17 = vld [vmem:[#allocation3 + $0x2c0] sm:$0xff]   ;;  %v12977_v33 = vld [vmem:[#allocation3 + $0x328] sm:$0xff]  }
 0x328   : > { %7768 = vmatpush1.bf16.msra.mxu1 %v12959_v46  ;;  %7574 = vmatprep.subr.bf16.mxu0 %v16242_v19  ;;  %v5787_v29 = vpop.f32.mrf.mxu1  ;;  %v5380_v50 = vadd.f32 %v15786_v31, %v5243_v24 }
 0x329   : > { %7769 = vmatprep.subr.bf16.mxu1 %v16242_v19  ;;  %v5245_v34 = vadd.f32 %v15770_v2, %v5108_v43  ;;  %v5516_v20 = vadd.f32 %v15777_v23, %v5379_v16  ;;  %v5381_v48 = vadd.f32 %v15801_v51, %v5244_v27  ;;  %v7444_v43 = vld [vmem:[#allocation2 + $0x20] sm:$0x3f]  ;;  %v7968_v16 = vld [vmem:[#allocation2 + $0x38] sm:$0x1] }
 0x32a   : > { %v5918_v9 = vpop.f32.mrf.mxu0  ;;  %v5517_v57 = vadd.f32 %v15788_v56, %v5380_v50 }
 0x32b   : > { %7575 = vmatpush1.bf16.msra.mxu0 %v12960_v4  ;;  %v6055_v46 = vpop.f32.mrf.mxu1  ;;  %v5382_v31 = vadd.f32 %v15815_v58, %v5245_v34  ;;  %v5653_v40 = vadd.f32 %v5644_v13, %v5516_v20  ;;  %v5518_v2 = vadd.f32 %v15803_v5, %v5381_v48  ;;  %v12972_v58 = vld [vmem:[#allocation3 + $0x2d0] sm:$0xff]   ;;  %v12978_v48 = vld [vmem:[#allocation3 + $0x2b8] sm:$0xff]  }
 0x32c   : > { %7770 = vmatpush1.bf16.msra.mxu1 %v12961_v54  ;;  %7576 = vmatprep.subr.bf16.mxu0 %v16242_v19  ;;  %v5920_v4 = vpop.f32.mrf.mxu0  ;;  %v5654_v23 = vadd.f32 %v5646_v7, %v5517_v57  ;;  %v12975_v7 = vld [vmem:[#allocation3 + $0x330] sm:$0xff]   ;;  %v7442_v57 = vld [vmem:[#allocation2] sm:$0xc0] }
 0x32d   : > { %7771 = vmatprep.subr.bf16.mxu1 %v16242_v19  ;;  %v6057_v54 = vpop.f32.mrf.mxu1  ;;  %v5519_v51 = vadd.f32 %v15817_v11, %v5382_v31  ;;  %v5790_v56 = vadd.f32 %v15824_v38, %v5653_v40  ;;  %v5655_v41 = vadd.f32 %v5648_v61, %v5518_v2  ;;  %v12974_v11 = vld [vmem:[#allocation3 + $0x2c8] sm:$0xff]   ;;  %v7615_v38 = vld [vmem:[#allocation2 + $0x20] sm:$0x7f] }
 0x32e   : > { %v5922_v1 = vpop.f32.mrf.mxu0  ;;  %v5791_v21 = vadd.f32 %v15833_v35, %v5654_v23  ;;  %v7613_v35 = vld [vmem:[#allocation2] sm:$0x80]  ;;  %v7619_v45 = vpack.c.bf16 %v7615_v38, %v7615_v38  ;;  %v16264_v23 = vld [vmem:[#allocation9_spill] sm:$0xff]  ;;  %v12981_v38 = vld [vmem:[#allocation3 + $0x318] sm:$0xff]  }
 0x32f   : > { %7577 = vmatpush1.bf16.msra.mxu0 %v12962_v36  ;;  %v6059_v13 = vpop.f32.mrf.mxu1  ;;  %v5656_v36 = vadd.f32 %v5650_v42, %v5519_v51  ;;  %v5927_v5 = vadd.f32 %v5918_v9, %v5790_v56  ;;  %v7617_v28 = vpack.c.bf16 %v15871_v63, %v7613_v35  ;;  %v12979_v40 = vld [vmem:[#allocation3 + $0x320] sm:$0xff]  }
 0x330   : > { %7772 = vmatpush1.bf16.msra.mxu1 %v12963_v14  ;;  %7578 = vmatprep.subr.bf16.mxu0 %v16242_v19  ;;  %v5792_v14 = vadd.f32 %v5785_v52, %v5655_v41  ;;  %v5928_v37 = vadd.f32 %v5920_v4, %v5791_v21  ;;  %v5924_v59 = vpop.f32.mrf.mxu0  ;;  %v7658_v50 = vshrl.u32 %v7619_v45, 16  ;;  %v7448_v4 = vpack.c.bf16 %v7444_v43, %v7444_v43 }
 0x331   : > { %7773 = vmatprep.subr.bf16.mxu1 %v16242_v19  ;;  %v6061_v60 = vpop.f32.mrf.mxu1  ;;  %v5793_v30 = vadd.f32 %v5787_v29, %v5656_v36  ;;  %v6064_v62 = vadd.f32 %v6055_v46, %v5927_v5  ;;  %v7650_v3 = vshrl.u32 %v7617_v28, 16  ;;  %v7653_v27 = vshll.u32 %v7617_v28, 16  ;;  %v16263_v46 = vld [vmem:[#allocation7_spill] sm:$0xff] }
 0x332   : > { %v5929_v12 = vadd.f32 %v5922_v1, %v5792_v14  ;;  %v6065_v61 = vadd.f32 %v6057_v54, %v5928_v37  ;;  %v7972_v54 = vpack.c.bf16 %v7968_v16, %v7968_v16  ;;  %v7483_v35 = vrot.slane %v7448_v4, 3  ;;  %v12985_v16 = vld [vmem:[#allocation3 + $0x3d8] sm:$0xff]   ;;  %v13001_v4 = vld [vmem:[#allocation3 + $0x400] sm:$0xff]  }
 0x333   : > { %7579 = vmatpush1.bf16.msra.mxu0 %v12964_v53  ;;  %v7964_v53 = vld [vmem:[#allocation2 + $0x18] sm:$0xfe]  ;;  %v5930_v52 = vadd.f32 %v5924_v59, %v5793_v30  ;;  %v7652_v1 = vrot.slane %v7650_v3, 3  ;;  %v12989_v3 = vld [vmem:[#allocation3 + $0x3c8] sm:$0xff]  }
 0x334   : > { %7774 = vmatpush1.bf16.msra.mxu1 %v12965_v26  ;;  %7580 = vmatprep.subr.bf16.mxu0 %v16242_v19 }
 0x335   : > { %7775 = vmatprep.subr.bf16.mxu1 %v16242_v19  ;;  %v6067_v9 = vadd.f32 %v6061_v60, %v5930_v52  ;;  %v12983_v52 = vld [vmem:[#allocation3 + $0x3e0] sm:$0xff]  }
 0x337   : > { %7581 = vmatpush1.bf16.msra.mxu0 %v12966_v10  ;;  %v15876_v10 = vpack.c.bf16 %v15869_v15, %v7964_v53 }
 0x338   : > { %7776 = vmatpush1.bf16.msra.mxu1 %v12967_v0  ;;  %7582 = vmatprep.subr.bf16.mxu0 %v16242_v19  ;;  %v6066_v0 = vadd.f32 %v6059_v13, %v5929_v12  ;;  %v7655_v13 = vrot.slane %v7653_v27, 4  ;;  %v12990_v27 = vld [vmem:[#allocation3 + $0x358] sm:$0xff]  }
 0x339   : > { %7777 = vmatprep.subr.bf16.mxu1 %v16242_v19 }
 0x33a   : > { %v7656_v53 = vor.u32 %v7655_v13, %v7652_v1  ;;  %v13003_v13 = vld [vmem:[#allocation3 + $0x3f8] sm:$0xff]  }
 0x33b   : > { %7583 = vmatpush1.bf16.msra.mxu0 %v12968_v39  ;;  %v7661_v39 = vshll.u32 %v7619_v45, 16 }
 0x33c   : > { %7778 = vmatpush1.bf16.msra.mxu1 %v12969_v49  ;;  %7584 = vmatprep.subr.bf16.mxu0 %v16242_v19 }
 0x33d   : > { %7779 = vmatprep.subr.bf16.mxu1 %v16242_v19  ;;  %v7663_v21 = vrot.slane %v7661_v39, 4  ;;  %v12992_v39 = vld [vmem:[#allocation3 + $0x350] sm:$0xff]  }
 0x33f   : > { %7585 = vmatpush1.bf16.msra.mxu0 %v12970_v8  ;;  %v7446_v8 = vpack.c.bf16 %v15871_v63, %v7442_v57  ;;  %v12999_v57 = vld [vmem:[#allocation3 + $0x408] sm:$0xff]  }
 0x340   : > { %7780 = vmatpush1.bf16.msra.mxu1 %v12971_v55  ;;  %7592 = vmatprep.subr.bf16.mxu0 %v16242_v19  ;;  %v8015_v55 = vshll.u32 %v15876_v10, 16 }
 0x341   : > { %7787 = vmatprep.subr.bf16.mxu1 %v16242_v19  ;;  %v7482_v59 = vrot.slane %v7446_v8, 3  ;;  %v7963_v8 = vld [vmem:[#allocation2 + $0x10] sm:$0xfe] }
 0x342   : > { %v8017_v60 = vrot.slane %v8015_v55, 1 }
 0x343   : > { %7593 = vmatpush2.bf16.msra.mxu0 %v12972_v58 }
 0x344   : > { %7788 = vmatpush2.bf16.msra.mxu1 %v12973_v6  ;;  %7594 = vmatprep.subr.bf16.mxu0 %v16242_v19  ;;  %v7660_v6 = vrot.slane %v7658_v50, 3  ;;  %v12991_v50 = vld [vmem:[#allocation3 + $0x3c0] sm:$0xff]  }
 0x345   : > { %7789 = vmatprep.subr.bf16.mxu1 %v16242_v19 }
 0x346   : > { %v6192_v26 = vpop.f32.mrf.mxu0 }
 0x347   : > { %v6329_v18 = vpop.f32.mrf.mxu1  ;;  %v6201_v47 = vadd.f32 %v6192_v26, %v6064_v62  ;;  %7595 = vmatpush2.bf16.msra.mxu0 %v12974_v11  ;;  %v12980_v11 = vld [vmem:[#allocation3 + $0x2b0] sm:$0xff]   ;;  %v7664_v26 = vor.u32 %v7663_v21, %v7660_v6 }
 0x348   : > { %7790 = vmatpush2.bf16.msra.mxu1 %v12975_v7  ;;  %v6194_v22 = vpop.f32.mrf.mxu0  ;;  %7596 = vmatprep.subr.bf16.mxu0 %v16242_v19  ;;  %v8020_v7 = vshll.u32 %v7972_v54, 16 }
 0x349   : > { %v6331_v25 = vpop.f32.mrf.mxu1  ;;  %v6338_v32 = vadd.f32 %v6329_v18, %v6201_v47  ;;  %v6202_v24 = vadd.f32 %v6194_v22, %v6065_v61  ;;  %7791 = vmatprep.subr.bf16.mxu1 %v16242_v19  ;;  %v8013_v18 = vshrl.u32 %v15876_v10, 16  ;;  %v12982_v61 = vld [vmem:[#allocation3 + $0x378] sm:$0xff]   ;;  %v7665_v10 = vsel %vm7648_vm12, %v7656_v53, %v7664_v26 }
 0x34a   : > { %v6196_v42 = vpop.f32.mrf.mxu0 }
 0x34b   : > { %v6333_v29 = vpop.f32.mrf.mxu1  ;;  %v6342_v49 = vadd.f32 %v6338_v32, %v16263_v46  ;;  %v6339_v34 = vadd.f32 %v6331_v25, %v6202_v24  ;;  %v6203_v20 = vadd.f32 %v6196_v42, %v6066_v0  ;;  %7597 = vmatpush2.bf16.msra.mxu0 %v12976_v17  ;;  %v8018_v47 = vor.u32 %v8017_v60, %v8013_v18  ;;  %v12984_v24 = vld [vmem:[#allocation3 + $0x370] sm:$0xff]  }
 0x34c   : > { %7792 = vmatpush2.bf16.msra.mxu1 %v12977_v33  ;;  %v6198_v31 = vpop.f32.mrf.mxu0  ;;  %7598 = vmatprep.subr.bf16.mxu0 %v16242_v19  ;;  %v8022_v17 = vrot.slane %v8020_v7, 1  ;;  %v7484_v33 = vsel %vm3314_vm5, %v7482_v59, %v7483_v35  ;;  %v7811_v0 = vpack.c.bf16 %v15869_v15, %v15747_v44  ;;  %v12986_v44 = vld [vmem:[#allocation3 + $0x368] sm:$0xff]   ;;  %v12987_v42 = vld [vmem:[#allocation3 + $0x3d0] sm:$0xff]  }
 0x34d   : > { %v6346_v2 = vmax.f32 %v6342_v49, 0.0  ;;  %v6343_v51 = vadd.f32 %v6339_v34, %v16264_v23  ;;  %v6340_v56 = vadd.f32 %v6333_v29, %v6203_v20  ;;  %v6204_v41 = vadd.f32 %v6198_v31, %v6067_v9  ;;  %7793 = vmatprep.subr.bf16.mxu1 %v16242_v19  ;;  %v6335_v58 = vpop.f32.mrf.mxu1  ;;  %v12988_v29 = vld [vmem:[#allocation3 + $0x360] sm:$0xff]   ;;  %v12993_v9 = vld [vmem:[#allocation3 + $0x3b8] sm:$0xff]   ;;  %v12995_v49 = vld [vmem:[#allocation3 + $0x3b0] sm:$0xff]  }
 0x34e   : > { %v8023_v43 = vsel %vm6440_vm7, %v8018_v47, %v8022_v17  ;;  %v12996_v34 = vld [vmem:[#allocation3 + $0x340] sm:$0xff]   ;;  %v12997_v20 = vld [vmem:[#allocation3 + $0x3a8] sm:$0xff]   ;;  %v13000_v31 = vld [vmem:[#allocation3 + $0x398] sm:$0xff]  }
 0x34f   : > { %v6354_v36 = vrot.slane %v6346_v2, 3  ;;  %v6347_v5 = vmax.f32 %v6343_v51, 0.0  ;;  %v6344_v14 = vadd.f32 %v6340_v56, %v16263_v46  ;;  %v6341_v37 = vadd.f32 %v6335_v58, %v6204_v41  ;;  %7599 = vmatpush2.bf16.msra.mxu0 %v12978_v48  ;;  %v12994_v46 = vld [vmem:[#allocation3 + $0x348] sm:$0xff]   ;;  %v12998_v48 = vld [vmem:[#allocation3 + $0x3a0] sm:$0xff]   ;;  %v13002_v51 = vld [vmem:[#allocation3 + $0x390] sm:$0xff]  }
 0x350   : > { %7794 = vmatpush2.bf16.msra.mxu1 %v12979_v40  ;;  %7600 = vmatprep.subr.bf16.mxu0 %v16242_v19  ;;  %v15923_v40 = vld [vmem:[#allocation2 + $0x20] sm:$0xff]  ;;  %v7967_v56 = vld [vmem:[#allocation2 + $0x30] sm:$0x1] }
 0x351   : > { %6367 = vst [vmem:[#allocation2 + $0x40] sm:$0xe0] %v6354_v36  ;;  %v6355_v30 = vrot.slane %v6347_v5, 3  ;;  %v6348_v62 = vmax.f32 %v6344_v14, 0.0  ;;  %v6345_v12 = vadd.f32 %v6341_v37, %v16264_v23  ;;  %7795 = vmatprep.subr.bf16.mxu1 %v16242_v19  ;;  %v7969_v2 = vpack.c.bf16 %v15923_v40, %v7963_v8  ;;  %v13005_v7 = vld [vmem:[#allocation3 + $0x3f0] sm:$0xff]  }
 0x352   : > { %v7971_v5 = vpack.c.bf16 %v7967_v56, %v7967_v56  ;;  %v13021_v8 = vld [vmem:[#allocation3 + $0x70] sm:$0xff]   ;;  %v13027_v56 = vld [vmem:[#allocation3 + $0xc0] sm:$0xff]  }
 0x353   : > { %6368 = vst.msk [vmem:[#allocation2 + $0x48] sm:$0xe0] %vm3328_vm4, %v6355_v30  ;;  %v6356_v28 = vrot.slane %v6348_v62, 3  ;;  %v6349_v45 = vmax.f32 %v6345_v12, 0.0  ;;  %7601 = vmatpush2.bf16.msra.mxu0 %v12980_v11  ;;  %v8003_v14 = vshll.u32 %v7969_v2, 16  ;;  %v13004_v11 = vld [vmem:[#allocation3 + $0x388] sm:$0xff]  }
 0x354   : > { %7796 = vmatpush2.bf16.msra.mxu1 %v12981_v38  ;;  %7920 = vmatprep.subr.bf16.mxu0 %v16242_v19  ;;  %v8152_v62 = vld [vmem:[#allocation2 + $0x38] sm:$0x3]  ;;  %v8008_v26 = vshll.u32 %v7971_v5, 16  ;;  %v8001_v47 = vshrl.u32 %v7969_v2, 16  ;;  %v13024_v2 = vld [vmem:[#allocation3 + $0x470] sm:$0xff]  }
 0x355   : > { %v15893_v22 = vsel %vm3314_vm5, %v6354_v36, %v6356_v28  ;;  %6371 = vst [vmem:[#allocation2 + $0x60] sm:$0x1f] %v6356_v28  ;;  %v6358_v25 = vrot.slane %v6349_v45, 3  ;;  %8106 = vmatprep.subr.bf16.mxu1 %v16242_v19  ;;  %v8005_v53 = vrot.slane %v8003_v14, 1  ;;  %v13006_v28 = vld [vmem:[#allocation3 + $0x380] sm:$0xff]   ;;  %v13029_v14 = vld [vmem:[#allocation3 + $0xb8] sm:$0xff]  }
 0x356   : > { %6369 = vst [vmem:[#allocation2 + $0x50] sm:$0xff] %v15893_v22  ;;  %7603 = vmatmul.mubr.bf16.vlgmr.msra.gmra.mxu0 %v7484_v33  ;;  %v8010_v33 = vrot.slane %v8008_v26, 1  ;;  %v13031_v26 = vld [vmem:[#allocation3 + $0xb0] sm:$0xff]  }
 0x357   : > { %v6359_v32 = vsel %vm3314_vm5, %v6355_v30, %v6358_v25  ;;  %6372 = vst.msk [vmem:[#allocation2 + $0x68] sm:$0x1f] %vm3333_vm6, %v6358_v25  ;;  %7798 = vmatmul.mubr.bf16.vlgmr.msra.gmra.mxu1 %v7665_v10  ;;  %7921 = vmatpush1.bf16.msra.mxu0 %v12982_v61  ;;  %v8150_v30 = vld [vmem:[#allocation2 + $0x18] sm:$0xfc]  ;;  %v8156_v61 = vpack.c.bf16 %v8152_v62, %v8152_v62 }
 0x358   : > { %6370 = vst.msk [vmem:[#allocation2 + $0x58] sm:$0xff] %vm244_vm2, %v6359_v32  ;;  %11785 = vmatprep.mubr.msk.bf16.mxu0 %vm244_vm2, %v7811_v0  ;;  %8107 = vmatpush1.bf16.msra.mxu1 %v12983_v52  ;;  %v8154_v45 = vpack.c.bf16 %v15869_v15, %v8150_v30  ;;  %v13007_v52 = vld [vmem:[#allocation3 + $0x3e8] sm:$0xff]   ;;  %v8006_v25 = vor.u32 %v8005_v53, %v8001_v47  ;;  %v8151_v30 = vld [vmem:[#allocation2 + $0x30] sm:$0x3] }
 0x359   : > { %11799 = vmatprep.mubr.msk.bf16.mxu1 %vm244_vm2, %v8023_v43  ;;  %7922 = vmatprep.subr.bf16.mxu0 %v16242_v19  ;;  %v13008_v32 = vld [vmem:[#allocation3 + $0x448] sm:$0xff]   ;;  %v8192_v43 = vrot.slane %v8156_v61, 1  ;;  %v7810_v15 = vpack.c.bf16 %v15923_v40, %v15871_v63 }
 0x35a   : > { %8108 = vmatprep.subr.bf16.mxu1 %v16242_v19  ;;  %v8364_v41 = vld [vmem:[#allocation2 + $0x48] sm:$0xfe] }
 0x35b   : > { %7923 = vmatpush1.bf16.msra.mxu0 %v12984_v24  ;;  %v8191_v24 = vrot.slane %v8154_v45, 1 }
 0x35c   : > { %8109 = vmatpush1.bf16.msra.mxu1 %v12985_v16  ;;  %7924 = vmatprep.subr.bf16.mxu0 %v16242_v19  ;;  %v13009_v16 = vld [vmem:[#allocation3 + $0xa0] sm:$0xff]  }
 0x35d   : > { %8110 = vmatprep.subr.bf16.mxu1 %v16242_v19 }
 0x35e   : > { %v8366_v38 = vld [vmem:[#allocation2 + $0x68] sm:$0x1] }
 0x35f   : > { %7925 = vmatpush1.bf16.msra.mxu0 %v12986_v44  ;;  %v15927_v54 = vld [vmem:[#allocation2 + $0x58] sm:$0xff]  ;;  %v8370_v18 = vpack.c.bf16 %v8366_v38, %v8366_v38  ;;  %v8669_v47 = vld [vmem:[#allocation2 + $0x68] sm:$0x3] }
 0x360   : > { %8111 = vmatpush1.bf16.msra.mxu1 %v12987_v42  ;;  %7926 = vmatprep.subr.bf16.mxu0 %v16242_v19  ;;  %v8368_v6 = vpack.c.bf16 %v15927_v54, %v8364_v41  ;;  %v8011_v42 = vsel %vm6440_vm7, %v8006_v25, %v8010_v33  ;;  %v8363_v41 = vld [vmem:[#allocation2 + $0x40] sm:$0xfe]  ;;  %v8667_v25 = vld [vmem:[#allocation2 + $0x48] sm:$0xfc] }
 0x361   : > { %8112 = vmatprep.subr.bf16.mxu1 %v16242_v19  ;;  %v8417_v0 = vshll.u32 %v8370_v18, 16  ;;  %v13033_v33 = vld [vmem:[#allocation3 + $0xa8] sm:$0xff]  }
 0x362   : > { %v8412_v12 = vshll.u32 %v8368_v6, 16  ;;  %v8410_v10 = vshrl.u32 %v8368_v6, 16 }
 0x363   : > { %7927 = vmatpush1.bf16.msra.mxu0 %v12988_v29  ;;  %v8419_v29 = vrot.slane %v8417_v0, 1  ;;  %v8671_v0 = vpack.c.bf16 %v15927_v54, %v8667_v25 }
 0x364   : > { %8113 = vmatpush1.bf16.msra.mxu1 %v12989_v3  ;;  %7928 = vmatprep.subr.bf16.mxu0 %v16242_v19  ;;  %v8414_v17 = vrot.slane %v8412_v12, 1  ;;  %v8193_v3 = vsel %vm6749_vm8, %v8191_v24, %v8192_v43 }
 0x365   : > { %8114 = vmatprep.subr.bf16.mxu1 %v16242_v19 }
 0x366   : > { %v8415_v44 = vor.u32 %v8414_v17, %v8410_v10 }
 0x367   : > { %7929 = vmatpush1.bf16.msra.mxu0 %v12990_v27  ;;  %v13010_v27 = vld [vmem:[#allocation3 + $0x440] sm:$0xff]  }
 0x368   : > { %8115 = vmatpush1.bf16.msra.mxu1 %v12991_v50  ;;  %7930 = vmatprep.subr.bf16.mxu0 %v16242_v19  ;;  %v8420_v63 = vsel %vm6440_vm7, %v8415_v44, %v8419_v29  ;;  %v13011_v50 = vld [vmem:[#allocation3 + $0x98] sm:$0xff]   ;;  %v8707_v29 = vrot.slane %v8671_v0, 1  ;;  %v9031_v0 = vld [vmem:[#allocation2 + $0x68] sm:$0xf] }
 0x369   : > { %8116 = vmatprep.subr.bf16.mxu1 %v16242_v19 }
 0x36b   : > { %7931 = vmatpush1.bf16.msra.mxu0 %v12992_v39  ;;  %v13012_v39 = vld [vmem:[#allocation3 + $0x438] sm:$0xff]  }
 0x36c   : > { %8117 = vmatpush1.bf16.msra.mxu1 %v12993_v9  ;;  %7932 = vmatprep.subr.bf16.mxu0 %v16242_v19  ;;  %v13013_v9 = vld [vmem:[#allocation3 + $0x90] sm:$0xff]  }
 0x36d   : > { %8118 = vmatprep.subr.bf16.mxu1 %v16242_v19 }
 0x36f   : > { %7933 = vmatpush1.bf16.msra.mxu0 %v12994_v46  ;;  %v13014_v46 = vld [vmem:[#allocation3 + $0x430] sm:$0xff]  }
 0x370   : > { %8119 = vmatpush1.bf16.msra.mxu1 %v12995_v49  ;;  %7934 = vmatprep.subr.bf16.mxu0 %v16242_v19  ;;  %v13015_v49 = vld [vmem:[#allocation3 + $0x88] sm:$0xff]  }
 0x371   : > { %8120 = vmatprep.subr.bf16.mxu1 %v16242_v19 }
 0x373   : > { %7935 = vmatpush1.bf16.msra.mxu0 %v12996_v34  ;;  %v13016_v34 = vld [vmem:[#allocation3 + $0x428] sm:$0xff]  }
 0x374   : > { %8121 = vmatpush1.bf16.msra.mxu1 %v12997_v20  ;;  %7942 = vmatprep.subr.bf16.mxu0 %v16242_v19  ;;  %v13017_v20 = vld [vmem:[#allocation3 + $0x80] sm:$0xff]  }
 0x375   : > { %8128 = vmatprep.subr.bf16.mxu1 %v16242_v19 }
 0x377   : > { %7943 = vmatpush2.bf16.msra.mxu0 %v12998_v48  ;;  %v13018_v48 = vld [vmem:[#allocation3 + $0x420] sm:$0xff]  }
 0x378   : > { %8129 = vmatpush2.bf16.msra.mxu1 %v12999_v57  ;;  %7944 = vmatprep.subr.bf16.mxu0 %v16242_v19  ;;  %v13019_v57 = vld [vmem:[#allocation3 + $0x78] sm:$0xff]  }
 0x379   : > { %8130 = vmatprep.subr.bf16.mxu1 %v16242_v19 }
 0x37a   : > { %v6581_v55 = vpop.f32.mrf.mxu0 }
 0x37b   : > { %v6703_v23 = vpop.f32.mrf.mxu1  ;;  %7945 = vmatpush2.bf16.msra.mxu0 %v13000_v31  ;;  %v13020_v31 = vld [vmem:[#allocation3 + $0x418] sm:$0xff]  }
 0x37c   : > { %v15930_v58 = vadd.f32 %v6703_v23, %v6581_v55  ;;  %8131 = vmatpush2.bf16.msra.mxu1 %v13001_v4  ;;  %v6583_v1 = vpop.f32.mrf.mxu0  ;;  %7946 = vmatprep.subr.bf16.mxu0 %v16242_v19  ;;  %v13022_v4 = vld [vmem:[#allocation3 + $0x410] sm:$0xff]   ;;  %v13023_v55 = vld [vmem:[#allocation3 + $0x68] sm:$0xff]  }
 0x37d   : > { %v6705_v21 = vpop.f32.mrf.mxu1  ;;  %8132 = vmatprep.subr.bf16.mxu1 %v16242_v19  ;;  %v13025_v23 = vld [vmem:[#allocation3 + $0xc8] sm:$0xff]  }
 0x37e   : > { %v6584_v36 = vpop.f32.mrf.mxu0  ;;  %v13028_v21 = vld [vmem:[#allocation3 + $0x460] sm:$0xff]  }
 0x37f   : > { %v6706_v37 = vpop.f32.mrf.mxu1  ;;  %7947 = vmatpush2.bf16.msra.mxu0 %v13002_v51  ;;  %v13026_v51 = vld [vmem:[#allocation3 + $0x468] sm:$0xff]  }
 0x380   : > { %v15935_v59 = vadd.f32 %v6706_v37, %v6584_v36  ;;  %8133 = vmatpush2.bf16.msra.mxu1 %v13003_v13  ;;  %v6586_v60 = vpop.f32.mrf.mxu0  ;;  %7948 = vmatprep.subr.bf16.mxu0 %v16242_v19  ;;  %v8365_v36 = vld [vmem:[#allocation2 + $0x60] sm:$0x1]  ;;  %v8367_v37 = vpack.c.bf16 %v15893_v22, %v8363_v41 }
 0x381   : > { %v6708_v35 = vpop.f32.mrf.mxu1  ;;  %8134 = vmatprep.subr.bf16.mxu1 %v16242_v19  ;;  %v13050_v41 = vld [vmem:[#allocation3 + $0x60] sm:$0xff]  }
 0x382   : > { %v13030_v35 = vld [vmem:[#allocation3 + $0x458] sm:$0xff]   ;;  %v8400_v18 = vshll.u32 %v8367_v37, 16 }
 0x383   : > { %7949 = vmatpush2.bf16.msra.mxu0 %v13004_v11 }
 0x384   : > { %8135 = vmatpush2.bf16.msra.mxu1 %v13005_v7  ;;  %7950 = vmatprep.subr.bf16.mxu0 %v16242_v19  ;;  %v8149_v7 = vld [vmem:[#allocation2 + $0x10] sm:$0xfc]  ;;  %v8402_v10 = vrot.slane %v8400_v18, 1 }
 0x385   : > { %8136 = vmatprep.subr.bf16.mxu1 %v16242_v19  ;;  %v8153_v61 = vpack.c.bf16 %v15923_v40, %v8149_v7 }
 0x387   : > { %7951 = vmatpush2.bf16.msra.mxu0 %v13006_v28  ;;  %v8188_v24 = vrot.slane %v8153_v61, 1 }
 0x388   : > { %8137 = vmatpush2.bf16.msra.mxu1 %v13007_v52  ;;  %8276 = vmatprep.subr.bf16.mxu0 %v16242_v19  ;;  %v8155_v52 = vpack.c.bf16 %v8151_v30, %v8151_v30 }
 0x389   : > { %8503 = vmatprep.subr.bf16.mxu1 %v16242_v19 }
 0x38a   : > { %7953 = vmatmul.mubr.bf16.vlgmr.msra.gmra.mxu0 %v7810_v15  ;;  %v8189_v43 = vrot.slane %v8155_v52, 1  ;;  %v8398_v15 = vshrl.u32 %v8367_v37, 16 }
 0x38b   : > { %8139 = vmatmul.mubr.bf16.vlgmr.msra.gmra.mxu1 %v8011_v42  ;;  %8277 = vmatpush1.bf16.msra.mxu0 %v13008_v32  ;;  %v8673_v32 = vpack.c.bf16 %v8669_v47, %v8669_v47  ;;  %v13035_v42 = vld [vmem:[#allocation3 + $0x108] sm:$0xff]  }
 0x38c   : > { %11813 = vmatprep.mubr.msk.bf16.mxu0 %vm244_vm2, %v8193_v3  ;;  %8504 = vmatpush1.bf16.msra.mxu1 %v13009_v16  ;;  %v13034_v16 = vld [vmem:[#allocation3 + $0x38] sm:$0xff]   ;;  %v8403_v44 = vor.u32 %v8402_v10, %v8398_v15  ;;  %v8666_v10 = vld [vmem:[#allocation2 + $0x40] sm:$0xfc] }
 0x38d   : > { %11828 = vmatprep.mubr.msk.bf16.mxu1 %vm244_vm2, %v8420_v63  ;;  %8278 = vmatprep.subr.bf16.mxu0 %v16242_v19  ;;  %v8708_v3 = vrot.slane %v8673_v32, 1  ;;  %v8332_v63 = vld [vmem:[#allocation2 + $0x48] sm:$0xff] }
 0x38e   : > { %8505 = vmatprep.subr.bf16.mxu1 %v16242_v19  ;;  %v9029_v32 = vld [vmem:[#allocation2 + $0x48] sm:$0xf0] }
 0x38f   : > { %8279 = vmatpush1.bf16.msra.mxu0 %v13010_v27  ;;  %v8190_v27 = vsel %vm6749_vm8, %v8188_v24, %v8189_v43  ;;  %v13058_v24 = vld [vmem:[#allocation3 + $0x40] sm:$0xff]  }
 0x390   : > { %8506 = vmatpush1.bf16.msra.mxu1 %v13011_v50  ;;  %8280 = vmatprep.subr.bf16.mxu0 %v16242_v19 }
 0x391   : > { %8507 = vmatprep.subr.bf16.mxu1 %v16242_v19 }
 0x393   : > { %8281 = vmatpush1.bf16.msra.mxu0 %v13012_v39  ;;  %v8336_v39 = vpack.c.bf16 %v15927_v54, %v8332_v63 }
 0x394   : > { %8508 = vmatpush1.bf16.msra.mxu1 %v13013_v9  ;;  %8282 = vmatprep.subr.bf16.mxu0 %v16242_v19  ;;  %v13036_v9 = vld [vmem:[#allocation3 + $0x30] sm:$0xff]  }
 0x395   : > { %8509 = vmatprep.subr.bf16.mxu1 %v16242_v19 }
 0x397   : > { %8283 = vmatpush1.bf16.msra.mxu0 %v13014_v46  ;;  %v8709_v46 = vsel %vm6749_vm8, %v8707_v29, %v8708_v3  ;;  %v9033_v29 = vpack.c.bf16 %v15927_v54, %v9029_v32  ;;  %v9035_v3 = vpack.c.bf16 %v9031_v0, %v9031_v0 }
 0x398   : > { %8510 = vmatpush1.bf16.msra.mxu1 %v13015_v49  ;;  %8284 = vmatprep.subr.bf16.mxu0 %v16242_v19  ;;  %v13037_v49 = vld [vmem:[#allocation3 + $0x100] sm:$0xff]  }
 0x399   : > { %8511 = vmatprep.subr.bf16.mxu1 %v16242_v19 }
 0x39b   : > { %8285 = vmatpush1.bf16.msra.mxu0 %v13016_v34  ;;  %v13038_v34 = vld [vmem:[#allocation3 + $0x28] sm:$0xff]  }
 0x39c   : > { %8512 = vmatpush1.bf16.msra.mxu1 %v13017_v20  ;;  %8286 = vmatprep.subr.bf16.mxu0 %v16242_v19  ;;  %v13039_v20 = vld [vmem:[#allocation3 + $0xf8] sm:$0xff]  }
 0x39d   : > { %8513 = vmatprep.subr.bf16.mxu1 %v16242_v19 }
 0x39f   : > { %8287 = vmatpush1.bf16.msra.mxu0 %v13018_v48  ;;  %v13040_v48 = vld [vmem:[#allocation3 + $0x20] sm:$0xff]  }
 0x3a0   : > { %8514 = vmatpush1.bf16.msra.mxu1 %v13019_v57  ;;  %8288 = vmatprep.subr.bf16.mxu0 %v16242_v19  ;;  %v13041_v57 = vld [vmem:[#allocation3 + $0xf0] sm:$0xff]  }
 0x3a1   : > { %8515 = vmatprep.subr.bf16.mxu1 %v16242_v19 }
 0x3a3   : > { %8289 = vmatpush1.bf16.msra.mxu0 %v13020_v31  ;;  %v13042_v31 = vld [vmem:[#allocation3 + $0x18] sm:$0xff]  }
 0x3a4   : > { %8516 = vmatpush1.bf16.msra.mxu1 %v13021_v8  ;;  %8290 = vmatprep.subr.bf16.mxu0 %v16242_v19  ;;  %v13043_v8 = vld [vmem:[#allocation3 + $0xe8] sm:$0xff]  }
 0x3a5   : > { %8517 = vmatprep.subr.bf16.mxu1 %v16242_v19 }
 0x3a7   : > { %8291 = vmatpush1.bf16.msra.mxu0 %v13022_v4  ;;  %v13044_v4 = vld [vmem:[#allocation3 + $0x10] sm:$0xff]  }
 0x3a8   : > { %8518 = vmatpush1.bf16.msra.mxu1 %v13023_v55  ;;  %8298 = vmatprep.subr.bf16.mxu0 %v16242_v19  ;;  %v13045_v55 = vld [vmem:[#allocation3 + $0xe0] sm:$0xff]  }
 0x3a9   : > { %8525 = vmatprep.subr.bf16.mxu1 %v16242_v19 }
 0x3ab   : > { %8299 = vmatpush2.bf16.msra.mxu0 %v13024_v2  ;;  %v13046_v2 = vld [vmem:[#allocation3 + $0x8] sm:$0xff]  }
 0x3ac   : > { %8526 = vmatpush2.bf16.msra.mxu1 %v13025_v23  ;;  %8300 = vmatprep.subr.bf16.mxu0 %v16242_v19  ;;  %v13047_v23 = vld [vmem:[#allocation3 + $0xd8] sm:$0xff]  }
 0x3ad   : > { %8527 = vmatprep.subr.bf16.mxu1 %v16242_v19 }
 0x3ae   : > { %v6872_v1 = vpop.f32.mrf.mxu0 }
 0x3af   : > { %v6879_v13 = vadd.f32 %v6872_v1, %v15930_v58  ;;  %v7067_v6 = vpop.f32.mrf.mxu1  ;;  %8301 = vmatpush2.bf16.msra.mxu0 %v13026_v51  ;;  %v8369_v58 = vpack.c.bf16 %v8365_v36, %v8365_v36  ;;  %v13048_v51 = vld [vmem:[#allocation3] sm:$0xff]   ;;  %v13051_v1 = vld [vmem:[#allocation3 + $0x130] sm:$0xff]   ;;  %v8836_v36 = vld [vmem:[#allocation2 + $0x48] sm:$0xf8] }
 0x3b0   : > { %8528 = vmatpush2.bf16.msra.mxu1 %v13027_v56  ;;  %v6874_v5 = vpop.f32.mrf.mxu0  ;;  %8302 = vmatprep.subr.bf16.mxu0 %v16242_v19  ;;  %v13049_v56 = vld [vmem:[#allocation3 + $0xd0] sm:$0xff]  }
 0x3b1   : > { %v15972_v11 = vadd.f32 %v7067_v6, %v6879_v13  ;;  %v7069_v38 = vpop.f32.mrf.mxu1  ;;  %8529 = vmatprep.subr.bf16.mxu1 %v16242_v19  ;;  %v8405_v17 = vshll.u32 %v8369_v58, 16  ;;  %v13052_v13 = vld [vmem:[#allocation3 + $0x58] sm:$0xff]   ;;  %v13053_v6 = vld [vmem:[#allocation3 + $0x128] sm:$0xff]   ;;  %v13055_v58 = vld [vmem:[#allocation3 + $0x120] sm:$0xff]  }
 0x3b2   : > { %v6875_v60 = vpop.f32.mrf.mxu0 }
 0x3b3   : > { %v6880_v62 = vadd.f32 %v6875_v60, %v15935_v59  ;;  %v7070_v12 = vpop.f32.mrf.mxu1  ;;  %8303 = vmatpush2.bf16.msra.mxu0 %v13028_v21  ;;  %v13032_v59 = vld [vmem:[#allocation3 + $0x450] sm:$0xff]   ;;  %v8407_v40 = vrot.slane %v8405_v17, 1  ;;  %v8838_v21 = vld [vmem:[#allocation2 + $0x68] sm:$0x7] }
 0x3b4   : > { %8530 = vmatpush2.bf16.msra.mxu1 %v13029_v14  ;;  %v6877_v53 = vpop.f32.mrf.mxu0  ;;  %8304 = vmatprep.subr.bf16.mxu0 %v16242_v19  ;;  %v8840_v14 = vpack.c.bf16 %v15927_v54, %v8836_v36  ;;  %v13054_v60 = vld [vmem:[#allocation3 + $0x50] sm:$0xff]   ;;  %v8842_v7 = vpack.c.bf16 %v8838_v21, %v8838_v21  ;;  %v13072_v21 = vld [vmem:[#allocation3 + $0x140] sm:$0xff]   ;;  %v13073_v36 = vld [vmem:[#allocation3 + $0x1a8] sm:$0xff]  }
 0x3b5   : > { %v15977_v28 = vadd.f32 %v7070_v12, %v6880_v62  ;;  %v7072_v45 = vpop.f32.mrf.mxu1  ;;  %8531 = vmatprep.subr.bf16.mxu1 %v16242_v19  ;;  %v8408_v50 = vsel %vm6440_vm7, %v8403_v44, %v8407_v40  ;;  %v13059_v44 = vld [vmem:[#allocation3 + $0x110] sm:$0xff]  }
 0x3b6   : > { %v8887_v53 = vshrl.u32 %v8840_v14, 16  ;;  %v8668_v45 = vld [vmem:[#allocation2 + $0x60] sm:$0x3]  ;;  %v8890_v61 = vshll.u32 %v8840_v14, 16  ;;  %v8895_v52 = vshrl.u32 %v8842_v7, 16  ;;  %v8898_v47 = vshll.u32 %v8842_v7, 16 }
 0x3b7   : > { %8305 = vmatpush2.bf16.msra.mxu0 %v13030_v35  ;;  %v13075_v14 = vld [vmem:[#allocation3 + $0x1a0] sm:$0xff]   ;;  %v13078_v7 = vld [vmem:[#allocation3 + $0x190] sm:$0xff]  }
 0x3b8   : > { %8532 = vmatpush2.bf16.msra.mxu1 %v13031_v26  ;;  %8306 = vmatprep.subr.bf16.mxu0 %v16242_v19  ;;  %v8889_v43 = vrot.slane %v8887_v53, 1  ;;  %v8892_v15 = vrot.slane %v8890_v61, 2  ;;  %v8897_v40 = vrot.slane %v8895_v52, 1  ;;  %v9198_v53 = vld [vmem:[#allocation2 + $0x48] sm:$0xe0] }
 0x3b9   : > { %8533 = vmatprep.subr.bf16.mxu1 %v16242_v19  ;;  %v13080_v52 = vld [vmem:[#allocation3 + $0x188] sm:$0xff]  }
 0x3bb   : > { %8307 = vmatpush2.bf16.msra.mxu0 %v13032_v59  ;;  %v13057_v59 = vld [vmem:[#allocation3 + $0x118] sm:$0xff]  }
 0x3bc   : > { %8534 = vmatpush2.bf16.msra.mxu1 %v13033_v33  ;;  %8625 = vmatprep.subr.bf16.mxu0 %v16242_v19 }
 0x3bd   : > { %8792 = vmatprep.subr.bf16.mxu1 %v16242_v19 }
 0x3be   : > { %8309 = vmatmul.mubr.bf16.vlgmr.msra.gmra.mxu0 %v8190_v27  ;;  %v8331_v27 = vld [vmem:[#allocation2 + $0x40] sm:$0xff] }
 0x3bf   : > { %8536 = vmatmul.mubr.bf16.vlgmr.msra.gmra.mxu1 %v8408_v50  ;;  %8626 = vmatpush1.bf16.msra.mxu0 %v13034_v16  ;;  %v8900_v16 = vrot.slane %v8898_v47, 2  ;;  %v13060_v50 = vld [vmem:[#allocation3 + $0x170] sm:$0xff]  }
 0x3c0   : > { %11842 = vmatprep.mubr.msk.bf16.mxu0 %vm244_vm2, %v8336_v39  ;;  %8793 = vmatpush1.bf16.msra.mxu1 %v13035_v42  ;;  %v8670_v42 = vpack.c.bf16 %v15893_v22, %v8666_v10  ;;  %v8893_v39 = vor.u32 %v8892_v15, %v8889_v43 }
 0x3c1   : > { %11856 = vmatprep.mubr.msk.bf16.mxu1 %vm244_vm2, %v8709_v46  ;;  %8627 = vmatprep.subr.bf16.mxu0 %v16242_v19  ;;  %v8335_v46 = vpack.c.bf16 %v15893_v22, %v8331_v27 }
 0x3c2   : > { %8794 = vmatprep.subr.bf16.mxu1 %v16242_v19 }
 0x3c3   : > { %8628 = vmatpush1.bf16.msra.mxu0 %v13036_v9  ;;  %v8901_v9 = vor.u32 %v8900_v16, %v8897_v40  ;;  %v13082_v16 = vld [vmem:[#allocation3 + $0x180] sm:$0xff]  }
 0x3c4   : > { %8795 = vmatpush1.bf16.msra.mxu1 %v13037_v49  ;;  %8629 = vmatprep.subr.bf16.mxu0 %v16242_v19  ;;  %v8704_v49 = vrot.slane %v8670_v42, 1 }
 0x3c5   : > { %8796 = vmatprep.subr.bf16.mxu1 %v16242_v19 }
 0x3c7   : > { %8630 = vmatpush1.bf16.msra.mxu0 %v13038_v34  ;;  %v13061_v34 = vld [vmem:[#allocation3 + $0x1d8] sm:$0xff]  }
 0x3c8   : > { %8797 = vmatpush1.bf16.msra.mxu1 %v13039_v20  ;;  %8631 = vmatprep.subr.bf16.mxu0 %v16242_v19  ;;  %v9069_v20 = vrot.slane %v9033_v29, 2 }
 0x3c9   : > { %8798 = vmatprep.subr.bf16.mxu1 %v16242_v19 }
 0x3cb   : > { %8632 = vmatpush1.bf16.msra.mxu0 %v13040_v48  ;;  %v9070_v48 = vrot.slane %v9035_v3, 2 }
 0x3cc   : > { %8799 = vmatpush1.bf16.msra.mxu1 %v13041_v57  ;;  %8633 = vmatprep.subr.bf16.mxu0 %v16242_v19 }
 0x3cd   : > { %8800 = vmatprep.subr.bf16.mxu1 %v16242_v19 }
 0x3cf   : > { %8634 = vmatpush1.bf16.msra.mxu0 %v13042_v31  ;;  %v8902_v31 = vsel %vm6916_vm9, %v8893_v39, %v8901_v9 }
 0x3d0   : > { %8801 = vmatpush1.bf16.msra.mxu1 %v13043_v8  ;;  %8635 = vmatprep.subr.bf16.mxu0 %v16242_v19  ;;  %v13062_v8 = vld [vmem:[#allocation3 + $0x168] sm:$0xff]  }
 0x3d1   : > { %8802 = vmatprep.subr.bf16.mxu1 %v16242_v19 }
 0x3d3   : > { %8636 = vmatpush1.bf16.msra.mxu0 %v13044_v4  ;;  %v9071_v4 = vsel %vm7115_vm10, %v9069_v20, %v9070_v48 }
 0x3d4   : > { %8803 = vmatpush1.bf16.msra.mxu1 %v13045_v55  ;;  %8637 = vmatprep.subr.bf16.mxu0 %v16242_v19  ;;  %v13063_v55 = vld [vmem:[#allocation3 + $0x1d0] sm:$0xff]  }
 0x3d5   : > { %8804 = vmatprep.subr.bf16.mxu1 %v16242_v19 }
 0x3d7   : > { %8638 = vmatpush1.bf16.msra.mxu0 %v13046_v2  ;;  %v13064_v2 = vld [vmem:[#allocation3 + $0x160] sm:$0xff]  }
 0x3d8   : > { %8805 = vmatpush1.bf16.msra.mxu1 %v13047_v23  ;;  %8639 = vmatprep.subr.bf16.mxu0 %v16242_v19  ;;  %v13065_v23 = vld [vmem:[#allocation3 + $0x1c8] sm:$0xff]  }
 0x3d9   : > { %8806 = vmatprep.subr.bf16.mxu1 %v16242_v19 }
 0x3db   : > { %8640 = vmatpush1.bf16.msra.mxu0 %v13048_v51  ;;  %v13066_v51 = vld [vmem:[#allocation3 + $0x158] sm:$0xff]  }
 0x3dc   : > { %8807 = vmatpush1.bf16.msra.mxu1 %v13049_v56  ;;  %8647 = vmatprep.subr.bf16.mxu0 %v16242_v19  ;;  %v13067_v56 = vld [vmem:[#allocation3 + $0x1c0] sm:$0xff]  }
 0x3dd   : > { %8814 = vmatprep.subr.bf16.mxu1 %v16242_v19 }
 0x3df   : > { %8648 = vmatpush2.bf16.msra.mxu0 %v13050_v41  ;;  %v13068_v41 = vld [vmem:[#allocation3 + $0x150] sm:$0xff]  }
 0x3e0   : > { %8815 = vmatpush2.bf16.msra.mxu1 %v13051_v1  ;;  %8649 = vmatprep.subr.bf16.mxu0 %v16242_v19  ;;  %v13069_v1 = vld [vmem:[#allocation3 + $0x1b8] sm:$0xff]  }
 0x3e1   : > { %8816 = vmatprep.subr.bf16.mxu1 %v16242_v19 }
 0x3e2   : > { %v7238_v5 = vpop.f32.mrf.mxu0 }
 0x3e3   : > { %v7245_v37 = vadd.f32 %v7238_v5, %v15972_v11  ;;  %v7433_v38 = vpop.f32.mrf.mxu1  ;;  %8650 = vmatpush2.bf16.msra.mxu0 %v13052_v13  ;;  %v13056_v11 = vld [vmem:[#allocation3 + $0x48] sm:$0xff]   ;;  %v13074_v5 = vld [vmem:[#allocation3 + $0x138] sm:$0xff]  }
 0x3e4   : > { %8817 = vmatpush2.bf16.msra.mxu1 %v13053_v6  ;;  %v7240_v30 = vpop.f32.mrf.mxu0  ;;  %8651 = vmatprep.subr.bf16.mxu0 %v16242_v19  ;;  %v13070_v13 = vld [vmem:[#allocation3 + $0x148] sm:$0xff]   ;;  %v13071_v6 = vld [vmem:[#allocation3 + $0x1b0] sm:$0xff]  }
 0x3e5   : > { %v16013_v62 = vadd.f32 %v7433_v38, %v7245_v37  ;;  %v7435_v12 = vpop.f32.mrf.mxu1  ;;  %8818 = vmatprep.subr.bf16.mxu1 %v16242_v19  ;;  %v13076_v37 = vld [vmem:[#allocation3 + $0x198] sm:$0xff]   ;;  %v13077_v38 = vld [vmem:[#allocation3 + $0x200] sm:$0xff]  }
 0x3e6   : > { %v7241_v35 = vpop.f32.mrf.mxu0  ;;  %v8835_v30 = vld [vmem:[#allocation2 + $0x40] sm:$0xf8]  ;;  %v9200_v12 = vld [vmem:[#allocation2 + $0x68] sm:$0x1f] }
 0x3e7   : > { %v7246_v26 = vadd.f32 %v7241_v35, %v15977_v28  ;;  %v7436_v18 = vpop.f32.mrf.mxu1  ;;  %8652 = vmatpush2.bf16.msra.mxu0 %v13054_v60  ;;  %v8672_v28 = vpack.c.bf16 %v8668_v45, %v8668_v45  ;;  %v8837_v60 = vld [vmem:[#allocation2 + $0x60] sm:$0x7]  ;;  %v9204_v47 = vpack.c.bf16 %v9200_v12, %v9200_v12 }
 0x3e8   : > { %8819 = vmatpush2.bf16.msra.mxu1 %v13055_v58  ;;  %v7243_v17 = vpop.f32.mrf.mxu0  ;;  %8653 = vmatprep.subr.bf16.mxu0 %v16242_v19  ;;  %v13079_v58 = vld [vmem:[#allocation3 + $0x1f8] sm:$0xff]   ;;  %v8841_v35 = vpack.c.bf16 %v8837_v60, %v8837_v60  ;;  %v13089_v12 = vld [vmem:[#allocation3 + $0x2a0] sm:$0xff]  }
 0x3e9   : > { %v16018_v25 = vadd.f32 %v7436_v18, %v7246_v26  ;;  %v7438_v33 = vpop.f32.mrf.mxu1  ;;  %8820 = vmatprep.subr.bf16.mxu1 %v16242_v19  ;;  %v8705_v63 = vrot.slane %v8672_v28, 1  ;;  %v8839_v18 = vpack.c.bf16 %v15893_v22, %v8835_v30  ;;  %v9257_v29 = vshrl.u32 %v9204_v47, 16  ;;  %v13088_v30 = vld [vmem:[#allocation3 + $0x238] sm:$0xff]  }
 0x3ea   : > { %v8878_v0 = vshrl.u32 %v8841_v35, 16  ;;  %v8881_v28 = vshll.u32 %v8841_v35, 16  ;;  %v9260_v3 = vshll.u32 %v9204_v47, 16  ;;  %v13090_v35 = vld [vmem:[#allocation3 + $0x230] sm:$0xff]  }
 0x3eb   : > { %8654 = vmatpush2.bf16.msra.mxu0 %v13056_v11  ;;  %v8706_v57 = vsel %vm6749_vm8, %v8704_v49, %v8705_v63  ;;  %v9202_v11 = vpack.c.bf16 %v15927_v54, %v9198_v53  ;;  %v8873_v43 = vshll.u32 %v8839_v18, 16  ;;  %v13083_v63 = vld [vmem:[#allocation3 + $0x1e8] sm:$0xff]   ;;  %v13091_v53 = vld [vmem:[#allocation3 + $0x298] sm:$0xff]   ;;  %v13098_v47 = vld [vmem:[#allocation3 + $0x210] sm:$0xff]  }
 0x3ec   : > { %8821 = vmatpush2.bf16.msra.mxu1 %v13057_v59  ;;  %8655 = vmatprep.subr.bf16.mxu0 %v16242_v19  ;;  %v13081_v59 = vld [vmem:[#allocation3 + $0x1f0] sm:$0xff]   ;;  %v8880_v9 = vrot.slane %v8878_v0, 1  ;;  %v9393_v49 = vld [vmem:[#allocation2 + $0x68] sm:$0x3f] }
 0x3ed   : > { %8822 = vmatprep.subr.bf16.mxu1 %v16242_v19  ;;  %v9252_v42 = vshll.u32 %v9202_v11, 16  ;;  %v8875_v20 = vrot.slane %v8873_v43, 2  ;;  %v13102_v0 = vld [vmem:[#allocation3 + $0x268] sm:$0xff]   ;;  %v9197_v43 = vld [vmem:[#allocation2 + $0x40] sm:$0xe0] }
 0x3ef   : > { %8656 = vmatpush2.bf16.msra.mxu0 %v13058_v24  ;;  %v8870_v24 = vshrl.u32 %v8839_v18, 16  ;;  %v13093_v18 = vld [vmem:[#allocation3 + $0x290] sm:$0xff]  }
 0x3f0   : > { %8823 = vmatpush2.bf16.msra.mxu1 %v13059_v44  ;;  %8985 = vmatprep.subr.bf16.mxu0 %v16242_v19  ;;  %v9030_v44 = vld [vmem:[#allocation2 + $0x60] sm:$0xf] }
 0x3f1   : > { %9154 = vmatprep.subr.bf16.mxu1 %v16242_v19  ;;  %v9034_v48 = vpack.c.bf16 %v9030_v44, %v9030_v44  ;;  %v16095_v44 = vld [vmem:[#allocation2 + $0x50] sm:$0xff] }
 0x3f2   : > { %8658 = vmatmul.mubr.bf16.vlgmr.msra.gmra.mxu0 %v8335_v46  ;;  %v8883_v46 = vrot.slane %v8881_v28, 2  ;;  %v13103_v28 = vld [vmem:[#allocation3 + $0x2d0] sm:$0xff]  }
 0x3f3   : > { %8825 = vmatmul.mubr.bf16.vlgmr.msra.gmra.mxu1 %v8706_v57  ;;  %8986 = vmatpush1.bf16.msra.mxu0 %v13060_v50  ;;  %v9391_v57 = vld [vmem:[#allocation2 + $0x48] sm:$0xc0] }
 0x3f4   : > { %11870 = vmatprep.mubr.msk.bf16.mxu0 %vm244_vm2, %v8902_v31  ;;  %9155 = vmatpush1.bf16.msra.mxu1 %v13061_v34  ;;  %v8872_v34 = vrot.slane %v8870_v24, 1  ;;  %v13084_v31 = vld [vmem:[#allocation3 + $0x178] sm:$0xff]   ;;  %v13104_v24 = vld [vmem:[#allocation3 + $0x260] sm:$0xff]  }
 0x3f5   : > { %11884 = vmatprep.mubr.msk.bf16.mxu1 %vm244_vm2, %v9071_v4  ;;  %8987 = vmatprep.subr.bf16.mxu0 %v16242_v19  ;;  %v9254_v4 = vrot.slane %v9252_v42, 3  ;;  %v9201_v42 = vpack.c.bf16 %v16095_v44, %v9197_v43  ;;  %v13118_v43 = vld [vmem:[#allocation3 + $0x2f8] sm:$0xff]  }
 0x3f6   : > { %9156 = vmatprep.subr.bf16.mxu1 %v16242_v19 }
 0x3f7   : > { %8988 = vmatpush1.bf16.msra.mxu0 %v13062_v8 }
 0x3f8   : > { %9157 = vmatpush1.bf16.msra.mxu1 %v13063_v55  ;;  %8989 = vmatprep.subr.bf16.mxu0 %v16242_v19  ;;  %v9259_v55 = vrot.slane %v9257_v29, 2  ;;  %v9560_v29 = vld [vmem:[#allocation2 + $0x48] sm:$0x80] }
 0x3f9   : > { %9158 = vmatprep.subr.bf16.mxu1 %v16242_v19 }
 0x3fb   : > { %8990 = vmatpush1.bf16.msra.mxu0 %v13064_v2  ;;  %v9262_v2 = vrot.slane %v9260_v3, 3 }
 0x3fc   : > { %9159 = vmatpush1.bf16.msra.mxu1 %v13065_v23  ;;  %8991 = vmatprep.subr.bf16.mxu0 %v16242_v19  ;;  %v13085_v23 = vld [vmem:[#allocation3 + $0x1e0] sm:$0xff]  }
 0x3fd   : > { %9160 = vmatprep.subr.bf16.mxu1 %v16242_v19 }
 0x3ff   : > { %8992 = vmatpush1.bf16.msra.mxu0 %v13066_v51 }
 0x400   : > { %9161 = vmatpush1.bf16.msra.mxu1 %v13067_v56  ;;  %8993 = vmatprep.subr.bf16.mxu0 %v16242_v19  ;;  %v9395_v56 = vpack.c.bf16 %v15927_v54, %v9391_v57  ;;  %v9232_v57 = vshrl.u32 %v9201_v42, 16 }
 0x401   : > { %9162 = vmatprep.subr.bf16.mxu1 %v16242_v19 }
 0x403   : > { %8994 = vmatpush1.bf16.msra.mxu0 %v13068_v41  ;;  %v9397_v41 = vpack.c.bf16 %v9393_v49, %v9393_v49 }
 0x404   : > { %9163 = vmatpush1.bf16.msra.mxu1 %v13069_v1  ;;  %8995 = vmatprep.subr.bf16.mxu0 %v16242_v19  ;;  %v8884_v1 = vor.u32 %v8883_v46, %v8880_v9 }
 0x405   : > { %9164 = vmatprep.subr.bf16.mxu1 %v16242_v19  ;;  %v9432_v60 = vrot.slane %v9397_v41, 3 }
 0x407   : > { %8996 = vmatpush1.bf16.msra.mxu0 %v13070_v13  ;;  %v9067_v13 = vrot.slane %v9034_v48, 2 }
 0x408   : > { %9165 = vmatpush1.bf16.msra.mxu1 %v13071_v6  ;;  %8997 = vmatprep.subr.bf16.mxu0 %v16242_v19  ;;  %v8876_v6 = vor.u32 %v8875_v20, %v8872_v34 }
 0x409   : > { %9166 = vmatprep.subr.bf16.mxu1 %v16242_v19 }
 0x40b   : > { %8998 = vmatpush1.bf16.msra.mxu0 %v13072_v21  ;;  %v13086_v21 = vld [vmem:[#allocation3 + $0x240] sm:$0xff]  }
 0x40c   : > { %9167 = vmatpush1.bf16.msra.mxu1 %v13073_v36  ;;  %8999 = vmatprep.subr.bf16.mxu0 %v16242_v19 }
 0x40d   : > { %9168 = vmatprep.subr.bf16.mxu1 %v16242_v19 }
 0x40f   : > { %9000 = vmatpush1.bf16.msra.mxu0 %v13074_v5  ;;  %v9263_v5 = vor.u32 %v9262_v2, %v9259_v55  ;;  %v13108_v55 = vld [vmem:[#allocation3 + $0x250] sm:$0xff]  }
 0x410   : > { %9169 = vmatpush1.bf16.msra.mxu1 %v13075_v14  ;;  %9007 = vmatprep.subr.bf16.mxu0 %v16242_v19 }
 0x411   : > { %9176 = vmatprep.subr.bf16.mxu1 %v16242_v19 }
 0x413   : > { %9008 = vmatpush2.bf16.msra.mxu0 %v13076_v37  ;;  %v13087_v37 = vld [vmem:[#allocation3 + $0x2a8] sm:$0xff]  }
 0x414   : > { %9177 = vmatpush2.bf16.msra.mxu1 %v13077_v38  ;;  %9009 = vmatprep.subr.bf16.mxu0 %v16242_v19  ;;  %v9431_v38 = vrot.slane %v9395_v56, 3 }
 0x415   : > { %9178 = vmatprep.subr.bf16.mxu1 %v16242_v19 }
 0x416   : > { %v7604_v26 = vpop.f32.mrf.mxu0 }
 0x417   : > { %v7611_v45 = vadd.f32 %v7604_v26, %v16013_v62  ;;  %v7799_v61 = vpop.f32.mrf.mxu1  ;;  %9010 = vmatpush2.bf16.msra.mxu0 %v13078_v7  ;;  %v9249_v62 = vshrl.u32 %v9202_v11, 16  ;;  %v13092_v26 = vld [vmem:[#allocation3 + $0x228] sm:$0xff]   ;;  %v13094_v11 = vld [vmem:[#allocation3 + $0x220] sm:$0xff]  }
 0x418   : > { %9179 = vmatpush2.bf16.msra.mxu1 %v13079_v58  ;;  %v7606_v17 = vpop.f32.mrf.mxu0  ;;  %9011 = vmatprep.subr.bf16.mxu0 %v16242_v19  ;;  %v9433_v58 = vsel %vm3314_vm5, %v9431_v38, %v9432_v60  ;;  %v13110_v38 = vld [vmem:[#allocation3 + $0x248] sm:$0xff]  }
 0x419   : > { %v16055_v33 = vadd.f32 %v7799_v61, %v7611_v45  ;;  %v7801_v10 = vpop.f32.mrf.mxu1  ;;  %9180 = vmatprep.subr.bf16.mxu1 %v16242_v19  ;;  %v9251_v8 = vrot.slane %v9249_v62, 2  ;;  %v13095_v45 = vld [vmem:[#allocation3 + $0x288] sm:$0xff]   ;;  %v13096_v61 = vld [vmem:[#allocation3 + $0x218] sm:$0xff]  }
 0x41a   : > { %v7607_v32 = vpop.f32.mrf.mxu0  ;;  %v13099_v17 = vld [vmem:[#allocation3 + $0x278] sm:$0xff]   ;;  %v13101_v10 = vld [vmem:[#allocation3 + $0x270] sm:$0xff]   ;;  %v13105_v62 = vld [vmem:[#allocation3 + $0x2c8] sm:$0xff]  }
 0x41b   : > { %v7612_v15 = vadd.f32 %v7607_v32, %v16018_v25  ;;  %v7802_v40 = vpop.f32.mrf.mxu1  ;;  %9012 = vmatpush2.bf16.msra.mxu0 %v13080_v52  ;;  %v9028_v25 = vld [vmem:[#allocation2 + $0x40] sm:$0xf0]  ;;  %v9255_v36 = vor.u32 %v9254_v4, %v9251_v8 }
 0x41c   : > { %9181 = vmatpush2.bf16.msra.mxu1 %v13081_v59  ;;  %v7609_v27 = vpop.f32.mrf.mxu0  ;;  %9013 = vmatprep.subr.bf16.mxu0 %v16242_v19  ;;  %v9032_v51 = vpack.c.bf16 %v15893_v22, %v9028_v25  ;;  %v8885_v22 = vsel %vm6916_vm9, %v8876_v6, %v8884_v1  ;;  %v13097_v52 = vld [vmem:[#allocation3 + $0x280] sm:$0xff]   ;;  %v13100_v59 = vld [vmem:[#allocation3 + $0x208] sm:$0xff]   ;;  %v13109_v1 = vld [vmem:[#allocation3 + $0x2b8] sm:$0xff]  }
 0x41d   : > { %v16060_v50 = vadd.f32 %v7802_v40, %v7612_v15  ;;  %v7804_v39 = vpop.f32.mrf.mxu1  ;;  %9182 = vmatprep.subr.bf16.mxu1 %v16242_v19  ;;  %v9264_v7 = vsel %vm7282_vm11, %v9255_v36, %v9263_v5  ;;  %v9199_v32 = vld [vmem:[#allocation2 + $0x60] sm:$0x1f]  ;;  %v9562_v15 = vld [vmem:[#allocation2 + $0x68] sm:$0x7f]  ;;  %v13106_v27 = vld [vmem:[#allocation3 + $0x258] sm:$0xff]   ;;  %v9234_v5 = vrot.slane %v9232_v57, 2 }
 0x41e   : > { %v9066_v14 = vrot.slane %v9032_v51, 2  ;;  %v9203_v40 = vpack.c.bf16 %v9199_v32, %v9199_v32  ;;  %v9566_v9 = vpack.c.bf16 %v9562_v15, %v9562_v15  ;;  %v13107_v25 = vld [vmem:[#allocation3 + $0x2c0] sm:$0xff]   ;;  %v13120_v15 = vld [vmem:[#allocation3 + $0x2f0] sm:$0xff]  }
 0x41f   : > { %9014 = vmatpush2.bf16.msra.mxu0 %v13082_v16  ;;  %v9392_v8 = vld [vmem:[#allocation2 + $0x60] sm:$0x3f]  ;;  %v9390_v36 = vld [vmem:[#allocation2 + $0x40] sm:$0xc0] }
 0x420   : > { %9183 = vmatpush2.bf16.msra.mxu1 %v13083_v63  ;;  %9015 = vmatprep.subr.bf16.mxu0 %v16242_v19  ;;  %v9068_v54 = vsel %vm7115_vm10, %v9066_v14, %v9067_v13  ;;  %v16100_v63 = vld [vmem:[#allocation2 + $0x58] sm:$0xff]  ;;  %v9240_v34 = vshrl.u32 %v9203_v40, 16  ;;  %v9243_v20 = vshll.u32 %v9203_v40, 16  ;;  %v9619_v51 = vshrl.u32 %v9566_v9, 16  ;;  %v13116_v32 = vld [vmem:[#allocation3 + $0x300] sm:$0xff]  }
 0x421   : > { %9184 = vmatprep.subr.bf16.mxu1 %v16242_v19  ;;  %v9564_v39 = vpack.c.bf16 %v16100_v63, %v9560_v29  ;;  %v9622_v56 = vshll.u32 %v9566_v9, 16  ;;  %v13121_v40 = vld [vmem:[#allocation3 + $0x358] sm:$0xff]   ;;  %v13123_v29 = vld [vmem:[#allocation3 + $0x350] sm:$0xff]   ;;  %v13127_v9 = vld [vmem:[#allocation3 + $0x340] sm:$0xff]  }
 0x422   : > { %v9242_v6 = vrot.slane %v9240_v34, 2  ;;  %v9561_v34 = vld [vmem:[#allocation2 + $0x60] sm:$0x7f]  ;;  %v9559_v57 = vld [vmem:[#allocation2 + $0x40] sm:$0x80] }
 0x423   : > { %9016 = vmatpush2.bf16.msra.mxu0 %v13084_v31  ;;  %v9235_v31 = vshll.u32 %v9201_v42, 16  ;;  %v9611_v2 = vshrl.u32 %v9564_v39, 16  ;;  %v13122_v42 = vld [vmem:[#allocation3 + $0x2e8] sm:$0xff]  }
 0x424   : > { %9185 = vmatpush2.bf16.msra.mxu1 %v13085_v23  ;;  %9347 = vmatprep.subr.bf16.mxu0 %v16242_v19  ;;  %v9614_v23 = vshll.u32 %v9564_v39, 16  ;;  %v13126_v39 = vld [vmem:[#allocation3 + $0x2d8] sm:$0xff]  }
 0x425   : > { %9516 = vmatprep.subr.bf16.mxu1 %v16242_v19  ;;  %v9237_v14 = vrot.slane %v9235_v31, 3  ;;  %v9613_v60 = vrot.slane %v9611_v2, 3  ;;  %v13131_v31 = vld [vmem:[#allocation3 + $0x398] sm:$0xff]  }
 0x426   : > { %9018 = vmatmul.mubr.bf16.vlgmr.msra.gmra.mxu0 %v8885_v22  ;;  %v9616_v22 = vrot.slane %v9614_v23, 4 }
 0x427   : > { %9187 = vmatmul.mubr.bf16.vlgmr.msra.gmra.mxu1 %v9068_v54  ;;  %9348 = vmatpush1.bf16.msra.mxu0 %v13086_v21  ;;  %v9245_v21 = vrot.slane %v9243_v20, 3  ;;  %v9621_v54 = vrot.slane %v9619_v51, 3  ;;  %v13130_v20 = vld [vmem:[#allocation3 + $0x330] sm:$0xff]   ;;  %v9563_v51 = vpack.c.bf16 %v16095_v44, %v9559_v57  ;;  %v13141_v57 = vld [vmem:[#allocation3 + $0x440] sm:$0xff]  }
 0x428   : > { %11898 = vmatprep.mubr.msk.bf16.mxu0 %vm244_vm2, %v9264_v7  ;;  %9517 = vmatpush1.bf16.msra.mxu1 %v13087_v37  ;;  %v9396_v37 = vpack.c.bf16 %v9392_v8, %v9392_v8  ;;  %v9624_v7 = vrot.slane %v9622_v56, 4  ;;  %v9907_v8 = vld [vmem:[#allocation2 + $0x58] sm:$0xfe] }
 0x429   : > { %11912 = vmatprep.mubr.msk.bf16.mxu1 %vm244_vm2, %v9433_v58  ;;  %9349 = vmatprep.subr.bf16.mxu0 %v16242_v19  ;;  %v9394_v58 = vpack.c.bf16 %v16095_v44, %v9390_v36 }
 0x42a   : > { %9518 = vmatprep.subr.bf16.mxu1 %v16242_v19 }
 0x42b   : > { %9350 = vmatpush1.bf16.msra.mxu0 %v13088_v30  ;;  %v13111_v30 = vld [vmem:[#allocation3 + $0x2b0] sm:$0xff]  }
 0x42c   : > { %9519 = vmatpush1.bf16.msra.mxu1 %v13089_v12  ;;  %9351 = vmatprep.subr.bf16.mxu0 %v16242_v19  ;;  %v9246_v12 = vor.u32 %v9245_v21, %v9242_v6 }
 0x42d   : > { %9520 = vmatprep.subr.bf16.mxu1 %v16242_v19 }
 0x42f   : > { %9352 = vmatpush1.bf16.msra.mxu0 %v13090_v35  ;;  %v9429_v35 = vrot.slane %v9396_v37, 3 }
 0x430   : > { %9521 = vmatpush1.bf16.msra.mxu1 %v13091_v53  ;;  %9353 = vmatprep.subr.bf16.mxu0 %v16242_v19  ;;  %v9238_v53 = vor.u32 %v9237_v14, %v9234_v5 }
 0x431   : > { %9522 = vmatprep.subr.bf16.mxu1 %v16242_v19 }
 0x433   : > { %9354 = vmatpush1.bf16.msra.mxu0 %v13092_v26  ;;  %v13112_v26 = vld [vmem:[#allocation3 + $0x310] sm:$0xff]  }
 0x434   : > { %9523 = vmatpush1.bf16.msra.mxu1 %v13093_v18  ;;  %9355 = vmatprep.subr.bf16.mxu0 %v16242_v19  ;;  %v9617_v18 = vor.u32 %v9616_v22, %v9613_v60 }
 0x435   : > { %9524 = vmatprep.subr.bf16.mxu1 %v16242_v19 }
 0x437   : > { %9356 = vmatpush1.bf16.msra.mxu0 %v13094_v11  ;;  %v9625_v11 = vor.u32 %v9624_v7, %v9621_v54 }
 0x438   : > { %9525 = vmatpush1.bf16.msra.mxu1 %v13095_v45  ;;  %9357 = vmatprep.subr.bf16.mxu0 %v16242_v19  ;;  %v9428_v45 = vrot.slane %v9394_v58, 3 }
 0x439   : > { %9526 = vmatprep.subr.bf16.mxu1 %v16242_v19 }
 0x43b   : > { %9358 = vmatpush1.bf16.msra.mxu0 %v13096_v61  ;;  %v13113_v61 = vld [vmem:[#allocation3 + $0x378] sm:$0xff]  }
 0x43c   : > { %9527 = vmatpush1.bf16.msra.mxu1 %v13097_v52  ;;  %9359 = vmatprep.subr.bf16.mxu0 %v16242_v19  ;;  %v16115_v52 = vld [vmem:[#allocation2 + $0x68] sm:$0xff] }
 0x43d   : > { %9528 = vmatprep.subr.bf16.mxu1 %v16242_v19 }
 0x43f   : > { %9360 = vmatpush1.bf16.msra.mxu0 %v13098_v47  ;;  %v9247_v47 = vsel %vm7282_vm11, %v9238_v53, %v9246_v12 }
 0x440   : > { %9529 = vmatpush1.bf16.msra.mxu1 %v13099_v17  ;;  %9361 = vmatprep.subr.bf16.mxu0 %v16242_v19  ;;  %v9430_v17 = vsel %vm3314_vm5, %v9428_v45, %v9429_v35  ;;  %v13135_v35 = vld [vmem:[#allocation3 + $0x388] sm:$0xff]   ;;  %v10092_v45 = vld [vmem:[#allocation2 + $0x58] sm:$0xfc] }
 0x441   : > { %9530 = vmatprep.subr.bf16.mxu1 %v16242_v19 }
 0x443   : > { %9362 = vmatpush1.bf16.msra.mxu0 %v13100_v59  ;;  %v9626_v59 = vsel %vm7648_vm12, %v9617_v18, %v9625_v11 }
 0x444   : > { %9531 = vmatpush1.bf16.msra.mxu1 %v13101_v10  ;;  %9369 = vmatprep.subr.bf16.mxu0 %v16242_v19  ;;  %v9755_v10 = vpack.c.bf16 %v16115_v52, %v16100_v63  ;;  %v13125_v63 = vld [vmem:[#allocation3 + $0x348] sm:$0xff]  }
 0x445   : > { %9538 = vmatprep.subr.bf16.mxu1 %v16242_v19 }
 0x447   : > { %9370 = vmatpush2.bf16.msra.mxu0 %v13102_v0  ;;  %v13114_v0 = vld [vmem:[#allocation3 + $0x308] sm:$0xff]  }
 0x448   : > { %9539 = vmatpush2.bf16.msra.mxu1 %v13103_v28  ;;  %9371 = vmatprep.subr.bf16.mxu0 %v16242_v19  ;;  %v13115_v28 = vld [vmem:[#allocation3 + $0x370] sm:$0xff]  }
 0x449   : > { %9540 = vmatprep.subr.bf16.mxu1 %v16242_v19 }
 0x44a   : > { %v16093_v16 = vpop.f32.mrf.mxu0 }
 0x44b   : > { %v16098_v3 = vpop.f32.mrf.mxu1  ;;  %9372 = vmatpush2.bf16.msra.mxu0 %v13104_v24  ;;  %v13117_v24 = vld [vmem:[#allocation3 + $0x368] sm:$0xff]  }
 0x44c   : > { %9541 = vmatpush2.bf16.msra.mxu1 %v13105_v62  ;;  %v7956_v46 = vpop.f32.mrf.mxu0  ;;  %9373 = vmatprep.subr.bf16.mxu0 %v16242_v19  ;;  %v13119_v62 = vld [vmem:[#allocation3 + $0x360] sm:$0xff]  }
 0x44d   : > { %v8142_v49 = vpop.f32.mrf.mxu1  ;;  %9542 = vmatprep.subr.bf16.mxu1 %v16242_v19  ;;  %v13128_v46 = vld [vmem:[#allocation3 + $0x338] sm:$0xff]  }
 0x44e   : > { %v16105_v48 = vpop.f32.mrf.mxu0  ;;  %v7961_v49 = vadd.f32 %v16093_v16, %v16055_v33  ;;  %v9565_v33 = vpack.c.bf16 %v9561_v34, %v9561_v34  ;;  %v16151_v16 = vld [vmem:[%s16229_s4] ss:$0 sm:$0xff]  ;;  %v13140_v34 = vld [vmem:[#allocation3 + $0x3d8] sm:$0xff]  }
 0x44f   : > { %v16107_v4 = vpop.f32.mrf.mxu1  ;;  %9374 = vmatpush2.bf16.msra.mxu0 %v13106_v27  ;;  %v13124_v27 = vld [vmem:[#allocation3 + $0x2e0] sm:$0xff]   ;;  %v7962_v2 = vadd.f32 %v16105_v48, %v16060_v50  ;;  %v9913_v50 = vpack.c.bf16 %v16115_v52, %v9907_v8  ;;  %v13144_v8 = vld [vmem:[#allocation3 + $0x3c8] sm:$0xff]  }
 0x450   : > { %9543 = vmatpush2.bf16.msra.mxu1 %v13107_v25  ;;  %v7959_v41 = vpop.f32.mrf.mxu0  ;;  %9375 = vmatprep.subr.bf16.mxu0 %v16242_v19  ;;  %v13129_v25 = vld [vmem:[#allocation3 + $0x3a0] sm:$0xff]   ;;  %v9602_v5 = vshrl.u32 %v9565_v33, 16  ;;  %v9605_v14 = vshll.u32 %v9565_v33, 16  ;;  %v13147_v33 = vld [vmem:[#allocation3 + $0x428] sm:$0xff]  }
 0x451   : > { %v8145_v13 = vpop.f32.mrf.mxu1  ;;  %9544 = vmatprep.subr.bf16.mxu1 %v16242_v19  ;;  %v8148_v6 = vadd.f32 %v16107_v4, %v7962_v2  ;;  %v13134_v4 = vld [vmem:[#allocation3 + $0x320] sm:$0xff]   ;;  %v9957_v58 = vshll.u32 %v9913_v50, 16 }
 0x452   : > { %v13133_v13 = vld [vmem:[#allocation3 + $0x390] sm:$0xff]   ;;  %v9604_v18 = vrot.slane %v9602_v5, 3  ;;  %v9607_v11 = vrot.slane %v9605_v14, 4  ;;  %v13146_v2 = vld [vmem:[#allocation3 + $0x3c0] sm:$0xff]  }
 0x453   : > { %9376 = vmatpush2.bf16.msra.mxu0 %v13108_v55  ;;  %v8147_v55 = vadd.f32 %v16098_v3, %v7961_v49  ;;  %v13132_v3 = vld [vmem:[#allocation3 + $0x328] sm:$0xff]  }
 0x454   : > { %9545 = vmatpush2.bf16.msra.mxu1 %v13109_v1  ;;  %9377 = vmatprep.subr.bf16.mxu0 %v16242_v19  ;;  %v9911_v1 = vld [vmem:[#allocation2 + $0x78] sm:$0x1] }
 0x455   : > { %9546 = vmatprep.subr.bf16.mxu1 %v16242_v19  ;;  %v9915_v60 = vpack.c.bf16 %v9911_v1, %v9911_v1  ;;  %v13152_v1 = vld [vmem:[#allocation3 + $0x3a8] sm:$0xff]  }
 0x457   : > { %9378 = vmatpush2.bf16.msra.mxu0 %v13110_v38  ;;  %v9594_v38 = vshrl.u32 %v9563_v51, 16 }
 0x458   : > { %9547 = vmatpush2.bf16.msra.mxu1 %v13111_v30  ;;  %9709 = vmatprep.subr.bf16.mxu0 %v16242_v19  ;;  %v9597_v30 = vshll.u32 %v9563_v51, 16  ;;  %v13149_v51 = vld [vmem:[#allocation3 + $0x420] sm:$0xff]  }
 0x459   : > { %9863 = vmatprep.subr.bf16.mxu1 %v16242_v19 }
 0x45a   : > { %9380 = vmatmul.mubr.bf16.vlgmr.msra.gmra.mxu0 %v9247_v47  ;;  %v9962_v47 = vshll.u32 %v9915_v60, 16 }
 0x45b   : > { %9549 = vmatmul.mubr.bf16.vlgmr.msra.gmra.mxu1 %v9430_v17  ;;  %9710 = vmatpush1.bf16.msra.mxu0 %v13112_v26 }
 0x45c   : > { %11926 = vmatprep.mubr.msk.bf16.mxu0 %vm244_vm2, %v9626_v59  ;;  %9864 = vmatpush1.bf16.msra.mxu1 %v13113_v61  ;;  %v10094_v61 = vld [vmem:[#allocation2 + $0x78] sm:$0x3] }
 0x45d   : > { %11940 = vmatprep.mubr.msk.bf16.mxu1 %vm244_vm2, %v9755_v10  ;;  %9711 = vmatprep.subr.bf16.mxu0 %v16242_v19  ;;  %v13136_v59 = vld [vmem:[#allocation3 + $0x318] sm:$0xff]   ;;  %v9596_v10 = vrot.slane %v9594_v38, 3 }
 0x45e   : > { %9865 = vmatprep.subr.bf16.mxu1 %v16242_v19 }
 0x45f   : > { %9712 = vmatpush1.bf16.msra.mxu0 %v13114_v0  ;;  %v9599_v0 = vrot.slane %v9597_v30, 4 }
 0x460   : > { %9866 = vmatpush1.bf16.msra.mxu1 %v13115_v28  ;;  %9713 = vmatprep.subr.bf16.mxu0 %v16242_v19  ;;  %v9959_v28 = vrot.slane %v9957_v58, 1 }
 0x461   : > { %9867 = vmatprep.subr.bf16.mxu1 %v16242_v19 }
 0x463   : > { %9714 = vmatpush1.bf16.msra.mxu0 %v13116_v32  ;;  %v13137_v32 = vld [vmem:[#allocation3 + $0x380] sm:$0xff]  }
 0x464   : > { %9868 = vmatpush1.bf16.msra.mxu1 %v13117_v24  ;;  %9715 = vmatprep.subr.bf16.mxu0 %v16242_v19  ;;  %v10096_v24 = vpack.c.bf16 %v16115_v52, %v10092_v45  ;;  %v10093_v45 = vld [vmem:[#allocation2 + $0x70] sm:$0x3] }
 0x465   : > { %9869 = vmatprep.subr.bf16.mxu1 %v16242_v19 }
 0x467   : > { %9716 = vmatpush1.bf16.msra.mxu0 %v13118_v43  ;;  %v10098_v43 = vpack.c.bf16 %v10094_v61, %v10094_v61 }
 0x468   : > { %9870 = vmatpush1.bf16.msra.mxu1 %v13119_v62  ;;  %9717 = vmatprep.subr.bf16.mxu0 %v16242_v19  ;;  %v9608_v62 = vor.u32 %v9607_v11, %v9604_v18  ;;  %v10091_v11 = vld [vmem:[#allocation2 + $0x50] sm:$0xfc] }
 0x469   : > { %9871 = vmatprep.subr.bf16.mxu1 %v16242_v19 }
 0x46b   : > { %9718 = vmatpush1.bf16.msra.mxu0 %v13120_v15  ;;  %v9955_v15 = vshrl.u32 %v9913_v50, 16  ;;  %v13153_v50 = vld [vmem:[#allocation3 + $0x410] sm:$0xff]  }
 0x46c   : > { %9872 = vmatpush1.bf16.msra.mxu1 %v13121_v40  ;;  %9719 = vmatprep.subr.bf16.mxu0 %v16242_v19  ;;  %v16177_v40 = vld [vmem:[#allocation2 + $0x60] sm:$0xff] }
 0x46d   : > { %9873 = vmatprep.subr.bf16.mxu1 %v16242_v19 }
 0x46f   : > { %9720 = vmatpush1.bf16.msra.mxu0 %v13122_v42  ;;  %v9600_v42 = vor.u32 %v9599_v0, %v9596_v10 }
 0x470   : > { %9874 = vmatpush1.bf16.msra.mxu1 %v13123_v29  ;;  %9721 = vmatprep.subr.bf16.mxu0 %v16242_v19  ;;  %v13138_v29 = vld [vmem:[#allocation3 + $0x3e0] sm:$0xff]  }
 0x471   : > { %9875 = vmatprep.subr.bf16.mxu1 %v16242_v19  ;;  %v9609_v52 = vsel %vm7648_vm12, %v9600_v42, %v9608_v62 }
 0x473   : > { %9722 = vmatpush1.bf16.msra.mxu0 %v13124_v27  ;;  %v9960_v27 = vor.u32 %v9959_v28, %v9955_v15  ;;  %v10095_v28 = vpack.c.bf16 %v16177_v40, %v10091_v11 }
 0x474   : > { %9876 = vmatpush1.bf16.msra.mxu1 %v13125_v63  ;;  %9723 = vmatprep.subr.bf16.mxu0 %v16242_v19  ;;  %v9964_v63 = vrot.slane %v9962_v47, 1  ;;  %v13161_v47 = vld [vmem:[#allocation3 + $0x458] sm:$0xff]  }
 0x475   : > { %9877 = vmatprep.subr.bf16.mxu1 %v16242_v19  ;;  %v10129_v42 = vrot.slane %v10095_v28, 1 }
 0x476   : > { %v9965_v49 = vsel %vm6440_vm7, %v9960_v27, %v9964_v63 }
 0x477   : > { %9724 = vmatpush1.bf16.msra.mxu0 %v13126_v39  ;;  %v13139_v39 = vld [vmem:[#allocation3 + $0x448] sm:$0xff]  }
 0x478   : > { %9878 = vmatpush1.bf16.msra.mxu1 %v13127_v9  ;;  %9731 = vmatprep.subr.bf16.mxu0 %v16242_v19  ;;  %v10132_v9 = vrot.slane %v10096_v24, 1 }
 0x479   : > { %9885 = vmatprep.subr.bf16.mxu1 %v16242_v19 }
 0x47b   : > { %9732 = vmatpush2.bf16.msra.mxu0 %v13128_v46  ;;  %v10133_v46 = vrot.slane %v10098_v43, 1  ;;  %v13163_v43 = vld [vmem:[#allocation3 + $0x450] sm:$0xff]  }
 0x47c   : > { %9886 = vmatpush2.bf16.msra.mxu1 %v13129_v25  ;;  %9733 = vmatprep.subr.bf16.mxu0 %v16242_v19  ;;  %v9754_v25 = vpack.c.bf16 %v16177_v40, %v16095_v44  ;;  %v13142_v44 = vld [vmem:[#allocation3 + $0x3d0] sm:$0xff]  }
 0x47d   : > { %9887 = vmatprep.subr.bf16.mxu1 %v16242_v19 }
 0x47e   : > { %v8310_v23 = vpop.f32.mrf.mxu0 }
 0x47f   : > { %v8317_v56 = vadd.f32 %v8310_v23, %v8147_v55  ;;  %v16155_v41 = vpop.f32.mrf.mxu1  ;;  %9734 = vmatpush2.bf16.msra.mxu0 %v13130_v20  ;;  %v10134_v20 = vsel %vm6749_vm8, %v10132_v9, %v10133_v46  ;;  %v13145_v55 = vld [vmem:[#allocation3 + $0x430] sm:$0xff]   ;;  %v13148_v23 = vld [vmem:[#allocation3 + $0x3b8] sm:$0xff]  }
 0x480   : > { %9888 = vmatpush2.bf16.msra.mxu1 %v13131_v31  ;;  %v8312_v48 = vpop.f32.mrf.mxu0  ;;  %9735 = vmatprep.subr.bf16.mxu0 %v16242_v19  ;;  %v13143_v31 = vld [vmem:[#allocation3 + $0x438] sm:$0xff]  }
 0x481   : > { %v8325_v21 = vadd.f32 %v16151_v16, %v8317_v56  ;;  %v8539_v36 = vpop.f32.mrf.mxu1  ;;  %9889 = vmatprep.subr.bf16.mxu1 %v16242_v19  ;;  %v13150_v56 = vld [vmem:[#allocation3 + $0x3b0] sm:$0xff]   ;;  %v13154_v48 = vld [vmem:[#allocation3 + $0x408] sm:$0xff]  }
 0x482   : > { %v8313_v37 = vpop.f32.mrf.mxu0  ;;  %v13157_v36 = vld [vmem:[#allocation3 + $0x468] sm:$0xff]  }
 0x483   : > { %v8327_v22 = vmax.f32 %v8325_v21, 0.0  ;;  %v8318_v54 = vadd.f32 %v8313_v37, %v8148_v6  ;;  %v16167_v7 = vpop.f32.mrf.mxu1  ;;  %9736 = vmatpush2.bf16.msra.mxu0 %v13132_v3  ;;  %v13151_v3 = vld [vmem:[#allocation3 + $0x418] sm:$0xff]   ;;  %v9906_v6 = vld [vmem:[#allocation2 + $0x50] sm:$0xfe]  ;;  %v13156_v21 = vld [vmem:[#allocation3 + $0x400] sm:$0xff]  }
 0x484   : > { %9890 = vmatpush2.bf16.msra.mxu1 %v13133_v13  ;;  %v8315_v12 = vpop.f32.mrf.mxu0  ;;  %9737 = vmatprep.subr.bf16.mxu0 %v16242_v19  ;;  %v13155_v13 = vld [vmem:[#allocation3 + $0x470] sm:$0xff]   ;;  %v9912_v5 = vpack.c.bf16 %v16177_v40, %v9906_v6 }
 0x485   : > { %8329 = vst [vmem:[%s16165_s10] sm:$0xff] %v8327_v22  ;;  %v8326_v53 = vadd.f32 %v16151_v16, %v8318_v54  ;;  %v8542_v26 = vpop.f32.mrf.mxu1  ;;  %9891 = vmatprep.subr.bf16.mxu1 %v16242_v19  ;;  %v9910_v37 = vld [vmem:[#allocation2 + $0x70] sm:$0x1]  ;;  %v13158_v22 = vld [vmem:[#allocation3 + $0x3f8] sm:$0xff]  }
 0x486   : > { %v9914_v12 = vpack.c.bf16 %v9910_v37, %v9910_v37  ;;  %v9943_v24 = vshrl.u32 %v9912_v5, 16 }
 0x487   : > { %v8328_v17 = vmax.f32 %v8326_v53, 0.0  ;;  %9738 = vmatpush2.bf16.msra.mxu0 %v13134_v4  ;;  %v13159_v4 = vld [vmem:[#allocation3 + $0x460] sm:$0xff]  }
 0x488   : > { %9892 = vmatpush2.bf16.msra.mxu1 %v13135_v35  ;;  %9739 = vmatprep.subr.bf16.mxu0 %v16242_v19  ;;  %v9945_v35 = vshll.u32 %v9912_v5, 16  ;;  %v9950_v0 = vshll.u32 %v9914_v12, 16 }
 0x489   : > { %8330 = vst [vmem:[%s16165_s10 + $0x8] sm:$0xff] %v8328_v17  ;;  %9893 = vmatprep.subr.bf16.mxu1 %v16242_v19 }
 0x48a   : > { %v9947_v10 = vrot.slane %v9945_v35, 1  ;;  %v9952_v15 = vrot.slane %v9950_v0, 1 }
 0x48b   : > { %9740 = vmatpush2.bf16.msra.mxu0 %v13136_v59 }
 0x48c   : > { %9894 = vmatpush2.bf16.msra.mxu1 %v13137_v32  ;;  %10048 = vmatprep.subr.bf16.mxu0 %v16242_v19  ;;  %v10097_v32 = vpack.c.bf16 %v10093_v45, %v10093_v45  ;;  %v9948_v62 = vor.u32 %v9947_v10, %v9943_v24 }
 0x48d   : > { %10217 = vmatprep.subr.bf16.mxu1 %v16242_v19 }
 0x48e   : > { %9742 = vmatmul.mubr.bf16.vlgmr.msra.gmra.mxu0 %v9609_v52  ;;  %v9953_v27 = vsel %vm6440_vm7, %v9948_v62, %v9952_v15 }
 0x48f   : > { %9896 = vmatmul.mubr.bf16.vlgmr.msra.gmra.mxu1 %v9754_v25  ;;  %10049 = vmatpush1.bf16.msra.mxu0 %v13138_v29  ;;  %v10130_v29 = vrot.slane %v10097_v32, 1 }
 0x490   : > { %11954 = vmatprep.mubr.msk.bf16.mxu0 %vm244_vm2, %v9965_v49  ;;  %10218 = vmatpush1.bf16.msra.mxu1 %v13139_v39 }
 0x491   : > { %11968 = vmatprep.mubr.msk.bf16.mxu1 %vm244_vm2, %v10134_v20  ;;  %10050 = vmatprep.subr.bf16.mxu0 %v16242_v19  ;;  %v10131_v40 = vsel %vm6749_vm8, %v10129_v42, %v10130_v29 }
 0x492   : > { %10219 = vmatprep.subr.bf16.mxu1 %v16242_v19 }
 0x493   : > { %10051 = vmatpush1.bf16.msra.mxu0 %v13140_v34 }
 0x494   : > { %10220 = vmatpush1.bf16.msra.mxu1 %v13141_v57  ;;  %10052 = vmatprep.subr.bf16.mxu0 %v16242_v19 }
 0x495   : > { %10221 = vmatprep.subr.bf16.mxu1 %v16242_v19 }
 0x497   : > { %10053 = vmatpush1.bf16.msra.mxu0 %v13142_v44 }
 0x498   : > { %10222 = vmatpush1.bf16.msra.mxu1 %v13143_v31  ;;  %10054 = vmatprep.subr.bf16.mxu0 %v16242_v19 }
 0x499   : > { %10223 = vmatprep.subr.bf16.mxu1 %v16242_v19 }
 0x49b   : > { %10055 = vmatpush1.bf16.msra.mxu0 %v13144_v8 }
 0x49c   : > { %10224 = vmatpush1.bf16.msra.mxu1 %v13145_v55  ;;  %10056 = vmatprep.subr.bf16.mxu0 %v16242_v19 }
 0x49d   : > { %10225 = vmatprep.subr.bf16.mxu1 %v16242_v19 }
 0x49f   : > { %10057 = vmatpush1.bf16.msra.mxu0 %v13146_v2 }
 0x4a0   : > { %10226 = vmatpush1.bf16.msra.mxu1 %v13147_v33  ;;  %10058 = vmatprep.subr.bf16.mxu0 %v16242_v19 }
 0x4a1   : > { %10227 = vmatprep.subr.bf16.mxu1 %v16242_v19 }
 0x4a3   : > { %10059 = vmatpush1.bf16.msra.mxu0 %v13148_v23 }
 0x4a4   : > { %10228 = vmatpush1.bf16.msra.mxu1 %v13149_v51  ;;  %10060 = vmatprep.subr.bf16.mxu0 %v16242_v19 }
 0x4a5   : > { %10229 = vmatprep.subr.bf16.mxu1 %v16242_v19 }
 0x4a7   : > { %10061 = vmatpush1.bf16.msra.mxu0 %v13150_v56 }
 0x4a8   : > { %10230 = vmatpush1.bf16.msra.mxu1 %v13151_v3  ;;  %10062 = vmatprep.subr.bf16.mxu0 %v16242_v19 }
 0x4a9   : > { %10231 = vmatprep.subr.bf16.mxu1 %v16242_v19 }
 0x4ab   : > { %10063 = vmatpush1.bf16.msra.mxu0 %v13152_v1 }
 0x4ac   : > { %10232 = vmatpush1.bf16.msra.mxu1 %v13153_v50  ;;  %10070 = vmatprep.subr.bf16.mxu0 %v16242_v19 }
 0x4ad   : > { %10239 = vmatprep.subr.bf16.mxu1 %v16242_v19 }
 0x4af   : > { %10071 = vmatpush2.bf16.msra.mxu0 %v13154_v48 }
 0x4b0   : > { %10240 = vmatpush2.bf16.msra.mxu1 %v13155_v13  ;;  %10072 = vmatprep.subr.bf16.mxu0 %v16242_v19 }
 0x4b1   : > { %10241 = vmatprep.subr.bf16.mxu1 %v16242_v19 }
 0x4b2   : > { %v8659_v14 = vpop.f32.mrf.mxu0 }
 0x4b3   : > { %v8660_v38 = vadd.f32 %v8659_v14, %v16155_v41  ;;  %v8826_v60 = vpop.f32.mrf.mxu1  ;;  %10073 = vmatpush2.bf16.msra.mxu0 %v13156_v21  ;;  %v13160_v41 = vld [vmem:[#allocation3 + $0x3f0] sm:$0xff]  }
 0x4b4   : > { %10242 = vmatpush2.bf16.msra.mxu1 %v13157_v36  ;;  %v8661_v54 = vpop.f32.mrf.mxu0  ;;  %10074 = vmatprep.subr.bf16.mxu0 %v16242_v19 }
 0x4b5   : > { %v8833_v30 = vadd.f32 %v8826_v60, %v8660_v38  ;;  %v8828_v58 = vpop.f32.mrf.mxu1  ;;  %10243 = vmatprep.subr.bf16.mxu1 %v16242_v19 }
 0x4b6   : > { %v8662_v53 = vpop.f32.mrf.mxu0 }
 0x4b7   : > { %v8663_v26 = vadd.f32 %v8662_v53, %v16167_v7  ;;  %v8829_v18 = vpop.f32.mrf.mxu1  ;;  %10075 = vmatpush2.bf16.msra.mxu0 %v13158_v22  ;;  %v13162_v7 = vld [vmem:[#allocation3 + $0x3e8] sm:$0xff]  }
 0x4b8   : > { %10244 = vmatpush2.bf16.msra.mxu1 %v13159_v4  ;;  %v8664_v61 = vpop.f32.mrf.mxu0  ;;  %10076 = vmatprep.subr.bf16.mxu0 %v16242_v19 }
 0x4b9   : > { %v8834_v17 = vadd.f32 %v8829_v18, %v8663_v26  ;;  %v8831_v59 = vpop.f32.mrf.mxu1  ;;  %10245 = vmatprep.subr.bf16.mxu1 %v16242_v19 }
 0x4bb   : > { %10077 = vmatpush2.bf16.msra.mxu0 %v13160_v41 }
 0x4bc   : > { %10246 = vmatpush2.bf16.msra.mxu1 %v13161_v47  ;;  %10078 = vmatprep.subr.bf16.mxu0 %v16242_v19 }
 0x4bd   : > { %10247 = vmatprep.subr.bf16.mxu1 %v16242_v19 }
 0x4bf   : > { %10079 = vmatpush2.bf16.msra.mxu0 %v13162_v7 }
 0x4c0   : > { %10248 = vmatpush2.bf16.msra.mxu1 %v13163_v43 }
 0x4c2   : > { %10081 = vmatmul.mubr.bf16.vlgmr.msra.gmra.mxu0 %v9953_v27 }
 0x4c3   : > { %10250 = vmatmul.mubr.bf16.vlgmr.msra.gmra.mxu1 %v10131_v40 }
 0x4e6   : > { %v9019_v63 = vpop.f32.mrf.mxu0 }
 0x4e7   : > { %v9026_v39 = vadd.f32 %v9019_v63, %v8833_v30  ;;  %v9188_v9 = vpop.f32.mrf.mxu1 }
 0x4e8   : > { %v9021_v46 = vpop.f32.mrf.mxu0 }
 0x4e9   : > { %v9195_v52 = vadd.f32 %v9188_v9, %v9026_v39  ;;  %v9190_v25 = vpop.f32.mrf.mxu1 }
 0x4ea   : > { %v9022_v49 = vpop.f32.mrf.mxu0 }
 0x4eb   : > { %v9027_v19 = vadd.f32 %v9022_v49, %v8834_v17  ;;  %v9191_v34 = vpop.f32.mrf.mxu1 }
 0x4ec   : > { %v9024_v20 = vpop.f32.mrf.mxu0 }
 0x4ed   : > { %v9196_v57 = vadd.f32 %v9191_v34, %v9027_v19  ;;  %v9193_v44 = vpop.f32.mrf.mxu1 }
 0x51a   : > { %v9381_v31 = vpop.f32.mrf.mxu0 }
 0x51b   : > { %v9388_v8 = vadd.f32 %v9381_v31, %v9195_v52  ;;  %v9550_v55 = vpop.f32.mrf.mxu1 }
 0x51c   : > { %v9383_v2 = vpop.f32.mrf.mxu0 }
 0x51d   : > { %v9557_v33 = vadd.f32 %v9550_v55, %v9388_v8  ;;  %v9552_v23 = vpop.f32.mrf.mxu1 }
 0x51e   : > { %v9384_v51 = vpop.f32.mrf.mxu0 }
 0x51f   : > { %v9389_v56 = vadd.f32 %v9384_v51, %v9196_v57  ;;  %v9553_v3 = vpop.f32.mrf.mxu1 }
 0x520   : > { %v9386_v1 = vpop.f32.mrf.mxu0 }
 0x521   : > { %v9558_v50 = vadd.f32 %v9553_v3, %v9389_v56  ;;  %v9555_v48 = vpop.f32.mrf.mxu1 }
 0x54e   : > { %v9743_v13 = vpop.f32.mrf.mxu0 }
 0x54f   : > { %v9897_v6 = vpop.f32.mrf.mxu1  ;;  %v9750_v60 = vadd.f32 %v9743_v13, %v9557_v33 }
 0x550   : > { %v9745_v21 = vpop.f32.mrf.mxu0 }
 0x551   : > { %v9899_v36 = vpop.f32.mrf.mxu1  ;;  %v9904_v22 = vadd.f32 %v9897_v6, %v9750_v60 }
 0x552   : > { %v9746_v5 = vpop.f32.mrf.mxu0 }
 0x553   : > { %v9900_v14 = vpop.f32.mrf.mxu1  ;;  %v9751_v54 = vadd.f32 %v9746_v5, %v9558_v50 }
 0x554   : > { %v9748_v37 = vpop.f32.mrf.mxu0 }
 0x555   : > { %v9902_v38 = vpop.f32.mrf.mxu1  ;;  %v9905_v35 = vadd.f32 %v9900_v14, %v9751_v54 }
 0x582   : > { %v10082_v4 = vpop.f32.mrf.mxu0 }
 0x583   : > { %v10089_v30 = vadd.f32 %v10082_v4, %v9904_v22  ;;  %v10251_v58 = vpop.f32.mrf.mxu1 }
 0x584   : > { %v10084_v12 = vpop.f32.mrf.mxu0 }
 0x585   : > { %v10258_v53 = vadd.f32 %v10251_v58, %v10089_v30  ;;  %v10253_v26 = vpop.f32.mrf.mxu1 }
 0x586   : > { %v10085_v18 = vpop.f32.mrf.mxu0 }
 0x587   : > { %v10260_v41 = vadd.f32 %v16151_v16, %v10258_v53  ;;  %v10090_v11 = vadd.f32 %v10085_v18, %v9905_v35  ;;  %v10254_v45 = vpop.f32.mrf.mxu1 }
 0x588   : > { %v10087_v61 = vpop.f32.mrf.mxu0 }
 0x589   : > { %v10262_v47 = vmax.f32 %v10260_v41, 0.0  ;;  %v10259_v17 = vadd.f32 %v10254_v45, %v10090_v11  ;;  %v10256_v59 = vpop.f32.mrf.mxu1 }
 0x58b   : > { %11969 = vst [vmem:[%s16165_s10 + $0x10] sm:$0xff] %v10262_v47  ;;  %v10261_v10 = vadd.f32 %v16151_v16, %v10259_v17 }
 0x58d   : > { %v10263_v0 = vmax.f32 %v10261_v10, 0.0 }
 0x58f   : > { %11970 = vst [vmem:[%s16165_s10 + $0x18] sm:$0xff] %v10263_v0 }
 0x590 PF: > { %s16_s18 = sadd.s32 1, %s13210_s18  }
 0x591   : > { %p13_p1 = scmp.ge.s32.totalorder %s16_s18, 4  }
 0x593   :  { %15 = sbr.rel (!%p13_p1) target bundleno = 1 (0x1), region = 110 }
 0x598   :  { %10288 = vsyncpa [#allocation4], 1 }
 0x599   :  { %10290 = vsyncpa [#allocation4 + $0x1], 1 }

</bundles_post_ra>
